<compile_context>
chip_gen: v6e
topology: v6e:2x2x1
jax: 0.10.0
libtpu: 0.0.40
codegen_flags: <defaults>
</compile_context>

<pallas_src>
import jax
import jax.numpy as jnp
import numpy as np
from jax.experimental import pallas as pl
from jax.experimental.pallas import tpu as pltpu

CIN = 119          # fixed by the module
CINP = 128         # Cin zero-padded to one full lane tile
COUT = 256         # `channels` in the PyTorch module
KH = KW = 3
BN_EPS = 1e-5


def _conv_bn_relu_kernel(x_ref, w_ref, scale_ref, bias_ref, o_ref):
    """Fused 3x3 conv + BN(eval) + ReLU for one tile of batch images.

    x_ref:     (BT, Hp, Wp, CINP) bf16  zero-padded NHWC input, Hp=H+2, Wp>=W+2, Wp%16==0
    w_ref:     (9, CINP, COUT)    bf16  tap-major conv weights (t = ky*3 + kx)
    scale_ref: (1, COUT)          f32   folded BN scale
    bias_ref:  (1, COUT)          f32   folded BN bias (includes conv bias)
    o_ref:     (BT, H, W, COUT)   f32
    """
    bt, hp, wp, cinp = x_ref.shape
    _, h, w, cout = o_ref.shape
    m = bt * hp * wp

    # Layout-preserving flatten of the padded images (wp is a multiple of the
    # bf16 sublane tile, so no relayout copy).
    x_flat = x_ref[...].reshape(m, cinp)

    # One MXU matmul per tap; shift the *output* rows by the tap offset with an
    # XLU sublane roll (offset in flattened padded coords = ky*wp + kx).
    # Tap 0 has offset 0 -> no roll, and it initializes the accumulator.
    acc = jnp.dot(x_flat, w_ref[0], preferred_element_type=jnp.float32)
    for t in range(1, KH * KW):
        ky, kx = divmod(t, KW)
        off = ky * wp + kx
        y_t = jnp.dot(x_flat, w_ref[t], preferred_element_type=jnp.float32)
        # result[r] = y_t[(r + off) % m]; wrapped rows land only in cropped halo rows.
        acc = acc + pltpu.roll(y_t, shift=(m - off) % m, axis=0)

    # Crop halo (padded coords -> real output coords); slice is tile-friendly.
    y = acc.reshape(bt, hp, wp, cout)[:, :h, :w, :]
    scale = scale_ref[...].reshape(1, 1, 1, cout)
    bias = bias_ref[...].reshape(1, 1, 1, cout)
    y = jnp.maximum(y * scale + bias, 0.0)           # fused BN (eval) + ReLU
    o_ref[...] = y.astype(o_ref.dtype)               # full-lane (256) unmasked store


def _pick_batch_tile(n, h, w):
    """Fold batch into M (>=~512 rows/step) but keep >= 2 grid steps for megacore."""
    if n <= 1:
        return 1
    want = max(1, min(n // 2, (512 + h * w - 1) // (h * w)))
    bt = 1
    for d in range(1, want + 1):
        if n % d == 0:
            bt = d
    return bt


@jax.jit
def conv_block_forward(x_nchw, conv_w, conv_b, bn_gamma, bn_beta, bn_mean, bn_var):
    """ConvBlock.forward (eval-mode BN). Input/output in PyTorch NCHW layout."""
    n, cin, h, w = x_nchw.shape
    assert cin == CIN

    hp = h + 2
    wp = ((w + 2 + 15) // 16) * 16       # >= w+2 and a multiple of the bf16 sublane tile
    bt = _pick_batch_tile(n, h, w)

    # --- glue (plain JAX): layout, dtype, padding, BN folding ---
    # TODO(synk): the NCHW<->NHWC transposes cost one extra HBM pass each; keep the
    #             surrounding model NHWC to drop them entirely.
    x = jnp.transpose(x_nchw, (0, 2, 3, 1)).astype(jnp.bfloat16)          # NCHW -> NHWC, bf16
    x_pad = jnp.pad(x, ((0, 0), (1, 1), (1, wp - w - 1), (0, CINP - CIN)))

    w_hwio = jnp.transpose(conv_w, (2, 3, 1, 0))                          # OIHW -> HWIO
    w_pad = jnp.pad(w_hwio, ((0, 0), (0, 0), (0, CINP - CIN), (0, 0)))
    w_all = w_pad.reshape(KH * KW, CINP, COUT).astype(jnp.bfloat16)       # tap-major

    inv_std = 1.0 / jnp.sqrt(bn_var.astype(jnp.float32) + BN_EPS)
    scale = (bn_gamma * inv_std).astype(jnp.float32)                      # (COUT,)
    bias = (bn_beta + (conv_b - bn_mean) * scale).astype(jnp.float32)     # (COUT,)
    scale2 = scale.reshape(1, COUT)
    bias2 = bias.reshape(1, COUT)

    flops = 2 * n * hp * wp * CINP * KH * KW * COUT
    bytes_accessed = (x_pad.size * 2 + w_all.size * 2
                      + (scale2.size + bias2.size) * 4 + n * h * w * COUT * 4)

    out_nhwc = pl.pallas_call(
        _conv_bn_relu_kernel,
        out_shape=jax.ShapeDtypeStruct((n, h, w, COUT), jnp.float32),
        grid=(n // bt,),
        in_specs=[
            pl.BlockSpec((bt, hp, wp, CINP), lambda i: (i, 0, 0, 0)),
            pl.BlockSpec((KH * KW, CINP, COUT), lambda i: (0, 0, 0)),
            pl.BlockSpec((1, COUT), lambda i: (0, 0)),
            pl.BlockSpec((1, COUT), lambda i: (0, 0)),
        ],
        out_specs=pl.BlockSpec((bt, h, w, COUT), lambda i: (i, 0, 0, 0)),
        compiler_params=pltpu.CompilerParams(
            dimension_semantics=("parallel",),
            vmem_limit_bytes=32 * 1024 * 1024),
        cost_estimate=pl.CostEstimate(flops=flops, transcendentals=0,
                                      bytes_accessed=bytes_accessed),
    )(x_pad, w_all, scale2, bias2)

    return jnp.transpose(out_nhwc, (0, 3, 1, 2))                          # NHWC -> NCHW


def _reference(x_nchw, conv_w, conv_b, bn_gamma, bn_beta, bn_mean, bn_var):
    """Pure-JAX f32 reference of the same forward pass (self-check)."""
    x = jnp.transpose(x_nchw, (0, 2, 3, 1))
    w_hwio = jnp.transpose(conv_w, (2, 3, 1, 0))
    y = jax.lax.conv_general_dilated(
        x, w_hwio, window_strides=(1, 1), padding="SAME",
        dimension_numbers=("NHWC", "HWIO", "NHWC"))
    y = y + conv_b
    y = (y - bn_mean) / jnp.sqrt(bn_var + BN_EPS) * bn_gamma + bn_beta
    y = jnp.maximum(y, 0.0)
    return jnp.transpose(y, (0, 3, 1, 2))


if __name__ == "__main__":
    key = jax.random.PRNGKey(0)
    kx, kw, kb, kg, kbe, km, kv = jax.random.split(key, 7)

    # Small-but-consistent shapes: batch=2, Cin=119 (fixed by the module), 16x16 spatial.
    N, H, W = 2, 16, 16
    x = jax.random.normal(kx, (N, CIN, H, W), dtype=jnp.float32)

    conv_w = 0.05 * jax.random.normal(kw, (COUT, CIN, KH, KW), dtype=jnp.float32)
    conv_b = 0.1 * jax.random.normal(kb, (COUT,), dtype=jnp.float32)
    bn_gamma = 1.0 + 0.1 * jax.random.normal(kg, (COUT,), dtype=jnp.float32)
    bn_beta = 0.1 * jax.random.normal(kbe, (COUT,), dtype=jnp.float32)
    bn_mean = 0.1 * jax.random.normal(km, (COUT,), dtype=jnp.float32)
    bn_var = jax.random.uniform(kv, (COUT,), dtype=jnp.float32,
                                minval=0.5, maxval=1.5)

    out = conv_block_forward(x, conv_w, conv_b, bn_gamma, bn_beta, bn_mean, bn_var)
    out = jax.block_until_ready(out)

    ref = _reference(x, conv_w, conv_b, bn_gamma, bn_beta, bn_mean, bn_var)
    # bf16 matmul inputs with f32 accumulation -> loosened tolerance vs f32 reference.
    np.testing.assert_allclose(np.asarray(out), np.asarray(ref), rtol=5e-2, atol=1e-1)

    assert out.shape == (N, COUT, H, W)
    print("KERNEL_OK")
</pallas_src>

<mosaic_0001>
module attributes {stable_mosaic.version = 11 : i64} {
  func.func @_conv_bn_relu_kernel(%arg0: i32, %arg1: memref<1x18x32x128xbf16, #tpu.memory_space<vmem>>, %arg2: memref<9x128x256xbf16, #tpu.memory_space<vmem>>, %arg3: memref<1x256xf32, #tpu.memory_space<vmem>>, %arg4: memref<1x256xf32, #tpu.memory_space<vmem>>, %arg5: memref<1x16x16x256xf32, #tpu.memory_space<vmem>>) attributes {dimension_semantics = [#tpu.dimension_semantics<parallel>], iteration_bounds = array<i64: 2>, scalar_prefetch = 0 : i64, scratch_operands = 0 : i64, tpu.core_type = #tpu.core_type<tc>, window_params = [{transform_indices = @transform_0, window_bounds = array<i64: 1, 18, 32, 128>}, {pipeline_mode = #tpu.pipeline_mode<synchronous>, transform_indices = @transform_1, window_bounds = array<i64: 9, 128, 256>}, {pipeline_mode = #tpu.pipeline_mode<synchronous>, transform_indices = @transform_2, window_bounds = array<i64: 1, 256>}, {pipeline_mode = #tpu.pipeline_mode<synchronous>, transform_indices = @transform_3, window_bounds = array<i64: 1, 256>}, {transform_indices = @transform_4, window_bounds = array<i64: 1, 16, 16, 256>}]} {
    %c0 = arith.constant 0 : index
    %c0_0 = arith.constant 0 : index
    %c0_1 = arith.constant 0 : index
    %c0_2 = arith.constant 0 : index
    %0 = vector.load %arg1[%c0, %c0_0, %c0_1, %c0_2] : memref<1x18x32x128xbf16, #tpu.memory_space<vmem>>, vector<1x18x32x128xbf16>
    %1 = vector.shape_cast %0 : vector<1x18x32x128xbf16> to vector<576x128xbf16>
    %c0_3 = arith.constant 0 : index
    %c0_4 = arith.constant 0 : index
    %c0_5 = arith.constant 0 : index
    %2 = vector.load %arg2[%c0_3, %c0_4, %c0_5] : memref<9x128x256xbf16, #tpu.memory_space<vmem>>, vector<1x128x256xbf16>
    %3 = vector.shape_cast %2 : vector<1x128x256xbf16> to vector<128x256xbf16>
    %cst = arith.constant dense<0.000000e+00> : vector<576x256xf32>
    %4 = tpu.matmul %1, %3, %cst {dimension_numbers = #tpu.dot_dimension_numbers<[1], [0], [0], [1], [0, 0, 1, 1], [], []>} : vector<576x128xbf16>, vector<128x256xbf16>, vector<576x256xf32> -> vector<576x256xf32>
    %c1 = arith.constant 1 : index
    %c0_6 = arith.constant 0 : index
    %c0_7 = arith.constant 0 : index
    %5 = vector.load %arg2[%c1, %c0_6, %c0_7] : memref<9x128x256xbf16, #tpu.memory_space<vmem>>, vector<1x128x256xbf16>
    %6 = vector.shape_cast %5 : vector<1x128x256xbf16> to vector<128x256xbf16>
    %cst_8 = arith.constant dense<0.000000e+00> : vector<576x256xf32>
    %7 = tpu.matmul %1, %6, %cst_8 {dimension_numbers = #tpu.dot_dimension_numbers<[1], [0], [0], [1], [0, 0, 1, 1], [], []>} : vector<576x128xbf16>, vector<128x256xbf16>, vector<576x256xf32> -> vector<576x256xf32>
    %c575_i32 = arith.constant 575 : i32
    %8 = tpu.dynamic_rotate %7 by %c575_i32 dim 0 : vector<576x256xf32>, i32 -> vector<576x256xf32>
    %9 = arith.addf %4, %8 : vector<576x256xf32>
    %c2 = arith.constant 2 : index
    %c0_9 = arith.constant 0 : index
    %c0_10 = arith.constant 0 : index
    %10 = vector.load %arg2[%c2, %c0_9, %c0_10] : memref<9x128x256xbf16, #tpu.memory_space<vmem>>, vector<1x128x256xbf16>
    %11 = vector.shape_cast %10 : vector<1x128x256xbf16> to vector<128x256xbf16>
    %cst_11 = arith.constant dense<0.000000e+00> : vector<576x256xf32>
    %12 = tpu.matmul %1, %11, %cst_11 {dimension_numbers = #tpu.dot_dimension_numbers<[1], [0], [0], [1], [0, 0, 1, 1], [], []>} : vector<576x128xbf16>, vector<128x256xbf16>, vector<576x256xf32> -> vector<576x256xf32>
    %c574_i32 = arith.constant 574 : i32
    %13 = tpu.dynamic_rotate %12 by %c574_i32 dim 0 : vector<576x256xf32>, i32 -> vector<576x256xf32>
    %14 = arith.addf %9, %13 : vector<576x256xf32>
    %c3 = arith.constant 3 : index
    %c0_12 = arith.constant 0 : index
    %c0_13 = arith.constant 0 : index
    %15 = vector.load %arg2[%c3, %c0_12, %c0_13] : memref<9x128x256xbf16, #tpu.memory_space<vmem>>, vector<1x128x256xbf16>
    %16 = vector.shape_cast %15 : vector<1x128x256xbf16> to vector<128x256xbf16>
    %cst_14 = arith.constant dense<0.000000e+00> : vector<576x256xf32>
    %17 = tpu.matmul %1, %16, %cst_14 {dimension_numbers = #tpu.dot_dimension_numbers<[1], [0], [0], [1], [0, 0, 1, 1], [], []>} : vector<576x128xbf16>, vector<128x256xbf16>, vector<576x256xf32> -> vector<576x256xf32>
    %c544_i32 = arith.constant 544 : i32
    %18 = tpu.dynamic_rotate %17 by %c544_i32 dim 0 : vector<576x256xf32>, i32 -> vector<576x256xf32>
    %19 = arith.addf %14, %18 : vector<576x256xf32>
    %c4 = arith.constant 4 : index
    %c0_15 = arith.constant 0 : index
    %c0_16 = arith.constant 0 : index
    %20 = vector.load %arg2[%c4, %c0_15, %c0_16] : memref<9x128x256xbf16, #tpu.memory_space<vmem>>, vector<1x128x256xbf16>
    %21 = vector.shape_cast %20 : vector<1x128x256xbf16> to vector<128x256xbf16>
    %cst_17 = arith.constant dense<0.000000e+00> : vector<576x256xf32>
    %22 = tpu.matmul %1, %21, %cst_17 {dimension_numbers = #tpu.dot_dimension_numbers<[1], [0], [0], [1], [0, 0, 1, 1], [], []>} : vector<576x128xbf16>, vector<128x256xbf16>, vector<576x256xf32> -> vector<576x256xf32>
    %c543_i32 = arith.constant 543 : i32
    %23 = tpu.dynamic_rotate %22 by %c543_i32 dim 0 : vector<576x256xf32>, i32 -> vector<576x256xf32>
    %24 = arith.addf %19, %23 : vector<576x256xf32>
    %c5 = arith.constant 5 : index
    %c0_18 = arith.constant 0 : index
    %c0_19 = arith.constant 0 : index
    %25 = vector.load %arg2[%c5, %c0_18, %c0_19] : memref<9x128x256xbf16, #tpu.memory_space<vmem>>, vector<1x128x256xbf16>
    %26 = vector.shape_cast %25 : vector<1x128x256xbf16> to vector<128x256xbf16>
    %cst_20 = arith.constant dense<0.000000e+00> : vector<576x256xf32>
    %27 = tpu.matmul %1, %26, %cst_20 {dimension_numbers = #tpu.dot_dimension_numbers<[1], [0], [0], [1], [0, 0, 1, 1], [], []>} : vector<576x128xbf16>, vector<128x256xbf16>, vector<576x256xf32> -> vector<576x256xf32>
    %c542_i32 = arith.constant 542 : i32
    %28 = tpu.dynamic_rotate %27 by %c542_i32 dim 0 : vector<576x256xf32>, i32 -> vector<576x256xf32>
    %29 = arith.addf %24, %28 : vector<576x256xf32>
    %c6 = arith.constant 6 : index
    %c0_21 = arith.constant 0 : index
    %c0_22 = arith.constant 0 : index
    %30 = vector.load %arg2[%c6, %c0_21, %c0_22] : memref<9x128x256xbf16, #tpu.memory_space<vmem>>, vector<1x128x256xbf16>
    %31 = vector.shape_cast %30 : vector<1x128x256xbf16> to vector<128x256xbf16>
    %cst_23 = arith.constant dense<0.000000e+00> : vector<576x256xf32>
    %32 = tpu.matmul %1, %31, %cst_23 {dimension_numbers = #tpu.dot_dimension_numbers<[1], [0], [0], [1], [0, 0, 1, 1], [], []>} : vector<576x128xbf16>, vector<128x256xbf16>, vector<576x256xf32> -> vector<576x256xf32>
    %c512_i32 = arith.constant 512 : i32
    %33 = tpu.dynamic_rotate %32 by %c512_i32 dim 0 : vector<576x256xf32>, i32 -> vector<576x256xf32>
    %34 = arith.addf %29, %33 : vector<576x256xf32>
    %c7 = arith.constant 7 : index
    %c0_24 = arith.constant 0 : index
    %c0_25 = arith.constant 0 : index
    %35 = vector.load %arg2[%c7, %c0_24, %c0_25] : memref<9x128x256xbf16, #tpu.memory_space<vmem>>, vector<1x128x256xbf16>
    %36 = vector.shape_cast %35 : vector<1x128x256xbf16> to vector<128x256xbf16>
    %cst_26 = arith.constant dense<0.000000e+00> : vector<576x256xf32>
    %37 = tpu.matmul %1, %36, %cst_26 {dimension_numbers = #tpu.dot_dimension_numbers<[1], [0], [0], [1], [0, 0, 1, 1], [], []>} : vector<576x128xbf16>, vector<128x256xbf16>, vector<576x256xf32> -> vector<576x256xf32>
    %c511_i32 = arith.constant 511 : i32
    %38 = tpu.dynamic_rotate %37 by %c511_i32 dim 0 : vector<576x256xf32>, i32 -> vector<576x256xf32>
    %39 = arith.addf %34, %38 : vector<576x256xf32>
    %c8 = arith.constant 8 : index
    %c0_27 = arith.constant 0 : index
    %c0_28 = arith.constant 0 : index
    %40 = vector.load %arg2[%c8, %c0_27, %c0_28] : memref<9x128x256xbf16, #tpu.memory_space<vmem>>, vector<1x128x256xbf16>
    %41 = vector.shape_cast %40 : vector<1x128x256xbf16> to vector<128x256xbf16>
    %cst_29 = arith.constant dense<0.000000e+00> : vector<576x256xf32>
    %42 = tpu.matmul %1, %41, %cst_29 {dimension_numbers = #tpu.dot_dimension_numbers<[1], [0], [0], [1], [0, 0, 1, 1], [], []>} : vector<576x128xbf16>, vector<128x256xbf16>, vector<576x256xf32> -> vector<576x256xf32>
    %c510_i32 = arith.constant 510 : i32
    %43 = tpu.dynamic_rotate %42 by %c510_i32 dim 0 : vector<576x256xf32>, i32 -> vector<576x256xf32>
    %44 = arith.addf %39, %43 : vector<576x256xf32>
    %45 = vector.shape_cast %44 : vector<576x256xf32> to vector<1x18x32x256xf32>
    %46 = vector.extract_strided_slice %45 {offsets = [0, 0, 0, 0], sizes = [1, 16, 16, 256], strides = [1, 1, 1, 1]} : vector<1x18x32x256xf32> to vector<1x16x16x256xf32>
    %c0_30 = arith.constant 0 : index
    %c0_31 = arith.constant 0 : index
    %47 = vector.load %arg3[%c0_30, %c0_31] : memref<1x256xf32, #tpu.memory_space<vmem>>, vector<1x256xf32>
    %48 = vector.shape_cast %47 : vector<1x256xf32> to vector<1x1x1x256xf32>
    %c0_32 = arith.constant 0 : index
    %c0_33 = arith.constant 0 : index
    %49 = vector.load %arg4[%c0_32, %c0_33] : memref<1x256xf32, #tpu.memory_space<vmem>>, vector<1x256xf32>
    %50 = vector.shape_cast %49 : vector<1x256xf32> to vector<1x1x1x256xf32>
    %51 = vector.broadcast %48 : vector<1x1x1x256xf32> to vector<1x16x16x256xf32>
    %52 = arith.mulf %46, %51 : vector<1x16x16x256xf32>
    %53 = vector.broadcast %50 : vector<1x1x1x256xf32> to vector<1x16x16x256xf32>
    %54 = arith.addf %52, %53 : vector<1x16x16x256xf32>
    %cst_34 = arith.constant 0.000000e+00 : f32
    %55 = vector.broadcast %cst_34 : f32 to vector<1x16x16x256xf32>
    %56 = arith.maximumf %54, %55 : vector<1x16x16x256xf32>
    %c0_35 = arith.constant 0 : index
    %c0_36 = arith.constant 0 : index
    %c0_37 = arith.constant 0 : index
    %c0_38 = arith.constant 0 : index
    %57 = vector.load %arg5[%c0_35, %c0_36, %c0_37, %c0_38] : memref<1x16x16x256xf32, #tpu.memory_space<vmem>>, vector<1x16x16x256xf32>
    tpu.vector_store %arg5[%c0_35, %c0_36, %c0_37, %c0_38], %56 {strides = array<i32>} : memref<1x16x16x256xf32, #tpu.memory_space<vmem>>, vector<1x16x16x256xf32>,
    return
  }
  func.func @transform_0(%arg0: i32) -> (i32, i32, i32, i32) {
    %c0_i32 = arith.constant 0 : i32
    %c0_i32_0 = arith.constant 0 : i32
    %c0_i32_1 = arith.constant 0 : i32
    %c0_i32_2 = arith.constant 0 : i32
    return %arg0, %c0_i32, %c0_i32_0, %c0_i32_1 : i32, i32, i32, i32
  }
  func.func @transform_1(%arg0: i32) -> (i32, i32, i32) {
    %c0_i32 = arith.constant 0 : i32
    %c0_i32_0 = arith.constant 0 : i32
    %c0_i32_1 = arith.constant 0 : i32
    %c0_i32_2 = arith.constant 0 : i32
    return %c0_i32, %c0_i32_0, %c0_i32_1 : i32, i32, i32
  }
  func.func @transform_2(%arg0: i32) -> (i32, i32) {
    %c0_i32 = arith.constant 0 : i32
    %c0_i32_0 = arith.constant 0 : i32
    %c0_i32_1 = arith.constant 0 : i32
    return %c0_i32, %c0_i32_0 : i32, i32
  }
  func.func @transform_3(%arg0: i32) -> (i32, i32) {
    %c0_i32 = arith.constant 0 : i32
    %c0_i32_0 = arith.constant 0 : i32
    %c0_i32_1 = arith.constant 0 : i32
    return %c0_i32, %c0_i32_0 : i32, i32
  }
  func.func @transform_4(%arg0: i32) -> (i32, i32, i32, i32) {
    %c0_i32 = arith.constant 0 : i32
    %c0_i32_0 = arith.constant 0 : i32
    %c0_i32_1 = arith.constant 0 : i32
    %c0_i32_2 = arith.constant 0 : i32
    return %arg0, %c0_i32, %c0_i32_0, %c0_i32_1 : i32, i32, i32, i32
  }
}

</mosaic_0001>

<bundles_post_ra>
// kernel: conv_block_forward.1
= control target key start
LH: loop header
LB: loop body
LE: loop exit
PB: predicated region body
PF: predicated region fallthrough
CT: control target
= control target key end

     0   :  { %9 = vsyncpa [#allocation3], 0  ;;  %s9849_s0 = inlined_call_operand.vmem [shape: bf16[2,18,32,128], index: 0, kind: input, shape index: {}]   ;;  %s9850_s1 = inlined_call_operand.vmem [shape: bf16[9,128,256], index: 1, kind: input, shape index: {}]   ;;  %s9851_s2 = inlined_call_operand.vmem [shape: f32[1,256], index: 2, kind: input, shape index: {}]   ;;  %s9852_s3 = inlined_call_operand.vmem [shape: f32[1,256], index: 3, kind: input, shape index: {}]   ;;  %s9853_s4 = inlined_call_operand.hbm [shape: f32[2,16,16,256], index: 4, kind: output, shape index: {}]  }
   0x1   :  { %11 = vsyncpa [#allocation3 + $0x1], 0  ;;  %s6982_s15 = smov 0   ;;  %s6984_s16 = smov 0  }
   0x2   :  { %s6986_s17 = smov 0   ;;  %s6988_s18 = smov 0  }
   0x3 LB: > { %s7003_s19 = sadd.s32 4294967295, %s6951_s18   ;;  %s6134_s20 = sadd.s32 4294967294, %s6951_s18   ;;  %s6951_s18 = sphi %s6988_s18, %s10034_s18   ;;  %s6947_s17 = sphi %s6986_s17, %s10033_s17   ;;  %s6943_s16 = sphi %s6984_s16, %s10032_s16   ;;  %s6939_s15 = sphi %s6982_s15, %s10031_s15  }
   0x4   : > { %s7007_s21 = sadd.s32 1, %s6951_s18   ;;  %s113_s22 = sadd.s32 1, %s6947_s17 }
   0x5   : > { %s110_s23 = ssub.s32 %s6951_s18, %s7007_s21  ;;  %p123_p0 = scmp.ne.s32.totalorder %s6947_s17, %s6943_s16 }
   0x6   : > { %p111_p1 = scmp.eq.s32.totalorder %s110_s23, 0  ;;  %p124_p2 = scmp.eq.s32.totalorder %s7003_s19, 1 }
   0x7   : > { %p129_p3 = scmp.ne.s32.totalorder %s6943_s16, %s6939_s15  ;;  %p130_p4 = scmp.eq.s32.totalorder %s6134_s20, 1 }
   0x8   : > { %s7018_s24 = scalar_select %p111_p1, %s6947_s17, %s113_s22  }
   0x9   : > { %p7020_p5 = por %p124_p2, %p123_p0  ;;  %p7024_p6 = por %p130_p4, %p129_p3 }
   0xa   : > { %p6137_p7 = scmp.ge.s32.totalorder %s6951_s18, 1  ;;  %p165_p8 = scmp.lt.s32.totalorder %s6951_s18, 3 }
   0xc   : > { %p166_p9 = pnand %p6137_p7, %p165_p8 }
   0xe   : > { %169 = sbr.rel (%p166_p9) target bundleno = 1563 (0x61b), region = 36 }
  0x13   : > { %v6513_v0 = vld [vmem:[%s9850_s1 + $0xf4] ss:$8 sps:$4 sm:$0xff]   ;;  %p191_p10 = scmp.lt.s32.totalorder %s7003_s19, 1  ;;  %v6515_v1 = vld [vmem:[%s9850_s1 + $0xf0] ss:$8 sps:$4 sm:$0xff]   ;;  %v9854_v2 = vmov 0  }
  0x14   : > { %630 = vmatprep.mubr.bf16.mxu0 %v9854_v2  ;;  %792 = vmatprep.mubr.bf16.mxu1 %v9854_v2  ;;  %v6516_v3 = vld [vmem:[%s9850_s1 + $0xe4] ss:$8 sps:$4 sm:$0xff]   ;;  %v6518_v4 = vld [vmem:[%s9850_s1 + $0xe0] ss:$8 sps:$4 sm:$0xff]   ;;  %v6519_v5 = vld [vmem:[%s9850_s1 + $0xd4] ss:$8 sps:$4 sm:$0xff]  }
  0x15   : > { %598 = vmatprep.subr.bf16.mxu0 %v6513_v0  ;;  %6454 = vmatprep.subr.bf16.mxu1 %v6513_v0  ;;  %s192_s7 = scalar_select %p191_p10, %s7003_s19, 1  ;;  %v6521_v6 = vld [vmem:[%s9850_s1 + $0xd0] ss:$8 sps:$4 sm:$0xff]   ;;  %v6522_v7 = vld [vmem:[%s9850_s1 + $0xc4] ss:$8 sps:$4 sm:$0xff]  }
  0x16   : > { %599 = vmatpush1.bf16.msra.mxu0 %v6515_v1  ;;  %6462 = vmatpush1.bf16.msra.mxu1 %v6515_v1  ;;  %v6524_v8 = vld [vmem:[%s9850_s1 + $0xc0] ss:$8 sps:$4 sm:$0xff]   ;;  %v6525_v9 = vld [vmem:[%s9850_s1 + $0xb4] ss:$8 sps:$4 sm:$0xff]   ;;  %v6527_v10 = vld [vmem:[%s9850_s1 + $0xb0] ss:$8 sps:$4 sm:$0xff]  }
  0x17   : > { %600 = vmatprep.subr.bf16.mxu0 %v6516_v3  ;;  %6455 = vmatprep.subr.bf16.mxu1 %v6516_v3  ;;  %s6470_s12 = smul.u32 288, %s192_s7  ;;  %v6528_v11 = vld [vmem:[%s9850_s1 + $0xa4] ss:$8 sps:$4 sm:$0xff]   ;;  %v6530_v12 = vld [vmem:[%s9850_s1 + $0xa0] ss:$8 sps:$4 sm:$0xff]   ;;  %s188_s9 = sand.u32 1, %s6943_s16  }
  0x18   : > { %v6531_v13 = vld [vmem:[%s9850_s1 + $0x94] ss:$8 sps:$4 sm:$0xff]   ;;  %v6533_v14 = vld [vmem:[%s9850_s1 + $0x90] ss:$8 sps:$4 sm:$0xff]   ;;  %v6534_v15 = vld [vmem:[%s9850_s1 + $0x84] ss:$8 sps:$4 sm:$0xff]  }
  0x19   : > { %s7058_s28 = scalar_lea.vmem %s9849_s0, %s6470_s12  ;;  %v6536_v16 = vld [vmem:[%s9850_s1 + $0x80] ss:$8 sps:$4 sm:$0xff]   ;;  %v6541_v18 = vld [vmem:[%s9850_s1 + $0x74] ss:$8 sps:$4 sm:$0xff]   ;;  %v6539_v21 = vld [vmem:[%s9850_s1 + $0x70] ss:$8 sps:$4 sm:$0xff]  }
  0x1a   : > { %601 = vmatpush1.bf16.msra.mxu0 %v6518_v4  ;;  %6463 = vmatpush1.bf16.msra.mxu1 %v6518_v4  ;;  %v7088_v17 = vld [vmem:[%s7058_s28] sm:$0xff]   ;;  %v6544_v19 = vld [vmem:[%s9850_s1 + $0x174] ss:$8 sps:$4 sm:$0xff]   ;;  %v6542_v22 = vld [vmem:[%s9850_s1 + $0x170] ss:$8 sps:$4 sm:$0xff]   ;;  %s6138_s10 = sshll.u32 %s188_s9, 9 }
  0x1b   : > { %602 = vmatprep.subr.bf16.mxu0 %v6519_v5  ;;  %6456 = vmatprep.subr.bf16.mxu1 %v6519_v5  ;;  %v6538_v20 = vld [vmem:[%s7058_s28 + $0x90] sm:$0xff]   ;;  %v6549_v23 = vld [vmem:[%s9850_s1 + $0x60] ss:$8 sps:$4 sm:$0xff]   ;;  %v6551_v24 = vld [vmem:[%s9850_s1 + $0x64] ss:$8 sps:$4 sm:$0xff]   ;;  %s9296_s11 = scalar_lea.vmem [#allocation2], %s6138_s10 }
  0x1c   : > { %v6554_v25 = vld [vmem:[%s9850_s1 + $0x164] ss:$8 sps:$4 sm:$0xff]   ;;  %v6552_v26 = vld [vmem:[%s9850_s1 + $0x160] ss:$8 sps:$4 sm:$0xff]   ;;  %v6561_v27 = vld [vmem:[%s9850_s1 + $0x54] ss:$8 sps:$4 sm:$0xff]  }
  0x1d   : > { %v7122_v28 = vld [vmem:[%s7058_s28 + $0x8] sm:$0xff]   ;;  %v6564_v29 = vld [vmem:[%s9850_s1 + $0x154] ss:$8 sps:$4 sm:$0xff]   ;;  %v6559_v31 = vld [vmem:[%s9850_s1 + $0x50] ss:$8 sps:$4 sm:$0xff]   ;;  %s6072_s12 = sshll.u32 %s9296_s11, 4  ;;  %s9803_s12 = int_to_ptr.vmem [resolvable:$true] %s6072_s12 }
  0x1e   : > { %603 = vmatpush1.bf16.msra.mxu0 %v6521_v6  ;;  %6464 = vmatpush1.bf16.msra.mxu1 %v6521_v6  ;;  %v6546_v30 = vld [vmem:[%s7058_s28 + $0x98] sm:$0xff]   ;;  %v6571_v33 = vld [vmem:[%s9850_s1 + $0x44] ss:$8 sps:$4 sm:$0xff]   ;;  %v6569_v35 = vld [vmem:[%s9850_s1 + $0x40] ss:$8 sps:$4 sm:$0xff]   ;;  %s6891_s22 = scalar_lea.vmem %s9803_s12, 8192 }
  0x1f   : > { %604 = vmatprep.subr.bf16.mxu0 %v6522_v7  ;;  %6457 = vmatprep.subr.bf16.mxu1 %v6522_v7  ;;  %v6562_v32 = vld [vmem:[%s9850_s1 + $0x150] ss:$8 sps:$4 sm:$0xff]   ;;  %v6576_v34 = vld [vmem:[%s9850_s1 + $0x144] ss:$8 sps:$4 sm:$0xff]   ;;  %v6574_v36 = vld [vmem:[%s9850_s1 + $0x140] ss:$8 sps:$4 sm:$0xff]   ;;  %p6892_p11 = scmp.ne.s32.totalorder %s9803_s12, %s6891_s22 }
  0x20   : > { %v7150_v37 = vld [vmem:[%s7058_s28 + $0x10] sm:$0xff]   ;;  %v6548_v40 = vld [vmem:[%s7058_s28 + $0xa0] sm:$0xff]   ;;  %v7181_v47 = vld [vmem:[%s7058_s28 + $0x18] sm:$0xff]   ;;  %s6954_s23 = smov [#allocation2]  }
  0x21   : > { %v6583_v38 = vld [vmem:[%s9850_s1 + $0x34] ss:$8 sps:$4 sm:$0xff]   ;;  %v6581_v41 = vld [vmem:[%s9850_s1 + $0x30] ss:$8 sps:$4 sm:$0xff]   ;;  %v6593_v43 = vld [vmem:[%s9850_s1 + $0x24] ss:$8 sps:$4 sm:$0xff]   ;;  %p6893_p12 = pnand %p6892_p11, %p7020_p5 }
  0x22   : > { %605 = vmatpush1.bf16.msra.mxu0 %v6524_v8  ;;  %6465 = vmatpush1.bf16.msra.mxu1 %v6524_v8  ;;  %v6586_v39 = vld [vmem:[%s9850_s1 + $0x134] ss:$8 sps:$4 sm:$0xff]   ;;  %v6584_v42 = vld [vmem:[%s9850_s1 + $0x130] ss:$8 sps:$4 sm:$0xff]   ;;  %v6596_v44 = vld [vmem:[%s9850_s1 + $0x124] ss:$8 sps:$4 sm:$0xff]  }
  0x23   : > { %606 = vmatprep.subr.bf16.mxu0 %v6525_v9  ;;  %6458 = vmatprep.subr.bf16.mxu1 %v6525_v9  ;;  %v6591_v45 = vld [vmem:[%s9850_s1 + $0x20] ss:$8 sps:$4 sm:$0xff]   ;;  %v6601_v49 = vld [vmem:[%s9850_s1 + $0x10] ss:$8 sps:$4 sm:$0xff]   ;;  %v6603_v50 = vld [vmem:[%s9850_s1 + $0x14] ss:$8 sps:$4 sm:$0xff]   ;;  %p6894_p13 = pneg %p6893_p12 }
  0x24   : > { %v6594_v46 = vld [vmem:[%s9850_s1 + $0x120] ss:$8 sps:$4 sm:$0xff]   ;;  %v6604_v51 = vld [vmem:[%s9850_s1 + $0x110] ss:$8 sps:$4 sm:$0xff]   ;;  %v6606_v52 = vld [vmem:[%s9850_s1 + $0x114] ss:$8 sps:$4 sm:$0xff]  }
  0x25   : > { %v6556_v48 = vld [vmem:[%s7058_s28 + $0xa8] sm:$0xff]   ;;  %v7200_v53 = vld [vmem:[%s7058_s28 + $0x20] sm:$0xff]   ;;  %v6558_v54 = vld [vmem:[%s7058_s28 + $0xb0] sm:$0xff]   ;;  %s6895_s27 = sshll.u32 %s6954_s23, 4  ;;  %s6896_s27 = int_to_ptr.vmem [resolvable:$false] %s6895_s27 }
  0x26   : > { %607 = vmatpush1.bf16.msra.mxu0 %v6527_v10  ;;  %6466 = vmatpush1.bf16.msra.mxu1 %v6527_v10  ;;  %v6611_v55 = vld [vmem:[%s9850_s1] ss:$8 sps:$4 sm:$0xff]   ;;  %v6613_v56 = vld [vmem:[%s9850_s1 + $0x4] ss:$8 sps:$4 sm:$0xff]   ;;  %v6623_v60 = vld [vmem:[%s9850_s1 + $0x1f4] ss:$8 sps:$4 sm:$0xff]   ;;  %p6898_p0 = scmp.lt.s32.totalorder %s9803_s12, %s6896_s27 }
  0x27   : > { %608 = vmatprep.subr.bf16.mxu0 %v6528_v11  ;;  %6459 = vmatprep.subr.bf16.mxu1 %v6528_v11  ;;  %v6616_v57 = vld [vmem:[%s9850_s1 + $0x100] ss:$8 sps:$4 sm:$0xff]   ;;  %v6618_v58 = vld [vmem:[%s9850_s1 + $0x104] ss:$8 sps:$4 sm:$0xff]   ;;  %v6566_v61 = vld [vmem:[%s7058_s28 + $0xb8] sm:$0xff]   ;;  %s6897_s29 = scalar_lea.vmem %s6896_s27, 16384 }
  0x28   : > { %v7219_v59 = vld [vmem:[%s7058_s28 + $0x28] sm:$0xff]   ;;  %v6626_v62 = vld [vmem:[%s9850_s1 + $0x274] ss:$8 sps:$4 sm:$0xff]   ;;  %v6568_v0 = vld [vmem:[%s7058_s28 + $0xc0] sm:$0xff]   ;;  %p6899_p1 = scmp.lt.s32.totalorder %s6897_s29, %s6891_s22 }
  0x29   : > { %v7232_v63 = vld [vmem:[%s7058_s28 + $0x30] sm:$0xff]   ;;  %v7239_v1 = vld [vmem:[%s7058_s28 + $0x38] sm:$0xff]   ;;  %v6573_v3 = vld [vmem:[%s7058_s28 + $0xc8] sm:$0xff]  }
  0x2a   : > { %609 = vmatpush1.bf16.msra.mxu0 %v6530_v12  ;;  %6467 = vmatpush1.bf16.msra.mxu1 %v6530_v12  ;;  %v7246_v4 = vld [vmem:[%s7058_s28 + $0x40] sm:$0xff]   ;;  %v6578_v5 = vld [vmem:[%s7058_s28 + $0xd0] sm:$0xff]   ;;  %v7253_v6 = vld [vmem:[%s7058_s28 + $0x48] sm:$0xff]   ;;  %p6900_p2 = por %p6899_p1, %p6898_p0 }
  0x2b   : > { %610 = vmatprep.subr.bf16.mxu0 %v6531_v13  ;;  %6460 = vmatprep.subr.bf16.mxu1 %v6531_v13  ;;  %v6580_v7 = vld [vmem:[%s7058_s28 + $0xd8] sm:$0xff]   ;;  %v7260_v8 = vld [vmem:[%s7058_s28 + $0x50] sm:$0xff]   ;;  %v6588_v9 = vld [vmem:[%s7058_s28 + $0xe0] sm:$0xff]  }
  0x2c   : > { %v7267_v10 = vld [vmem:[%s7058_s28 + $0x58] sm:$0xff]   ;;  %v6590_v11 = vld [vmem:[%s7058_s28 + $0xe8] sm:$0xff]   ;;  %v7274_v12 = vld [vmem:[%s7058_s28 + $0x60] sm:$0xff]   ;;  %p6901_p3 = pnand %p6900_p2, %p6894_p13 }
  0x2d   : > { %v6598_v13 = vld [vmem:[%s7058_s28 + $0xf0] sm:$0xff]  }
  0x2e   : > { %611 = vmatpush1.bf16.msra.mxu0 %v6533_v14  ;;  %6468 = vmatpush1.bf16.msra.mxu1 %v6533_v14  ;;  %v7281_v14 = vld [vmem:[%s7058_s28 + $0x68] sm:$0xff]  }
  0x2f   : > { %612 = vmatprep.subr.bf16.mxu0 %v6534_v15  ;;  %6461 = vmatprep.subr.bf16.mxu1 %v6534_v15  ;;  %v6600_v15 = vld [vmem:[%s7058_s28 + $0xf8] sm:$0xff]  }
  0x32   : > { %613 = vmatpush1.bf16.msra.mxu0 %v6536_v16  ;;  %6469 = vmatpush1.bf16.msra.mxu1 %v6536_v16  ;;  %v7288_v16 = vld [vmem:[%s7058_s28 + $0x70] sm:$0xff]  }
  0x33   : > { %1186 = vmatprep.subr.bf16.mxu1 %v6541_v18  ;;  %1596 = vmatprep.subr.bf16.mxu0 %v6544_v19  ;;  %v6608_v18 = vld [vmem:[%s7058_s28 + $0x100] sm:$0xff]   ;;  %v7295_v19 = vld [vmem:[%s7058_s28 + $0x78] sm:$0xff]  }
  0x35   : > { %631 = vmatmul.mubr.bf16.vlgmr.msra.gmra.mxu0 %v7088_v17  ;;  %793 = vmatmul.mubr.bf16.vlgmr.msra.gmra.mxu1 %v6538_v20  ;;  %v6610_v20 = vld [vmem:[%s7058_s28 + $0x108] sm:$0xff]  }
  0x36   : > { %1187 = vmatpush1.bf16.msra.mxu1 %v6539_v21  ;;  %1597 = vmatpush1.bf16.msra.mxu0 %v6542_v22  ;;  %v7302_v21 = vld [vmem:[%s7058_s28 + $0x80] sm:$0xff]   ;;  %v6615_v22 = vld [vmem:[%s7058_s28 + $0x110] sm:$0xff]  }
  0x37   : > { %640 = vmatprep.mubr.bf16.mxu0 %v9854_v2  ;;  %802 = vmatprep.mubr.bf16.mxu1 %v9854_v2 }
  0x38   : > { %1188 = vmatprep.subr.bf16.mxu1 %v6551_v24  ;;  %1598 = vmatprep.subr.bf16.mxu0 %v6554_v25  ;;  %v6620_v24 = vld [vmem:[%s7058_s28 + $0x118] sm:$0xff]  }
  0x39   : > { %v6621_v25 = vld [vmem:[%s9850_s1 + $0x1f0] ss:$8 sps:$4 sm:$0xff]  }
  0x3a   : > { %1189 = vmatpush1.bf16.msra.mxu1 %v6549_v23  ;;  %1599 = vmatpush1.bf16.msra.mxu0 %v6552_v26  ;;  %v7309_v23 = vld [vmem:[%s7058_s28 + $0x88] sm:$0xff]   ;;  %v6624_v26 = vld [vmem:[%s9850_s1 + $0x270] ss:$8 sps:$4 sm:$0xff]  }
  0x3b   : > { %1190 = vmatprep.subr.bf16.mxu1 %v6561_v27  ;;  %1600 = vmatprep.subr.bf16.mxu0 %v6564_v29  ;;  %v6629_v27 = vld [vmem:[%s9850_s1 + $0x1e4] ss:$8 sps:$4 sm:$0xff]  }
  0x3c   : > { %v6632_v29 = vld [vmem:[%s9850_s1 + $0x264] ss:$8 sps:$4 sm:$0xff]  }
  0x3d   : > { %641 = vmatmul.mubr.bf16.gmra.mxu0 %v7122_v28  ;;  %803 = vmatmul.mubr.bf16.gmra.mxu1 %v6546_v30  ;;  %v6627_v30 = vld [vmem:[%s9850_s1 + $0x1e0] ss:$8 sps:$4 sm:$0xff]  }
  0x3e   : > { %648 = vmatprep.mubr.bf16.mxu0 %v9854_v2  ;;  %810 = vmatprep.mubr.bf16.mxu1 %v9854_v2 }
  0x3f   : > { %1191 = vmatpush1.bf16.msra.mxu1 %v6559_v31  ;;  %1601 = vmatpush1.bf16.msra.mxu0 %v6562_v32  ;;  %v6630_v31 = vld [vmem:[%s9850_s1 + $0x260] ss:$8 sps:$4 sm:$0xff]   ;;  %v6635_v32 = vld [vmem:[%s9850_s1 + $0x1d4] ss:$8 sps:$4 sm:$0xff]  }
  0x40   : > { %1192 = vmatprep.subr.bf16.mxu1 %v6571_v33  ;;  %1602 = vmatprep.subr.bf16.mxu0 %v6576_v34  ;;  %v6633_v33 = vld [vmem:[%s9850_s1 + $0x1d0] ss:$8 sps:$4 sm:$0xff]  }
  0x41   : > { %v6636_v34 = vld [vmem:[%s9850_s1 + $0x250] ss:$8 sps:$4 sm:$0xff]  }
  0x43   : > { %1193 = vmatpush1.bf16.msra.mxu1 %v6569_v35  ;;  %1603 = vmatpush1.bf16.msra.mxu0 %v6574_v36  ;;  %v6641_v35 = vld [vmem:[%s9850_s1 + $0x1c4] ss:$8 sps:$4 sm:$0xff]  }
  0x44   : > { %1194 = vmatprep.subr.bf16.mxu1 %v6583_v38  ;;  %1604 = vmatprep.subr.bf16.mxu0 %v6586_v39  ;;  %v6644_v36 = vld [vmem:[%s9850_s1 + $0x244] ss:$8 sps:$4 sm:$0xff]   ;;  %v6639_v38 = vld [vmem:[%s9850_s1 + $0x1c0] ss:$8 sps:$4 sm:$0xff]  }
  0x45   : > { %649 = vmatmul.mubr.bf16.gmra.mxu0 %v7150_v37  ;;  %811 = vmatmul.mubr.bf16.gmra.mxu1 %v6548_v40  ;;  %v6642_v39 = vld [vmem:[%s9850_s1 + $0x240] ss:$8 sps:$4 sm:$0xff]   ;;  %v6647_v40 = vld [vmem:[%s9850_s1 + $0x1b4] ss:$8 sps:$4 sm:$0xff]  }
  0x46   : > { %658 = vmatprep.mubr.bf16.mxu0 %v9854_v2  ;;  %820 = vmatprep.mubr.bf16.mxu1 %v9854_v2 }
  0x47   : > { %1195 = vmatpush1.bf16.msra.mxu1 %v6581_v41  ;;  %1605 = vmatpush1.bf16.msra.mxu0 %v6584_v42  ;;  %v6648_v41 = vld [vmem:[%s9850_s1 + $0x230] ss:$8 sps:$4 sm:$0xff]   ;;  %v1039_v42 = vlaneseq }
  0x48   : > { %1196 = vmatprep.subr.bf16.mxu1 %v6593_v43  ;;  %1606 = vmatprep.subr.bf16.mxu0 %v6596_v44 }
  0x4b   : > { %1197 = vmatpush1.bf16.msra.mxu1 %v6591_v45  ;;  %1607 = vmatpush1.bf16.msra.mxu0 %v6594_v46  ;;  %v7395_v45 = vshrl.u32 %v1039_v42, 7 }
  0x4c   : > { %1198 = vmatprep.subr.bf16.mxu1 %v6603_v50  ;;  %1608 = vmatprep.subr.bf16.mxu0 %v6606_v52 }
  0x4d   : > { %659 = vmatmul.mubr.bf16.gmra.mxu0 %v7181_v47  ;;  %821 = vmatmul.mubr.bf16.gmra.mxu1 %v6556_v48  ;;  %vm1041_vm0 = vcmp.lt.s32.totalorder %v7395_v45, 7  ;;  %vm2037_vm1 = vcmp.lt.s32.totalorder %v7395_v45, 6 }
  0x4e   : > { %666 = vmatprep.mubr.bf16.mxu0 %v9854_v2  ;;  %828 = vmatprep.mubr.bf16.mxu1 %v9854_v2 }
  0x4f   : > { %1199 = vmatpush1.bf16.msra.mxu1 %v6601_v49  ;;  %1609 = vmatpush1.bf16.msra.mxu0 %v6604_v51 }
  0x50   : > { %1200 = vmatprep.subr.bf16.mxu1 %v6613_v56  ;;  %1610 = vmatprep.subr.bf16.mxu0 %v6618_v58 }
  0x53   : > { %1201 = vmatpush1.bf16.msra.mxu1 %v6611_v55  ;;  %1611 = vmatpush1.bf16.msra.mxu0 %v6616_v57 }
  0x54   : > { %2263 = vmatprep.subr.bf16.mxu1 %v6623_v60  ;;  %2737 = vmatprep.subr.bf16.mxu0 %v6626_v62  ;;  %v6654_v62 = vld [vmem:[%s9850_s1 + $0x220] ss:$8 sps:$4 sm:$0xff]  }
  0x55   : > { %667 = vmatmul.mubr.bf16.gmra.mxu0 %v7200_v53  ;;  %829 = vmatmul.mubr.bf16.gmra.mxu1 %v6558_v54  ;;  %v6653_v54 = vld [vmem:[%s9850_s1 + $0x1a4] ss:$8 sps:$4 sm:$0xff]  }
  0x56   : > { %676 = vmatprep.mubr.bf16.mxu0 %v9854_v2  ;;  %838 = vmatprep.mubr.bf16.mxu1 %v9854_v2 }
  0x5d   : > { %677 = vmatmul.mubr.bf16.gmra.mxu0 %v7219_v59  ;;  %839 = vmatmul.mubr.bf16.gmra.mxu1 %v6566_v61 }
  0x5e   : > { %684 = vmatprep.mubr.bf16.mxu0 %v9854_v2  ;;  %846 = vmatprep.mubr.bf16.mxu1 %v9854_v2 }
  0x65   : > { %685 = vmatmul.mubr.bf16.gmra.mxu0 %v7232_v63  ;;  %847 = vmatmul.mubr.bf16.gmra.mxu1 %v6568_v0 }
  0x66   : > { %694 = vmatprep.mubr.bf16.mxu0 %v9854_v2  ;;  %856 = vmatprep.mubr.bf16.mxu1 %v9854_v2 }
  0x6d   : > { %695 = vmatmul.mubr.bf16.gmra.mxu0 %v7239_v1  ;;  %857 = vmatmul.mubr.bf16.gmra.mxu1 %v6573_v3 }
  0x6e   : > { %702 = vmatprep.mubr.bf16.mxu0 %v9854_v2  ;;  %864 = vmatprep.mubr.bf16.mxu1 %v9854_v2 }
  0x75   : > { %703 = vmatmul.mubr.bf16.gmra.mxu0 %v7246_v4  ;;  %865 = vmatmul.mubr.bf16.gmra.mxu1 %v6578_v5 }
  0x76   : > { %712 = vmatprep.mubr.bf16.mxu0 %v9854_v2  ;;  %874 = vmatprep.mubr.bf16.mxu1 %v9854_v2 }
  0x7d   : > { %713 = vmatmul.mubr.bf16.gmra.mxu0 %v7253_v6  ;;  %875 = vmatmul.mubr.bf16.gmra.mxu1 %v6580_v7 }
  0x7e   : > { %720 = vmatprep.mubr.bf16.mxu0 %v9854_v2  ;;  %882 = vmatprep.mubr.bf16.mxu1 %v9854_v2 }
  0x85   : > { %721 = vmatmul.mubr.bf16.gmra.mxu0 %v7260_v8  ;;  %883 = vmatmul.mubr.bf16.gmra.mxu1 %v6588_v9 }
  0x86   : > { %730 = vmatprep.mubr.bf16.mxu0 %v9854_v2  ;;  %892 = vmatprep.mubr.bf16.mxu1 %v9854_v2 }
  0x8d   : > { %731 = vmatmul.mubr.bf16.gmra.mxu0 %v7267_v10  ;;  %893 = vmatmul.mubr.bf16.gmra.mxu1 %v6590_v11 }
  0x8e   : > { %738 = vmatprep.mubr.bf16.mxu0 %v9854_v2  ;;  %900 = vmatprep.mubr.bf16.mxu1 %v9854_v2 }
  0x95   : > { %739 = vmatmul.mubr.bf16.gmra.mxu0 %v7274_v12  ;;  %901 = vmatmul.mubr.bf16.gmra.mxu1 %v6598_v13 }
  0x96   : > { %748 = vmatprep.mubr.bf16.mxu0 %v9854_v2  ;;  %910 = vmatprep.mubr.bf16.mxu1 %v9854_v2 }
  0x9d   : > { %749 = vmatmul.mubr.bf16.gmra.mxu0 %v7281_v14  ;;  %911 = vmatmul.mubr.bf16.gmra.mxu1 %v6600_v15 }
  0x9e   : > { %756 = vmatprep.mubr.bf16.mxu0 %v9854_v2  ;;  %918 = vmatprep.mubr.bf16.mxu1 %v9854_v2 }
  0xa5   : > { %757 = vmatmul.mubr.bf16.gmra.mxu0 %v7288_v16  ;;  %919 = vmatmul.mubr.bf16.gmra.mxu1 %v6608_v18 }
  0xa6   : > { %766 = vmatprep.mubr.bf16.mxu0 %v9854_v2  ;;  %924 = vmatprep.mubr.bf16.mxu1 %v9854_v2 }
  0xad   : > { %767 = vmatmul.mubr.bf16.gmra.mxu0 %v7295_v19  ;;  %925 = vmatmul.mubr.bf16.gmra.mxu1 %v6610_v20 }
  0xae   : > { %774 = vmatprep.mubr.bf16.mxu0 %v9854_v2  ;;  %930 = vmatprep.mubr.bf16.mxu1 %v9854_v2 }
  0xb5   : > { %775 = vmatmul.mubr.bf16.gmra.mxu0 %v7302_v21  ;;  %931 = vmatmul.mubr.bf16.gmra.mxu1 %v6615_v22 }
  0xb6   : > { %784 = vmatprep.mubr.bf16.mxu0 %v9854_v2  ;;  %936 = vmatprep.mubr.bf16.mxu1 %v9854_v2 }
  0xbd   : > { %785 = vmatmul.mubr.bf16.gmra.mxu0 %v7309_v23  ;;  %937 = vmatmul.mubr.bf16.gmra.mxu1 %v6620_v24 }
  0xbe   : > { %1218 = vmatprep.mubr.bf16.mxu1 %v9854_v2  ;;  %1628 = vmatprep.mubr.bf16.mxu0 %v9854_v2 }
  0xc5   : > { %1219 = vmatmul.mubr.bf16.vlgmr.msra.gmra.mxu1 %v7088_v17  ;;  %1629 = vmatmul.mubr.bf16.vlgmr.msra.gmra.mxu0 %v7088_v17  ;;  %v6638_v17 = vld [vmem:[%s9850_s1 + $0x254] ss:$8 sps:$4 sm:$0xff]  }
  0xc6   : > { %2264 = vmatpush1.bf16.msra.mxu1 %v6621_v25  ;;  %2738 = vmatpush1.bf16.msra.mxu0 %v6624_v26 }
  0xc7   : > { %1228 = vmatprep.mubr.bf16.mxu1 %v9854_v2  ;;  %1638 = vmatprep.mubr.bf16.mxu0 %v9854_v2 }
  0xc8   : > { %2265 = vmatprep.subr.bf16.mxu1 %v6629_v27  ;;  %2739 = vmatprep.subr.bf16.mxu0 %v6632_v29 }
  0xca   : > { %2266 = vmatpush1.bf16.msra.mxu1 %v6627_v30  ;;  %2740 = vmatpush1.bf16.msra.mxu0 %v6630_v31 }
  0xcb   : > { %2267 = vmatprep.subr.bf16.mxu1 %v6635_v32  ;;  %2741 = vmatprep.subr.bf16.mxu0 %v6638_v17 }
  0xcd   : > { %1229 = vmatmul.mubr.bf16.gmra.mxu1 %v7122_v28  ;;  %1639 = vmatmul.mubr.bf16.gmra.mxu0 %v7122_v28  ;;  %v6645_v28 = vld [vmem:[%s9850_s1 + $0x1b0] ss:$8 sps:$4 sm:$0xff]  }
  0xce   : > { %1234 = vmatprep.mubr.bf16.mxu1 %v9854_v2  ;;  %1646 = vmatprep.mubr.bf16.mxu0 %v9854_v2 }
  0xcf   : > { %2268 = vmatpush1.bf16.msra.mxu1 %v6633_v33  ;;  %2742 = vmatpush1.bf16.msra.mxu0 %v6636_v34 }
  0xd0   : > { %2269 = vmatprep.subr.bf16.mxu1 %v6641_v35  ;;  %2743 = vmatprep.subr.bf16.mxu0 %v6644_v36 }
  0xd3   : > { %2270 = vmatpush1.bf16.msra.mxu1 %v6639_v38  ;;  %2744 = vmatpush1.bf16.msra.mxu0 %v6642_v39 }
  0xd4   : > { %2271 = vmatprep.subr.bf16.mxu1 %v6647_v40 }
  0xd5   : > { %1235 = vmatmul.mubr.bf16.gmra.mxu1 %v7150_v37  ;;  %1647 = vmatmul.mubr.bf16.gmra.mxu0 %v7150_v37  ;;  %v6650_v37 = vld [vmem:[%s9850_s1 + $0x234] ss:$8 sps:$4 sm:$0xff]  }
  0xd6   : > { %1244 = vmatprep.mubr.bf16.mxu1 %v9854_v2  ;;  %1656 = vmatprep.mubr.bf16.mxu0 %v9854_v2 }
  0xd7   : > { %2272 = vmatpush1.bf16.msra.mxu1 %v6645_v28  ;;  %2745 = vmatprep.subr.bf16.mxu0 %v6650_v37 }
  0xd8   : > { %2746 = vmatpush1.bf16.msra.mxu0 %v6648_v41  ;;  %2273 = vmatprep.subr.bf16.mxu1 %v6653_v54 }
  0xdd   : > { %1245 = vmatmul.mubr.bf16.gmra.mxu1 %v7181_v47  ;;  %1657 = vmatmul.mubr.bf16.gmra.mxu0 %v7181_v47 }
  0xde   : > { %1250 = vmatprep.mubr.bf16.mxu1 %v9854_v2  ;;  %1664 = vmatprep.mubr.bf16.mxu0 %v9854_v2 }
  0xe5   : > { %1251 = vmatmul.mubr.bf16.gmra.mxu1 %v7200_v53  ;;  %1665 = vmatmul.mubr.bf16.gmra.mxu0 %v7200_v53 }
  0xe6   : > { %1260 = vmatprep.mubr.bf16.mxu1 %v9854_v2  ;;  %1674 = vmatprep.mubr.bf16.mxu0 %v9854_v2 }
  0xed   : > { %1261 = vmatmul.mubr.bf16.gmra.mxu1 %v7219_v59  ;;  %1675 = vmatmul.mubr.bf16.gmra.mxu0 %v7219_v59  ;;  %v6651_v59 = vld [vmem:[%s9850_s1 + $0x1a0] ss:$8 sps:$4 sm:$0xff]  }
  0xee   : > { %1266 = vmatprep.mubr.bf16.mxu1 %v9854_v2  ;;  %1682 = vmatprep.mubr.bf16.mxu0 %v9854_v2 }
  0xef   : > { %2274 = vmatpush1.bf16.msra.mxu1 %v6651_v59 }
  0xf5   : > { %v632_v43 = vpop.f32.mrf.mxu0  ;;  %v794_v44 = vpop.f32.mrf.mxu1  ;;  %1267 = vmatmul.mubr.bf16.gmra.mxu1 %v7232_v63  ;;  %1683 = vmatmul.mubr.bf16.gmra.mxu0 %v7232_v63  ;;  %v6656_v63 = vld [vmem:[%s9850_s1 + $0x224] ss:$8 sps:$4 sm:$0xff]  }
  0xf6   : > { %1276 = vmatprep.mubr.bf16.mxu1 %v9854_v2  ;;  %1692 = vmatprep.mubr.bf16.mxu0 %v9854_v2  ;;  %v943_v50 = vrot.slane %v632_v43, 1  ;;  %v997_v51 = vrot.slane %v794_v44, 1 }
  0xf7   : > { %v634_v46 = vpop.f32.mrf.mxu0  ;;  %v796_v47 = vpop.f32.mrf.mxu1  ;;  %2747 = vmatprep.subr.bf16.mxu0 %v6656_v63 }
  0xf8   : > { %v944_v55 = vrot.slane %v634_v46, 1  ;;  %v998_v56 = vrot.slane %v796_v47, 1  ;;  %2748 = vmatpush1.bf16.msra.mxu0 %v6654_v62 }
  0xf9   : > { %v636_v48 = vpop.f32.mrf.mxu0  ;;  %v798_v49 = vpop.f32.mrf.mxu1 }
  0xfa   : > { %v945_v52 = vrot.slane %v636_v48, 1  ;;  %v999_v53 = vrot.slane %v798_v49, 1 }
  0xfb   : > { %v638_v57 = vpop.f32.mrf.mxu0  ;;  %v800_v58 = vpop.f32.mrf.mxu1 }
  0xfc   : > { %v946_v60 = vrot.slane %v638_v57, 1  ;;  %v1000_v61 = vrot.slane %v800_v58, 1  ;;  %v7414_v0 = vsel %vm1041_vm0, %v943_v50, %v945_v52  ;;  %v7418_v3 = vsel %vm1041_vm0, %v997_v51, %v999_v53 }
  0xfd   : > { %v642_v5 = vpop.f32.mrf.mxu0  ;;  %v804_v7 = vpop.f32.mrf.mxu1  ;;  %1277 = vmatmul.mubr.bf16.gmra.mxu1 %v7239_v1  ;;  %1693 = vmatmul.mubr.bf16.gmra.mxu0 %v7239_v1 }
  0xfe   : > { %v947_v9 = vrot.slane %v642_v5, 1  ;;  %v1001_v11 = vrot.slane %v804_v7, 1  ;;  %1282 = vmatprep.mubr.bf16.mxu1 %v9854_v2  ;;  %1700 = vmatprep.mubr.bf16.mxu0 %v9854_v2  ;;  %v7426_v13 = vsel %vm1041_vm0, %v944_v55, %v946_v60  ;;  %v7430_v15 = vsel %vm1041_vm0, %v998_v56, %v1000_v61 }
  0xff   : > { %v644_v18 = vpop.f32.mrf.mxu0  ;;  %v806_v20 = vpop.f32.mrf.mxu1 }
 0x100   : > { %v948_v22 = vrot.slane %v644_v18, 1  ;;  %v1002_v1 = vrot.slane %v806_v20, 1  ;;  %v7434_v24 = vsel %vm1041_vm0, %v945_v52, %v947_v9  ;;  %v7438_v25 = vsel %vm1041_vm0, %v999_v53, %v1001_v11 }
 0x101   : > { %v646_v26 = vpop.f32.mrf.mxu0  ;;  %v808_v27 = vpop.f32.mrf.mxu1 }
 0x102   : > { %v7442_v29 = vsel %vm1041_vm0, %v946_v60, %v948_v22  ;;  %v7446_v30 = vsel %vm1041_vm0, %v1000_v61, %v1002_v1 }
 0x103   : > { %v647_v31 = vpop.f32.mrf.mxu0  ;;  %v809_v32 = vpop.f32.mrf.mxu1 }
 0x105   : > { %v650_v17 = vpop.f32.mrf.mxu0  ;;  %v812_v33 = vpop.f32.mrf.mxu1  ;;  %1283 = vmatmul.mubr.bf16.gmra.mxu1 %v7246_v4  ;;  %1701 = vmatmul.mubr.bf16.gmra.mxu0 %v7246_v4 }
 0x106   : > { %1292 = vmatprep.mubr.bf16.mxu1 %v9854_v2  ;;  %1710 = vmatprep.mubr.bf16.mxu0 %v9854_v2  ;;  %v949_v39 = vrot.slane %v650_v17, 1  ;;  %v1003_v28 = vrot.slane %v812_v33, 1 }
 0x107   : > { %v652_v34 = vpop.f32.mrf.mxu0  ;;  %v814_v35 = vpop.f32.mrf.mxu1 }
 0x108   : > { %v950_v37 = vrot.slane %v652_v34, 1  ;;  %v1004_v42 = vrot.slane %v814_v35, 1 }
 0x109   : > { %v654_v36 = vpop.f32.mrf.mxu0  ;;  %v816_v38 = vpop.f32.mrf.mxu1 }
 0x10a   : > { %v951_v40 = vrot.slane %v654_v36, 1  ;;  %v1005_v41 = vrot.slane %v816_v38, 1 }
 0x10b   : > { %v656_v43 = vpop.f32.mrf.mxu0  ;;  %v818_v44 = vpop.f32.mrf.mxu1 }
 0x10c   : > { %v952_v46 = vrot.slane %v656_v43, 1  ;;  %v1006_v47 = vrot.slane %v818_v44, 1  ;;  %v7454_v4 = vsel %vm1041_vm0, %v949_v39, %v951_v40  ;;  %v7458_v48 = vsel %vm1041_vm0, %v1003_v28, %v1005_v41  ;;  %v6659_v43 = vld [vmem:[%s9850_s1 + $0x194] ss:$8 sps:$4 sm:$0xff]  }
 0x10d   : > { %v660_v49 = vpop.f32.mrf.mxu0  ;;  %v822_v50 = vpop.f32.mrf.mxu1  ;;  %1293 = vmatmul.mubr.bf16.gmra.mxu1 %v7253_v6  ;;  %1711 = vmatmul.mubr.bf16.gmra.mxu0 %v7253_v6 }
 0x10e   : > { %v953_v51 = vrot.slane %v660_v49, 1  ;;  %v1007_v52 = vrot.slane %v822_v50, 1  ;;  %1298 = vmatprep.mubr.bf16.mxu1 %v9854_v2  ;;  %1718 = vmatprep.mubr.bf16.mxu0 %v9854_v2  ;;  %v7466_v53 = vsel %vm1041_vm0, %v950_v37, %v952_v46  ;;  %v7470_v54 = vsel %vm1041_vm0, %v1004_v42, %v1006_v47  ;;  %v6657_v42 = vld [vmem:[%s9850_s1 + $0x190] ss:$8 sps:$4 sm:$0xff]  }
 0x10f   : > { %v662_v55 = vpop.f32.mrf.mxu0  ;;  %v824_v56 = vpop.f32.mrf.mxu1  ;;  %2275 = vmatprep.subr.bf16.mxu1 %v6659_v43 }
 0x110   : > { %v954_v57 = vrot.slane %v662_v55, 1  ;;  %v1008_v58 = vrot.slane %v824_v56, 1  ;;  %v7474_v6 = vsel %vm1041_vm0, %v951_v40, %v953_v51  ;;  %v7478_v59 = vsel %vm1041_vm0, %v1005_v41, %v1007_v52  ;;  %v6660_v51 = vld [vmem:[%s9850_s1 + $0x210] ss:$8 sps:$4 sm:$0xff]   ;;  %v6662_v52 = vld [vmem:[%s9850_s1 + $0x214] ss:$8 sps:$4 sm:$0xff]   ;;  %2276 = vmatpush1.bf16.msra.mxu1 %v6657_v42 }
 0x111   : > { %v664_v60 = vpop.f32.mrf.mxu0  ;;  %v826_v61 = vpop.f32.mrf.mxu1  ;;  %2749 = vmatprep.subr.bf16.mxu0 %v6662_v52 }
 0x112   : > { %v7482_v62 = vsel %vm1041_vm0, %v952_v46, %v954_v57  ;;  %v7486_v63 = vsel %vm1041_vm0, %v1006_v47, %v1008_v58  ;;  %2750 = vmatpush1.bf16.msra.mxu0 %v6660_v51 }
 0x113   : > { %v665_v5 = vpop.f32.mrf.mxu0  ;;  %v827_v7 = vpop.f32.mrf.mxu1 }
 0x115   : > { %v668_v9 = vpop.f32.mrf.mxu0  ;;  %v830_v11 = vpop.f32.mrf.mxu1  ;;  %1299 = vmatmul.mubr.bf16.gmra.mxu1 %v7260_v8  ;;  %1719 = vmatmul.mubr.bf16.gmra.mxu0 %v7260_v8 }
 0x116   : > { %1308 = vmatprep.mubr.bf16.mxu1 %v9854_v2  ;;  %1728 = vmatprep.mubr.bf16.mxu0 %v9854_v2  ;;  %v955_v26 = vrot.slane %v668_v9, 1  ;;  %v1009_v27 = vrot.slane %v830_v11, 1 }
 0x117   : > { %v670_v18 = vpop.f32.mrf.mxu0  ;;  %v832_v20 = vpop.f32.mrf.mxu1 }
 0x118   : > { %v956_v17 = vrot.slane %v670_v18, 1  ;;  %v1010_v33 = vrot.slane %v832_v20, 1 }
 0x119   : > { %v672_v22 = vpop.f32.mrf.mxu0  ;;  %v834_v1 = vpop.f32.mrf.mxu1 }
 0x11a   : > { %v957_v31 = vrot.slane %v672_v22, 1  ;;  %v1011_v32 = vrot.slane %v834_v1, 1 }
 0x11b   : > { %v674_v34 = vpop.f32.mrf.mxu0  ;;  %v836_v35 = vpop.f32.mrf.mxu1 }
 0x11c   : > { %v958_v36 = vrot.slane %v674_v34, 1  ;;  %v1012_v38 = vrot.slane %v836_v35, 1  ;;  %v7494_v8 = vsel %vm1041_vm0, %v955_v26, %v957_v31  ;;  %v7498_v39 = vsel %vm1041_vm0, %v1009_v27, %v1011_v32 }
 0x11d   : > { %v678_v28 = vpop.f32.mrf.mxu0  ;;  %v840_v40 = vpop.f32.mrf.mxu1  ;;  %1309 = vmatmul.mubr.bf16.gmra.mxu1 %v7267_v10  ;;  %1729 = vmatmul.mubr.bf16.gmra.mxu0 %v7267_v10 }
 0x11e   : > { %v959_v41 = vrot.slane %v678_v28, 1  ;;  %v1013_v37 = vrot.slane %v840_v40, 1  ;;  %1314 = vmatprep.mubr.bf16.mxu1 %v9854_v2  ;;  %1736 = vmatprep.mubr.bf16.mxu0 %v9854_v2  ;;  %v7512_v44 = vsel %vm1041_vm0, %v956_v17, %v958_v36  ;;  %v7516_v10 = vsel %vm1041_vm0, %v1010_v33, %v1012_v38 }
 0x11f   : > { %9858 = vst [vmem:[#allocation5_spill] sm:$0xff] %v7516_v10  ;;  %v680_v46 = vpop.f32.mrf.mxu0  ;;  %v842_v47 = vpop.f32.mrf.mxu1  ;;  %v6772_v10 = vld [vmem:[%s7058_s28 + $0xc8] sm:$0xff]  }
 0x120   : > { %v960_v49 = vrot.slane %v680_v46, 1  ;;  %v1014_v50 = vrot.slane %v842_v47, 1  ;;  %v7526_v55 = vsel %vm1041_vm0, %v957_v31, %v959_v41  ;;  %v7530_v56 = vsel %vm1041_vm0, %v1011_v32, %v1013_v37 }
 0x121   : > { %9859 = vst [vmem:[#allocation6_spill] sm:$0xff] %v7530_v56  ;;  %v682_v57 = vpop.f32.mrf.mxu0  ;;  %v844_v58 = vpop.f32.mrf.mxu1 }
 0x122   : > { %v7534_v60 = vsel %vm1041_vm0, %v958_v36, %v960_v49  ;;  %v7538_v61 = vsel %vm1041_vm0, %v1012_v38, %v1014_v50 }
 0x123   : > { %9860 = vst [vmem:[#allocation7_spill] sm:$0xff] %v7538_v61  ;;  %v683_v5 = vpop.f32.mrf.mxu0  ;;  %v845_v7 = vpop.f32.mrf.mxu1 }
 0x125   : > { %v686_v9 = vpop.f32.mrf.mxu0  ;;  %v848_v11 = vpop.f32.mrf.mxu1  ;;  %1315 = vmatmul.mubr.bf16.gmra.mxu1 %v7274_v12  ;;  %1737 = vmatmul.mubr.bf16.gmra.mxu0 %v7274_v12 }
 0x126   : > { %1324 = vmatprep.mubr.bf16.mxu1 %v9854_v2  ;;  %1746 = vmatprep.mubr.bf16.mxu0 %v9854_v2  ;;  %v961_v26 = vrot.slane %v686_v9, 1  ;;  %v1015_v27 = vrot.slane %v848_v11, 1 }
 0x127   : > { %v688_v18 = vpop.f32.mrf.mxu0  ;;  %v850_v20 = vpop.f32.mrf.mxu1 }
 0x128   : > { %v962_v17 = vrot.slane %v688_v18, 1  ;;  %v1016_v33 = vrot.slane %v850_v20, 1 }
 0x129   : > { %v690_v22 = vpop.f32.mrf.mxu0  ;;  %v852_v1 = vpop.f32.mrf.mxu1 }
 0x12a   : > { %v963_v31 = vrot.slane %v690_v22, 1  ;;  %v1017_v32 = vrot.slane %v852_v1, 1 }
 0x12b   : > { %v692_v34 = vpop.f32.mrf.mxu0  ;;  %v854_v35 = vpop.f32.mrf.mxu1 }
 0x12c   : > { %v964_v36 = vrot.slane %v692_v34, 1  ;;  %v1018_v38 = vrot.slane %v854_v35, 1  ;;  %v7546_v12 = vsel %vm1041_vm0, %v961_v26, %v963_v31  ;;  %v7550_v28 = vsel %vm1041_vm0, %v1015_v27, %v1017_v32 }
 0x12d   : > { %9861 = vst [vmem:[#allocation8_spill] sm:$0xff] %v7550_v28  ;;  %v696_v40 = vpop.f32.mrf.mxu0  ;;  %v858_v41 = vpop.f32.mrf.mxu1  ;;  %1325 = vmatmul.mubr.bf16.gmra.mxu1 %v7281_v14  ;;  %1747 = vmatmul.mubr.bf16.gmra.mxu0 %v7281_v14 }
 0x12e   : > { %v965_v37 = vrot.slane %v696_v40, 1  ;;  %v1019_v42 = vrot.slane %v858_v41, 1  ;;  %1330 = vmatprep.mubr.bf16.mxu1 %v9854_v2  ;;  %1754 = vmatprep.mubr.bf16.mxu0 %v9854_v2  ;;  %v7558_v43 = vsel %vm1041_vm0, %v962_v17, %v964_v36  ;;  %v7562_v46 = vsel %vm1041_vm0, %v1016_v33, %v1018_v38 }
 0x12f   : > { %9862 = vst [vmem:[#allocation9_spill] sm:$0xff] %v7562_v46  ;;  %v698_v47 = vpop.f32.mrf.mxu0  ;;  %v860_v49 = vpop.f32.mrf.mxu1  ;;  %v6771_v46 = vld [vmem:[%s7058_s28 + $0xc0] sm:$0xff]  }
 0x130   : > { %v966_v50 = vrot.slane %v698_v47, 1  ;;  %v1020_v51 = vrot.slane %v860_v49, 1  ;;  %v7566_v14 = vsel %vm1041_vm0, %v963_v31, %v965_v37  ;;  %v7570_v52 = vsel %vm1041_vm0, %v1017_v32, %v1019_v42 }
 0x131   : > { %9863 = vst [vmem:[#allocation10_spill] sm:$0xff] %v7570_v52  ;;  %v700_v57 = vpop.f32.mrf.mxu0  ;;  %v862_v58 = vpop.f32.mrf.mxu1 }
 0x132   : > { %v7574_v5 = vsel %vm1041_vm0, %v964_v36, %v966_v50  ;;  %v7578_v7 = vsel %vm1041_vm0, %v1018_v38, %v1020_v51 }
 0x133   : > { %9864 = vst [vmem:[#allocation11_spill] sm:$0xff] %v7578_v7  ;;  %v701_v9 = vpop.f32.mrf.mxu0  ;;  %v863_v11 = vpop.f32.mrf.mxu1  ;;  %v6770_v7 = vld [vmem:[%s7058_s28 + $0xb8] sm:$0xff]  }
 0x135   : > { %v704_v18 = vpop.f32.mrf.mxu0  ;;  %v866_v20 = vpop.f32.mrf.mxu1  ;;  %1331 = vmatmul.mubr.bf16.gmra.mxu1 %v7288_v16  ;;  %1755 = vmatmul.mubr.bf16.gmra.mxu0 %v7288_v16 }
 0x136   : > { %1340 = vmatprep.mubr.bf16.mxu1 %v9854_v2  ;;  %1764 = vmatprep.mubr.bf16.mxu0 %v9854_v2  ;;  %v967_v31 = vrot.slane %v704_v18, 1  ;;  %v1021_v32 = vrot.slane %v866_v20, 1 }
 0x137   : > { %v706_v22 = vpop.f32.mrf.mxu0  ;;  %v868_v1 = vpop.f32.mrf.mxu1 }
 0x138   : > { %v968_v34 = vrot.slane %v706_v22, 1  ;;  %v1022_v35 = vrot.slane %v868_v1, 1 }
 0x139   : > { %v708_v26 = vpop.f32.mrf.mxu0  ;;  %v870_v27 = vpop.f32.mrf.mxu1 }
 0x13a   : > { %v969_v17 = vrot.slane %v708_v26, 1  ;;  %v1023_v33 = vrot.slane %v870_v27, 1  ;;  %v6663_v26 = vld [vmem:[%s9850_s1 + $0x180] ss:$8 sps:$4 sm:$0xff]   ;;  %v6665_v27 = vld [vmem:[%s9850_s1 + $0x184] ss:$8 sps:$4 sm:$0xff]  }
 0x13b   : > { %v710_v36 = vpop.f32.mrf.mxu0  ;;  %v872_v38 = vpop.f32.mrf.mxu1  ;;  %2277 = vmatprep.subr.bf16.mxu1 %v6665_v27 }
 0x13c   : > { %v970_v40 = vrot.slane %v710_v36, 1  ;;  %v1024_v41 = vrot.slane %v872_v38, 1  ;;  %v7586_v16 = vsel %vm1041_vm0, %v967_v31, %v969_v17  ;;  %v7590_v37 = vsel %vm1041_vm0, %v1021_v32, %v1023_v33  ;;  %2278 = vmatpush1.bf16.msra.mxu1 %v6663_v26 }
 0x13d   : > { %9865 = vst [vmem:[#allocation12_spill] sm:$0xff] %v7590_v37  ;;  %v714_v42 = vpop.f32.mrf.mxu0  ;;  %v876_v47 = vpop.f32.mrf.mxu1  ;;  %1341 = vmatmul.mubr.bf16.gmra.mxu1 %v7295_v19  ;;  %1765 = vmatmul.mubr.bf16.gmra.mxu0 %v7295_v19  ;;  %v6769_v37 = vld [vmem:[%s7058_s28 + $0xb0] sm:$0xff]  }
 0x13e   : > { %v971_v49 = vrot.slane %v714_v42, 1  ;;  %v1025_v50 = vrot.slane %v876_v47, 1  ;;  %1346 = vmatprep.mubr.bf16.mxu1 %v9854_v2  ;;  %1772 = vmatprep.mubr.bf16.mxu0 %v9854_v2  ;;  %v7598_v51 = vsel %vm1041_vm0, %v968_v34, %v970_v40  ;;  %v7602_v57 = vsel %vm1041_vm0, %v1022_v35, %v1024_v41  ;;  %v6668_v34 = vld [vmem:[%s9850_s1 + $0x204] ss:$8 sps:$4 sm:$0xff]   ;;  %v6666_v35 = vld [vmem:[%s9850_s1 + $0x200] ss:$8 sps:$4 sm:$0xff]  }
 0x13f   : > { %9866 = vst [vmem:[#allocation13_spill] sm:$0xff] %v7602_v57  ;;  %v716_v58 = vpop.f32.mrf.mxu0  ;;  %v878_v9 = vpop.f32.mrf.mxu1  ;;  %2751 = vmatprep.subr.bf16.mxu0 %v6668_v34 }
 0x140   : > { %v972_v11 = vrot.slane %v716_v58, 1  ;;  %v1026_v18 = vrot.slane %v878_v9, 1  ;;  %v7606_v19 = vsel %vm1041_vm0, %v969_v17, %v971_v49  ;;  %v7610_v20 = vsel %vm1041_vm0, %v1023_v33, %v1025_v50  ;;  %2752 = vmatpush1.bf16.msra.mxu0 %v6666_v35 }
 0x141   : > { %9867 = vst [vmem:[#allocation14_spill] sm:$0xff] %v7610_v20  ;;  %v718_v22 = vpop.f32.mrf.mxu0  ;;  %v880_v1 = vpop.f32.mrf.mxu1 }
 0x142   : > { %v7620_v31 = vsel %vm1041_vm0, %v970_v40, %v972_v11  ;;  %v7624_v32 = vsel %vm1041_vm0, %v1024_v41, %v1026_v18 }
 0x143   : > { %9868 = vst [vmem:[#allocation15_spill] sm:$0xff] %v7624_v32  ;;  %v719_v17 = vpop.f32.mrf.mxu0  ;;  %v881_v33 = vpop.f32.mrf.mxu1 }
 0x145   : > { %v722_v36 = vpop.f32.mrf.mxu0  ;;  %v884_v38 = vpop.f32.mrf.mxu1  ;;  %1347 = vmatmul.mubr.bf16.gmra.mxu1 %v7302_v21  ;;  %1773 = vmatmul.mubr.bf16.gmra.mxu0 %v7302_v21 }
 0x146   : > { %1356 = vmatprep.mubr.bf16.mxu1 %v9854_v2  ;;  %1782 = vmatprep.mubr.bf16.mxu0 %v9854_v2  ;;  %v973_v49 = vrot.slane %v722_v36, 1  ;;  %v1027_v50 = vrot.slane %v884_v38, 1 }
 0x147   : > { %v724_v40 = vpop.f32.mrf.mxu0  ;;  %v886_v41 = vpop.f32.mrf.mxu1 }
 0x148   : > { %v974_v11 = vrot.slane %v724_v40, 1  ;;  %v1028_v18 = vrot.slane %v886_v41, 1 }
 0x149   : > { %v726_v42 = vpop.f32.mrf.mxu0  ;;  %v888_v47 = vpop.f32.mrf.mxu1 }
 0x14a   : > { %v975_v58 = vrot.slane %v726_v42, 1  ;;  %v1029_v9 = vrot.slane %v888_v47, 1 }
 0x14b   : > { %v728_v22 = vpop.f32.mrf.mxu0  ;;  %v890_v1 = vpop.f32.mrf.mxu1 }
 0x14c   : > { %v976_v26 = vrot.slane %v728_v22, 1  ;;  %v1030_v21 = vrot.slane %v890_v1, 1  ;;  %v7638_v27 = vsel %vm1041_vm0, %v973_v49, %v975_v58  ;;  %v7642_v17 = vsel %vm1041_vm0, %v1027_v50, %v1029_v9 }
 0x14d   : > { %9869 = vst [vmem:[#allocation16_spill] sm:$0xff] %v7642_v17  ;;  %v732_v33 = vpop.f32.mrf.mxu0  ;;  %v894_v34 = vpop.f32.mrf.mxu1  ;;  %1357 = vmatmul.mubr.bf16.gmra.mxu1 %v7309_v23  ;;  %1783 = vmatmul.mubr.bf16.gmra.mxu0 %v7309_v23 }
 0x14e   : > { %v977_v35 = vrot.slane %v732_v33, 1  ;;  %v1031_v36 = vrot.slane %v894_v34, 1  ;;  %1362 = vmatprep.mubr.bf16.mxu1 %v9854_v2  ;;  %1790 = vmatprep.mubr.bf16.mxu0 %v9854_v2  ;;  %v7650_v38 = vsel %vm1041_vm0, %v974_v11, %v976_v26  ;;  %v7654_v40 = vsel %vm1041_vm0, %v1028_v18, %v1030_v21 }
 0x14f   : > { %9870 = vst [vmem:[#allocation17_spill] sm:$0xff] %v7654_v40  ;;  %v734_v41 = vpop.f32.mrf.mxu0  ;;  %v896_v42 = vpop.f32.mrf.mxu1 }
 0x150   : > { %v978_v47 = vrot.slane %v734_v41, 1  ;;  %v1032_v49 = vrot.slane %v896_v42, 1  ;;  %v7658_v23 = vsel %vm1041_vm0, %v975_v58, %v977_v35  ;;  %v7662_v50 = vsel %vm1041_vm0, %v1029_v9, %v1031_v36  ;;  %v6765_v58 = vld [vmem:[%s7058_s28 + $0x90] sm:$0xff]  }
 0x151   : > { %9871 = vst [vmem:[#allocation18_spill] sm:$0xff] %v7662_v50  ;;  %v736_v22 = vpop.f32.mrf.mxu0  ;;  %v898_v11 = vpop.f32.mrf.mxu1 }
 0x152   : > { %v7666_v1 = vsel %vm1041_vm0, %v976_v26, %v978_v47  ;;  %v7670_v18 = vsel %vm1041_vm0, %v1030_v21, %v1032_v49 }
 0x153   : > { %9872 = vst [vmem:[#allocation19_spill] sm:$0xff] %v7670_v18  ;;  %v737_v33 = vpop.f32.mrf.mxu0  ;;  %v899_v34 = vpop.f32.mrf.mxu1 }
 0x155   : > { %v740_v41 = vpop.f32.mrf.mxu0  ;;  %v902_v42 = vpop.f32.mrf.mxu1  ;;  %1363 = vmatmul.mubr.bf16.gmra.mxu1 %v6765_v58  ;;  %1791 = vmatmul.mubr.bf16.gmra.mxu0 %v6765_v58 }
 0x156   : > { %1372 = vmatprep.mubr.bf16.mxu1 %v9854_v2  ;;  %1800 = vmatprep.mubr.bf16.mxu0 %v9854_v2  ;;  %v979_v47 = vrot.slane %v740_v41, 1  ;;  %v1033_v22 = vrot.slane %v902_v42, 1  ;;  %v6766_v41 = vld [vmem:[%s7058_s28 + $0x98] sm:$0xff]  }
 0x157   : > { %v742_v9 = vpop.f32.mrf.mxu0  ;;  %v904_v35 = vpop.f32.mrf.mxu1 }
 0x158   : > { %v980_v11 = vrot.slane %v742_v9, 1  ;;  %v1034_v33 = vrot.slane %v904_v35, 1  ;;  %v9874_v35 = vmov 0  }
 0x159   : > { %v744_v36 = vpop.f32.mrf.mxu0  ;;  %v906_v26 = vpop.f32.mrf.mxu1 }
 0x15a   : > { %v981_v21 = vrot.slane %v744_v36, 1  ;;  %v1035_v49 = vrot.slane %v906_v26, 1 }
 0x15b   : > { %v746_v34 = vpop.f32.mrf.mxu0  ;;  %v908_v18 = vpop.f32.mrf.mxu1 }
 0x15c   : > { %v982_v50 = vrot.slane %v746_v34, 1  ;;  %v1036_v40 = vrot.slane %v908_v18, 1  ;;  %v7677_v58 = vsel %vm1041_vm0, %v979_v47, %v981_v21  ;;  %v7681_v2 = vsel %vm1041_vm0, %v1033_v22, %v1035_v49 }
 0x15d   : > { %9873 = vst [vmem:[#allocation20_spill] sm:$0xff] %v7681_v2  ;;  %v750_v17 = vpop.f32.mrf.mxu0  ;;  %v912_v32 = vpop.f32.mrf.mxu1  ;;  %1373 = vmatmul.mubr.bf16.gmra.mxu1 %v6766_v41  ;;  %1801 = vmatmul.mubr.bf16.gmra.mxu0 %v6766_v41 }
 0x15e   : > { %v983_v42 = vrot.slane %v750_v17, 1  ;;  %v1037_v9 = vrot.slane %v912_v32, 1  ;;  %1378 = vmatprep.mubr.bf16.mxu1 %v9874_v35  ;;  %1808 = vmatprep.mubr.bf16.mxu0 %v9874_v35  ;;  %v7688_v18 = vsel %vm1041_vm0, %v980_v11, %v982_v50  ;;  %v7692_v36 = vsel %vm1041_vm0, %v1034_v33, %v1036_v40 }
 0x15f   : > { %9875 = vst [vmem:[#allocation21_spill] sm:$0xff] %v7692_v36  ;;  %v752_v26 = vpop.f32.mrf.mxu0  ;;  %v914_v47 = vpop.f32.mrf.mxu1 }
 0x160   : > { %v984_v22 = vrot.slane %v752_v26, 1  ;;  %v1038_v34 = vrot.slane %v914_v47, 1  ;;  %v7696_v32 = vsel %vm1041_vm0, %v981_v21, %v983_v42  ;;  %v7700_v17 = vsel %vm1041_vm0, %v1035_v49, %v1037_v9  ;;  %v6767_v21 = vld [vmem:[%s7058_s28 + $0xa0] sm:$0xff]  }
 0x161   : > { %9876 = vst [vmem:[#allocation22_spill] sm:$0xff] %v7700_v17  ;;  %v754_v41 = vpop.f32.mrf.mxu0  ;;  %v916_v11 = vpop.f32.mrf.mxu1 }
 0x162   : > { %v7704_v2 = vsel %vm1041_vm0, %v982_v50, %v984_v22  ;;  %v7708_v33 = vsel %vm1041_vm0, %v1036_v40, %v1038_v34  ;;  %v6671_v50 = vld [vmem:[%s9850_s1 + $0x2f4] ss:$8 sps:$4 sm:$0xff]  }
 0x163   : > { %9877 = vst [vmem:[#allocation23_spill] sm:$0xff] %v7708_v33  ;;  %v755_v26 = vpop.f32.mrf.mxu0  ;;  %v917_v47 = vpop.f32.mrf.mxu1  ;;  %3403 = vmatprep.subr.bf16.mxu1 %v6671_v50  ;;  %v6674_v40 = vld [vmem:[%s9850_s1 + $0x374] ss:$8 sps:$4 sm:$0xff]   ;;  %v6768_v50 = vld [vmem:[%s7058_s28 + $0xa8] sm:$0xff]  }
 0x164   : > { %4069 = vmatprep.subr.bf16.mxu0 %v6674_v40 }
 0x165   : > { %v758_v36 = vpop.f32.mrf.mxu0  ;;  %v920_v20 = vpop.f32.mrf.mxu1  ;;  %1379 = vmatmul.mubr.bf16.gmra.mxu1 %v6767_v21  ;;  %1809 = vmatmul.mubr.bf16.gmra.mxu0 %v6767_v21 }
 0x166   : > { %1388 = vmatprep.mubr.bf16.mxu1 %v9874_v35  ;;  %1818 = vmatprep.mubr.bf16.mxu0 %v9874_v35  ;;  %v985_v22 = vrot.slane %v758_v36, 1 }
 0x167   : > { %v760_v49 = vpop.f32.mrf.mxu0  ;;  %v921_v42 = vpop.f32.mrf.mxu1 }
 0x168   : > { %v986_v26 = vrot.slane %v760_v49, 1 }
 0x169   : > { %v762_v20 = vpop.f32.mrf.mxu0  ;;  %v922_v9 = vpop.f32.mrf.mxu1 }
 0x16a   : > { %v987_v34 = vrot.slane %v762_v20, 1 }
 0x16b   : > { %v764_v41 = vpop.f32.mrf.mxu0  ;;  %v923_v11 = vpop.f32.mrf.mxu1 }
 0x16c   : > { %v988_v47 = vrot.slane %v764_v41, 1  ;;  %v7721_v21 = vsel %vm1041_vm0, %v985_v22, %v987_v34 }
 0x16d   : > { %v768_v33 = vpop.f32.mrf.mxu0  ;;  %v926_v42 = vpop.f32.mrf.mxu1  ;;  %1389 = vmatmul.mubr.bf16.gmra.mxu1 %v6768_v50  ;;  %1819 = vmatmul.mubr.bf16.gmra.mxu0 %v6768_v50 }
 0x16e   : > { %v989_v17 = vrot.slane %v768_v33, 1  ;;  %1394 = vmatprep.mubr.bf16.mxu1 %v9874_v35  ;;  %1826 = vmatprep.mubr.bf16.mxu0 %v9874_v35  ;;  %v7728_v36 = vsel %vm1041_vm0, %v986_v26, %v988_v47 }
 0x16f   : > { %v770_v49 = vpop.f32.mrf.mxu0  ;;  %v927_v40 = vpop.f32.mrf.mxu1 }
 0x170   : > { %v990_v20 = vrot.slane %v770_v49, 1  ;;  %v7732_v9 = vsel %vm1041_vm0, %v987_v34, %v989_v17 }
 0x171   : > { %v772_v22 = vpop.f32.mrf.mxu0  ;;  %v928_v41 = vpop.f32.mrf.mxu1 }
 0x172   : > { %v7736_v33 = vsel %vm1041_vm0, %v988_v47, %v990_v20 }
 0x173   : > { %v773_v11 = vpop.f32.mrf.mxu0  ;;  %v929_v42 = vpop.f32.mrf.mxu1 }
 0x175   : > { %v776_v50 = vpop.f32.mrf.mxu0  ;;  %v932_v57 = vpop.f32.mrf.mxu1  ;;  %1395 = vmatmul.mubr.bf16.gmra.mxu1 %v6769_v37  ;;  %1827 = vmatmul.mubr.bf16.gmra.mxu0 %v6769_v37 }
 0x176   : > { %1404 = vmatprep.mubr.bf16.mxu1 %v9874_v35  ;;  %1836 = vmatprep.mubr.bf16.mxu0 %v9874_v35  ;;  %v991_v40 = vrot.slane %v776_v50, 1 }
 0x177   : > { %v778_v17 = vpop.f32.mrf.mxu0  ;;  %v933_v34 = vpop.f32.mrf.mxu1 }
 0x178   : > { %v992_v41 = vrot.slane %v778_v17, 1 }
 0x179   : > { %v780_v26 = vpop.f32.mrf.mxu0  ;;  %v934_v49 = vpop.f32.mrf.mxu1 }
 0x17a   : > { %v993_v22 = vrot.slane %v780_v26, 1 }
 0x17b   : > { %v782_v47 = vpop.f32.mrf.mxu0  ;;  %v935_v20 = vpop.f32.mrf.mxu1 }
 0x17c   : > { %v994_v11 = vrot.slane %v782_v47, 1  ;;  %v7743_v57 = vsel %vm1041_vm0, %v991_v40, %v993_v22 }
 0x17d   : > { %v786_v37 = vpop.f32.mrf.mxu0  ;;  %v938_v42 = vpop.f32.mrf.mxu1  ;;  %1405 = vmatmul.mubr.bf16.gmra.mxu1 %v6770_v7  ;;  %1837 = vmatmul.mubr.bf16.gmra.mxu0 %v6770_v7 }
 0x17e   : > { %v995_v52 = vrot.slane %v786_v37, 1  ;;  %1410 = vmatprep.mubr.bf16.mxu1 %v9874_v35  ;;  %1844 = vmatprep.mubr.bf16.mxu0 %v9874_v35  ;;  %v7750_v50 = vsel %vm1041_vm0, %v992_v41, %v994_v11 }
 0x17f   : > { %v788_v17 = vpop.f32.mrf.mxu0  ;;  %v939_v34 = vpop.f32.mrf.mxu1 }
 0x180   : > { %v996_v26 = vrot.slane %v788_v17, 1  ;;  %v7754_v49 = vsel %vm1041_vm0, %v993_v22, %v995_v52 }
 0x181   : > { %v790_v40 = vpop.f32.mrf.mxu0  ;;  %v940_v47 = vpop.f32.mrf.mxu1 }
 0x182   : > { %v7758_v7 = vsel %vm1041_vm0, %v994_v11, %v996_v26 }
 0x183   : > { %v791_v20 = vpop.f32.mrf.mxu0  ;;  %v941_v37 = vpop.f32.mrf.mxu1 }
 0x185   : > { %v1220_v42 = vpop.f32.mrf.mxu1  ;;  %1411 = vmatmul.mubr.bf16.gmra.mxu1 %v6771_v46  ;;  %v1630_v41 = vpop.f32.mrf.mxu0  ;;  %1845 = vmatmul.mubr.bf16.gmra.mxu0 %v6771_v46 }
 0x186   : > { %v1221_v34 = vadd.f32 %v1220_v42, %v7414_v0  ;;  %1420 = vmatprep.mubr.bf16.mxu1 %v9874_v35  ;;  %1854 = vmatprep.mubr.bf16.mxu0 %v9874_v35  ;;  %v1941_v40 = vrot.slane %v1630_v41, 2 }
 0x187   : > { %v1222_v52 = vpop.f32.mrf.mxu1  ;;  %v1632_v22 = vpop.f32.mrf.mxu0 }
 0x188   : > { %v1223_v17 = vadd.f32 %v1222_v52, %v7426_v13  ;;  %v1942_v0 = vrot.slane %v1632_v22, 2 }
 0x189   : > { %v1224_v11 = vpop.f32.mrf.mxu1  ;;  %v1634_v26 = vpop.f32.mrf.mxu0 }
 0x18a   : > { %v1225_v47 = vadd.f32 %v1224_v11, %v7434_v24  ;;  %v1943_v20 = vrot.slane %v1634_v26, 2 }
 0x18b   : > { %v1226_v46 = vpop.f32.mrf.mxu1  ;;  %v1636_v37 = vpop.f32.mrf.mxu0 }
 0x18c   : > { %v1227_v42 = vadd.f32 %v1226_v46, %v7442_v29  ;;  %v1944_v28 = vrot.slane %v1636_v37, 2  ;;  %v2100_v61 = vsel %vm2037_vm1, %v1941_v40, %v1943_v20 }
 0x18d   : > { %v1230_v56 = vpop.f32.mrf.mxu1  ;;  %1421 = vmatmul.mubr.bf16.gmra.mxu1 %v6772_v10  ;;  %v1640_v13 = vpop.f32.mrf.mxu0  ;;  %1855 = vmatmul.mubr.bf16.gmra.mxu0 %v6772_v10  ;;  %v7771_v52 = vadd.f32 %v2100_v61, %v1221_v34 }
 0x18e   : > { %v1945_v41 = vrot.slane %v1640_v13, 2  ;;  %1426 = vmatprep.mubr.bf16.mxu1 %v9874_v35  ;;  %1862 = vmatprep.mubr.bf16.mxu0 %v9874_v35  ;;  %v2101_v24 = vsel %vm2037_vm1, %v1942_v0, %v1944_v28 }
 0x18f   : > { %v1231_v29 = vpop.f32.mrf.mxu1  ;;  %v1642_v22 = vpop.f32.mrf.mxu0  ;;  %v7777_v11 = vadd.f32 %v2101_v24, %v1223_v17 }
 0x190   : > { %v1946_v56 = vrot.slane %v1642_v22, 2  ;;  %v2098_v26 = vsel %vm2037_vm1, %v1943_v20, %v1945_v41  ;;  %v6773_v29 = vld [vmem:[%s7058_s28 + $0xd0] sm:$0xff]  }
 0x191   : > { %v1232_v10 = vpop.f32.mrf.mxu1  ;;  %v1644_v61 = vpop.f32.mrf.mxu0  ;;  %v7781_v34 = vadd.f32 %v2098_v26, %v1225_v47 }
 0x192   : > { %v2099_v40 = vsel %vm2037_vm1, %v1944_v28, %v1946_v56 }
 0x193   : > { %v1233_v46 = vpop.f32.mrf.mxu1  ;;  %v1645_v37 = vpop.f32.mrf.mxu0  ;;  %v7785_v13 = vadd.f32 %v2099_v40, %v1227_v42 }
 0x195   : > { %9878 = vst [vmem:[#allocation24_spill] sm:$0xff] %v7785_v13  ;;  %v1236_v0 = vpop.f32.mrf.mxu1  ;;  %1427 = vmatmul.mubr.bf16.gmra.mxu1 %v6773_v29  ;;  %v1648_v17 = vpop.f32.mrf.mxu0  ;;  %1863 = vmatmul.mubr.bf16.gmra.mxu0 %v6773_v29  ;;  %v6774_v29 = vld [vmem:[%s7058_s28 + $0xd8] sm:$0xff]  }
 0x196   : > { %v1237_v24 = vadd.f32 %v1236_v0, %v7454_v4  ;;  %1436 = vmatprep.mubr.bf16.mxu1 %v9874_v35  ;;  %1872 = vmatprep.mubr.bf16.mxu0 %v9874_v35  ;;  %v1947_v42 = vrot.slane %v1648_v17, 2 }
 0x197   : > { %v1238_v47 = vpop.f32.mrf.mxu1  ;;  %v1650_v20 = vpop.f32.mrf.mxu0 }
 0x198   : > { %v1239_v28 = vadd.f32 %v1238_v47, %v7466_v53  ;;  %v1948_v40 = vrot.slane %v1650_v20, 2 }
 0x199   : > { %v1240_v41 = vpop.f32.mrf.mxu1  ;;  %v1652_v22 = vpop.f32.mrf.mxu0 }
 0x19a   : > { %v1241_v56 = vadd.f32 %v1240_v41, %v7474_v6  ;;  %v1949_v26 = vrot.slane %v1652_v22, 2 }
 0x19b   : > { %v1242_v10 = vpop.f32.mrf.mxu1  ;;  %v1654_v61 = vpop.f32.mrf.mxu0 }
 0x19c   : > { %v1243_v4 = vadd.f32 %v1242_v10, %v7482_v62  ;;  %v1950_v46 = vrot.slane %v1654_v61, 2  ;;  %v2096_v37 = vsel %vm2037_vm1, %v1947_v42, %v1949_v26 }
 0x19d   : > { %v1246_v0 = vpop.f32.mrf.mxu1  ;;  %1437 = vmatmul.mubr.bf16.gmra.mxu1 %v6774_v29  ;;  %v1658_v13 = vpop.f32.mrf.mxu0  ;;  %1873 = vmatmul.mubr.bf16.gmra.mxu0 %v6774_v29  ;;  %v7797_v53 = vadd.f32 %v2096_v37, %v1237_v24  ;;  %v6775_v29 = vld [vmem:[%s7058_s28 + $0xe0] sm:$0xff]  }
 0x19e   : > { %v1951_v17 = vrot.slane %v1658_v13, 2  ;;  %1442 = vmatprep.mubr.bf16.mxu1 %v9874_v35  ;;  %1880 = vmatprep.mubr.bf16.mxu0 %v9874_v35  ;;  %v2097_v6 = vsel %vm2037_vm1, %v1948_v40, %v1950_v46 }
 0x19f   : > { %v1247_v62 = vpop.f32.mrf.mxu1  ;;  %v1660_v47 = vpop.f32.mrf.mxu0  ;;  %v7803_v20 = vadd.f32 %v2097_v6, %v1239_v28 }
 0x1a0   : > { %v1952_v41 = vrot.slane %v1660_v47, 2  ;;  %v2094_v22 = vsel %vm2037_vm1, %v1949_v26, %v1951_v17 }
 0x1a1   : > { %v1248_v42 = vpop.f32.mrf.mxu1  ;;  %v1662_v24 = vpop.f32.mrf.mxu0  ;;  %v7807_v10 = vadd.f32 %v2094_v22, %v1241_v56 }
 0x1a2   : > { %v2095_v13 = vsel %vm2037_vm1, %v1950_v46, %v1952_v41 }
 0x1a3   : > { %v1249_v61 = vpop.f32.mrf.mxu1  ;;  %v1663_v37 = vpop.f32.mrf.mxu0  ;;  %v7811_v0 = vadd.f32 %v2095_v13, %v1243_v4 }
 0x1a5   : > { %v1252_v40 = vpop.f32.mrf.mxu1  ;;  %1443 = vmatmul.mubr.bf16.gmra.mxu1 %v6775_v29  ;;  %v1666_v28 = vpop.f32.mrf.mxu0  ;;  %1881 = vmatmul.mubr.bf16.gmra.mxu0 %v6775_v29 }
 0x1a6   : > { %v1253_v6 = vadd.f32 %v1252_v40, %v7494_v8  ;;  %1452 = vmatprep.mubr.bf16.mxu1 %v9874_v35  ;;  %1890 = vmatprep.mubr.bf16.mxu0 %v9874_v35  ;;  %v1953_v4 = vrot.slane %v1666_v28, 2  ;;  %v6776_v40 = vld [vmem:[%s7058_s28 + $0xe8] sm:$0xff]  }
 0x1a7   : > { %v1254_v56 = vpop.f32.mrf.mxu1  ;;  %v1668_v26 = vpop.f32.mrf.mxu0 }
 0x1a8   : > { %v1255_v46 = vadd.f32 %v1254_v56, %v7512_v44  ;;  %v1954_v24 = vrot.slane %v1668_v26, 2 }
 0x1a9   : > { %v1256_v17 = vpop.f32.mrf.mxu1  ;;  %v1670_v62 = vpop.f32.mrf.mxu0 }
 0x1aa   : > { %v1257_v47 = vadd.f32 %v1256_v17, %v7526_v55  ;;  %v1955_v41 = vrot.slane %v1670_v62, 2 }
 0x1ab   : > { %v1258_v22 = vpop.f32.mrf.mxu1  ;;  %v1672_v42 = vpop.f32.mrf.mxu0 }
 0x1ac   : > { %v1259_v8 = vadd.f32 %v1258_v22, %v7534_v60  ;;  %v1956_v13 = vrot.slane %v1672_v42, 2  ;;  %v2092_v61 = vsel %vm2037_vm1, %v1953_v4, %v1955_v41 }
 0x1ad   : > { %v1262_v37 = vpop.f32.mrf.mxu1  ;;  %1453 = vmatmul.mubr.bf16.gmra.mxu1 %v6776_v40  ;;  %v1676_v29 = vpop.f32.mrf.mxu0  ;;  %1891 = vmatmul.mubr.bf16.gmra.mxu0 %v6776_v40  ;;  %v7823_v44 = vadd.f32 %v2092_v61, %v1253_v6 }
 0x1ae   : > { %v1957_v28 = vrot.slane %v1676_v29, 2  ;;  %1458 = vmatprep.mubr.bf16.mxu1 %v9874_v35  ;;  %1898 = vmatprep.mubr.bf16.mxu0 %v9874_v35  ;;  %v2093_v55 = vsel %vm2037_vm1, %v1954_v24, %v1956_v13  ;;  %v6777_v29 = vld [vmem:[%s7058_s28 + $0xf0] sm:$0xff]  }
 0x1af   : > { %v1263_v60 = vpop.f32.mrf.mxu1  ;;  %v1678_v56 = vpop.f32.mrf.mxu0  ;;  %v7829_v26 = vadd.f32 %v2093_v55, %v1255_v46 }
 0x1b0   : > { %v1958_v17 = vrot.slane %v1678_v56, 2  ;;  %v2090_v62 = vsel %vm2037_vm1, %v1955_v41, %v1957_v28 }
 0x1b1   : > { %v1264_v4 = vpop.f32.mrf.mxu1  ;;  %v1680_v6 = vpop.f32.mrf.mxu0  ;;  %v7833_v22 = vadd.f32 %v2090_v62, %v1257_v47 }
 0x1b2   : > { %v2091_v42 = vsel %vm2037_vm1, %v1956_v13, %v1958_v17 }
 0x1b3   : > { %v1265_v61 = vpop.f32.mrf.mxu1  ;;  %v1681_v37 = vpop.f32.mrf.mxu0  ;;  %v7837_v40 = vadd.f32 %v2091_v42, %v1259_v8 }
 0x1b5   : > { %v1268_v24 = vpop.f32.mrf.mxu1  ;;  %1459 = vmatmul.mubr.bf16.gmra.mxu1 %v6777_v29  ;;  %v1684_v46 = vpop.f32.mrf.mxu0  ;;  %1899 = vmatmul.mubr.bf16.gmra.mxu0 %v6777_v29 }
 0x1b6   : > { %v1269_v55 = vadd.f32 %v1268_v24, %v7546_v12  ;;  %1468 = vmatprep.mubr.bf16.mxu1 %v9874_v35  ;;  %1908 = vmatprep.mubr.bf16.mxu0 %v9874_v35  ;;  %v1959_v8 = vrot.slane %v1684_v46, 2  ;;  %v6778_v24 = vld [vmem:[%s7058_s28 + $0xf8] sm:$0xff]  }
 0x1b7   : > { %v1270_v47 = vpop.f32.mrf.mxu1  ;;  %v1686_v41 = vpop.f32.mrf.mxu0 }
 0x1b8   : > { %v1271_v13 = vadd.f32 %v1270_v47, %v7558_v43  ;;  %v1960_v6 = vrot.slane %v1686_v41, 2 }
 0x1b9   : > { %v1272_v28 = vpop.f32.mrf.mxu1  ;;  %v1688_v60 = vpop.f32.mrf.mxu0 }
 0x1ba   : > { %v1273_v56 = vadd.f32 %v1272_v28, %v7566_v14  ;;  %v1961_v17 = vrot.slane %v1688_v60, 2 }
 0x1bb   : > { %v1274_v62 = vpop.f32.mrf.mxu1  ;;  %v1690_v4 = vpop.f32.mrf.mxu0 }
 0x1bc   : > { %v1275_v12 = vadd.f32 %v1274_v62, %v7574_v5  ;;  %v1962_v42 = vrot.slane %v1690_v4, 2  ;;  %v2088_v61 = vsel %vm2037_vm1, %v1959_v8, %v1961_v17 }
 0x1bd   : > { %v1278_v37 = vpop.f32.mrf.mxu1  ;;  %1469 = vmatmul.mubr.bf16.gmra.mxu1 %v6778_v24  ;;  %v1694_v29 = vpop.f32.mrf.mxu0  ;;  %1909 = vmatmul.mubr.bf16.gmra.mxu0 %v6778_v24  ;;  %v7849_v43 = vadd.f32 %v2088_v61, %v1269_v55 }
 0x1be   : > { %v1963_v46 = vrot.slane %v1694_v29, 2  ;;  %1474 = vmatprep.mubr.bf16.mxu1 %v9874_v35  ;;  %1916 = vmatprep.mubr.bf16.mxu0 %v9874_v35  ;;  %v2089_v14 = vsel %vm2037_vm1, %v1960_v6, %v1962_v42  ;;  %v6779_v29 = vld [vmem:[%s7058_s28 + $0x100] sm:$0xff]  }
 0x1bf   : > { %v1279_v5 = vpop.f32.mrf.mxu1  ;;  %v1696_v47 = vpop.f32.mrf.mxu0  ;;  %v7855_v41 = vadd.f32 %v2089_v14, %v1271_v13 }
 0x1c0   : > { %v1964_v28 = vrot.slane %v1696_v47, 2  ;;  %v2086_v60 = vsel %vm2037_vm1, %v1961_v17, %v1963_v46 }
 0x1c1   : > { %v1280_v8 = vpop.f32.mrf.mxu1  ;;  %v1698_v55 = vpop.f32.mrf.mxu0  ;;  %v7859_v62 = vadd.f32 %v2086_v60, %v1273_v56 }
 0x1c2   : > { %v2087_v4 = vsel %vm2037_vm1, %v1962_v42, %v1964_v28 }
 0x1c3   : > { %v1281_v61 = vpop.f32.mrf.mxu1  ;;  %v1699_v37 = vpop.f32.mrf.mxu0  ;;  %v7863_v24 = vadd.f32 %v2087_v4, %v1275_v12 }
 0x1c5   : > { %v1284_v6 = vpop.f32.mrf.mxu1  ;;  %1475 = vmatmul.mubr.bf16.gmra.mxu1 %v6779_v29  ;;  %v1702_v13 = vpop.f32.mrf.mxu0  ;;  %1917 = vmatmul.mubr.bf16.gmra.mxu0 %v6779_v29 }
 0x1c6   : > { %v1285_v14 = vadd.f32 %v1284_v6, %v7586_v16  ;;  %1480 = vmatprep.mubr.bf16.mxu1 %v9874_v35  ;;  %1922 = vmatprep.mubr.bf16.mxu0 %v9874_v35  ;;  %v1965_v12 = vrot.slane %v1702_v13, 2  ;;  %v6780_v6 = vld [vmem:[%s7058_s28 + $0x108] sm:$0xff]  }
 0x1c7   : > { %v1286_v56 = vpop.f32.mrf.mxu1  ;;  %v1704_v17 = vpop.f32.mrf.mxu0 }
 0x1c8   : > { %v1287_v42 = vadd.f32 %v1286_v56, %v7598_v51  ;;  %v1966_v55 = vrot.slane %v1704_v17, 2 }
 0x1c9   : > { %v1288_v46 = vpop.f32.mrf.mxu1  ;;  %v1706_v5 = vpop.f32.mrf.mxu0 }
 0x1ca   : > { %v1289_v47 = vadd.f32 %v1288_v46, %v7606_v19  ;;  %v1967_v28 = vrot.slane %v1706_v5, 2 }
 0x1cb   : > { %v1290_v60 = vpop.f32.mrf.mxu1  ;;  %v1708_v8 = vpop.f32.mrf.mxu0 }
 0x1cc   : > { %v1291_v16 = vadd.f32 %v1290_v60, %v7620_v31  ;;  %v1968_v4 = vrot.slane %v1708_v8, 2  ;;  %v2084_v61 = vsel %vm2037_vm1, %v1965_v12, %v1967_v28 }
 0x1cd   : > { %v1294_v37 = vpop.f32.mrf.mxu1  ;;  %1481 = vmatmul.mubr.bf16.gmra.mxu1 %v6780_v6  ;;  %v1712_v29 = vpop.f32.mrf.mxu0  ;;  %1923 = vmatmul.mubr.bf16.gmra.mxu0 %v6780_v6  ;;  %v7875_v51 = vadd.f32 %v2084_v61, %v1285_v14 }
 0x1ce   : > { %v1969_v13 = vrot.slane %v1712_v29, 2  ;;  %1486 = vmatprep.mubr.bf16.mxu1 %v9874_v35  ;;  %1928 = vmatprep.mubr.bf16.mxu0 %v9874_v35  ;;  %v2085_v19 = vsel %vm2037_vm1, %v1966_v55, %v1968_v4  ;;  %v6781_v29 = vld [vmem:[%s7058_s28 + $0x110] sm:$0xff]  }
 0x1cf   : > { %v1295_v31 = vpop.f32.mrf.mxu1  ;;  %v1714_v56 = vpop.f32.mrf.mxu0  ;;  %v7881_v17 = vadd.f32 %v2085_v19, %v1287_v42 }
 0x1d0   : > { %v1970_v46 = vrot.slane %v1714_v56, 2  ;;  %v2082_v5 = vsel %vm2037_vm1, %v1967_v28, %v1969_v13 }
 0x1d1   : > { %v1296_v12 = vpop.f32.mrf.mxu1  ;;  %v1716_v14 = vpop.f32.mrf.mxu0  ;;  %v7885_v60 = vadd.f32 %v2082_v5, %v1289_v47 }
 0x1d2   : > { %v2083_v8 = vsel %vm2037_vm1, %v1968_v4, %v1970_v46 }
 0x1d3   : > { %v1297_v61 = vpop.f32.mrf.mxu1  ;;  %v1717_v37 = vpop.f32.mrf.mxu0  ;;  %v7889_v6 = vadd.f32 %v2083_v8, %v1291_v16 }
 0x1d5   : > { %v1300_v55 = vpop.f32.mrf.mxu1  ;;  %1487 = vmatmul.mubr.bf16.gmra.mxu1 %v6781_v29  ;;  %v1720_v42 = vpop.f32.mrf.mxu0  ;;  %1929 = vmatmul.mubr.bf16.gmra.mxu0 %v6781_v29 }
 0x1d6   : > { %v1301_v19 = vadd.f32 %v1300_v55, %v7638_v27  ;;  %1492 = vmatprep.mubr.bf16.mxu1 %v9874_v35  ;;  %1934 = vmatprep.mubr.bf16.mxu0 %v9874_v35  ;;  %v1971_v16 = vrot.slane %v1720_v42, 2  ;;  %v6782_v55 = vld [vmem:[%s7058_s28 + $0x118] sm:$0xff]  }
 0x1d7   : > { %v1302_v47 = vpop.f32.mrf.mxu1  ;;  %v1722_v28 = vpop.f32.mrf.mxu0 }
 0x1d8   : > { %v1303_v4 = vadd.f32 %v1302_v47, %v7650_v38  ;;  %v1972_v14 = vrot.slane %v1722_v28, 2 }
 0x1d9   : > { %v1304_v13 = vpop.f32.mrf.mxu1  ;;  %v1724_v31 = vpop.f32.mrf.mxu0 }
 0x1da   : > { %v1305_v56 = vadd.f32 %v1304_v13, %v7658_v23  ;;  %v1973_v46 = vrot.slane %v1724_v31, 2 }
 0x1db   : > { %v1306_v5 = vpop.f32.mrf.mxu1  ;;  %v1726_v12 = vpop.f32.mrf.mxu0 }
 0x1dc   : > { %v1307_v27 = vadd.f32 %v1306_v5, %v7666_v1  ;;  %v1974_v8 = vrot.slane %v1726_v12, 2  ;;  %v2080_v61 = vsel %vm2037_vm1, %v1971_v16, %v1973_v46  ;;  %v6669_v12 = vld [vmem:[%s9850_s1 + $0x2f0] ss:$8 sps:$4 sm:$0xff]  }
 0x1dd   : > { %v1310_v37 = vpop.f32.mrf.mxu1  ;;  %1493 = vmatmul.mubr.bf16.gmra.mxu1 %v6782_v55  ;;  %v1730_v29 = vpop.f32.mrf.mxu0  ;;  %1935 = vmatmul.mubr.bf16.gmra.mxu0 %v6782_v55  ;;  %v7901_v38 = vadd.f32 %v2080_v61, %v1301_v19 }
 0x1de   : > { %v1975_v42 = vrot.slane %v1730_v29, 2  ;;  %2295 = vmatprep.mubr.bf16.mxu1 %v9874_v35  ;;  %2769 = vmatprep.mubr.bf16.mxu0 %v9874_v35  ;;  %v2081_v23 = vsel %vm2037_vm1, %v1972_v14, %v1974_v8  ;;  %v6672_v14 = vld [vmem:[%s9850_s1 + $0x370] ss:$8 sps:$4 sm:$0xff]  }
 0x1df   : > { %v1311_v1 = vpop.f32.mrf.mxu1  ;;  %v1732_v47 = vpop.f32.mrf.mxu0  ;;  %v7907_v28 = vadd.f32 %v2081_v23, %v1303_v4  ;;  %v6783_v23 = vld [vmem:[%s7058_s28] sm:$0xff]  }
 0x1e0   : > { %v1976_v13 = vrot.slane %v1732_v47, 2  ;;  %v2078_v31 = vsel %vm2037_vm1, %v1973_v46, %v1975_v42  ;;  %v6680_v46 = vld [vmem:[%s9850_s1 + $0x364] ss:$8 sps:$4 sm:$0xff]  }
 0x1e1   : > { %v1312_v16 = vpop.f32.mrf.mxu1  ;;  %v1734_v19 = vpop.f32.mrf.mxu0  ;;  %v7911_v5 = vadd.f32 %v2078_v31, %v1305_v56  ;;  %v6677_v56 = vld [vmem:[%s9850_s1 + $0x2e4] ss:$8 sps:$4 sm:$0xff]   ;;  %v6686_v31 = vld [vmem:[%s9850_s1 + $0x354] ss:$8 sps:$4 sm:$0xff]  }
 0x1e2   : > { %v2079_v4 = vsel %vm2037_vm1, %v1974_v8, %v1976_v13  ;;  %v6678_v8 = vld [vmem:[%s9850_s1 + $0x360] ss:$8 sps:$4 sm:$0xff]  }
 0x1e3   : > { %v1313_v61 = vpop.f32.mrf.mxu1  ;;  %v1735_v37 = vpop.f32.mrf.mxu0  ;;  %v7921_v55 = vadd.f32 %v2079_v4, %v1307_v27  ;;  %v6675_v27 = vld [vmem:[%s9850_s1 + $0x2e0] ss:$8 sps:$4 sm:$0xff]  }
 0x1e5   : > { %v1316_v29 = vpop.f32.mrf.mxu1  ;;  %v1738_v42 = vpop.f32.mrf.mxu0  ;;  %2296 = vmatmul.mubr.bf16.vlgmr.msra.gmra.mxu1 %v6783_v23  ;;  %2770 = vmatmul.mubr.bf16.vlgmr.msra.gmra.mxu0 %v6783_v23  ;;  %v6681_v23 = vld [vmem:[%s9850_s1 + $0x2d0] ss:$8 sps:$4 sm:$0xff]  }
 0x1e6   : > { %v1317_v1 = vadd.f32 %v1316_v29, %v7677_v58  ;;  %3404 = vmatpush1.bf16.msra.mxu1 %v6669_v12  ;;  %4070 = vmatpush1.bf16.msra.mxu0 %v6672_v14  ;;  %v6683_v58 = vld [vmem:[%s9850_s1 + $0x2d4] ss:$8 sps:$4 sm:$0xff]   ;;  %v1977_v14 = vrot.slane %v1738_v42, 2  ;;  %v6689_v42 = vld [vmem:[%s9850_s1 + $0x2c4] ss:$8 sps:$4 sm:$0xff]  }
 0x1e7   : > { %v1318_v47 = vpop.f32.mrf.mxu1  ;;  %v1740_v13 = vpop.f32.mrf.mxu0  ;;  %2301 = vmatprep.mubr.bf16.mxu1 %v9874_v35  ;;  %2775 = vmatprep.mubr.bf16.mxu0 %v9874_v35 }
 0x1e8   : > { %v1319_v16 = vadd.f32 %v1318_v47, %v7688_v18  ;;  %3405 = vmatprep.subr.bf16.mxu1 %v6677_v56  ;;  %4071 = vmatprep.subr.bf16.mxu0 %v6680_v46  ;;  %v6684_v18 = vld [vmem:[%s9850_s1 + $0x350] ss:$8 sps:$4 sm:$0xff]   ;;  %v1978_v56 = vrot.slane %v1740_v13, 2 }
 0x1e9   : > { %v1320_v19 = vpop.f32.mrf.mxu1  ;;  %v1742_v12 = vpop.f32.mrf.mxu0 }
 0x1ea   : > { %v1321_v4 = vadd.f32 %v1320_v19, %v7696_v32  ;;  %v1979_v61 = vrot.slane %v1742_v12, 2  ;;  %3406 = vmatpush1.bf16.msra.mxu1 %v6675_v27  ;;  %4072 = vmatpush1.bf16.msra.mxu0 %v6678_v8  ;;  %v6692_v27 = vld [vmem:[%s9850_s1 + $0x344] ss:$8 sps:$4 sm:$0xff]  }
 0x1eb   : > { %v1322_v37 = vpop.f32.mrf.mxu1  ;;  %v1744_v29 = vpop.f32.mrf.mxu0  ;;  %3407 = vmatprep.subr.bf16.mxu1 %v6683_v58  ;;  %4073 = vmatprep.subr.bf16.mxu0 %v6686_v31  ;;  %v6784_v19 = vld [vmem:[%s7058_s28 + $0x8] sm:$0xff]  }
 0x1ec   : > { %v1323_v46 = vadd.f32 %v1322_v37, %v7704_v2  ;;  %v1980_v32 = vrot.slane %v1744_v29, 2  ;;  %v2076_v8 = vsel %vm2037_vm1, %v1977_v14, %v1979_v61  ;;  %v6687_v14 = vld [vmem:[%s9850_s1 + $0x2c0] ss:$8 sps:$4 sm:$0xff]  }
 0x1ed   : > { %v1326_v47 = vpop.f32.mrf.mxu1  ;;  %v1748_v58 = vpop.f32.mrf.mxu0  ;;  %2302 = vmatmul.mubr.bf16.gmra.mxu1 %v6784_v19  ;;  %2776 = vmatmul.mubr.bf16.gmra.mxu0 %v6784_v19  ;;  %v7963_v13 = vadd.f32 %v2076_v8, %v1317_v1  ;;  %v6690_v1 = vld [vmem:[%s9850_s1 + $0x340] ss:$8 sps:$4 sm:$0xff]  }
 0x1ee   : > { %v1981_v2 = vrot.slane %v1748_v58, 2  ;;  %2307 = vmatprep.mubr.bf16.mxu1 %v9874_v35  ;;  %2781 = vmatprep.mubr.bf16.mxu0 %v9874_v35  ;;  %v2077_v31 = vsel %vm2037_vm1, %v1978_v56, %v1980_v32 }
 0x1ef   : > { %v1327_v12 = vpop.f32.mrf.mxu1  ;;  %v1750_v37 = vpop.f32.mrf.mxu0  ;;  %3408 = vmatpush1.bf16.msra.mxu1 %v6681_v23  ;;  %4074 = vmatpush1.bf16.msra.mxu0 %v6684_v18  ;;  %v7975_v29 = vadd.f32 %v2077_v31, %v1319_v16 }
 0x1f0   : > { %v1982_v8 = vrot.slane %v1750_v37, 2  ;;  %3409 = vmatprep.subr.bf16.mxu1 %v6689_v42  ;;  %4075 = vmatprep.subr.bf16.mxu0 %v6692_v27  ;;  %v2074_v56 = vsel %vm2037_vm1, %v1979_v61, %v1981_v2  ;;  %v6785_v42 = vld [vmem:[%s7058_s28 + $0x10] sm:$0xff]  }
 0x1f1   : > { %v1328_v47 = vpop.f32.mrf.mxu1  ;;  %v1752_v23 = vpop.f32.mrf.mxu0  ;;  %v7979_v18 = vadd.f32 %v2074_v56, %v1321_v4  ;;  %v6693_v4 = vld [vmem:[%s9850_s1 + $0x2b0] ss:$8 sps:$4 sm:$0xff]  }
 0x1f2   : > { %v2075_v58 = vsel %vm2037_vm1, %v1980_v32, %v1982_v8 }
 0x1f3   : > { %v1329_v19 = vpop.f32.mrf.mxu1  ;;  %v1753_v12 = vpop.f32.mrf.mxu0  ;;  %3410 = vmatpush1.bf16.msra.mxu1 %v6687_v14  ;;  %4076 = vmatpush1.bf16.msra.mxu0 %v6690_v1  ;;  %v7983_v16 = vadd.f32 %v2075_v58, %v1323_v46  ;;  %v6695_v46 = vld [vmem:[%s9850_s1 + $0x2b4] ss:$8 sps:$4 sm:$0xff]  }
 0x1f4   : > { %3411 = vmatprep.subr.bf16.mxu1 %v6695_v46  ;;  %v6698_v14 = vld [vmem:[%s9850_s1 + $0x334] ss:$8 sps:$4 sm:$0xff]  }
 0x1f5   : > { %9879 = vst [vmem:[#allocation25_spill] sm:$0xff] %v7983_v16  ;;  %v1332_v31 = vpop.f32.mrf.mxu1  ;;  %v1756_v37 = vpop.f32.mrf.mxu0  ;;  %2308 = vmatmul.mubr.bf16.gmra.mxu1 %v6785_v42  ;;  %2782 = vmatmul.mubr.bf16.gmra.mxu0 %v6785_v42  ;;  %v6786_v16 = vld [vmem:[%s7058_s28 + $0x18] sm:$0xff]  }
 0x1f6   : > { %v1333_v61 = vadd.f32 %v1332_v31, %v7721_v21  ;;  %2317 = vmatprep.mubr.bf16.mxu1 %v9874_v35  ;;  %2791 = vmatprep.mubr.bf16.mxu0 %v9874_v35  ;;  %v6696_v21 = vld [vmem:[%s9850_s1 + $0x330] ss:$8 sps:$4 sm:$0xff]   ;;  %v1983_v56 = vrot.slane %v1756_v37, 2 }
 0x1f7   : > { %v1334_v32 = vpop.f32.mrf.mxu1  ;;  %v1758_v27 = vpop.f32.mrf.mxu0  ;;  %3412 = vmatpush1.bf16.msra.mxu1 %v6693_v4  ;;  %4077 = vmatprep.subr.bf16.mxu0 %v6698_v14 }
 0x1f8   : > { %v1335_v2 = vadd.f32 %v1334_v32, %v7728_v36  ;;  %4078 = vmatpush1.bf16.msra.mxu0 %v6696_v21  ;;  %v1984_v19 = vrot.slane %v1758_v27, 2 }
 0x1f9   : > { %v1336_v1 = vpop.f32.mrf.mxu1  ;;  %v1760_v8 = vpop.f32.mrf.mxu0 }
 0x1fa   : > { %v1337_v47 = vadd.f32 %v1336_v1, %v7732_v9  ;;  %v1985_v23 = vrot.slane %v1760_v8, 2 }
 0x1fb   : > { %v1338_v58 = vpop.f32.mrf.mxu1  ;;  %v1762_v36 = vpop.f32.mrf.mxu0 }
 0x1fc   : > { %v1339_v12 = vadd.f32 %v1338_v58, %v7736_v33  ;;  %v1986_v31 = vrot.slane %v1762_v36, 2  ;;  %v2072_v42 = vsel %vm2037_vm1, %v1983_v56, %v1985_v23 }
 0x1fd   : > { %v1342_v46 = vpop.f32.mrf.mxu1  ;;  %v1766_v32 = vpop.f32.mrf.mxu0  ;;  %2318 = vmatmul.mubr.bf16.gmra.mxu1 %v6786_v16  ;;  %2792 = vmatmul.mubr.bf16.gmra.mxu0 %v6786_v16  ;;  %v8007_v37 = vadd.f32 %v2072_v42, %v1333_v61 }
 0x1fe   : > { %v1987_v9 = vrot.slane %v1766_v32, 2  ;;  %2323 = vmatprep.mubr.bf16.mxu1 %v9874_v35  ;;  %2799 = vmatprep.mubr.bf16.mxu0 %v9874_v35  ;;  %v2073_v33 = vsel %vm2037_vm1, %v1984_v19, %v1986_v31  ;;  %v6787_v32 = vld [vmem:[%s7058_s28 + $0x20] sm:$0xff]  }
 0x1ff   : > { %v1343_v4 = vpop.f32.mrf.mxu1  ;;  %v1768_v27 = vpop.f32.mrf.mxu0  ;;  %v8013_v21 = vadd.f32 %v2073_v33, %v1335_v2 }
 0x200   : > { %v1988_v14 = vrot.slane %v1768_v27, 2  ;;  %v2070_v1 = vsel %vm2037_vm1, %v1985_v23, %v1987_v9 }
 0x201   : > { %v1344_v16 = vpop.f32.mrf.mxu1  ;;  %v1770_v61 = vpop.f32.mrf.mxu0  ;;  %v8017_v8 = vadd.f32 %v2070_v1, %v1337_v47 }
 0x202   : > { %v2071_v56 = vsel %vm2037_vm1, %v1986_v31, %v1988_v14 }
 0x203   : > { %v1345_v58 = vpop.f32.mrf.mxu1  ;;  %v1771_v36 = vpop.f32.mrf.mxu0  ;;  %v8021_v42 = vadd.f32 %v2071_v56, %v1339_v12 }
 0x205   : > { %v1348_v19 = vpop.f32.mrf.mxu1  ;;  %v1774_v46 = vpop.f32.mrf.mxu0  ;;  %2324 = vmatmul.mubr.bf16.gmra.mxu1 %v6787_v32  ;;  %2800 = vmatmul.mubr.bf16.gmra.mxu0 %v6787_v32 }
 0x206   : > { %v1349_v2 = vadd.f32 %v1348_v19, %v7743_v57  ;;  %2333 = vmatprep.mubr.bf16.mxu1 %v9874_v35  ;;  %2809 = vmatprep.mubr.bf16.mxu0 %v9874_v35  ;;  %v1989_v12 = vrot.slane %v1774_v46, 2  ;;  %v6788_v19 = vld [vmem:[%s7058_s28 + $0x28] sm:$0xff]  }
 0x207   : > { %v1350_v47 = vpop.f32.mrf.mxu1  ;;  %v1776_v23 = vpop.f32.mrf.mxu0 }
 0x208   : > { %v1351_v31 = vadd.f32 %v1350_v47, %v7750_v50  ;;  %v1990_v16 = vrot.slane %v1776_v23, 2 }
 0x209   : > { %v1352_v9 = vpop.f32.mrf.mxu1  ;;  %v1778_v33 = vpop.f32.mrf.mxu0 }
 0x20a   : > { %v1353_v4 = vadd.f32 %v1352_v9, %v7754_v49  ;;  %v1991_v27 = vrot.slane %v1778_v33, 2 }
 0x20b   : > { %v1354_v14 = vpop.f32.mrf.mxu1  ;;  %v1780_v1 = vpop.f32.mrf.mxu0 }
 0x20c   : > { %v1355_v57 = vadd.f32 %v1354_v14, %v7758_v7  ;;  %v1992_v61 = vrot.slane %v1780_v1, 2  ;;  %v2068_v56 = vsel %vm2037_vm1, %v1989_v12, %v1991_v27 }
 0x20d   : > { %v1358_v58 = vpop.f32.mrf.mxu1  ;;  %v1784_v36 = vpop.f32.mrf.mxu0  ;;  %2334 = vmatmul.mubr.bf16.gmra.mxu1 %v6788_v19  ;;  %2810 = vmatmul.mubr.bf16.gmra.mxu0 %v6788_v19  ;;  %v8033_v50 = vadd.f32 %v2068_v56, %v1349_v2  ;;  %v6789_v19 = vld [vmem:[%s7058_s28 + $0x30] sm:$0xff]  }
 0x20e   : > { %v1993_v46 = vrot.slane %v1784_v36, 2  ;;  %2339 = vmatprep.mubr.bf16.mxu1 %v9874_v35  ;;  %2817 = vmatprep.mubr.bf16.mxu0 %v9874_v35  ;;  %v2069_v49 = vsel %vm2037_vm1, %v1990_v16, %v1992_v61 }
 0x20f   : > { %v1359_v7 = vpop.f32.mrf.mxu1  ;;  %v1786_v32 = vpop.f32.mrf.mxu0  ;;  %v8039_v47 = vadd.f32 %v2069_v49, %v1351_v31 }
 0x210   : > { %v1994_v23 = vrot.slane %v1786_v32, 2  ;;  %v2066_v9 = vsel %vm2037_vm1, %v1991_v27, %v1993_v46  ;;  %v6701_v7 = vld [vmem:[%s9850_s1 + $0x2a4] ss:$8 sps:$4 sm:$0xff]  }
 0x211   : > { %v1360_v33 = vpop.f32.mrf.mxu1  ;;  %v1788_v2 = vpop.f32.mrf.mxu0  ;;  %v8043_v12 = vadd.f32 %v2066_v9, %v1353_v4  ;;  %3413 = vmatprep.subr.bf16.mxu1 %v6701_v7 }
 0x212   : > { %v2067_v14 = vsel %vm2037_vm1, %v1992_v61, %v1994_v23 }
 0x213   : > { %v1361_v1 = vpop.f32.mrf.mxu1  ;;  %v1789_v56 = vpop.f32.mrf.mxu0  ;;  %v8047_v58 = vadd.f32 %v2067_v14, %v1355_v57  ;;  %v6699_v57 = vld [vmem:[%s9850_s1 + $0x2a0] ss:$8 sps:$4 sm:$0xff]  }
 0x214   : > { %3414 = vmatpush1.bf16.msra.mxu1 %v6699_v57  ;;  %v6702_v56 = vld [vmem:[%s9850_s1 + $0x320] ss:$8 sps:$4 sm:$0xff]  }
 0x215   : > { %v1364_v16 = vpop.f32.mrf.mxu1  ;;  %v1792_v36 = vpop.f32.mrf.mxu0  ;;  %2340 = vmatmul.mubr.bf16.gmra.mxu1 %v6789_v19  ;;  %2818 = vmatmul.mubr.bf16.gmra.mxu0 %v6789_v19  ;;  %v6790_v19 = vld [vmem:[%s7058_s28 + $0x38] sm:$0xff]  }
 0x216   : > { %v1365_v31 = vadd.f32 %v1364_v16, %v7418_v3  ;;  %2349 = vmatprep.mubr.bf16.mxu1 %v9874_v35  ;;  %2827 = vmatprep.mubr.bf16.mxu0 %v9874_v35  ;;  %v1995_v3 = vrot.slane %v1792_v36, 2 }
 0x217   : > { %v1366_v4 = vpop.f32.mrf.mxu1  ;;  %v1794_v27 = vpop.f32.mrf.mxu0 }
 0x218   : > { %v1367_v46 = vadd.f32 %v1366_v4, %v7430_v15  ;;  %v6704_v15 = vld [vmem:[%s9850_s1 + $0x324] ss:$8 sps:$4 sm:$0xff]   ;;  %v1996_v2 = vrot.slane %v1794_v27, 2 }
 0x219   : > { %v1368_v61 = vpop.f32.mrf.mxu1  ;;  %v1796_v49 = vpop.f32.mrf.mxu0  ;;  %4079 = vmatprep.subr.bf16.mxu0 %v6704_v15 }
 0x21a   : > { %v1369_v32 = vadd.f32 %v1368_v61, %v7438_v25  ;;  %v1997_v23 = vrot.slane %v1796_v49, 2  ;;  %4080 = vmatpush1.bf16.msra.mxu0 %v6702_v56 }
 0x21b   : > { %v1370_v9 = vpop.f32.mrf.mxu1  ;;  %v1798_v33 = vpop.f32.mrf.mxu0 }
 0x21c   : > { %v1371_v14 = vadd.f32 %v1370_v9, %v7446_v30  ;;  %v1998_v1 = vrot.slane %v1798_v33, 2  ;;  %v2064_v25 = vsel %vm2037_vm1, %v1995_v3, %v1997_v23 }
 0x21d   : > { %v1374_v16 = vpop.f32.mrf.mxu1  ;;  %v1802_v36 = vpop.f32.mrf.mxu0  ;;  %2350 = vmatmul.mubr.bf16.gmra.mxu1 %v6790_v19  ;;  %2828 = vmatmul.mubr.bf16.gmra.mxu0 %v6790_v19  ;;  %v8071_v4 = vadd.f32 %v2064_v25, %v1365_v31 }
 0x21e   : > { %v1999_v61 = vrot.slane %v1802_v36, 2  ;;  %2355 = vmatprep.mubr.bf16.mxu1 %v9874_v35  ;;  %2835 = vmatprep.mubr.bf16.mxu0 %v9874_v35  ;;  %v2065_v30 = vsel %vm2037_vm1, %v1996_v2, %v1998_v1 }
 0x21f   : > { %v1375_v27 = vpop.f32.mrf.mxu1  ;;  %v1804_v49 = vpop.f32.mrf.mxu0  ;;  %v8077_v57 = vadd.f32 %v2065_v30, %v1367_v46  ;;  %v6791_v46 = vld [vmem:[%s7058_s28 + $0x40] sm:$0xff]  }
 0x220   : > { %v2000_v7 = vrot.slane %v1804_v49, 2  ;;  %v2062_v31 = vsel %vm2037_vm1, %v1997_v23, %v1999_v61 }
 0x221   : > { %v1376_v3 = vpop.f32.mrf.mxu1  ;;  %v1806_v9 = vpop.f32.mrf.mxu0  ;;  %v8081_v33 = vadd.f32 %v2062_v31, %v1369_v32 }
 0x222   : > { %v2063_v25 = vsel %vm2037_vm1, %v1998_v1, %v2000_v7 }
 0x223   : > { %v1377_v16 = vpop.f32.mrf.mxu1  ;;  %v1807_v2 = vpop.f32.mrf.mxu0  ;;  %v8085_v36 = vadd.f32 %v2063_v25, %v1371_v14 }
 0x225   : > { %v1380_v19 = vpop.f32.mrf.mxu1  ;;  %v1810_v15 = vpop.f32.mrf.mxu0  ;;  %2356 = vmatmul.mubr.bf16.gmra.mxu1 %v6791_v46  ;;  %2836 = vmatmul.mubr.bf16.gmra.mxu0 %v6791_v46 }
 0x226   : > { %v1381_v56 = vadd.f32 %v1380_v19, %v7458_v48  ;;  %2365 = vmatprep.mubr.bf16.mxu1 %v9874_v35  ;;  %2845 = vmatprep.mubr.bf16.mxu0 %v9874_v35  ;;  %v2001_v14 = vrot.slane %v1810_v15, 2  ;;  %v6792_v19 = vld [vmem:[%s7058_s28 + $0x48] sm:$0xff]  }
 0x227   : > { %v1382_v32 = vpop.f32.mrf.mxu1  ;;  %v1812_v23 = vpop.f32.mrf.mxu0 }
 0x228   : > { %v1383_v1 = vadd.f32 %v1382_v32, %v7470_v54  ;;  %v2002_v3 = vrot.slane %v1812_v23, 2 }
 0x229   : > { %v1384_v61 = vpop.f32.mrf.mxu1  ;;  %v1814_v30 = vpop.f32.mrf.mxu0 }
 0x22a   : > { %v1385_v27 = vadd.f32 %v1384_v61, %v7478_v59  ;;  %v2003_v49 = vrot.slane %v1814_v30, 2 }
 0x22b   : > { %v1386_v7 = vpop.f32.mrf.mxu1  ;;  %v1816_v31 = vpop.f32.mrf.mxu0 }
 0x22c   : > { %v1387_v48 = vadd.f32 %v1386_v7, %v7486_v63  ;;  %v2004_v9 = vrot.slane %v1816_v31, 2  ;;  %v2060_v25 = vsel %vm2037_vm1, %v2001_v14, %v2003_v49 }
 0x22d   : > { %v1390_v16 = vpop.f32.mrf.mxu1  ;;  %v1820_v2 = vpop.f32.mrf.mxu0  ;;  %2366 = vmatmul.mubr.bf16.gmra.mxu1 %v6792_v19  ;;  %2846 = vmatmul.mubr.bf16.gmra.mxu0 %v6792_v19  ;;  %v8097_v54 = vadd.f32 %v2060_v25, %v1381_v56  ;;  %v6793_v19 = vld [vmem:[%s7058_s28 + $0x50] sm:$0xff]  }
 0x22e   : > { %v2005_v15 = vrot.slane %v1820_v2, 2  ;;  %2371 = vmatprep.mubr.bf16.mxu1 %v9874_v35  ;;  %2853 = vmatprep.mubr.bf16.mxu0 %v9874_v35  ;;  %v2061_v59 = vsel %vm2037_vm1, %v2002_v3, %v2004_v9 }
 0x22f   : > { %v1391_v63 = vpop.f32.mrf.mxu1  ;;  %v1822_v46 = vpop.f32.mrf.mxu0  ;;  %v8103_v32 = vadd.f32 %v2061_v59, %v1383_v1 }
 0x230   : > { %v2006_v23 = vrot.slane %v1822_v46, 2  ;;  %v2058_v61 = vsel %vm2037_vm1, %v2003_v49, %v2005_v15  ;;  %v9883_v15 = vld [vmem:[#allocation5_spill] sm:$0xff]  ;;  %v9884_v46 = vld [vmem:[#allocation6_spill] sm:$0xff] }
 0x231   : > { %9880 = vst [vmem:[#allocation26_spill] sm:$0xff] %v8103_v32  ;;  %v1392_v30 = vpop.f32.mrf.mxu1  ;;  %v1824_v56 = vpop.f32.mrf.mxu0  ;;  %v8107_v14 = vadd.f32 %v2058_v61, %v1385_v27  ;;  %v6800_v32 = vld [vmem:[%s7058_s28 + $0x88] sm:$0xff]  }
 0x232   : > { %v2059_v7 = vsel %vm2037_vm1, %v2004_v9, %v2006_v23 }
 0x233   : > { %9881 = vst [vmem:[#allocation27_spill] sm:$0xff] %v8107_v14  ;;  %v1393_v31 = vpop.f32.mrf.mxu1  ;;  %v1825_v25 = vpop.f32.mrf.mxu0  ;;  %v8111_v16 = vadd.f32 %v2059_v7, %v1387_v48  ;;  %v6794_v14 = vld [vmem:[%s7058_s28 + $0x58] sm:$0xff]  }
 0x234   : > { %v9885_v31 = vld [vmem:[#allocation7_spill] sm:$0xff] }
 0x235   : > { %9882 = vst [vmem:[#allocation28_spill] sm:$0xff] %v8111_v16  ;;  %v1396_v3 = vpop.f32.mrf.mxu1  ;;  %v1828_v2 = vpop.f32.mrf.mxu0  ;;  %2372 = vmatmul.mubr.bf16.gmra.mxu1 %v6793_v19  ;;  %2854 = vmatmul.mubr.bf16.gmra.mxu0 %v6793_v19 }
 0x236   : > { %v1397_v1 = vadd.f32 %v1396_v3, %v7498_v39  ;;  %2381 = vmatprep.mubr.bf16.mxu1 %v9874_v35  ;;  %2863 = vmatprep.mubr.bf16.mxu0 %v9874_v35  ;;  %v2007_v48 = vrot.slane %v1828_v2, 2 }
 0x237   : > { %v1398_v27 = vpop.f32.mrf.mxu1  ;;  %v1830_v49 = vpop.f32.mrf.mxu0 }
 0x238   : > { %v1399_v9 = vadd.f32 %v1398_v27, %v9883_v15  ;;  %v2008_v7 = vrot.slane %v1830_v49, 2 }
 0x239   : > { %v1400_v59 = vpop.f32.mrf.mxu1  ;;  %v1832_v63 = vpop.f32.mrf.mxu0 }
 0x23a   : > { %v1401_v23 = vadd.f32 %v1400_v59, %v9884_v46  ;;  %v2009_v61 = vrot.slane %v1832_v63, 2  ;;  %v6705_v46 = vld [vmem:[%s9850_s1 + $0x290] ss:$8 sps:$4 sm:$0xff]  }
 0x23b   : > { %v1402_v30 = vpop.f32.mrf.mxu1  ;;  %v1834_v56 = vpop.f32.mrf.mxu0 }
 0x23c   : > { %v1403_v39 = vadd.f32 %v1402_v30, %v9885_v31  ;;  %v2010_v25 = vrot.slane %v1834_v56, 2  ;;  %v2056_v3 = vsel %vm2037_vm1, %v2007_v48, %v2009_v61 }
 0x23d   : > { %v1406_v19 = vpop.f32.mrf.mxu1  ;;  %v1838_v16 = vpop.f32.mrf.mxu0  ;;  %2382 = vmatmul.mubr.bf16.gmra.mxu1 %v6794_v14  ;;  %2864 = vmatmul.mubr.bf16.gmra.mxu0 %v6794_v14  ;;  %v8123_v27 = vadd.f32 %v2056_v3, %v1397_v1  ;;  %v6707_v14 = vld [vmem:[%s9850_s1 + $0x294] ss:$8 sps:$4 sm:$0xff]  }
 0x23e   : > { %v2011_v2 = vrot.slane %v1838_v16, 2  ;;  %2387 = vmatprep.mubr.bf16.mxu1 %v9874_v35  ;;  %2871 = vmatprep.mubr.bf16.mxu0 %v9874_v35  ;;  %v2057_v49 = vsel %vm2037_vm1, %v2008_v7, %v2010_v25  ;;  %v6708_v19 = vld [vmem:[%s9850_s1 + $0x310] ss:$8 sps:$4 sm:$0xff]  }
 0x23f   : > { %9886 = vst [vmem:[#allocation5_spill] sm:$0xff] %v8123_v27  ;;  %v1407_v15 = vpop.f32.mrf.mxu1  ;;  %v1840_v59 = vpop.f32.mrf.mxu0  ;;  %v8129_v63 = vadd.f32 %v2057_v49, %v1399_v9  ;;  %3415 = vmatprep.subr.bf16.mxu1 %v6707_v14  ;;  %v6710_v9 = vld [vmem:[%s9850_s1 + $0x314] ss:$8 sps:$4 sm:$0xff]   ;;  %v6795_v49 = vld [vmem:[%s7058_s28 + $0x60] sm:$0xff]  }
 0x240   : > { %v2012_v48 = vrot.slane %v1840_v59, 2  ;;  %v2054_v16 = vsel %vm2037_vm1, %v2009_v61, %v2011_v2  ;;  %3416 = vmatpush1.bf16.msra.mxu1 %v6705_v46  ;;  %4081 = vmatprep.subr.bf16.mxu0 %v6710_v9  ;;  %v9890_v15 = vld [vmem:[#allocation8_spill] sm:$0xff]  ;;  %v9891_v46 = vld [vmem:[#allocation9_spill] sm:$0xff] }
 0x241   : > { %9887 = vst [vmem:[#allocation6_spill] sm:$0xff] %v8129_v63  ;;  %v1408_v1 = vpop.f32.mrf.mxu1  ;;  %v1842_v30 = vpop.f32.mrf.mxu0  ;;  %v8139_v56 = vadd.f32 %v2054_v16, %v1401_v23  ;;  %4082 = vmatpush1.bf16.msra.mxu0 %v6708_v19  ;;  %v6796_v19 = vld [vmem:[%s7058_s28 + $0x68] sm:$0xff]  }
 0x242   : > { %v2055_v7 = vsel %vm2037_vm1, %v2010_v25, %v2012_v48  ;;  %v9892_v30 = vld [vmem:[#allocation10_spill] sm:$0xff] }
 0x243   : > { %9888 = vst [vmem:[#allocation7_spill] sm:$0xff] %v8139_v56  ;;  %v1409_v31 = vpop.f32.mrf.mxu1  ;;  %v1843_v3 = vpop.f32.mrf.mxu0  ;;  %v8149_v61 = vadd.f32 %v2055_v7, %v1403_v39 }
 0x245   : > { %9889 = vst [vmem:[#allocation29_spill] sm:$0xff] %v8149_v61  ;;  %v1412_v23 = vpop.f32.mrf.mxu1  ;;  %v1846_v2 = vpop.f32.mrf.mxu0  ;;  %2388 = vmatmul.mubr.bf16.gmra.mxu1 %v6795_v49  ;;  %2872 = vmatmul.mubr.bf16.gmra.mxu0 %v6795_v49 }
 0x246   : > { %v1413_v59 = vadd.f32 %v1412_v23, %v9890_v15  ;;  %2397 = vmatprep.mubr.bf16.mxu1 %v9874_v35  ;;  %2881 = vmatprep.mubr.bf16.mxu0 %v9874_v35  ;;  %v2013_v1 = vrot.slane %v1846_v2, 2  ;;  %v9893_v23 = vld [vmem:[#allocation11_spill] sm:$0xff] }
 0x247   : > { %v1414_v25 = vpop.f32.mrf.mxu1  ;;  %v1848_v48 = vpop.f32.mrf.mxu0 }
 0x248   : > { %v1415_v14 = vadd.f32 %v1414_v25, %v9891_v46  ;;  %v2014_v49 = vrot.slane %v1848_v48, 2 }
 0x249   : > { %v1416_v39 = vpop.f32.mrf.mxu1  ;;  %v1850_v16 = vpop.f32.mrf.mxu0 }
 0x24a   : > { %v1417_v9 = vadd.f32 %v1416_v39, %v9892_v30  ;;  %v2015_v7 = vrot.slane %v1850_v16, 2 }
 0x24b   : > { %v1418_v31 = vpop.f32.mrf.mxu1  ;;  %v1852_v3 = vpop.f32.mrf.mxu0 }
 0x24c   : > { %v1419_v15 = vadd.f32 %v1418_v31, %v9893_v23  ;;  %v2016_v61 = vrot.slane %v1852_v3, 2  ;;  %v2052_v56 = vsel %vm2037_vm1, %v2013_v1, %v2015_v7 }
 0x24d   : > { %v1422_v63 = vpop.f32.mrf.mxu1  ;;  %v1856_v27 = vpop.f32.mrf.mxu0  ;;  %2398 = vmatmul.mubr.bf16.gmra.mxu1 %v6796_v19  ;;  %2882 = vmatmul.mubr.bf16.gmra.mxu0 %v6796_v19  ;;  %v8161_v25 = vadd.f32 %v2052_v56, %v1413_v59 }
 0x24e   : > { %v2017_v2 = vrot.slane %v1856_v27, 2  ;;  %2403 = vmatprep.mubr.bf16.mxu1 %v9874_v35  ;;  %2889 = vmatprep.mubr.bf16.mxu0 %v9874_v35  ;;  %v2053_v48 = vsel %vm2037_vm1, %v2014_v49, %v2016_v61 }
 0x24f   : > { %9894 = vst [vmem:[#allocation8_spill] sm:$0xff] %v8161_v25  ;;  %v1423_v46 = vpop.f32.mrf.mxu1  ;;  %v1858_v39 = vpop.f32.mrf.mxu0  ;;  %v8167_v16 = vadd.f32 %v2053_v48, %v1415_v14  ;;  %v9898_v14 = vld [vmem:[#allocation12_spill] sm:$0xff] }
 0x250   : > { %v2018_v63 = vrot.slane %v1858_v39, 2  ;;  %v2050_v1 = vsel %vm2037_vm1, %v2015_v7, %v2017_v2  ;;  %v6797_v46 = vld [vmem:[%s7058_s28 + $0x70] sm:$0xff]   ;;  %v9899_v2 = vld [vmem:[#allocation13_spill] sm:$0xff]  ;;  %v6798_v25 = vld [vmem:[%s7058_s28 + $0x78] sm:$0xff]  }
 0x251   : > { %9895 = vst [vmem:[#allocation9_spill] sm:$0xff] %v8167_v16  ;;  %v1424_v30 = vpop.f32.mrf.mxu1  ;;  %v1860_v56 = vpop.f32.mrf.mxu0  ;;  %v8171_v59 = vadd.f32 %v2050_v1, %v1417_v9  ;;  %v9900_v1 = vld [vmem:[#allocation14_spill] sm:$0xff] }
 0x252   : > { %v2051_v27 = vsel %vm2037_vm1, %v2016_v61, %v2018_v63 }
 0x253   : > { %9896 = vst [vmem:[#allocation10_spill] sm:$0xff] %v8171_v59  ;;  %v1425_v31 = vpop.f32.mrf.mxu1  ;;  %v1861_v3 = vpop.f32.mrf.mxu0  ;;  %v8175_v23 = vadd.f32 %v2051_v27, %v1419_v15 }
 0x255   : > { %9897 = vst [vmem:[#allocation11_spill] sm:$0xff] %v8175_v23  ;;  %v1428_v49 = vpop.f32.mrf.mxu1  ;;  %v1864_v19 = vpop.f32.mrf.mxu0  ;;  %2404 = vmatmul.mubr.bf16.gmra.mxu1 %v6797_v46  ;;  %2890 = vmatmul.mubr.bf16.gmra.mxu0 %v6797_v46  ;;  %v9901_v46 = vld [vmem:[#allocation15_spill] sm:$0xff] }
 0x256   : > { %v1429_v48 = vadd.f32 %v1428_v49, %v9898_v14  ;;  %2413 = vmatprep.mubr.bf16.mxu1 %v9874_v35  ;;  %2899 = vmatprep.mubr.bf16.mxu0 %v9874_v35  ;;  %v2019_v15 = vrot.slane %v1864_v19, 2 }
 0x257   : > { %v1430_v9 = vpop.f32.mrf.mxu1  ;;  %v1866_v7 = vpop.f32.mrf.mxu0 }
 0x258   : > { %v1431_v61 = vadd.f32 %v1430_v9, %v9899_v2  ;;  %v2020_v3 = vrot.slane %v1866_v7, 2 }
 0x259   : > { %v1432_v39 = vpop.f32.mrf.mxu1  ;;  %v1868_v63 = vpop.f32.mrf.mxu0 }
 0x25a   : > { %v1433_v30 = vadd.f32 %v1432_v39, %v9900_v1  ;;  %v2021_v56 = vrot.slane %v1868_v63, 2 }
 0x25b   : > { %v1434_v27 = vpop.f32.mrf.mxu1  ;;  %v1870_v31 = vpop.f32.mrf.mxu0 }
 0x25c   : > { %v1435_v49 = vadd.f32 %v1434_v27, %v9901_v46  ;;  %v2022_v14 = vrot.slane %v1870_v31, 2  ;;  %v2048_v23 = vsel %vm2037_vm1, %v2019_v15, %v2021_v56 }
 0x25d   : > { %v1438_v59 = vpop.f32.mrf.mxu1  ;;  %v1874_v16 = vpop.f32.mrf.mxu0  ;;  %2414 = vmatmul.mubr.bf16.gmra.mxu1 %v6798_v25  ;;  %2900 = vmatmul.mubr.bf16.gmra.mxu0 %v6798_v25  ;;  %v8187_v9 = vadd.f32 %v2048_v23, %v1429_v48 }
 0x25e   : > { %v2023_v19 = vrot.slane %v1874_v16, 2  ;;  %2419 = vmatprep.mubr.bf16.mxu1 %v9874_v35  ;;  %2907 = vmatprep.mubr.bf16.mxu0 %v9874_v35  ;;  %v2049_v7 = vsel %vm2037_vm1, %v2020_v3, %v2022_v14  ;;  %v6713_v16 = vld [vmem:[%s9850_s1 + $0x284] ss:$8 sps:$4 sm:$0xff]  }
 0x25f   : > { %9902 = vst [vmem:[#allocation12_spill] sm:$0xff] %v8187_v9  ;;  %v1439_v2 = vpop.f32.mrf.mxu1  ;;  %v1876_v39 = vpop.f32.mrf.mxu0  ;;  %v8193_v63 = vadd.f32 %v2049_v7, %v1431_v61  ;;  %v6711_v61 = vld [vmem:[%s9850_s1 + $0x280] ss:$8 sps:$4 sm:$0xff]   ;;  %3417 = vmatprep.subr.bf16.mxu1 %v6713_v16  ;;  %v9906_v7 = vld [vmem:[#allocation16_spill] sm:$0xff] }
 0x260   : > { %v2024_v15 = vrot.slane %v1876_v39, 2  ;;  %v2046_v59 = vsel %vm2037_vm1, %v2021_v56, %v2023_v19  ;;  %v6716_v56 = vld [vmem:[%s9850_s1 + $0x304] ss:$8 sps:$4 sm:$0xff]   ;;  %3418 = vmatpush1.bf16.msra.mxu1 %v6711_v61 }
 0x261   : > { %9903 = vst [vmem:[#allocation13_spill] sm:$0xff] %v8193_v63  ;;  %v1440_v25 = vpop.f32.mrf.mxu1  ;;  %v1878_v23 = vpop.f32.mrf.mxu0  ;;  %v8197_v48 = vadd.f32 %v2046_v59, %v1433_v30  ;;  %v6714_v30 = vld [vmem:[%s9850_s1 + $0x300] ss:$8 sps:$4 sm:$0xff]   ;;  %4083 = vmatprep.subr.bf16.mxu0 %v6716_v56 }
 0x262   : > { %v2047_v1 = vsel %vm2037_vm1, %v2022_v14, %v2024_v15  ;;  %v6799_v14 = vld [vmem:[%s7058_s28 + $0x80] sm:$0xff]   ;;  %4084 = vmatpush1.bf16.msra.mxu0 %v6714_v30 }
 0x263   : > { %9904 = vst [vmem:[#allocation14_spill] sm:$0xff] %v8197_v48  ;;  %v1441_v27 = vpop.f32.mrf.mxu1  ;;  %v1879_v31 = vpop.f32.mrf.mxu0  ;;  %v8210_v3 = vadd.f32 %v2047_v1, %v1435_v49  ;;  %v9907_v49 = vld [vmem:[#allocation17_spill] sm:$0xff]  ;;  %v9908_v1 = vld [vmem:[#allocation18_spill] sm:$0xff] }
 0x265   : > { %9905 = vst [vmem:[#allocation15_spill] sm:$0xff] %v8210_v3  ;;  %v1444_v46 = vpop.f32.mrf.mxu1  ;;  %v1882_v19 = vpop.f32.mrf.mxu0  ;;  %2420 = vmatmul.mubr.bf16.gmra.mxu1 %v6799_v14  ;;  %2908 = vmatmul.mubr.bf16.gmra.mxu0 %v6799_v14  ;;  %v9909_v3 = vld [vmem:[#allocation19_spill] sm:$0xff] }
 0x266   : > { %v1445_v2 = vadd.f32 %v1444_v46, %v9906_v7  ;;  %2429 = vmatprep.mubr.bf16.mxu1 %v9874_v35  ;;  %2917 = vmatprep.mubr.bf16.mxu0 %v9874_v35  ;;  %v2025_v16 = vrot.slane %v1882_v19, 2 }
 0x267   : > { %v1446_v39 = vpop.f32.mrf.mxu1  ;;  %v1884_v15 = vpop.f32.mrf.mxu0 }
 0x268   : > { %v1447_v59 = vadd.f32 %v1446_v39, %v9907_v49  ;;  %v2026_v7 = vrot.slane %v1884_v15, 2 }
 0x269   : > { %v1448_v25 = vpop.f32.mrf.mxu1  ;;  %v1886_v23 = vpop.f32.mrf.mxu0 }
 0x26a   : > { %v1449_v27 = vadd.f32 %v1448_v25, %v9908_v1  ;;  %v2027_v31 = vrot.slane %v1886_v23, 2 }
 0x26b   : > { %v1450_v14 = vpop.f32.mrf.mxu1  ;;  %v1888_v46 = vpop.f32.mrf.mxu0 }
 0x26c   : > { %v1451_v48 = vadd.f32 %v1450_v14, %v9909_v3  ;;  %v2028_v63 = vrot.slane %v1888_v46, 2  ;;  %v2044_v61 = vsel %vm2037_vm1, %v2025_v16, %v2027_v31 }
 0x26d   : > { %v1454_v56 = vpop.f32.mrf.mxu1  ;;  %v1892_v9 = vpop.f32.mrf.mxu0  ;;  %2430 = vmatmul.mubr.bf16.gmra.mxu1 %v6800_v32  ;;  %2918 = vmatmul.mubr.bf16.gmra.mxu0 %v6800_v32  ;;  %v8225_v30 = vadd.f32 %v2044_v61, %v1445_v2 }
 0x26e   : > { %v2029_v19 = vrot.slane %v1892_v9, 2  ;;  %2435 = vmatprep.mubr.bf16.mxu1 %v9874_v35  ;;  %2925 = vmatprep.mubr.bf16.mxu0 %v9874_v35  ;;  %v2045_v3 = vsel %vm2037_vm1, %v2026_v7, %v2028_v63  ;;  %v6801_v56 = vld [vmem:[%s7058_s28 + $0x90] sm:$0xff]  }
 0x26f   : > { %v1455_v39 = vpop.f32.mrf.mxu1  ;;  %v1894_v15 = vpop.f32.mrf.mxu0  ;;  %v8231_v49 = vadd.f32 %v2045_v3, %v1447_v59  ;;  %v9913_v59 = vld [vmem:[#allocation20_spill] sm:$0xff] }
 0x270   : > { %v2030_v25 = vrot.slane %v1894_v15, 2  ;;  %v2042_v23 = vsel %vm2037_vm1, %v2027_v31, %v2029_v19  ;;  %v9914_v19 = vld [vmem:[#allocation21_spill] sm:$0xff] }
 0x271   : > { %9910 = vst [vmem:[#allocation16_spill] sm:$0xff] %v8231_v49  ;;  %v1456_v32 = vpop.f32.mrf.mxu1  ;;  %v1896_v2 = vpop.f32.mrf.mxu0  ;;  %v8235_v16 = vadd.f32 %v2042_v23, %v1449_v27  ;;  %v6802_v49 = vld [vmem:[%s7058_s28 + $0x98] sm:$0xff]  }
 0x272   : > { %v2043_v9 = vsel %vm2037_vm1, %v2028_v63, %v2030_v25  ;;  %v9915_v25 = vld [vmem:[#allocation22_spill] sm:$0xff] }
 0x273   : > { %9911 = vst [vmem:[#allocation17_spill] sm:$0xff] %v8235_v16  ;;  %v1457_v1 = vpop.f32.mrf.mxu1  ;;  %v1897_v14 = vpop.f32.mrf.mxu0  ;;  %v8239_v46 = vadd.f32 %v2043_v9, %v1451_v48 }
 0x274   : > { %v9916_v14 = vld [vmem:[#allocation23_spill] sm:$0xff] }
 0x275   : > { %9912 = vst [vmem:[#allocation18_spill] sm:$0xff] %v8239_v46  ;;  %v1460_v7 = vpop.f32.mrf.mxu1  ;;  %v1900_v61 = vpop.f32.mrf.mxu0  ;;  %2436 = vmatmul.mubr.bf16.gmra.mxu1 %v6801_v56  ;;  %2926 = vmatmul.mubr.bf16.gmra.mxu0 %v6801_v56 }
 0x276   : > { %v1461_v3 = vadd.f32 %v1460_v7, %v9913_v59  ;;  %2445 = vmatprep.mubr.bf16.mxu1 %v9874_v35  ;;  %2935 = vmatprep.mubr.bf16.mxu0 %v9874_v35  ;;  %v2031_v48 = vrot.slane %v1900_v61, 2 }
 0x277   : > { %v1462_v27 = vpop.f32.mrf.mxu1  ;;  %v1902_v31 = vpop.f32.mrf.mxu0 }
 0x278   : > { %v1463_v63 = vadd.f32 %v1462_v27, %v9914_v19  ;;  %v2032_v1 = vrot.slane %v1902_v31, 2 }
 0x279   : > { %v1464_v39 = vpop.f32.mrf.mxu1  ;;  %v1904_v15 = vpop.f32.mrf.mxu0 }
 0x27a   : > { %v1465_v23 = vadd.f32 %v1464_v39, %v9915_v25  ;;  %v2033_v32 = vrot.slane %v1904_v15, 2 }
 0x27b   : > { %v1466_v2 = vpop.f32.mrf.mxu1  ;;  %v1906_v9 = vpop.f32.mrf.mxu0 }
 0x27c   : > { %v1467_v7 = vadd.f32 %v1466_v2, %v9916_v14  ;;  %v2034_v56 = vrot.slane %v1906_v9, 2  ;;  %v2040_v59 = vsel %vm2037_vm1, %v2031_v48, %v2033_v32 }
 0x27d   : > { %v1470_v46 = vpop.f32.mrf.mxu1  ;;  %v1910_v16 = vpop.f32.mrf.mxu0  ;;  %2446 = vmatmul.mubr.bf16.gmra.mxu1 %v6802_v49  ;;  %2936 = vmatmul.mubr.bf16.gmra.mxu0 %v6802_v49  ;;  %v8251_v27 = vadd.f32 %v2040_v59, %v1461_v3 }
 0x27e   : > { %v2035_v61 = vrot.slane %v1910_v16, 2  ;;  %2451 = vmatprep.mubr.bf16.mxu1 %v9874_v35  ;;  %2943 = vmatprep.mubr.bf16.mxu0 %v9874_v35  ;;  %v2041_v31 = vsel %vm2037_vm1, %v2032_v1, %v2034_v56 }
 0x27f   : > { %v1471_v19 = vpop.f32.mrf.mxu1  ;;  %v1912_v39 = vpop.f32.mrf.mxu0  ;;  %v8257_v15 = vadd.f32 %v2041_v31, %v1463_v63  ;;  %v6719_v63 = vld [vmem:[%s9850_s1 + $0x3f4] ss:$8 sps:$4 sm:$0xff]  }
 0x280   : > { %v2036_v46 = vrot.slane %v1912_v39, 2  ;;  %v2038_v48 = vsel %vm2037_vm1, %v2033_v32, %v2035_v61  ;;  %v6803_v19 = vld [vmem:[%s7058_s28 + $0xa0] sm:$0xff]   ;;  %4543 = vmatprep.subr.bf16.mxu1 %v6719_v63 }
 0x281   : > { %v1472_v49 = vpop.f32.mrf.mxu1  ;;  %v1914_v3 = vpop.f32.mrf.mxu0  ;;  %v8261_v25 = vadd.f32 %v2038_v48, %v1465_v23 }
 0x282   : > { %v2039_v16 = vsel %vm2037_vm1, %v2034_v56, %v2036_v46  ;;  %v6804_v49 = vld [vmem:[%s7058_s28 + $0xa8] sm:$0xff]  }
 0x283   : > { %v1473_v2 = vpop.f32.mrf.mxu1  ;;  %v1915_v9 = vpop.f32.mrf.mxu0  ;;  %v8265_v14 = vadd.f32 %v2039_v16, %v1467_v7  ;;  %v6722_v7 = vld [vmem:[%s9850_s1 + $0x474] ss:$8 sps:$4 sm:$0xff]  }
 0x284   : > { %5209 = vmatprep.subr.bf16.mxu0 %v6722_v7 }
 0x285   : > { %9917 = vst [vmem:[#allocation19_spill] sm:$0xff] %v8265_v14  ;;  %v1476_v1 = vpop.f32.mrf.mxu1  ;;  %v1918_v59 = vpop.f32.mrf.mxu0  ;;  %2452 = vmatmul.mubr.bf16.gmra.mxu1 %v6803_v19  ;;  %2944 = vmatmul.mubr.bf16.gmra.mxu0 %v6803_v19 }
 0x286   : > { %2461 = vmatprep.mubr.bf16.mxu1 %v9874_v35  ;;  %2953 = vmatprep.mubr.bf16.mxu0 %v9874_v35 }
 0x287   : > { %v1477_v23 = vpop.f32.mrf.mxu1  ;;  %v1919_v32 = vpop.f32.mrf.mxu0 }
 0x288   : > { %v6805_v23 = vld [vmem:[%s7058_s28 + $0xb0] sm:$0xff]  }
 0x289   : > { %v1478_v56 = vpop.f32.mrf.mxu1  ;;  %v1920_v61 = vpop.f32.mrf.mxu0 }
 0x28b   : > { %v1479_v31 = vpop.f32.mrf.mxu1  ;;  %v1921_v39 = vpop.f32.mrf.mxu0 }
 0x28d   : > { %v1482_v46 = vpop.f32.mrf.mxu1  ;;  %v1924_v48 = vpop.f32.mrf.mxu0  ;;  %2462 = vmatmul.mubr.bf16.gmra.mxu1 %v6804_v49  ;;  %2954 = vmatmul.mubr.bf16.gmra.mxu0 %v6804_v49  ;;  %v6806_v49 = vld [vmem:[%s7058_s28 + $0xb8] sm:$0xff]  }
 0x28e   : > { %2467 = vmatprep.mubr.bf16.mxu1 %v9874_v35  ;;  %2961 = vmatprep.mubr.bf16.mxu0 %v9874_v35 }
 0x28f   : > { %v1483_v3 = vpop.f32.mrf.mxu1  ;;  %v1925_v16 = vpop.f32.mrf.mxu0 }
 0x291   : > { %v1484_v2 = vpop.f32.mrf.mxu1  ;;  %v1926_v9 = vpop.f32.mrf.mxu0 }
 0x293   : > { %v1485_v1 = vpop.f32.mrf.mxu1  ;;  %v1927_v59 = vpop.f32.mrf.mxu0 }
 0x295   : > { %v1488_v19 = vpop.f32.mrf.mxu1  ;;  %v1930_v63 = vpop.f32.mrf.mxu0  ;;  %2468 = vmatmul.mubr.bf16.gmra.mxu1 %v6805_v23  ;;  %2962 = vmatmul.mubr.bf16.gmra.mxu0 %v6805_v23 }
 0x296   : > { %2477 = vmatprep.mubr.bf16.mxu1 %v9874_v35  ;;  %2971 = vmatprep.mubr.bf16.mxu0 %v9874_v35  ;;  %v6807_v63 = vld [vmem:[%s7058_s28 + $0xc0] sm:$0xff]  }
 0x297   : > { %v1489_v32 = vpop.f32.mrf.mxu1  ;;  %v1931_v7 = vpop.f32.mrf.mxu0 }
 0x299   : > { %v1490_v56 = vpop.f32.mrf.mxu1  ;;  %v1932_v61 = vpop.f32.mrf.mxu0 }
 0x29b   : > { %v1491_v31 = vpop.f32.mrf.mxu1  ;;  %v1933_v39 = vpop.f32.mrf.mxu0 }
 0x29d   : > { %v1494_v46 = vpop.f32.mrf.mxu1  ;;  %v1936_v48 = vpop.f32.mrf.mxu0  ;;  %2478 = vmatmul.mubr.bf16.gmra.mxu1 %v6806_v49  ;;  %2972 = vmatmul.mubr.bf16.gmra.mxu0 %v6806_v49 }
 0x29e   : > { %2483 = vmatprep.mubr.bf16.mxu1 %v9874_v35  ;;  %2979 = vmatprep.mubr.bf16.mxu0 %v9874_v35  ;;  %v6808_v48 = vld [vmem:[%s7058_s28 + $0xc8] sm:$0xff]  }
 0x29f   : > { %v1495_v3 = vpop.f32.mrf.mxu1  ;;  %v1937_v16 = vpop.f32.mrf.mxu0 }
 0x2a1   : > { %v1496_v2 = vpop.f32.mrf.mxu1  ;;  %v1938_v9 = vpop.f32.mrf.mxu0 }
 0x2a3   : > { %v1497_v1 = vpop.f32.mrf.mxu1  ;;  %v1939_v59 = vpop.f32.mrf.mxu0 }
 0x2a5   : > { %v2297_v19 = vpop.f32.mrf.mxu1  ;;  %2484 = vmatmul.mubr.bf16.gmra.mxu1 %v6807_v63  ;;  %v2771_v23 = vpop.f32.mrf.mxu0  ;;  %2980 = vmatmul.mubr.bf16.gmra.mxu0 %v6807_v63  ;;  %v6809_v63 = vld [vmem:[%s7058_s28 + $0xd0] sm:$0xff]  }
 0x2a6   : > { %2493 = vmatprep.mubr.bf16.mxu1 %v9874_v35  ;;  %2989 = vmatprep.mubr.bf16.mxu0 %v9874_v35 }
 0x2a7   : > { %v2298_v32 = vpop.f32.mrf.mxu1  ;;  %v2772_v7 = vpop.f32.mrf.mxu0 }
 0x2a9   : > { %v2299_v56 = vpop.f32.mrf.mxu1  ;;  %v2773_v61 = vpop.f32.mrf.mxu0 }
 0x2ab   : > { %v2300_v31 = vpop.f32.mrf.mxu1  ;;  %v2774_v39 = vpop.f32.mrf.mxu0 }
 0x2ad   : > { %v2303_v46 = vpop.f32.mrf.mxu1  ;;  %2494 = vmatmul.mubr.bf16.gmra.mxu1 %v6808_v48  ;;  %v2777_v49 = vpop.f32.mrf.mxu0  ;;  %2990 = vmatmul.mubr.bf16.gmra.mxu0 %v6808_v48 }
 0x2ae   : > { %2499 = vmatprep.mubr.bf16.mxu1 %v9874_v35  ;;  %2997 = vmatprep.mubr.bf16.mxu0 %v9874_v35 }
 0x2af   : > { %v2304_v3 = vpop.f32.mrf.mxu1  ;;  %v2778_v16 = vpop.f32.mrf.mxu0 }
 0x2b1   : > { %v2305_v2 = vpop.f32.mrf.mxu1  ;;  %v2779_v9 = vpop.f32.mrf.mxu0 }
 0x2b2   : > { %v9918_v9 = vld [vmem:[#allocation24_spill] sm:$0xff] }
 0x2b3   : > { %v2306_v1 = vpop.f32.mrf.mxu1  ;;  %v2780_v59 = vpop.f32.mrf.mxu0 }
 0x2b5   : > { %v2309_v19 = vpop.f32.mrf.mxu1  ;;  %2500 = vmatmul.mubr.bf16.gmra.mxu1 %v6809_v63  ;;  %v2783_v23 = vpop.f32.mrf.mxu0  ;;  %2998 = vmatmul.mubr.bf16.gmra.mxu0 %v6809_v63  ;;  %v6810_v63 = vld [vmem:[%s7058_s28 + $0xd8] sm:$0xff]  }
 0x2b6   : > { %v2576_v32 = vadd.f32 %v2309_v19, %v7771_v52  ;;  %2509 = vmatprep.mubr.bf16.mxu1 %v9874_v35  ;;  %3007 = vmatprep.mubr.bf16.mxu0 %v9874_v35  ;;  %v3082_v46 = vrot.slane %v2783_v23, 1 }
 0x2b7   : > { %v2311_v7 = vpop.f32.mrf.mxu1  ;;  %v2785_v56 = vpop.f32.mrf.mxu0 }
 0x2b8   : > { %v2577_v61 = vadd.f32 %v2311_v7, %v7777_v11  ;;  %v3083_v2 = vrot.slane %v2785_v56, 1 }
 0x2b9   : > { %v2313_v31 = vpop.f32.mrf.mxu1  ;;  %v2787_v39 = vpop.f32.mrf.mxu0 }
 0x2ba   : > { %v2578_v48 = vadd.f32 %v2313_v31, %v7781_v34  ;;  %v3084_v49 = vrot.slane %v2787_v39, 1 }
 0x2bb   : > { %v2315_v3 = vpop.f32.mrf.mxu1  ;;  %v2789_v16 = vpop.f32.mrf.mxu0 }
 0x2bc   : > { %v3240_v52 = vsel %vm1041_vm0, %v3082_v46, %v3084_v49  ;;  %v2579_v1 = vadd.f32 %v2315_v3, %v9918_v9  ;;  %v3085_v59 = vrot.slane %v2789_v16, 1 }
 0x2bd   : > { %v2319_v19 = vpop.f32.mrf.mxu1  ;;  %2510 = vmatmul.mubr.bf16.gmra.mxu1 %v6810_v63  ;;  %v2793_v14 = vpop.f32.mrf.mxu0  ;;  %3008 = vmatmul.mubr.bf16.gmra.mxu0 %v6810_v63  ;;  %v8301_v11 = vadd.f32 %v3240_v52, %v2576_v32  ;;  %v6811_v63 = vld [vmem:[%s7058_s28 + $0xe0] sm:$0xff]  }
 0x2be   : > { %v3086_v23 = vrot.slane %v2793_v14, 1  ;;  %2515 = vmatprep.mubr.bf16.mxu1 %v9874_v35  ;;  %3015 = vmatprep.mubr.bf16.mxu0 %v9874_v35  ;;  %v3241_v34 = vsel %vm1041_vm0, %v3083_v2, %v3085_v59 }
 0x2bf   : > { %v2320_v7 = vpop.f32.mrf.mxu1  ;;  %v2795_v56 = vpop.f32.mrf.mxu0  ;;  %v8307_v31 = vadd.f32 %v3241_v34, %v2577_v61 }
 0x2c0   : > { %v3238_v39 = vsel %vm1041_vm0, %v3084_v49, %v3086_v23  ;;  %v3087_v46 = vrot.slane %v2795_v56, 1 }
 0x2c1   : > { %v2321_v3 = vpop.f32.mrf.mxu1  ;;  %v2797_v32 = vpop.f32.mrf.mxu0  ;;  %v8311_v16 = vadd.f32 %v3238_v39, %v2578_v48 }
 0x2c2   : > { %v3239_v14 = vsel %vm1041_vm0, %v3085_v59, %v3087_v46 }
 0x2c3   : > { %v2322_v52 = vpop.f32.mrf.mxu1  ;;  %v2798_v9 = vpop.f32.mrf.mxu0  ;;  %v8315_v19 = vadd.f32 %v3239_v14, %v2579_v1 }
 0x2c5   : > { %v2325_v2 = vpop.f32.mrf.mxu1  ;;  %2516 = vmatmul.mubr.bf16.gmra.mxu1 %v6811_v63  ;;  %v2801_v61 = vpop.f32.mrf.mxu0  ;;  %3016 = vmatmul.mubr.bf16.gmra.mxu0 %v6811_v63 }
 0x2c6   : > { %v2580_v34 = vadd.f32 %v2325_v2, %v7797_v53  ;;  %2525 = vmatprep.mubr.bf16.mxu1 %v9874_v35  ;;  %3025 = vmatprep.mubr.bf16.mxu0 %v9874_v35  ;;  %v3088_v1 = vrot.slane %v2801_v61, 1  ;;  %v6812_v2 = vld [vmem:[%s7058_s28 + $0xe8] sm:$0xff]  }
 0x2c7   : > { %v2327_v48 = vpop.f32.mrf.mxu1  ;;  %v2803_v49 = vpop.f32.mrf.mxu0 }
 0x2c8   : > { %v2581_v59 = vadd.f32 %v2327_v48, %v7803_v20  ;;  %v3089_v32 = vrot.slane %v2803_v49, 1 }
 0x2c9   : > { %v2329_v23 = vpop.f32.mrf.mxu1  ;;  %v2805_v7 = vpop.f32.mrf.mxu0 }
 0x2ca   : > { %v2582_v56 = vadd.f32 %v2329_v23, %v7807_v10  ;;  %v3090_v39 = vrot.slane %v2805_v7, 1 }
 0x2cb   : > { %v2331_v46 = vpop.f32.mrf.mxu1  ;;  %v2807_v3 = vpop.f32.mrf.mxu0 }
 0x2cc   : > { %v3236_v53 = vsel %vm1041_vm0, %v3088_v1, %v3090_v39  ;;  %v2583_v14 = vadd.f32 %v2331_v46, %v7811_v0  ;;  %v3091_v52 = vrot.slane %v2807_v3, 1 }
 0x2cd   : > { %v2335_v9 = vpop.f32.mrf.mxu1  ;;  %2526 = vmatmul.mubr.bf16.gmra.mxu1 %v6812_v2  ;;  %v2811_v63 = vpop.f32.mrf.mxu0  ;;  %3026 = vmatmul.mubr.bf16.gmra.mxu0 %v6812_v2  ;;  %v8327_v20 = vadd.f32 %v3236_v53, %v2580_v34 }
 0x2ce   : > { %v3092_v61 = vrot.slane %v2811_v63, 1  ;;  %2531 = vmatprep.mubr.bf16.mxu1 %v9874_v35  ;;  %3033 = vmatprep.mubr.bf16.mxu0 %v9874_v35  ;;  %v3237_v10 = vsel %vm1041_vm0, %v3089_v32, %v3091_v52  ;;  %v6813_v63 = vld [vmem:[%s7058_s28 + $0xf0] sm:$0xff]  }
 0x2cf   : > { %v2336_v48 = vpop.f32.mrf.mxu1  ;;  %v2813_v49 = vpop.f32.mrf.mxu0  ;;  %v8333_v0 = vadd.f32 %v3237_v10, %v2581_v59 }
 0x2d0   : > { %v3234_v23 = vsel %vm1041_vm0, %v3090_v39, %v3092_v61  ;;  %v3093_v7 = vrot.slane %v2813_v49, 1 }
 0x2d1   : > { %v2337_v1 = vpop.f32.mrf.mxu1  ;;  %v2815_v34 = vpop.f32.mrf.mxu0  ;;  %v8337_v46 = vadd.f32 %v3234_v23, %v2582_v56 }
 0x2d2   : > { %v3235_v3 = vsel %vm1041_vm0, %v3091_v52, %v3093_v7 }
 0x2d3   : > { %v2338_v53 = vpop.f32.mrf.mxu1  ;;  %v2816_v9 = vpop.f32.mrf.mxu0  ;;  %v8341_v2 = vadd.f32 %v3235_v3, %v2583_v14 }
 0x2d5   : > { %v2341_v32 = vpop.f32.mrf.mxu1  ;;  %2532 = vmatmul.mubr.bf16.gmra.mxu1 %v6813_v63  ;;  %v2819_v59 = vpop.f32.mrf.mxu0  ;;  %3034 = vmatmul.mubr.bf16.gmra.mxu0 %v6813_v63 }
 0x2d6   : > { %v2584_v10 = vadd.f32 %v2341_v32, %v7823_v44  ;;  %2541 = vmatprep.mubr.bf16.mxu1 %v9874_v35  ;;  %3043 = vmatprep.mubr.bf16.mxu0 %v9874_v35  ;;  %v3094_v14 = vrot.slane %v2819_v59, 1  ;;  %v6814_v32 = vld [vmem:[%s7058_s28 + $0xf8] sm:$0xff]  }
 0x2d7   : > { %v2343_v56 = vpop.f32.mrf.mxu1  ;;  %v2821_v39 = vpop.f32.mrf.mxu0 }
 0x2d8   : > { %v2585_v52 = vadd.f32 %v2343_v56, %v7829_v26  ;;  %v3095_v34 = vrot.slane %v2821_v39, 1 }
 0x2d9   : > { %v2345_v61 = vpop.f32.mrf.mxu1  ;;  %v2823_v48 = vpop.f32.mrf.mxu0 }
 0x2da   : > { %v2586_v49 = vadd.f32 %v2345_v61, %v7833_v22  ;;  %v3096_v23 = vrot.slane %v2823_v48, 1 }
 0x2db   : > { %v2347_v7 = vpop.f32.mrf.mxu1  ;;  %v2825_v1 = vpop.f32.mrf.mxu0 }
 0x2dc   : > { %v3232_v44 = vsel %vm1041_vm0, %v3094_v14, %v3096_v23  ;;  %v2587_v3 = vadd.f32 %v2347_v7, %v7837_v40  ;;  %v3097_v53 = vrot.slane %v2825_v1, 1 }
 0x2dd   : > { %v2351_v9 = vpop.f32.mrf.mxu1  ;;  %2542 = vmatmul.mubr.bf16.gmra.mxu1 %v6814_v32  ;;  %v2829_v63 = vpop.f32.mrf.mxu0  ;;  %3044 = vmatmul.mubr.bf16.gmra.mxu0 %v6814_v32  ;;  %v8353_v26 = vadd.f32 %v3232_v44, %v2584_v10 }
 0x2de   : > { %v3098_v59 = vrot.slane %v2829_v63, 1  ;;  %2547 = vmatprep.mubr.bf16.mxu1 %v9874_v35  ;;  %3051 = vmatprep.mubr.bf16.mxu0 %v9874_v35  ;;  %v3233_v22 = vsel %vm1041_vm0, %v3095_v34, %v3097_v53  ;;  %v6815_v63 = vld [vmem:[%s7058_s28 + $0x100] sm:$0xff]  }
 0x2df   : > { %v2352_v56 = vpop.f32.mrf.mxu1  ;;  %v2831_v39 = vpop.f32.mrf.mxu0  ;;  %v8359_v40 = vadd.f32 %v3233_v22, %v2585_v52 }
 0x2e0   : > { %v3230_v61 = vsel %vm1041_vm0, %v3096_v23, %v3098_v59  ;;  %v3099_v48 = vrot.slane %v2831_v39, 1 }
 0x2e1   : > { %v2353_v14 = vpop.f32.mrf.mxu1  ;;  %v2833_v10 = vpop.f32.mrf.mxu0  ;;  %v8363_v7 = vadd.f32 %v3230_v61, %v2586_v49 }
 0x2e2   : > { %v3231_v1 = vsel %vm1041_vm0, %v3097_v53, %v3099_v48 }
 0x2e3   : > { %v2354_v44 = vpop.f32.mrf.mxu1  ;;  %v2834_v9 = vpop.f32.mrf.mxu0  ;;  %v8367_v32 = vadd.f32 %v3231_v1, %v2587_v3 }
 0x2e5   : > { %v2357_v34 = vpop.f32.mrf.mxu1  ;;  %2548 = vmatmul.mubr.bf16.gmra.mxu1 %v6815_v63  ;;  %v2837_v52 = vpop.f32.mrf.mxu0  ;;  %3052 = vmatmul.mubr.bf16.gmra.mxu0 %v6815_v63 }
 0x2e6   : > { %v2588_v22 = vadd.f32 %v2357_v34, %v7849_v43  ;;  %2557 = vmatprep.mubr.bf16.mxu1 %v9874_v35  ;;  %3061 = vmatprep.mubr.bf16.mxu0 %v9874_v35  ;;  %v3100_v3 = vrot.slane %v2837_v52, 1  ;;  %v6816_v34 = vld [vmem:[%s7058_s28 + $0x108] sm:$0xff]  }
 0x2e7   : > { %v2359_v49 = vpop.f32.mrf.mxu1  ;;  %v2839_v23 = vpop.f32.mrf.mxu0 }
 0x2e8   : > { %v2589_v53 = vadd.f32 %v2359_v49, %v7855_v41  ;;  %v3101_v10 = vrot.slane %v2839_v23, 1 }
 0x2e9   : > { %v2361_v59 = vpop.f32.mrf.mxu1  ;;  %v2841_v56 = vpop.f32.mrf.mxu0 }
 0x2ea   : > { %v2590_v39 = vadd.f32 %v2361_v59, %v7859_v62  ;;  %v3102_v61 = vrot.slane %v2841_v56, 1 }
 0x2eb   : > { %v2363_v48 = vpop.f32.mrf.mxu1  ;;  %v2843_v14 = vpop.f32.mrf.mxu0 }
 0x2ec   : > { %v3228_v43 = vsel %vm1041_vm0, %v3100_v3, %v3102_v61  ;;  %v2591_v1 = vadd.f32 %v2363_v48, %v7863_v24  ;;  %v3103_v44 = vrot.slane %v2843_v14, 1 }
 0x2ed   : > { %v2367_v9 = vpop.f32.mrf.mxu1  ;;  %2558 = vmatmul.mubr.bf16.gmra.mxu1 %v6816_v34  ;;  %v2847_v63 = vpop.f32.mrf.mxu0  ;;  %3062 = vmatmul.mubr.bf16.gmra.mxu0 %v6816_v34  ;;  %v8379_v41 = vadd.f32 %v3228_v43, %v2588_v22 }
 0x2ee   : > { %v3104_v52 = vrot.slane %v2847_v63, 1  ;;  %2563 = vmatprep.mubr.bf16.mxu1 %v9874_v35  ;;  %3069 = vmatprep.mubr.bf16.mxu0 %v9874_v35  ;;  %v3229_v62 = vsel %vm1041_vm0, %v3101_v10, %v3103_v44  ;;  %v6817_v63 = vld [vmem:[%s7058_s28 + $0x110] sm:$0xff]  }
 0x2ef   : > { %v2368_v49 = vpop.f32.mrf.mxu1  ;;  %v2849_v23 = vpop.f32.mrf.mxu0  ;;  %v8385_v24 = vadd.f32 %v3229_v62, %v2589_v53 }
 0x2f0   : > { %v3226_v59 = vsel %vm1041_vm0, %v3102_v61, %v3104_v52  ;;  %v3105_v56 = vrot.slane %v2849_v23, 1 }
 0x2f1   : > { %v2369_v3 = vpop.f32.mrf.mxu1  ;;  %v2851_v22 = vpop.f32.mrf.mxu0  ;;  %v8389_v48 = vadd.f32 %v3226_v59, %v2590_v39 }
 0x2f2   : > { %v3227_v14 = vsel %vm1041_vm0, %v3103_v44, %v3105_v56 }
 0x2f3   : > { %v2370_v43 = vpop.f32.mrf.mxu1  ;;  %v2852_v9 = vpop.f32.mrf.mxu0  ;;  %v8393_v34 = vadd.f32 %v3227_v14, %v2591_v1 }
 0x2f5   : > { %v2373_v10 = vpop.f32.mrf.mxu1  ;;  %2564 = vmatmul.mubr.bf16.gmra.mxu1 %v6817_v63  ;;  %v2855_v53 = vpop.f32.mrf.mxu0  ;;  %3070 = vmatmul.mubr.bf16.gmra.mxu0 %v6817_v63 }
 0x2f6   : > { %v2592_v62 = vadd.f32 %v2373_v10, %v7875_v51  ;;  %2569 = vmatprep.mubr.bf16.mxu1 %v9874_v35  ;;  %3075 = vmatprep.mubr.bf16.mxu0 %v9874_v35  ;;  %v3106_v1 = vrot.slane %v2855_v53, 1  ;;  %v6818_v10 = vld [vmem:[%s7058_s28 + $0x118] sm:$0xff]  }
 0x2f7   : > { %v2375_v39 = vpop.f32.mrf.mxu1  ;;  %v2857_v61 = vpop.f32.mrf.mxu0 }
 0x2f8   : > { %v2593_v44 = vadd.f32 %v2375_v39, %v7881_v17  ;;  %v3107_v22 = vrot.slane %v2857_v61, 1 }
 0x2f9   : > { %v2377_v52 = vpop.f32.mrf.mxu1  ;;  %v2859_v49 = vpop.f32.mrf.mxu0 }
 0x2fa   : > { %v2594_v23 = vadd.f32 %v2377_v52, %v7885_v60  ;;  %v3108_v59 = vrot.slane %v2859_v49, 1 }
 0x2fb   : > { %v2379_v56 = vpop.f32.mrf.mxu1  ;;  %v2861_v3 = vpop.f32.mrf.mxu0 }
 0x2fc   : > { %v3224_v51 = vsel %vm1041_vm0, %v3106_v1, %v3108_v59  ;;  %v2595_v14 = vadd.f32 %v2379_v56, %v7889_v6  ;;  %v3109_v43 = vrot.slane %v2861_v3, 1 }
 0x2fd   : > { %v2383_v9 = vpop.f32.mrf.mxu1  ;;  %2570 = vmatmul.mubr.bf16.gmra.mxu1 %v6818_v10  ;;  %v2865_v63 = vpop.f32.mrf.mxu0  ;;  %3076 = vmatmul.mubr.bf16.gmra.mxu0 %v6818_v10  ;;  %v8405_v17 = vadd.f32 %v3224_v51, %v2592_v62 }
 0x2fe   : > { %v3110_v53 = vrot.slane %v2865_v63, 1  ;;  %3435 = vmatprep.mubr.bf16.mxu1 %v9874_v35  ;;  %4101 = vmatprep.mubr.bf16.mxu0 %v9874_v35  ;;  %v3225_v60 = vsel %vm1041_vm0, %v3107_v22, %v3109_v43  ;;  %v6717_v22 = vld [vmem:[%s9850_s1 + $0x3f0] ss:$8 sps:$4 sm:$0xff]  }
 0x2ff   : > { %v2384_v39 = vpop.f32.mrf.mxu1  ;;  %v2867_v61 = vpop.f32.mrf.mxu0  ;;  %v8411_v52 = vadd.f32 %v3225_v60, %v2593_v44  ;;  %v6720_v44 = vld [vmem:[%s9850_s1 + $0x470] ss:$8 sps:$4 sm:$0xff]  }
 0x300   : > { %v3222_v6 = vsel %vm1041_vm0, %v3108_v59, %v3110_v53  ;;  %v3111_v49 = vrot.slane %v2867_v61, 1  ;;  %v6728_v59 = vld [vmem:[%s9850_s1 + $0x464] ss:$8 sps:$4 sm:$0xff]   ;;  %v6726_v39 = vld [vmem:[%s9850_s1 + $0x460] ss:$8 sps:$4 sm:$0xff]  }
 0x301   : > { %v2385_v1 = vpop.f32.mrf.mxu1  ;;  %v2869_v62 = vpop.f32.mrf.mxu0  ;;  %v8415_v56 = vadd.f32 %v3222_v6, %v2594_v23  ;;  %v6725_v23 = vld [vmem:[%s9850_s1 + $0x3e4] ss:$8 sps:$4 sm:$0xff]  }
 0x302   : > { %v3223_v3 = vsel %vm1041_vm0, %v3109_v43, %v3111_v49  ;;  %v6819_v53 = vld [vmem:[%s7058_s28] sm:$0xff]   ;;  %v6734_v49 = vld [vmem:[%s9850_s1 + $0x454] ss:$8 sps:$4 sm:$0xff]  }
 0x303   : > { %v2386_v51 = vpop.f32.mrf.mxu1  ;;  %v2870_v9 = vpop.f32.mrf.mxu0  ;;  %v8425_v10 = vadd.f32 %v3223_v3, %v2595_v14  ;;  %v6723_v14 = vld [vmem:[%s9850_s1 + $0x3e0] ss:$8 sps:$4 sm:$0xff]  }
 0x305   : > { %v2389_v43 = vpop.f32.mrf.mxu1  ;;  %v2873_v63 = vpop.f32.mrf.mxu0  ;;  %3436 = vmatmul.mubr.bf16.vlgmr.msra.gmra.mxu1 %v6819_v53  ;;  %4102 = vmatmul.mubr.bf16.vlgmr.msra.gmra.mxu0 %v6819_v53  ;;  %v6729_v53 = vld [vmem:[%s9850_s1 + $0x3d0] ss:$8 sps:$4 sm:$0xff]  }
 0x306   : > { %v2596_v60 = vadd.f32 %v2389_v43, %v7901_v38  ;;  %4544 = vmatpush1.bf16.msra.mxu1 %v6717_v22  ;;  %5210 = vmatpush1.bf16.msra.mxu0 %v6720_v44  ;;  %v6731_v38 = vld [vmem:[%s9850_s1 + $0x3d4] ss:$8 sps:$4 sm:$0xff]   ;;  %v3112_v22 = vrot.slane %v2873_v63, 1 }
 0x307   : > { %v2391_v61 = vpop.f32.mrf.mxu1  ;;  %v2875_v6 = vpop.f32.mrf.mxu0  ;;  %3441 = vmatprep.mubr.bf16.mxu1 %v9874_v35  ;;  %4107 = vmatprep.mubr.bf16.mxu0 %v9874_v35 }
 0x308   : > { %v2597_v1 = vadd.f32 %v2391_v61, %v7907_v28  ;;  %4545 = vmatprep.subr.bf16.mxu1 %v6725_v23  ;;  %5211 = vmatprep.subr.bf16.mxu0 %v6728_v59  ;;  %v6732_v28 = vld [vmem:[%s9850_s1 + $0x450] ss:$8 sps:$4 sm:$0xff]   ;;  %v3113_v23 = vrot.slane %v2875_v6, 1 }
 0x309   : > { %v2393_v62 = vpop.f32.mrf.mxu1  ;;  %v2877_v3 = vpop.f32.mrf.mxu0 }
 0x30a   : > { %v2598_v44 = vadd.f32 %v2393_v62, %v7911_v5  ;;  %v3114_v51 = vrot.slane %v2877_v3, 1  ;;  %4546 = vmatpush1.bf16.msra.mxu1 %v6723_v14  ;;  %5212 = vmatpush1.bf16.msra.mxu0 %v6726_v39  ;;  %v6737_v14 = vld [vmem:[%s9850_s1 + $0x3c4] ss:$8 sps:$4 sm:$0xff]  }
 0x30b   : > { %v2395_v9 = vpop.f32.mrf.mxu1  ;;  %v2879_v43 = vpop.f32.mrf.mxu0  ;;  %4547 = vmatprep.subr.bf16.mxu1 %v6731_v38  ;;  %5213 = vmatprep.subr.bf16.mxu0 %v6734_v49  ;;  %v6740_v39 = vld [vmem:[%s9850_s1 + $0x444] ss:$8 sps:$4 sm:$0xff]  }
 0x30c   : > { %v3220_v5 = vsel %vm1041_vm0, %v3112_v22, %v3114_v51  ;;  %v2599_v59 = vadd.f32 %v2395_v9, %v7921_v55  ;;  %v3115_v63 = vrot.slane %v2879_v43, 1  ;;  %v6820_v62 = vld [vmem:[%s7058_s28 + $0x8] sm:$0xff]  }
 0x30d   : > { %v2399_v61 = vpop.f32.mrf.mxu1  ;;  %v2883_v38 = vpop.f32.mrf.mxu0  ;;  %3442 = vmatmul.mubr.bf16.gmra.mxu1 %v6820_v62  ;;  %4108 = vmatmul.mubr.bf16.gmra.mxu0 %v6820_v62  ;;  %v8467_v6 = vadd.f32 %v3220_v5, %v2596_v60  ;;  %v6735_v9 = vld [vmem:[%s9850_s1 + $0x3c0] ss:$8 sps:$4 sm:$0xff]  }
 0x30e   : > { %v3116_v49 = vrot.slane %v2883_v38, 1  ;;  %3447 = vmatprep.mubr.bf16.mxu1 %v9874_v35  ;;  %4113 = vmatprep.mubr.bf16.mxu0 %v9874_v35  ;;  %v3221_v55 = vsel %vm1041_vm0, %v3113_v23, %v3115_v63  ;;  %v6738_v60 = vld [vmem:[%s9850_s1 + $0x440] ss:$8 sps:$4 sm:$0xff]  }
 0x30f   : > { %9919 = vst [vmem:[#allocation20_spill] sm:$0xff] %v8467_v6  ;;  %v2400_v3 = vpop.f32.mrf.mxu1  ;;  %v2885_v22 = vpop.f32.mrf.mxu0  ;;  %4548 = vmatpush1.bf16.msra.mxu1 %v6729_v53  ;;  %5214 = vmatpush1.bf16.msra.mxu0 %v6732_v28  ;;  %v8479_v43 = vadd.f32 %v3221_v55, %v2597_v1  ;;  %v6821_v6 = vld [vmem:[%s7058_s28 + $0x10] sm:$0xff]  }
 0x310   : > { %v3218_v5 = vsel %vm1041_vm0, %v3114_v51, %v3116_v49  ;;  %v3117_v61 = vrot.slane %v2885_v22, 1  ;;  %4549 = vmatprep.subr.bf16.mxu1 %v6737_v14  ;;  %5215 = vmatprep.subr.bf16.mxu0 %v6740_v39 }
 0x311   : > { %9920 = vst [vmem:[#allocation21_spill] sm:$0xff] %v8479_v43  ;;  %v2401_v23 = vpop.f32.mrf.mxu1  ;;  %v2887_v53 = vpop.f32.mrf.mxu0  ;;  %v8483_v28 = vadd.f32 %v3218_v5, %v2598_v44  ;;  %v6741_v44 = vld [vmem:[%s9850_s1 + $0x3b0] ss:$8 sps:$4 sm:$0xff]  }
 0x312   : > { %v3219_v38 = vsel %vm1041_vm0, %v3115_v63, %v3117_v61 }
 0x313   : > { %v2402_v62 = vpop.f32.mrf.mxu1  ;;  %v2888_v3 = vpop.f32.mrf.mxu0  ;;  %4550 = vmatpush1.bf16.msra.mxu1 %v6735_v9  ;;  %5216 = vmatpush1.bf16.msra.mxu0 %v6738_v60  ;;  %v8487_v1 = vadd.f32 %v3219_v38, %v2599_v59  ;;  %v6743_v59 = vld [vmem:[%s9850_s1 + $0x3b4] ss:$8 sps:$4 sm:$0xff]   ;;  %v9921_v38 = vld [vmem:[#allocation25_spill] sm:$0xff] }
 0x314   : > { %4551 = vmatprep.subr.bf16.mxu1 %v6743_v59 }
 0x315   : > { %v2405_v55 = vpop.f32.mrf.mxu1  ;;  %v2891_v43 = vpop.f32.mrf.mxu0  ;;  %3448 = vmatmul.mubr.bf16.gmra.mxu1 %v6821_v6  ;;  %4114 = vmatmul.mubr.bf16.gmra.mxu0 %v6821_v6  ;;  %v6746_v6 = vld [vmem:[%s9850_s1 + $0x434] ss:$8 sps:$4 sm:$0xff]  }
 0x316   : > { %v2600_v51 = vadd.f32 %v2405_v55, %v7963_v13  ;;  %3457 = vmatprep.mubr.bf16.mxu1 %v9874_v35  ;;  %4119 = vmatprep.mubr.bf16.mxu0 %v9874_v35  ;;  %v6744_v13 = vld [vmem:[%s9850_s1 + $0x430] ss:$8 sps:$4 sm:$0xff]   ;;  %v3118_v9 = vrot.slane %v2891_v43, 1 }
 0x317   : > { %v2407_v63 = vpop.f32.mrf.mxu1  ;;  %v2893_v14 = vpop.f32.mrf.mxu0  ;;  %4552 = vmatpush1.bf16.msra.mxu1 %v6741_v44  ;;  %5217 = vmatprep.subr.bf16.mxu0 %v6746_v6 }
 0x318   : > { %v2601_v39 = vadd.f32 %v2407_v63, %v7975_v29  ;;  %5218 = vmatpush1.bf16.msra.mxu0 %v6744_v13  ;;  %v3119_v23 = vrot.slane %v2893_v14, 1  ;;  %v6822_v63 = vld [vmem:[%s7058_s28 + $0x18] sm:$0xff]  }
 0x319   : > { %v2409_v49 = vpop.f32.mrf.mxu1  ;;  %v2895_v22 = vpop.f32.mrf.mxu0 }
 0x31a   : > { %v2602_v60 = vadd.f32 %v2409_v49, %v7979_v18  ;;  %v3120_v5 = vrot.slane %v2895_v22, 1 }
 0x31b   : > { %v2411_v61 = vpop.f32.mrf.mxu1  ;;  %v2897_v29 = vpop.f32.mrf.mxu0 }
 0x31c   : > { %v3216_v53 = vsel %vm1041_vm0, %v3118_v9, %v3120_v5  ;;  %v2603_v62 = vadd.f32 %v2411_v61, %v9921_v38  ;;  %v3121_v3 = vrot.slane %v2897_v29, 1 }
 0x31d   : > { %v2415_v55 = vpop.f32.mrf.mxu1  ;;  %v2901_v59 = vpop.f32.mrf.mxu0  ;;  %3458 = vmatmul.mubr.bf16.gmra.mxu1 %v6822_v63  ;;  %4120 = vmatmul.mubr.bf16.gmra.mxu0 %v6822_v63  ;;  %v8511_v43 = vadd.f32 %v3216_v53, %v2600_v51  ;;  %v6823_v63 = vld [vmem:[%s7058_s28 + $0x20] sm:$0xff]  }
 0x31e   : > { %v3122_v18 = vrot.slane %v2901_v59, 1  ;;  %3465 = vmatprep.mubr.bf16.mxu1 %v9874_v35  ;;  %4125 = vmatprep.mubr.bf16.mxu0 %v9874_v35  ;;  %v3217_v44 = vsel %vm1041_vm0, %v3119_v23, %v3121_v3 }
 0x31f   : > { %v2416_v14 = vpop.f32.mrf.mxu1  ;;  %v2903_v13 = vpop.f32.mrf.mxu0  ;;  %v8517_v6 = vadd.f32 %v3217_v44, %v2601_v39 }
 0x320   : > { %v3214_v49 = vsel %vm1041_vm0, %v3120_v5, %v3122_v18  ;;  %v3123_v22 = vrot.slane %v2903_v13, 1 }
 0x321   : > { %v2417_v9 = vpop.f32.mrf.mxu1  ;;  %v2905_v51 = vpop.f32.mrf.mxu0  ;;  %v8521_v61 = vadd.f32 %v3214_v49, %v2602_v60 }
 0x322   : > { %v3215_v29 = vsel %vm1041_vm0, %v3121_v3, %v3123_v22 }
 0x323   : > { %v2418_v53 = vpop.f32.mrf.mxu1  ;;  %v2906_v38 = vpop.f32.mrf.mxu0  ;;  %v8525_v55 = vadd.f32 %v3215_v29, %v2603_v62 }
 0x325   : > { %v2421_v23 = vpop.f32.mrf.mxu1  ;;  %v2909_v59 = vpop.f32.mrf.mxu0  ;;  %3466 = vmatmul.mubr.bf16.gmra.mxu1 %v6823_v63  ;;  %4126 = vmatmul.mubr.bf16.gmra.mxu0 %v6823_v63 }
 0x326   : > { %v2604_v39 = vadd.f32 %v2421_v23, %v8007_v37  ;;  %3475 = vmatprep.mubr.bf16.mxu1 %v9874_v35  ;;  %4135 = vmatprep.mubr.bf16.mxu0 %v9874_v35  ;;  %v3124_v62 = vrot.slane %v2909_v59, 1  ;;  %v6824_v23 = vld [vmem:[%s7058_s28 + $0x28] sm:$0xff]  }
 0x327   : > { %v2423_v60 = vpop.f32.mrf.mxu1  ;;  %v2911_v5 = vpop.f32.mrf.mxu0 }
 0x328   : > { %v2605_v3 = vadd.f32 %v2423_v60, %v8013_v21  ;;  %v3125_v9 = vrot.slane %v2911_v5, 1 }
 0x329   : > { %v2425_v18 = vpop.f32.mrf.mxu1  ;;  %v2913_v44 = vpop.f32.mrf.mxu0 }
 0x32a   : > { %v2606_v14 = vadd.f32 %v2425_v18, %v8017_v8  ;;  %v3126_v13 = vrot.slane %v2913_v44, 1 }
 0x32b   : > { %v2427_v49 = vpop.f32.mrf.mxu1  ;;  %v2915_v22 = vpop.f32.mrf.mxu0 }
 0x32c   : > { %v3212_v37 = vsel %vm1041_vm0, %v3124_v62, %v3126_v13  ;;  %v2607_v51 = vadd.f32 %v2427_v49, %v8021_v42  ;;  %v3127_v29 = vrot.slane %v2915_v22, 1 }
 0x32d   : > { %v2431_v53 = vpop.f32.mrf.mxu1  ;;  %v2919_v38 = vpop.f32.mrf.mxu0  ;;  %3476 = vmatmul.mubr.bf16.gmra.mxu1 %v6824_v23  ;;  %4136 = vmatmul.mubr.bf16.gmra.mxu0 %v6824_v23  ;;  %v8537_v21 = vadd.f32 %v3212_v37, %v2604_v39  ;;  %v6825_v23 = vld [vmem:[%s7058_s28 + $0x30] sm:$0xff]  }
 0x32e   : > { %v3128_v59 = vrot.slane %v2919_v38, 1  ;;  %3483 = vmatprep.mubr.bf16.mxu1 %v9874_v35  ;;  %4141 = vmatprep.mubr.bf16.mxu0 %v9874_v35  ;;  %v3213_v8 = vsel %vm1041_vm0, %v3125_v9, %v3127_v29 }
 0x32f   : > { %v2432_v63 = vpop.f32.mrf.mxu1  ;;  %v2921_v60 = vpop.f32.mrf.mxu0  ;;  %v8543_v42 = vadd.f32 %v3213_v8, %v2605_v3 }
 0x330   : > { %v3210_v5 = vsel %vm1041_vm0, %v3126_v13, %v3128_v59  ;;  %v3129_v18 = vrot.slane %v2921_v60, 1  ;;  %v6749_v63 = vld [vmem:[%s9850_s1 + $0x3a4] ss:$8 sps:$4 sm:$0xff]  }
 0x331   : > { %v2433_v44 = vpop.f32.mrf.mxu1  ;;  %v2923_v39 = vpop.f32.mrf.mxu0  ;;  %v8547_v62 = vadd.f32 %v3210_v5, %v2606_v14  ;;  %4553 = vmatprep.subr.bf16.mxu1 %v6749_v63 }
 0x332   : > { %v3211_v49 = vsel %vm1041_vm0, %v3127_v29, %v3129_v18 }
 0x333   : > { %v2434_v22 = vpop.f32.mrf.mxu1  ;;  %v2924_v37 = vpop.f32.mrf.mxu0  ;;  %v8551_v53 = vadd.f32 %v3211_v49, %v2607_v51  ;;  %v6747_v51 = vld [vmem:[%s9850_s1 + $0x3a0] ss:$8 sps:$4 sm:$0xff]  }
 0x334   : > { %4554 = vmatpush1.bf16.msra.mxu1 %v6747_v51 }
 0x335   : > { %v2437_v9 = vpop.f32.mrf.mxu1  ;;  %v2927_v38 = vpop.f32.mrf.mxu0  ;;  %3484 = vmatmul.mubr.bf16.gmra.mxu1 %v6825_v23  ;;  %4142 = vmatmul.mubr.bf16.gmra.mxu0 %v6825_v23  ;;  %v6826_v23 = vld [vmem:[%s7058_s28 + $0x38] sm:$0xff]  }
 0x336   : > { %v2608_v3 = vadd.f32 %v2437_v9, %v8033_v50  ;;  %3493 = vmatprep.mubr.bf16.mxu1 %v9874_v35  ;;  %4151 = vmatprep.mubr.bf16.mxu0 %v9874_v35  ;;  %v3130_v50 = vrot.slane %v2927_v38, 1 }
 0x337   : > { %v2439_v14 = vpop.f32.mrf.mxu1  ;;  %v2929_v13 = vpop.f32.mrf.mxu0 }
 0x338   : > { %v2609_v59 = vadd.f32 %v2439_v14, %v8039_v47  ;;  %v6752_v47 = vld [vmem:[%s9850_s1 + $0x424] ss:$8 sps:$4 sm:$0xff]   ;;  %v3131_v39 = vrot.slane %v2929_v13, 1 }
 0x339   : > { %v2441_v29 = vpop.f32.mrf.mxu1  ;;  %v2931_v8 = vpop.f32.mrf.mxu0  ;;  %5219 = vmatprep.subr.bf16.mxu0 %v6752_v47 }
 0x33a   : > { %v2610_v60 = vadd.f32 %v2441_v29, %v8043_v12  ;;  %v3132_v5 = vrot.slane %v2931_v8, 1  ;;  %v6750_v12 = vld [vmem:[%s9850_s1 + $0x420] ss:$8 sps:$4 sm:$0xff]  }
 0x33b   : > { %v2443_v18 = vpop.f32.mrf.mxu1  ;;  %v2933_v44 = vpop.f32.mrf.mxu0  ;;  %5220 = vmatpush1.bf16.msra.mxu0 %v6750_v12 }
 0x33c   : > { %v3208_v49 = vsel %vm1041_vm0, %v3130_v50, %v3132_v5  ;;  %v2611_v22 = vadd.f32 %v2443_v18, %v8047_v58  ;;  %v3133_v37 = vrot.slane %v2933_v44, 1 }
 0x33d   : > { %v2447_v9 = vpop.f32.mrf.mxu1  ;;  %v2937_v38 = vpop.f32.mrf.mxu0  ;;  %3494 = vmatmul.mubr.bf16.gmra.mxu1 %v6826_v23  ;;  %4152 = vmatmul.mubr.bf16.gmra.mxu0 %v6826_v23  ;;  %v8575_v14 = vadd.f32 %v3208_v49, %v2608_v3 }
 0x33e   : > { %v3134_v29 = vrot.slane %v2937_v38, 1  ;;  %3501 = vmatprep.mubr.bf16.mxu1 %v9874_v35  ;;  %4157 = vmatprep.mubr.bf16.mxu0 %v9874_v35  ;;  %v3209_v58 = vsel %vm1041_vm0, %v3131_v39, %v3133_v37 }
 0x33f   : > { %v2448_v13 = vpop.f32.mrf.mxu1  ;;  %v2939_v8 = vpop.f32.mrf.mxu0  ;;  %v8581_v51 = vadd.f32 %v3209_v58, %v2609_v59  ;;  %v6827_v59 = vld [vmem:[%s7058_s28 + $0x40] sm:$0xff]  }
 0x340   : > { %v3206_v63 = vsel %vm1041_vm0, %v3132_v5, %v3134_v29  ;;  %v3135_v50 = vrot.slane %v2939_v8, 1 }
 0x341   : > { %v2449_v3 = vpop.f32.mrf.mxu1  ;;  %v2941_v18 = vpop.f32.mrf.mxu0  ;;  %v8585_v44 = vadd.f32 %v3206_v63, %v2610_v60 }
 0x342   : > { %v3207_v49 = vsel %vm1041_vm0, %v3133_v37, %v3135_v50 }
 0x343   : > { %v2450_v9 = vpop.f32.mrf.mxu1  ;;  %v2942_v39 = vpop.f32.mrf.mxu0  ;;  %v8589_v38 = vadd.f32 %v3207_v49, %v2611_v22 }
 0x345   : > { %v2453_v23 = vpop.f32.mrf.mxu1  ;;  %v2945_v47 = vpop.f32.mrf.mxu0  ;;  %3502 = vmatmul.mubr.bf16.gmra.mxu1 %v6827_v59  ;;  %4158 = vmatmul.mubr.bf16.gmra.mxu0 %v6827_v59 }
 0x346   : > { %v2612_v5 = vadd.f32 %v2453_v23, %v8071_v4  ;;  %3511 = vmatprep.mubr.bf16.mxu1 %v9874_v35  ;;  %4167 = vmatprep.mubr.bf16.mxu0 %v9874_v35  ;;  %v3136_v22 = vrot.slane %v2945_v47, 1  ;;  %v6828_v23 = vld [vmem:[%s7058_s28 + $0x48] sm:$0xff]  }
 0x347   : > { %v2455_v60 = vpop.f32.mrf.mxu1  ;;  %v2947_v12 = vpop.f32.mrf.mxu0 }
 0x348   : > { %v2613_v37 = vadd.f32 %v2455_v60, %v8077_v57  ;;  %v3137_v3 = vrot.slane %v2947_v12, 1 }
 0x349   : > { %v2457_v29 = vpop.f32.mrf.mxu1  ;;  %v2949_v58 = vpop.f32.mrf.mxu0 }
 0x34a   : > { %v2614_v13 = vadd.f32 %v2457_v29, %v8081_v33  ;;  %v3138_v8 = vrot.slane %v2949_v58, 1 }
 0x34b   : > { %v2459_v63 = vpop.f32.mrf.mxu1  ;;  %v2951_v50 = vpop.f32.mrf.mxu0 }
 0x34c   : > { %v3204_v4 = vsel %vm1041_vm0, %v3136_v22, %v3138_v8  ;;  %v2615_v18 = vadd.f32 %v2459_v63, %v8085_v36  ;;  %v3139_v49 = vrot.slane %v2951_v50, 1 }
 0x34d   : > { %v2463_v9 = vpop.f32.mrf.mxu1  ;;  %v2955_v39 = vpop.f32.mrf.mxu0  ;;  %3512 = vmatmul.mubr.bf16.gmra.mxu1 %v6828_v23  ;;  %4168 = vmatmul.mubr.bf16.gmra.mxu0 %v6828_v23  ;;  %v8601_v57 = vadd.f32 %v3204_v4, %v2612_v5  ;;  %v6829_v23 = vld [vmem:[%s7058_s28 + $0x50] sm:$0xff]  }
 0x34e   : > { %v3140_v47 = vrot.slane %v2955_v39, 1  ;;  %3519 = vmatprep.mubr.bf16.mxu1 %v9874_v35  ;;  %4173 = vmatprep.mubr.bf16.mxu0 %v9874_v35  ;;  %v3205_v33 = vsel %vm1041_vm0, %v3137_v3, %v3139_v49 }
 0x34f   : > { %v2464_v59 = vpop.f32.mrf.mxu1  ;;  %v2957_v60 = vpop.f32.mrf.mxu0  ;;  %v8607_v36 = vadd.f32 %v3205_v33, %v2613_v37 }
 0x350   : > { %v3202_v12 = vsel %vm1041_vm0, %v3138_v8, %v3140_v47  ;;  %v3141_v29 = vrot.slane %v2957_v60, 1  ;;  %v9925_v47 = vld [vmem:[#allocation26_spill] sm:$0xff]  ;;  %v9926_v60 = vld [vmem:[#allocation27_spill] sm:$0xff] }
 0x351   : > { %9922 = vst [vmem:[#allocation22_spill] sm:$0xff] %v8607_v36  ;;  %v2465_v58 = vpop.f32.mrf.mxu1  ;;  %v2959_v5 = vpop.f32.mrf.mxu0  ;;  %v8611_v22 = vadd.f32 %v3202_v12, %v2614_v13  ;;  %v6836_v36 = vld [vmem:[%s7058_s28 + $0x88] sm:$0xff]  }
 0x352   : > { %v3203_v63 = vsel %vm1041_vm0, %v3139_v49, %v3141_v29 }
 0x353   : > { %9923 = vst [vmem:[#allocation23_spill] sm:$0xff] %v8611_v22  ;;  %v2466_v50 = vpop.f32.mrf.mxu1  ;;  %v2960_v4 = vpop.f32.mrf.mxu0  ;;  %v8615_v9 = vadd.f32 %v3203_v63, %v2615_v18  ;;  %v6830_v22 = vld [vmem:[%s7058_s28 + $0x58] sm:$0xff]  }
 0x354   : > { %v9927_v50 = vld [vmem:[#allocation28_spill] sm:$0xff] }
 0x355   : > { %9924 = vst [vmem:[#allocation24_spill] sm:$0xff] %v8615_v9  ;;  %v2469_v3 = vpop.f32.mrf.mxu1  ;;  %v2963_v39 = vpop.f32.mrf.mxu0  ;;  %3520 = vmatmul.mubr.bf16.gmra.mxu1 %v6829_v23  ;;  %4174 = vmatmul.mubr.bf16.gmra.mxu0 %v6829_v23 }
 0x356   : > { %v2616_v37 = vadd.f32 %v2469_v3, %v8097_v54  ;;  %3529 = vmatprep.mubr.bf16.mxu1 %v9874_v35  ;;  %4183 = vmatprep.mubr.bf16.mxu0 %v9874_v35  ;;  %v3142_v18 = vrot.slane %v2963_v39, 1 }
 0x357   : > { %v2471_v13 = vpop.f32.mrf.mxu1  ;;  %v2965_v8 = vpop.f32.mrf.mxu0 }
 0x358   : > { %v2617_v49 = vadd.f32 %v2471_v13, %v9925_v47  ;;  %v3143_v63 = vrot.slane %v2965_v8, 1  ;;  %v6753_v8 = vld [vmem:[%s9850_s1 + $0x390] ss:$8 sps:$4 sm:$0xff]   ;;  %v6755_v47 = vld [vmem:[%s9850_s1 + $0x394] ss:$8 sps:$4 sm:$0xff]  }
 0x359   : > { %v2473_v33 = vpop.f32.mrf.mxu1  ;;  %v2967_v59 = vpop.f32.mrf.mxu0  ;;  %4555 = vmatprep.subr.bf16.mxu1 %v6755_v47 }
 0x35a   : > { %v2618_v12 = vadd.f32 %v2473_v33, %v9926_v60  ;;  %v3144_v29 = vrot.slane %v2967_v59, 1  ;;  %v6756_v60 = vld [vmem:[%s9850_s1 + $0x410] ss:$8 sps:$4 sm:$0xff]   ;;  %4556 = vmatpush1.bf16.msra.mxu1 %v6753_v8  ;;  %v9933_v8 = vld [vmem:[#allocation6_spill] sm:$0xff] }
 0x35b   : > { %v2475_v58 = vpop.f32.mrf.mxu1  ;;  %v2969_v5 = vpop.f32.mrf.mxu0 }
 0x35c   : > { %v3200_v54 = vsel %vm1041_vm0, %v3142_v18, %v3144_v29  ;;  %v2619_v4 = vadd.f32 %v2475_v58, %v9927_v50  ;;  %v3145_v3 = vrot.slane %v2969_v5, 1  ;;  %v6758_v58 = vld [vmem:[%s9850_s1 + $0x414] ss:$8 sps:$4 sm:$0xff]  }
 0x35d   : > { %v2479_v23 = vpop.f32.mrf.mxu1  ;;  %v2973_v9 = vpop.f32.mrf.mxu0  ;;  %3530 = vmatmul.mubr.bf16.gmra.mxu1 %v6830_v22  ;;  %4184 = vmatmul.mubr.bf16.gmra.mxu0 %v6830_v22  ;;  %v8627_v13 = vadd.f32 %v3200_v54, %v2616_v37 }
 0x35e   : > { %v3146_v39 = vrot.slane %v2973_v9, 1  ;;  %3537 = vmatprep.mubr.bf16.mxu1 %v9874_v35  ;;  %4189 = vmatprep.mubr.bf16.mxu0 %v9874_v35  ;;  %v3201_v33 = vsel %vm1041_vm0, %v3143_v63, %v3145_v3 }
 0x35f   : > { %9928 = vst [vmem:[#allocation25_spill] sm:$0xff] %v8627_v13  ;;  %v2480_v59 = vpop.f32.mrf.mxu1  ;;  %v2975_v22 = vpop.f32.mrf.mxu0  ;;  %v8639_v37 = vadd.f32 %v3201_v33, %v2617_v49  ;;  %5221 = vmatprep.subr.bf16.mxu0 %v6758_v58  ;;  %v6831_v33 = vld [vmem:[%s7058_s28 + $0x60] sm:$0xff]   ;;  %v9934_v58 = vld [vmem:[#allocation7_spill] sm:$0xff]  ;;  %v6832_v13 = vld [vmem:[%s7058_s28 + $0x68] sm:$0xff]  }
 0x360   : > { %v3198_v9 = vsel %vm1041_vm0, %v3144_v29, %v3146_v39  ;;  %v3147_v18 = vrot.slane %v2975_v22, 1  ;;  %5222 = vmatpush1.bf16.msra.mxu0 %v6756_v60  ;;  %v9932_v59 = vld [vmem:[#allocation5_spill] sm:$0xff] }
 0x361   : > { %9929 = vst [vmem:[#allocation26_spill] sm:$0xff] %v8639_v37  ;;  %v2481_v5 = vpop.f32.mrf.mxu1  ;;  %v2977_v63 = vpop.f32.mrf.mxu0  ;;  %v8649_v54 = vadd.f32 %v3198_v9, %v2618_v12 }
 0x362   : > { %v3199_v49 = vsel %vm1041_vm0, %v3145_v3, %v3147_v18 }
 0x363   : > { %9930 = vst [vmem:[#allocation27_spill] sm:$0xff] %v8649_v54  ;;  %v2482_v29 = vpop.f32.mrf.mxu1  ;;  %v2978_v50 = vpop.f32.mrf.mxu0  ;;  %v8653_v23 = vadd.f32 %v3199_v49, %v2619_v4 }
 0x365   : > { %9931 = vst [vmem:[#allocation28_spill] sm:$0xff] %v8653_v23  ;;  %v2485_v39 = vpop.f32.mrf.mxu1  ;;  %v2981_v47 = vpop.f32.mrf.mxu0  ;;  %3538 = vmatmul.mubr.bf16.gmra.mxu1 %v6831_v33  ;;  %4190 = vmatmul.mubr.bf16.gmra.mxu0 %v6831_v33  ;;  %v9935_v33 = vld [vmem:[#allocation29_spill] sm:$0xff] }
 0x366   : > { %v2620_v22 = vadd.f32 %v2485_v39, %v9932_v59  ;;  %3547 = vmatprep.mubr.bf16.mxu1 %v9874_v35  ;;  %4199 = vmatprep.mubr.bf16.mxu0 %v9874_v35  ;;  %v3148_v4 = vrot.slane %v2981_v47, 1 }
 0x367   : > { %v2487_v12 = vpop.f32.mrf.mxu1  ;;  %v2983_v3 = vpop.f32.mrf.mxu0 }
 0x368   : > { %v2621_v9 = vadd.f32 %v2487_v12, %v9933_v8  ;;  %v3149_v50 = vrot.slane %v2983_v3, 1 }
 0x369   : > { %v2489_v18 = vpop.f32.mrf.mxu1  ;;  %v2985_v60 = vpop.f32.mrf.mxu0 }
 0x36a   : > { %v2622_v5 = vadd.f32 %v2489_v18, %v9934_v58  ;;  %v3150_v63 = vrot.slane %v2985_v60, 1 }
 0x36b   : > { %v2491_v49 = vpop.f32.mrf.mxu1  ;;  %v2987_v29 = vpop.f32.mrf.mxu0 }
 0x36c   : > { %v3196_v39 = vsel %vm1041_vm0, %v3148_v4, %v3150_v63  ;;  %v2623_v59 = vadd.f32 %v2491_v49, %v9935_v33  ;;  %v3151_v23 = vrot.slane %v2987_v29, 1 }
 0x36d   : > { %v2495_v54 = vpop.f32.mrf.mxu1  ;;  %v2991_v37 = vpop.f32.mrf.mxu0  ;;  %3548 = vmatmul.mubr.bf16.gmra.mxu1 %v6832_v13  ;;  %4200 = vmatmul.mubr.bf16.gmra.mxu0 %v6832_v13  ;;  %v8665_v12 = vadd.f32 %v3196_v39, %v2620_v22 }
 0x36e   : > { %v3152_v47 = vrot.slane %v2991_v37, 1  ;;  %3555 = vmatprep.mubr.bf16.mxu1 %v9874_v35  ;;  %4205 = vmatprep.mubr.bf16.mxu0 %v9874_v35  ;;  %v3197_v3 = vsel %vm1041_vm0, %v3149_v50, %v3151_v23 }
 0x36f   : > { %9936 = vst [vmem:[#allocation5_spill] sm:$0xff] %v8665_v12  ;;  %v2496_v8 = vpop.f32.mrf.mxu1  ;;  %v2993_v18 = vpop.f32.mrf.mxu0  ;;  %v8671_v60 = vadd.f32 %v3197_v3, %v2621_v9  ;;  %v9940_v9 = vld [vmem:[#allocation8_spill] sm:$0xff] }
 0x370   : > { %v3194_v54 = vsel %vm1041_vm0, %v3150_v63, %v3152_v47  ;;  %v3153_v4 = vrot.slane %v2993_v18, 1  ;;  %v6833_v8 = vld [vmem:[%s7058_s28 + $0x70] sm:$0xff]   ;;  %v9941_v47 = vld [vmem:[#allocation9_spill] sm:$0xff]  ;;  %v6834_v12 = vld [vmem:[%s7058_s28 + $0x78] sm:$0xff]  }
 0x371   : > { %9937 = vst [vmem:[#allocation6_spill] sm:$0xff] %v8671_v60  ;;  %v2497_v13 = vpop.f32.mrf.mxu1  ;;  %v2995_v22 = vpop.f32.mrf.mxu0  ;;  %v8675_v58 = vadd.f32 %v3194_v54, %v2622_v5 }
 0x372   : > { %v3195_v37 = vsel %vm1041_vm0, %v3151_v23, %v3153_v4  ;;  %v9942_v4 = vld [vmem:[#allocation10_spill] sm:$0xff] }
 0x373   : > { %9938 = vst [vmem:[#allocation7_spill] sm:$0xff] %v8675_v58  ;;  %v2498_v49 = vpop.f32.mrf.mxu1  ;;  %v2996_v29 = vpop.f32.mrf.mxu0  ;;  %v8679_v39 = vadd.f32 %v3195_v37, %v2623_v59 }
 0x375   : > { %9939 = vst [vmem:[#allocation29_spill] sm:$0xff] %v8679_v39  ;;  %v2501_v50 = vpop.f32.mrf.mxu1  ;;  %v2999_v33 = vpop.f32.mrf.mxu0  ;;  %3556 = vmatmul.mubr.bf16.gmra.mxu1 %v6833_v8  ;;  %4206 = vmatmul.mubr.bf16.gmra.mxu0 %v6833_v8  ;;  %v9943_v8 = vld [vmem:[#allocation11_spill] sm:$0xff] }
 0x376   : > { %v2624_v3 = vadd.f32 %v2501_v50, %v9940_v9  ;;  %3565 = vmatprep.mubr.bf16.mxu1 %v9874_v35  ;;  %4215 = vmatprep.mubr.bf16.mxu0 %v9874_v35  ;;  %v3154_v59 = vrot.slane %v2999_v33, 1 }
 0x377   : > { %v2503_v5 = vpop.f32.mrf.mxu1  ;;  %v3001_v63 = vpop.f32.mrf.mxu0 }
 0x378   : > { %v2625_v23 = vadd.f32 %v2503_v5, %v9941_v47  ;;  %v3155_v29 = vrot.slane %v3001_v63, 1 }
 0x379   : > { %v2505_v18 = vpop.f32.mrf.mxu1  ;;  %v3003_v54 = vpop.f32.mrf.mxu0 }
 0x37a   : > { %v2626_v13 = vadd.f32 %v2505_v18, %v9942_v4  ;;  %v3156_v22 = vrot.slane %v3003_v54, 1  ;;  %v6761_v4 = vld [vmem:[%s9850_s1 + $0x384] ss:$8 sps:$4 sm:$0xff]  }
 0x37b   : > { %v2507_v37 = vpop.f32.mrf.mxu1  ;;  %v3005_v49 = vpop.f32.mrf.mxu0  ;;  %4557 = vmatprep.subr.bf16.mxu1 %v6761_v4  ;;  %v9950_v4 = vld [vmem:[#allocation14_spill] sm:$0xff] }
 0x37c   : > { %v3192_v50 = vsel %vm1041_vm0, %v3154_v59, %v3156_v22  ;;  %v2627_v9 = vadd.f32 %v2507_v37, %v9943_v8  ;;  %v3157_v39 = vrot.slane %v3005_v49, 1  ;;  %v6762_v8 = vld [vmem:[%s9850_s1 + $0x400] ss:$8 sps:$4 sm:$0xff]  }
 0x37d   : > { %v2511_v58 = vpop.f32.mrf.mxu1  ;;  %v3009_v60 = vpop.f32.mrf.mxu0  ;;  %3566 = vmatmul.mubr.bf16.gmra.mxu1 %v6834_v12  ;;  %4216 = vmatmul.mubr.bf16.gmra.mxu0 %v6834_v12  ;;  %v8691_v5 = vadd.f32 %v3192_v50, %v2624_v3 }
 0x37e   : > { %v3158_v33 = vrot.slane %v3009_v60, 1  ;;  %3573 = vmatprep.mubr.bf16.mxu1 %v9874_v35  ;;  %4221 = vmatprep.mubr.bf16.mxu0 %v9874_v35  ;;  %v3193_v63 = vsel %vm1041_vm0, %v3155_v29, %v3157_v39  ;;  %v6759_v60 = vld [vmem:[%s9850_s1 + $0x380] ss:$8 sps:$4 sm:$0xff]  }
 0x37f   : > { %9944 = vst [vmem:[#allocation8_spill] sm:$0xff] %v8691_v5  ;;  %v2512_v47 = vpop.f32.mrf.mxu1  ;;  %v3011_v18 = vpop.f32.mrf.mxu0  ;;  %v8697_v54 = vadd.f32 %v3193_v63, %v2625_v23  ;;  %4558 = vmatpush1.bf16.msra.mxu1 %v6759_v60  ;;  %v6835_v63 = vld [vmem:[%s7058_s28 + $0x80] sm:$0xff]  }
 0x380   : > { %v3190_v58 = vsel %vm1041_vm0, %v3156_v22, %v3158_v33  ;;  %v3159_v59 = vrot.slane %v3011_v18, 1  ;;  %v6764_v22 = vld [vmem:[%s9850_s1 + $0x404] ss:$8 sps:$4 sm:$0xff]  }
 0x381   : > { %9945 = vst [vmem:[#allocation9_spill] sm:$0xff] %v8697_v54  ;;  %v2513_v12 = vpop.f32.mrf.mxu1  ;;  %v3013_v3 = vpop.f32.mrf.mxu0  ;;  %v8707_v37 = vadd.f32 %v3190_v58, %v2626_v13  ;;  %5223 = vmatprep.subr.bf16.mxu0 %v6764_v22 }
 0x382   : > { %v3191_v23 = vsel %vm1041_vm0, %v3157_v39, %v3159_v59  ;;  %v9948_v39 = vld [vmem:[#allocation12_spill] sm:$0xff]  ;;  %5224 = vmatpush1.bf16.msra.mxu0 %v6762_v8 }
 0x383   : > { %9946 = vst [vmem:[#allocation10_spill] sm:$0xff] %v8707_v37  ;;  %v2514_v49 = vpop.f32.mrf.mxu1  ;;  %v3014_v29 = vpop.f32.mrf.mxu0  ;;  %v8714_v50 = vadd.f32 %v3191_v23, %v2627_v9  ;;  %v9949_v9 = vld [vmem:[#allocation13_spill] sm:$0xff] }
 0x385   : > { %9947 = vst [vmem:[#allocation11_spill] sm:$0xff] %v8714_v50  ;;  %v2517_v33 = vpop.f32.mrf.mxu1  ;;  %v3017_v13 = vpop.f32.mrf.mxu0  ;;  %3574 = vmatmul.mubr.bf16.gmra.mxu1 %v6835_v63  ;;  %4222 = vmatmul.mubr.bf16.gmra.mxu0 %v6835_v63  ;;  %v9951_v50 = vld [vmem:[#allocation15_spill] sm:$0xff] }
 0x386   : > { %v2628_v47 = vadd.f32 %v2517_v33, %v9948_v39  ;;  %3583 = vmatprep.mubr.bf16.mxu1 %v9874_v35  ;;  %4231 = vmatprep.mubr.bf16.mxu0 %v9874_v35  ;;  %v3160_v60 = vrot.slane %v3017_v13, 1 }
 0x387   : > { %v2519_v18 = vpop.f32.mrf.mxu1  ;;  %v3019_v58 = vpop.f32.mrf.mxu0 }
 0x388   : > { %v2629_v59 = vadd.f32 %v2519_v18, %v9949_v9  ;;  %v3161_v33 = vrot.slane %v3019_v58, 1 }
 0x389   : > { %v2521_v12 = vpop.f32.mrf.mxu1  ;;  %v3021_v3 = vpop.f32.mrf.mxu0 }
 0x38a   : > { %v2630_v23 = vadd.f32 %v2521_v12, %v9950_v4  ;;  %v3162_v49 = vrot.slane %v3021_v3, 1 }
 0x38b   : > { %v2523_v29 = vpop.f32.mrf.mxu1  ;;  %v3023_v63 = vpop.f32.mrf.mxu0 }
 0x38c   : > { %v3188_v39 = vsel %vm1041_vm0, %v3160_v60, %v3162_v49  ;;  %v2631_v37 = vadd.f32 %v2523_v29, %v9951_v50  ;;  %v3163_v54 = vrot.slane %v3023_v63, 1 }
 0x38d   : > { %v2527_v22 = vpop.f32.mrf.mxu1  ;;  %v3027_v5 = vpop.f32.mrf.mxu0  ;;  %3584 = vmatmul.mubr.bf16.gmra.mxu1 %v6836_v36  ;;  %4232 = vmatmul.mubr.bf16.gmra.mxu0 %v6836_v36  ;;  %v8729_v8 = vadd.f32 %v3188_v39, %v2628_v47 }
 0x38e   : > { %v3164_v13 = vrot.slane %v3027_v5, 1  ;;  %3591 = vmatprep.mubr.bf16.mxu1 %v9874_v35  ;;  %4237 = vmatprep.mubr.bf16.mxu0 %v9874_v35  ;;  %v3189_v18 = vsel %vm1041_vm0, %v3161_v33, %v3163_v54  ;;  %v6837_v22 = vld [vmem:[%s7058_s28 + $0x90] sm:$0xff]  }
 0x38f   : > { %v2528_v58 = vpop.f32.mrf.mxu1  ;;  %v3029_v9 = vpop.f32.mrf.mxu0  ;;  %v8735_v50 = vadd.f32 %v3189_v18, %v2629_v59 }
 0x390   : > { %v3186_v12 = vsel %vm1041_vm0, %v3162_v49, %v3164_v13  ;;  %v3165_v3 = vrot.slane %v3029_v9, 1  ;;  %v9954_v13 = vld [vmem:[#allocation16_spill] sm:$0xff]  ;;  %v9955_v9 = vld [vmem:[#allocation17_spill] sm:$0xff] }
 0x391   : > { %v2529_v36 = vpop.f32.mrf.mxu1  ;;  %v3031_v47 = vpop.f32.mrf.mxu0  ;;  %v8739_v60 = vadd.f32 %v3186_v12, %v2630_v23 }
 0x392   : > { %v3187_v5 = vsel %vm1041_vm0, %v3163_v54, %v3165_v3 }
 0x393   : > { %9952 = vst [vmem:[#allocation12_spill] sm:$0xff] %v8739_v60  ;;  %v2530_v4 = vpop.f32.mrf.mxu1  ;;  %v3032_v29 = vpop.f32.mrf.mxu0  ;;  %v8743_v63 = vadd.f32 %v3187_v5, %v2631_v37  ;;  %v6838_v60 = vld [vmem:[%s7058_s28 + $0x98] sm:$0xff]  }
 0x394   : > { %v9956_v4 = vld [vmem:[#allocation18_spill] sm:$0xff] }
 0x395   : > { %9953 = vst [vmem:[#allocation13_spill] sm:$0xff] %v8743_v63  ;;  %v2533_v33 = vpop.f32.mrf.mxu1  ;;  %v3035_v39 = vpop.f32.mrf.mxu0  ;;  %3592 = vmatmul.mubr.bf16.gmra.mxu1 %v6837_v22  ;;  %4238 = vmatmul.mubr.bf16.gmra.mxu0 %v6837_v22 }
 0x396   : > { %v2632_v59 = vadd.f32 %v2533_v33, %v8225_v30  ;;  %3601 = vmatprep.mubr.bf16.mxu1 %v9874_v35  ;;  %4247 = vmatprep.mubr.bf16.mxu0 %v9874_v35  ;;  %v3166_v37 = vrot.slane %v3035_v39, 1 }
 0x397   : > { %v2535_v23 = vpop.f32.mrf.mxu1  ;;  %v3037_v49 = vpop.f32.mrf.mxu0 }
 0x398   : > { %v2633_v54 = vadd.f32 %v2535_v23, %v9954_v13  ;;  %v3167_v5 = vrot.slane %v3037_v49, 1 }
 0x399   : > { %v2537_v18 = vpop.f32.mrf.mxu1  ;;  %v3039_v58 = vpop.f32.mrf.mxu0 }
 0x39a   : > { %v2634_v12 = vadd.f32 %v2537_v18, %v9955_v9  ;;  %v3168_v3 = vrot.slane %v3039_v58, 1 }
 0x39b   : > { %v2539_v36 = vpop.f32.mrf.mxu1  ;;  %v3041_v47 = vpop.f32.mrf.mxu0 }
 0x39c   : > { %v3184_v30 = vsel %vm1041_vm0, %v3166_v37, %v3168_v3  ;;  %v2635_v29 = vadd.f32 %v2539_v36, %v9956_v4  ;;  %v3169_v33 = vrot.slane %v3041_v47, 1 }
 0x39d   : > { %v2543_v22 = vpop.f32.mrf.mxu1  ;;  %v3045_v63 = vpop.f32.mrf.mxu0  ;;  %3602 = vmatmul.mubr.bf16.gmra.mxu1 %v6838_v60  ;;  %4248 = vmatmul.mubr.bf16.gmra.mxu0 %v6838_v60  ;;  %v8755_v23 = vadd.f32 %v3184_v30, %v2632_v59 }
 0x39e   : > { %v3170_v39 = vrot.slane %v3045_v63, 1  ;;  %3609 = vmatprep.mubr.bf16.mxu1 %v9874_v35  ;;  %4253 = vmatprep.mubr.bf16.mxu0 %v9874_v35  ;;  %v3185_v49 = vsel %vm1041_vm0, %v3167_v5, %v3169_v33 }
 0x39f   : > { %v2544_v13 = vpop.f32.mrf.mxu1  ;;  %v3047_v18 = vpop.f32.mrf.mxu0  ;;  %v8761_v58 = vadd.f32 %v3185_v49, %v2633_v54 }
 0x3a0   : > { %v3182_v37 = vsel %vm1041_vm0, %v3168_v3, %v3170_v39  ;;  %v3171_v9 = vrot.slane %v3047_v18, 1  ;;  %v6839_v13 = vld [vmem:[%s7058_s28 + $0xa0] sm:$0xff]  }
 0x3a1   : > { %v2545_v60 = vpop.f32.mrf.mxu1  ;;  %v3049_v59 = vpop.f32.mrf.mxu0  ;;  %v8765_v36 = vadd.f32 %v3182_v37, %v2634_v12 }
 0x3a2   : > { %v3183_v63 = vsel %vm1041_vm0, %v3169_v33, %v3171_v9 }
 0x3a3   : > { %v2546_v47 = vpop.f32.mrf.mxu1  ;;  %v3050_v30 = vpop.f32.mrf.mxu0  ;;  %v8769_v4 = vadd.f32 %v3183_v63, %v2635_v29  ;;  %v9958_v63 = vld [vmem:[#allocation19_spill] sm:$0xff] }
 0x3a5   : > { %9957 = vst [vmem:[#allocation14_spill] sm:$0xff] %v8769_v4  ;;  %v2549_v5 = vpop.f32.mrf.mxu1  ;;  %v3053_v22 = vpop.f32.mrf.mxu0  ;;  %3610 = vmatmul.mubr.bf16.gmra.mxu1 %v6839_v13  ;;  %4254 = vmatmul.mubr.bf16.gmra.mxu0 %v6839_v13  ;;  %v6840_v4 = vld [vmem:[%s7058_s28 + $0xa8] sm:$0xff]  }
 0x3a6   : > { %v2636_v54 = vadd.f32 %v2549_v5, %v8251_v27  ;;  %3619 = vmatprep.mubr.bf16.mxu1 %v9874_v35  ;;  %4263 = vmatprep.mubr.bf16.mxu0 %v9874_v35  ;;  %v3172_v29 = vrot.slane %v3053_v22, 1 }
 0x3a7   : > { %v2551_v12 = vpop.f32.mrf.mxu1  ;;  %v3055_v3 = vpop.f32.mrf.mxu0 }
 0x3a8   : > { %v2637_v33 = vadd.f32 %v2551_v12, %v8257_v15  ;;  %v3173_v59 = vrot.slane %v3055_v3, 1 }
 0x3a9   : > { %v2553_v39 = vpop.f32.mrf.mxu1  ;;  %v3057_v49 = vpop.f32.mrf.mxu0 }
 0x3aa   : > { %v2638_v18 = vadd.f32 %v2553_v39, %v8261_v25  ;;  %v3174_v37 = vrot.slane %v3057_v49, 1 }
 0x3ab   : > { %v2555_v9 = vpop.f32.mrf.mxu1  ;;  %v3059_v60 = vpop.f32.mrf.mxu0 }
 0x3ac   : > { %v3180_v27 = vsel %vm1041_vm0, %v3172_v29, %v3174_v37  ;;  %v2639_v47 = vadd.f32 %v2555_v9, %v9958_v63  ;;  %v3175_v30 = vrot.slane %v3059_v60, 1 }
 0x3ad   : > { %v2559_v5 = vpop.f32.mrf.mxu1  ;;  %v3063_v13 = vpop.f32.mrf.mxu0  ;;  %3620 = vmatmul.mubr.bf16.gmra.mxu1 %v6840_v4  ;;  %4264 = vmatmul.mubr.bf16.gmra.mxu0 %v6840_v4  ;;  %v8781_v15 = vadd.f32 %v3180_v27, %v2636_v54 }
 0x3ae   : > { %v3176_v22 = vrot.slane %v3063_v13, 1  ;;  %3627 = vmatprep.mubr.bf16.mxu1 %v9874_v35  ;;  %4269 = vmatprep.mubr.bf16.mxu0 %v9874_v35  ;;  %v3181_v25 = vsel %vm1041_vm0, %v3173_v59, %v3175_v30 }
 0x3af   : > { %v2560_v12 = vpop.f32.mrf.mxu1  ;;  %v3065_v3 = vpop.f32.mrf.mxu0  ;;  %v8787_v39 = vadd.f32 %v3181_v25, %v2637_v33  ;;  %v6841_v33 = vld [vmem:[%s7058_s28 + $0xb0] sm:$0xff]  }
 0x3b0   : > { %v3178_v49 = vsel %vm1041_vm0, %v3174_v37, %v3176_v22  ;;  %v3177_v29 = vrot.slane %v3065_v3, 1 }
 0x3b1   : > { %v2561_v4 = vpop.f32.mrf.mxu1  ;;  %v3067_v54 = vpop.f32.mrf.mxu0  ;;  %v8791_v9 = vadd.f32 %v3178_v49, %v2638_v18  ;;  %v6842_v49 = vld [vmem:[%s7058_s28 + $0xb8] sm:$0xff]  }
 0x3b2   : > { %v3179_v60 = vsel %vm1041_vm0, %v3175_v30, %v3177_v29 }
 0x3b3   : > { %v2562_v27 = vpop.f32.mrf.mxu1  ;;  %v3068_v63 = vpop.f32.mrf.mxu0  ;;  %v8795_v5 = vadd.f32 %v3179_v60, %v2639_v47 }
 0x3b5   : > { %v2565_v59 = vpop.f32.mrf.mxu1  ;;  %v3071_v13 = vpop.f32.mrf.mxu0  ;;  %3628 = vmatmul.mubr.bf16.gmra.mxu1 %v6841_v33  ;;  %4270 = vmatmul.mubr.bf16.gmra.mxu0 %v6841_v33 }
 0x3b6   : > { %3637 = vmatprep.mubr.bf16.mxu1 %v9874_v35  ;;  %4279 = vmatprep.mubr.bf16.mxu0 %v9874_v35  ;;  %v6843_v13 = vld [vmem:[%s7058_s28 + $0xc0] sm:$0xff]  }
 0x3b7   : > { %v2566_v37 = vpop.f32.mrf.mxu1  ;;  %v3072_v18 = vpop.f32.mrf.mxu0 }
 0x3b9   : > { %v2567_v22 = vpop.f32.mrf.mxu1  ;;  %v3073_v25 = vpop.f32.mrf.mxu0 }
 0x3bb   : > { %v2568_v12 = vpop.f32.mrf.mxu1  ;;  %v3074_v30 = vpop.f32.mrf.mxu0 }
 0x3bd   : > { %v2571_v3 = vpop.f32.mrf.mxu1  ;;  %v3077_v47 = vpop.f32.mrf.mxu0  ;;  %3638 = vmatmul.mubr.bf16.gmra.mxu1 %v6842_v49  ;;  %4280 = vmatmul.mubr.bf16.gmra.mxu0 %v6842_v49 }
 0x3be   : > { %3645 = vmatprep.mubr.bf16.mxu1 %v9874_v35  ;;  %4285 = vmatprep.mubr.bf16.mxu0 %v9874_v35  ;;  %v6844_v47 = vld [vmem:[%s7058_s28 + $0xc8] sm:$0xff]  }
 0x3bf   : > { %v2572_v29 = vpop.f32.mrf.mxu1  ;;  %v3078_v4 = vpop.f32.mrf.mxu0 }
 0x3c1   : > { %v2573_v54 = vpop.f32.mrf.mxu1  ;;  %v3079_v60 = vpop.f32.mrf.mxu0 }
 0x3c3   : > { %v2574_v27 = vpop.f32.mrf.mxu1  ;;  %v3080_v63 = vpop.f32.mrf.mxu0 }
 0x3c5   : > { %v3437_v59 = vpop.f32.mrf.mxu1  ;;  %3646 = vmatmul.mubr.bf16.gmra.mxu1 %v6843_v13  ;;  %v4103_v33 = vpop.f32.mrf.mxu0  ;;  %4286 = vmatmul.mubr.bf16.gmra.mxu0 %v6843_v13  ;;  %v6845_v13 = vld [vmem:[%s7058_s28 + $0xd0] sm:$0xff]  }
 0x3c6   : > { %3655 = vmatprep.mubr.bf16.mxu1 %v9874_v35  ;;  %4295 = vmatprep.mubr.bf16.mxu0 %v9874_v35 }
 0x3c7   : > { %v3438_v37 = vpop.f32.mrf.mxu1  ;;  %v4104_v18 = vpop.f32.mrf.mxu0 }
 0x3c9   : > { %v3439_v22 = vpop.f32.mrf.mxu1  ;;  %v4105_v25 = vpop.f32.mrf.mxu0 }
 0x3cb   : > { %v3440_v12 = vpop.f32.mrf.mxu1  ;;  %v4106_v30 = vpop.f32.mrf.mxu0 }
 0x3cd   : > { %v3443_v3 = vpop.f32.mrf.mxu1  ;;  %3656 = vmatmul.mubr.bf16.gmra.mxu1 %v6844_v47  ;;  %v4109_v49 = vpop.f32.mrf.mxu0  ;;  %4296 = vmatmul.mubr.bf16.gmra.mxu0 %v6844_v47 }
 0x3ce   : > { %3663 = vmatprep.mubr.bf16.mxu1 %v9874_v35  ;;  %4301 = vmatprep.mubr.bf16.mxu0 %v9874_v35 }
 0x3cf   : > { %v3444_v29 = vpop.f32.mrf.mxu1  ;;  %v4110_v4 = vpop.f32.mrf.mxu0 }
 0x3d1   : > { %v3445_v54 = vpop.f32.mrf.mxu1  ;;  %v4111_v60 = vpop.f32.mrf.mxu0 }
 0x3d2   : > { %v6846_v60 = vld [vmem:[%s7058_s28 + $0xd8] sm:$0xff]  }
 0x3d3   : > { %v3446_v27 = vpop.f32.mrf.mxu1  ;;  %v4112_v63 = vpop.f32.mrf.mxu0 }
 0x3d5   : > { %v3449_v59 = vpop.f32.mrf.mxu1  ;;  %3664 = vmatmul.mubr.bf16.gmra.mxu1 %v6845_v13  ;;  %v4115_v33 = vpop.f32.mrf.mxu0  ;;  %4302 = vmatmul.mubr.bf16.gmra.mxu0 %v6845_v13 }
 0x3d6   : > { %3673 = vmatprep.mubr.bf16.mxu1 %v9874_v35  ;;  %4311 = vmatprep.mubr.bf16.mxu0 %v9874_v35  ;;  %v3748_v12 = vrot.slane %v3449_v59, 2 }
 0x3d7   : > { %v3451_v37 = vpop.f32.mrf.mxu1  ;;  %v4116_v18 = vpop.f32.mrf.mxu0 }
 0x3d8   : > { %v3749_v49 = vrot.slane %v3451_v37, 2 }
 0x3d9   : > { %v3453_v22 = vpop.f32.mrf.mxu1  ;;  %v4117_v25 = vpop.f32.mrf.mxu0 }
 0x3da   : > { %v3750_v30 = vrot.slane %v3453_v22, 2 }
 0x3db   : > { %v3455_v3 = vpop.f32.mrf.mxu1  ;;  %v4118_v47 = vpop.f32.mrf.mxu0 }
 0x3dc   : > { %v3751_v29 = vrot.slane %v3455_v3, 2  ;;  %v3906_v4 = vsel %vm2037_vm1, %v3748_v12, %v3750_v30 }
 0x3dd   : > { %v3459_v54 = vpop.f32.mrf.mxu1  ;;  %3674 = vmatmul.mubr.bf16.gmra.mxu1 %v6846_v60  ;;  %v4121_v27 = vpop.f32.mrf.mxu0  ;;  %4312 = vmatmul.mubr.bf16.gmra.mxu0 %v6846_v60  ;;  %v3908_v63 = vadd.f32 %v3906_v4, %v8301_v11 }
 0x3de   : > { %v3752_v13 = vrot.slane %v3459_v54, 2  ;;  %3681 = vmatprep.mubr.bf16.mxu1 %v9874_v35  ;;  %4317 = vmatprep.mubr.bf16.mxu0 %v9874_v35  ;;  %v3907_v59 = vsel %vm2037_vm1, %v3749_v49, %v3751_v29  ;;  %v6847_v27 = vld [vmem:[%s7058_s28 + $0xe0] sm:$0xff]  }
 0x3df   : > { %v3461_v33 = vpop.f32.mrf.mxu1  ;;  %v4122_v37 = vpop.f32.mrf.mxu0  ;;  %v3909_v18 = vadd.f32 %v3907_v59, %v8307_v31 }
 0x3e0   : > { %v3753_v22 = vrot.slane %v3461_v33, 2  ;;  %v3904_v25 = vsel %vm2037_vm1, %v3750_v30, %v3752_v13 }
 0x3e1   : > { %v3463_v12 = vpop.f32.mrf.mxu1  ;;  %v4123_v3 = vpop.f32.mrf.mxu0  ;;  %v3910_v11 = vadd.f32 %v3904_v25, %v8311_v16 }
 0x3e2   : > { %v3905_v47 = vsel %vm2037_vm1, %v3751_v29, %v3753_v22 }
 0x3e3   : > { %v3464_v4 = vpop.f32.mrf.mxu1  ;;  %v4124_v54 = vpop.f32.mrf.mxu0  ;;  %v3911_v60 = vadd.f32 %v3905_v47, %v8315_v19 }
 0x3e5   : > { %v3467_v49 = vpop.f32.mrf.mxu1  ;;  %3682 = vmatmul.mubr.bf16.gmra.mxu1 %v6847_v27  ;;  %v4127_v37 = vpop.f32.mrf.mxu0  ;;  %4318 = vmatmul.mubr.bf16.gmra.mxu0 %v6847_v27  ;;  %v6848_v27 = vld [vmem:[%s7058_s28 + $0xe8] sm:$0xff]  }
 0x3e6   : > { %v8828_v31 = vadd.f32 %v4127_v37, %v3908_v63  ;;  %3691 = vmatprep.mubr.bf16.mxu1 %v9874_v35  ;;  %4327 = vmatprep.mubr.bf16.mxu0 %v9874_v35  ;;  %v3754_v33 = vrot.slane %v3467_v49, 2 }
 0x3e7   : > { %v3469_v16 = vpop.f32.mrf.mxu1  ;;  %v4129_v30 = vpop.f32.mrf.mxu0 }
 0x3e8   : > { %v8832_v13 = vadd.f32 %v4129_v30, %v3909_v18  ;;  %v3755_v3 = vrot.slane %v3469_v16, 2 }
 0x3e9   : > { %v3471_v29 = vpop.f32.mrf.mxu1  ;;  %v4131_v59 = vpop.f32.mrf.mxu0 }
 0x3ea   : > { %v3756_v19 = vrot.slane %v3471_v29, 2  ;;  %v8834_v22 = vadd.f32 %v4131_v59, %v3910_v11 }
 0x3eb   : > { %v3473_v25 = vpop.f32.mrf.mxu1  ;;  %v4133_v12 = vpop.f32.mrf.mxu0 }
 0x3ec   : > { %v3757_v63 = vrot.slane %v3473_v25, 2  ;;  %v8836_v47 = vadd.f32 %v4133_v12, %v3911_v60  ;;  %v3902_v4 = vsel %vm2037_vm1, %v3754_v33, %v3756_v19 }
 0x3ed   : > { %v3477_v54 = vpop.f32.mrf.mxu1  ;;  %3692 = vmatmul.mubr.bf16.gmra.mxu1 %v6848_v27  ;;  %v4137_v18 = vpop.f32.mrf.mxu0  ;;  %4328 = vmatmul.mubr.bf16.gmra.mxu0 %v6848_v27  ;;  %v3912_v37 = vadd.f32 %v3902_v4, %v8327_v20 }
 0x3ee   : > { %v3758_v49 = vrot.slane %v3477_v54, 2  ;;  %3699 = vmatprep.mubr.bf16.mxu1 %v9874_v35  ;;  %4333 = vmatprep.mubr.bf16.mxu0 %v9874_v35  ;;  %v3903_v11 = vsel %vm2037_vm1, %v3755_v3, %v3757_v63  ;;  %v6849_v18 = vld [vmem:[%s7058_s28 + $0xf0] sm:$0xff]  }
 0x3ef   : > { %v3479_v60 = vpop.f32.mrf.mxu1  ;;  %v4138_v16 = vpop.f32.mrf.mxu0  ;;  %v3913_v30 = vadd.f32 %v3903_v11, %v8333_v0 }
 0x3f0   : > { %v3759_v29 = vrot.slane %v3479_v60, 2  ;;  %v3900_v59 = vsel %vm2037_vm1, %v3756_v19, %v3758_v49 }
 0x3f1   : > { %v3481_v33 = vpop.f32.mrf.mxu1  ;;  %v4139_v25 = vpop.f32.mrf.mxu0  ;;  %v3914_v20 = vadd.f32 %v3900_v59, %v8337_v46 }
 0x3f2   : > { %v3901_v12 = vsel %vm2037_vm1, %v3757_v63, %v3759_v29 }
 0x3f3   : > { %v3482_v4 = vpop.f32.mrf.mxu1  ;;  %v4140_v54 = vpop.f32.mrf.mxu0  ;;  %v3915_v27 = vadd.f32 %v3901_v12, %v8341_v2 }
 0x3f5   : > { %v3485_v3 = vpop.f32.mrf.mxu1  ;;  %3700 = vmatmul.mubr.bf16.gmra.mxu1 %v6849_v18  ;;  %v4143_v16 = vpop.f32.mrf.mxu0  ;;  %4334 = vmatmul.mubr.bf16.gmra.mxu0 %v6849_v18  ;;  %v6850_v18 = vld [vmem:[%s7058_s28 + $0xf8] sm:$0xff]  }
 0x3f6   : > { %v8854_v0 = vadd.f32 %v4143_v16, %v3912_v37  ;;  %3709 = vmatprep.mubr.bf16.mxu1 %v9874_v35  ;;  %4343 = vmatprep.mubr.bf16.mxu0 %v9874_v35  ;;  %v3760_v60 = vrot.slane %v3485_v3, 2 }
 0x3f7   : > { %v3487_v46 = vpop.f32.mrf.mxu1  ;;  %v4145_v19 = vpop.f32.mrf.mxu0 }
 0x3f8   : > { %v8858_v49 = vadd.f32 %v4145_v19, %v3913_v30  ;;  %v3761_v25 = vrot.slane %v3487_v46, 2 }
 0x3f9   : > { %v3489_v63 = vpop.f32.mrf.mxu1  ;;  %v4147_v11 = vpop.f32.mrf.mxu0 }
 0x3fa   : > { %v3762_v2 = vrot.slane %v3489_v63, 2  ;;  %v8860_v29 = vadd.f32 %v4147_v11, %v3914_v20 }
 0x3fb   : > { %v3491_v59 = vpop.f32.mrf.mxu1  ;;  %v4149_v33 = vpop.f32.mrf.mxu0 }
 0x3fc   : > { %v3763_v37 = vrot.slane %v3491_v59, 2  ;;  %v8862_v12 = vadd.f32 %v4149_v33, %v3915_v27  ;;  %v3898_v4 = vsel %vm2037_vm1, %v3760_v60, %v3762_v2 }
 0x3fd   : > { %v3495_v54 = vpop.f32.mrf.mxu1  ;;  %3710 = vmatmul.mubr.bf16.gmra.mxu1 %v6850_v18  ;;  %v4153_v30 = vpop.f32.mrf.mxu0  ;;  %4344 = vmatmul.mubr.bf16.gmra.mxu0 %v6850_v18  ;;  %v3916_v16 = vadd.f32 %v3898_v4, %v8353_v26 }
 0x3fe   : > { %v3764_v3 = vrot.slane %v3495_v54, 2  ;;  %3717 = vmatprep.mubr.bf16.mxu1 %v9874_v35  ;;  %4349 = vmatprep.mubr.bf16.mxu0 %v9874_v35  ;;  %v3899_v20 = vsel %vm2037_vm1, %v3761_v25, %v3763_v37  ;;  %v6851_v30 = vld [vmem:[%s7058_s28 + $0x100] sm:$0xff]  }
 0x3ff   : > { %v3497_v27 = vpop.f32.mrf.mxu1  ;;  %v4154_v46 = vpop.f32.mrf.mxu0  ;;  %v3917_v19 = vadd.f32 %v3899_v20, %v8359_v40 }
 0x400   : > { %v3765_v63 = vrot.slane %v3497_v27, 2  ;;  %v3896_v11 = vsel %vm2037_vm1, %v3762_v2, %v3764_v3 }
 0x401   : > { %v3499_v60 = vpop.f32.mrf.mxu1  ;;  %v4155_v59 = vpop.f32.mrf.mxu0  ;;  %v3918_v26 = vadd.f32 %v3896_v11, %v8363_v7 }
 0x402   : > { %v3897_v33 = vsel %vm2037_vm1, %v3763_v37, %v3765_v63 }
 0x403   : > { %v3500_v4 = vpop.f32.mrf.mxu1  ;;  %v4156_v54 = vpop.f32.mrf.mxu0  ;;  %v3919_v18 = vadd.f32 %v3897_v33, %v8367_v32 }
 0x405   : > { %v3503_v25 = vpop.f32.mrf.mxu1  ;;  %3718 = vmatmul.mubr.bf16.gmra.mxu1 %v6851_v30  ;;  %v4159_v46 = vpop.f32.mrf.mxu0  ;;  %4350 = vmatmul.mubr.bf16.gmra.mxu0 %v6851_v30  ;;  %v6852_v30 = vld [vmem:[%s7058_s28 + $0x108] sm:$0xff]  }
 0x406   : > { %v8880_v40 = vadd.f32 %v4159_v46, %v3916_v16  ;;  %3727 = vmatprep.mubr.bf16.mxu1 %v9874_v35  ;;  %4359 = vmatprep.mubr.bf16.mxu0 %v9874_v35  ;;  %v3766_v27 = vrot.slane %v3503_v25, 2 }
 0x407   : > { %v3505_v7 = vpop.f32.mrf.mxu1  ;;  %v4161_v2 = vpop.f32.mrf.mxu0 }
 0x408   : > { %v8884_v3 = vadd.f32 %v4161_v2, %v3917_v19  ;;  %v3767_v59 = vrot.slane %v3505_v7, 2 }
 0x409   : > { %v3507_v37 = vpop.f32.mrf.mxu1  ;;  %v4163_v20 = vpop.f32.mrf.mxu0 }
 0x40a   : > { %v3768_v32 = vrot.slane %v3507_v37, 2  ;;  %v8886_v63 = vadd.f32 %v4163_v20, %v3918_v26 }
 0x40b   : > { %v3509_v11 = vpop.f32.mrf.mxu1  ;;  %v4165_v60 = vpop.f32.mrf.mxu0 }
 0x40c   : > { %v3769_v16 = vrot.slane %v3509_v11, 2  ;;  %v8888_v33 = vadd.f32 %v4165_v60, %v3919_v18  ;;  %v3894_v4 = vsel %vm2037_vm1, %v3766_v27, %v3768_v32 }
 0x40d   : > { %v3513_v54 = vpop.f32.mrf.mxu1  ;;  %3728 = vmatmul.mubr.bf16.gmra.mxu1 %v6852_v30  ;;  %v4169_v19 = vpop.f32.mrf.mxu0  ;;  %4360 = vmatmul.mubr.bf16.gmra.mxu0 %v6852_v30  ;;  %v3920_v46 = vadd.f32 %v3894_v4, %v8379_v41 }
 0x40e   : > { %v3770_v25 = vrot.slane %v3513_v54, 2  ;;  %3735 = vmatprep.mubr.bf16.mxu1 %v9874_v35  ;;  %4365 = vmatprep.mubr.bf16.mxu0 %v9874_v35  ;;  %v3895_v26 = vsel %vm2037_vm1, %v3767_v59, %v3769_v16  ;;  %v6853_v19 = vld [vmem:[%s7058_s28 + $0x110] sm:$0xff]  }
 0x40f   : > { %v3515_v18 = vpop.f32.mrf.mxu1  ;;  %v4170_v7 = vpop.f32.mrf.mxu0  ;;  %v3921_v2 = vadd.f32 %v3895_v26, %v8385_v24 }
 0x410   : > { %v3771_v37 = vrot.slane %v3515_v18, 2  ;;  %v3892_v20 = vsel %vm2037_vm1, %v3768_v32, %v3770_v25 }
 0x411   : > { %v3517_v27 = vpop.f32.mrf.mxu1  ;;  %v4171_v11 = vpop.f32.mrf.mxu0  ;;  %v3922_v41 = vadd.f32 %v3892_v20, %v8389_v48 }
 0x412   : > { %v3893_v60 = vsel %vm2037_vm1, %v3769_v16, %v3771_v37 }
 0x413   : > { %v3518_v4 = vpop.f32.mrf.mxu1  ;;  %v4172_v54 = vpop.f32.mrf.mxu0  ;;  %v3923_v30 = vadd.f32 %v3893_v60, %v8393_v34 }
 0x415   : > { %v3521_v59 = vpop.f32.mrf.mxu1  ;;  %3736 = vmatmul.mubr.bf16.gmra.mxu1 %v6853_v19  ;;  %v4175_v7 = vpop.f32.mrf.mxu0  ;;  %4366 = vmatmul.mubr.bf16.gmra.mxu0 %v6853_v19  ;;  %v6854_v19 = vld [vmem:[%s7058_s28 + $0x118] sm:$0xff]  }
 0x416   : > { %v8906_v24 = vadd.f32 %v4175_v7, %v3920_v46  ;;  %3741 = vmatprep.mubr.bf16.mxu1 %v9874_v35  ;;  %4375 = vmatprep.mubr.bf16.mxu0 %v9874_v35  ;;  %v3772_v18 = vrot.slane %v3521_v59, 2 }
 0x417   : > { %v3523_v48 = vpop.f32.mrf.mxu1  ;;  %v4177_v32 = vpop.f32.mrf.mxu0 }
 0x418   : > { %v8910_v25 = vadd.f32 %v4177_v32, %v3921_v2  ;;  %v3773_v11 = vrot.slane %v3523_v48, 2 }
 0x419   : > { %v3525_v16 = vpop.f32.mrf.mxu1  ;;  %v4179_v26 = vpop.f32.mrf.mxu0 }
 0x41a   : > { %v3774_v34 = vrot.slane %v3525_v16, 2  ;;  %v8912_v37 = vadd.f32 %v4179_v26, %v3922_v41 }
 0x41b   : > { %v3527_v20 = vpop.f32.mrf.mxu1  ;;  %v4181_v27 = vpop.f32.mrf.mxu0 }
 0x41c   : > { %v3775_v46 = vrot.slane %v3527_v20, 2  ;;  %v8914_v60 = vadd.f32 %v4181_v27, %v3923_v30  ;;  %v3890_v4 = vsel %vm2037_vm1, %v3772_v18, %v3774_v34 }
 0x41d   : > { %v3531_v54 = vpop.f32.mrf.mxu1  ;;  %3742 = vmatmul.mubr.bf16.gmra.mxu1 %v6854_v19  ;;  %v4185_v2 = vpop.f32.mrf.mxu0  ;;  %4376 = vmatmul.mubr.bf16.gmra.mxu0 %v6854_v19  ;;  %v3924_v7 = vadd.f32 %v3890_v4, %v8405_v17 }
 0x41e   : > { %v3776_v59 = vrot.slane %v3531_v54, 2  ;;  %4575 = vmatprep.mubr.bf16.mxu1 %v9874_v35  ;;  %5241 = vmatprep.mubr.bf16.mxu0 %v9874_v35  ;;  %v3891_v41 = vsel %vm2037_vm1, %v3773_v11, %v3775_v46 }
 0x41f   : > { %v3533_v30 = vpop.f32.mrf.mxu1  ;;  %v4186_v48 = vpop.f32.mrf.mxu0  ;;  %v3925_v32 = vadd.f32 %v3891_v41, %v8411_v52 }
 0x420   : > { %v3777_v16 = vrot.slane %v3533_v30, 2  ;;  %v3888_v26 = vsel %vm2037_vm1, %v3774_v34, %v3776_v59  ;;  %v6855_v48 = vld [vmem:[%s7058_s28] sm:$0xff]  }
 0x421   : > { %v3535_v18 = vpop.f32.mrf.mxu1  ;;  %v4187_v20 = vpop.f32.mrf.mxu0  ;;  %v3926_v17 = vadd.f32 %v3888_v26, %v8415_v56 }
 0x422   : > { %v3889_v27 = vsel %vm2037_vm1, %v3775_v46, %v3777_v16 }
 0x423   : > { %v3536_v4 = vpop.f32.mrf.mxu1  ;;  %v4188_v54 = vpop.f32.mrf.mxu0  ;;  %v3927_v19 = vadd.f32 %v3889_v27, %v8425_v10 }
 0x425   : > { %v3539_v11 = vpop.f32.mrf.mxu1  ;;  %v4191_v2 = vpop.f32.mrf.mxu0  ;;  %4576 = vmatmul.mubr.bf16.vlgmr.msra.gmra.mxu1 %v6855_v48  ;;  %5242 = vmatmul.mubr.bf16.vlgmr.msra.gmra.mxu0 %v6855_v48  ;;  %v6856_v48 = vld [vmem:[%s7058_s28 + $0x8] sm:$0xff]  }
 0x426   : > { %v8932_v52 = vadd.f32 %v4191_v2, %v3924_v7  ;;  %4581 = vmatprep.mubr.bf16.mxu1 %v9874_v35  ;;  %5247 = vmatprep.mubr.bf16.mxu0 %v9874_v35  ;;  %v3778_v30 = vrot.slane %v3539_v11, 2 }
 0x427   : > { %v3541_v34 = vpop.f32.mrf.mxu1  ;;  %v4193_v56 = vpop.f32.mrf.mxu0 }
 0x428   : > { %v8936_v59 = vadd.f32 %v4193_v56, %v3925_v32  ;;  %v3779_v20 = vrot.slane %v3541_v34, 2  ;;  %v9961_v32 = vld [vmem:[#allocation20_spill] sm:$0xff] }
 0x429   : > { %v3543_v46 = vpop.f32.mrf.mxu1  ;;  %v4195_v41 = vpop.f32.mrf.mxu0 }
 0x42a   : > { %v3780_v10 = vrot.slane %v3543_v46, 2  ;;  %v8938_v16 = vadd.f32 %v4195_v41, %v3926_v17  ;;  %v9962_v46 = vld [vmem:[#allocation21_spill] sm:$0xff] }
 0x42b   : > { %v3545_v26 = vpop.f32.mrf.mxu1  ;;  %v4197_v18 = vpop.f32.mrf.mxu0 }
 0x42c   : > { %9959 = vst [vmem:[#allocation15_spill] sm:$0xff] %v8938_v16  ;;  %v3781_v7 = vrot.slane %v3545_v26, 2  ;;  %v8940_v27 = vadd.f32 %v4197_v18, %v3927_v19  ;;  %v3886_v4 = vsel %vm2037_vm1, %v3778_v30, %v3780_v10 }
 0x42d   : > { %v3549_v54 = vpop.f32.mrf.mxu1  ;;  %v4201_v2 = vpop.f32.mrf.mxu0  ;;  %4582 = vmatmul.mubr.bf16.gmra.mxu1 %v6856_v48  ;;  %5248 = vmatmul.mubr.bf16.gmra.mxu0 %v6856_v48  ;;  %v3928_v56 = vadd.f32 %v3886_v4, %v9961_v32 }
 0x42e   : > { %9960 = vst [vmem:[#allocation16_spill] sm:$0xff] %v8940_v27  ;;  %v3782_v11 = vrot.slane %v3549_v54, 2  ;;  %4587 = vmatprep.mubr.bf16.mxu1 %v9874_v35  ;;  %5253 = vmatprep.mubr.bf16.mxu0 %v9874_v35  ;;  %v3887_v17 = vsel %vm2037_vm1, %v3779_v20, %v3781_v7 }
 0x42f   : > { %v3551_v19 = vpop.f32.mrf.mxu1  ;;  %v4202_v34 = vpop.f32.mrf.mxu0  ;;  %v3929_v41 = vadd.f32 %v3887_v17, %v9962_v46 }
 0x430   : > { %v3783_v30 = vrot.slane %v3551_v19, 2  ;;  %v3884_v26 = vsel %vm2037_vm1, %v3780_v10, %v3782_v11  ;;  %v6857_v34 = vld [vmem:[%s7058_s28 + $0x10] sm:$0xff]  }
 0x431   : > { %v3553_v18 = vpop.f32.mrf.mxu1  ;;  %v4203_v2 = vpop.f32.mrf.mxu0  ;;  %v3930_v4 = vadd.f32 %v3884_v26, %v8483_v28 }
 0x432   : > { %v3885_v54 = vsel %vm2037_vm1, %v3781_v7, %v3783_v30 }
 0x433   : > { %v3554_v48 = vpop.f32.mrf.mxu1  ;;  %v4204_v32 = vpop.f32.mrf.mxu0  ;;  %v3931_v27 = vadd.f32 %v3885_v54, %v8487_v1 }
 0x435   : > { %v3557_v20 = vpop.f32.mrf.mxu1  ;;  %v4207_v16 = vpop.f32.mrf.mxu0  ;;  %4588 = vmatmul.mubr.bf16.gmra.mxu1 %v6857_v34  ;;  %5254 = vmatmul.mubr.bf16.gmra.mxu0 %v6857_v34  ;;  %v6858_v34 = vld [vmem:[%s7058_s28 + $0x18] sm:$0xff]  }
 0x436   : > { %v8958_v17 = vadd.f32 %v4207_v16, %v3928_v56  ;;  %4593 = vmatprep.mubr.bf16.mxu1 %v9874_v35  ;;  %5259 = vmatprep.mubr.bf16.mxu0 %v9874_v35  ;;  %v3784_v46 = vrot.slane %v3557_v20, 2 }
 0x437   : > { %v3559_v10 = vpop.f32.mrf.mxu1  ;;  %v4209_v28 = vpop.f32.mrf.mxu0 }
 0x438   : > { %v8962_v11 = vadd.f32 %v4209_v28, %v3929_v41  ;;  %v3785_v2 = vrot.slane %v3559_v10, 2 }
 0x439   : > { %v3561_v7 = vpop.f32.mrf.mxu1  ;;  %v4211_v19 = vpop.f32.mrf.mxu0 }
 0x43a   : > { %v3786_v1 = vrot.slane %v3561_v7, 2  ;;  %v8964_v30 = vadd.f32 %v4211_v19, %v3930_v4 }
 0x43b   : > { %v3563_v26 = vpop.f32.mrf.mxu1  ;;  %v4213_v18 = vpop.f32.mrf.mxu0 }
 0x43c   : > { %v3787_v16 = vrot.slane %v3563_v26, 2  ;;  %v8966_v56 = vadd.f32 %v4213_v18, %v3931_v27  ;;  %v3882_v54 = vsel %vm2037_vm1, %v3784_v46, %v3786_v1 }
 0x43d   : > { %v3567_v48 = vpop.f32.mrf.mxu1  ;;  %v4217_v32 = vpop.f32.mrf.mxu0  ;;  %4594 = vmatmul.mubr.bf16.gmra.mxu1 %v6858_v34  ;;  %5260 = vmatmul.mubr.bf16.gmra.mxu0 %v6858_v34  ;;  %v3932_v41 = vadd.f32 %v3882_v54, %v8511_v43 }
 0x43e   : > { %v3788_v20 = vrot.slane %v3567_v48, 2  ;;  %4599 = vmatprep.mubr.bf16.mxu1 %v9874_v35  ;;  %5265 = vmatprep.mubr.bf16.mxu0 %v9874_v35  ;;  %v3883_v27 = vsel %vm2037_vm1, %v3785_v2, %v3787_v16 }
 0x43f   : > { %v3569_v4 = vpop.f32.mrf.mxu1  ;;  %v4218_v10 = vpop.f32.mrf.mxu0  ;;  %v3933_v28 = vadd.f32 %v3883_v27, %v8517_v6 }
 0x440   : > { %v3789_v7 = vrot.slane %v3569_v4, 2  ;;  %v3880_v19 = vsel %vm2037_vm1, %v3786_v1, %v3788_v20  ;;  %v6859_v10 = vld [vmem:[%s7058_s28 + $0x20] sm:$0xff]  }
 0x441   : > { %v3571_v46 = vpop.f32.mrf.mxu1  ;;  %v4219_v26 = vpop.f32.mrf.mxu0  ;;  %v3934_v43 = vadd.f32 %v3880_v19, %v8521_v61 }
 0x442   : > { %v3881_v18 = vsel %vm2037_vm1, %v3787_v16, %v3789_v7 }
 0x443   : > { %v3572_v54 = vpop.f32.mrf.mxu1  ;;  %v4220_v48 = vpop.f32.mrf.mxu0  ;;  %v3935_v32 = vadd.f32 %v3881_v18, %v8525_v55 }
 0x445   : > { %v3575_v2 = vpop.f32.mrf.mxu1  ;;  %v4223_v34 = vpop.f32.mrf.mxu0  ;;  %4600 = vmatmul.mubr.bf16.gmra.mxu1 %v6859_v10  ;;  %5266 = vmatmul.mubr.bf16.gmra.mxu0 %v6859_v10  ;;  %v6860_v10 = vld [vmem:[%s7058_s28 + $0x28] sm:$0xff]  }
 0x446   : > { %v8984_v6 = vadd.f32 %v4223_v34, %v3932_v41  ;;  %4609 = vmatprep.mubr.bf16.mxu1 %v9874_v35  ;;  %5275 = vmatprep.mubr.bf16.mxu0 %v9874_v35  ;;  %v3790_v4 = vrot.slane %v3575_v2, 2 }
 0x447   : > { %v3577_v1 = vpop.f32.mrf.mxu1  ;;  %v4225_v61 = vpop.f32.mrf.mxu0 }
 0x448   : > { %v8988_v20 = vadd.f32 %v4225_v61, %v3933_v28  ;;  %v3791_v26 = vrot.slane %v3577_v1, 2 }
 0x449   : > { %v3579_v16 = vpop.f32.mrf.mxu1  ;;  %v4227_v27 = vpop.f32.mrf.mxu0 }
 0x44a   : > { %v3792_v55 = vrot.slane %v3579_v16, 2  ;;  %v8990_v7 = vadd.f32 %v4227_v27, %v3934_v43 }
 0x44b   : > { %v3581_v19 = vpop.f32.mrf.mxu1  ;;  %v4229_v46 = vpop.f32.mrf.mxu0 }
 0x44c   : > { %v3793_v41 = vrot.slane %v3581_v19, 2  ;;  %v8992_v18 = vadd.f32 %v4229_v46, %v3935_v32  ;;  %v3878_v54 = vsel %vm2037_vm1, %v3790_v4, %v3792_v55 }
 0x44d   : > { %v3585_v48 = vpop.f32.mrf.mxu1  ;;  %v4233_v34 = vpop.f32.mrf.mxu0  ;;  %4610 = vmatmul.mubr.bf16.gmra.mxu1 %v6860_v10  ;;  %5276 = vmatmul.mubr.bf16.gmra.mxu0 %v6860_v10  ;;  %v3936_v28 = vadd.f32 %v3878_v54, %v8537_v21 }
 0x44e   : > { %v3794_v2 = vrot.slane %v3585_v48, 2  ;;  %4617 = vmatprep.mubr.bf16.mxu1 %v9874_v35  ;;  %5283 = vmatprep.mubr.bf16.mxu0 %v9874_v35  ;;  %v3879_v43 = vsel %vm2037_vm1, %v3791_v26, %v3793_v41 }
 0x44f   : > { %v3587_v32 = vpop.f32.mrf.mxu1  ;;  %v4234_v1 = vpop.f32.mrf.mxu0  ;;  %v3937_v61 = vadd.f32 %v3879_v43, %v8543_v42 }
 0x450   : > { %v3795_v16 = vrot.slane %v3587_v32, 2  ;;  %v3876_v27 = vsel %vm2037_vm1, %v3792_v55, %v3794_v2  ;;  %v6861_v1 = vld [vmem:[%s7058_s28 + $0x30] sm:$0xff]  }
 0x451   : > { %v3589_v4 = vpop.f32.mrf.mxu1  ;;  %v4235_v19 = vpop.f32.mrf.mxu0  ;;  %v3938_v21 = vadd.f32 %v3876_v27, %v8547_v62 }
 0x452   : > { %v3877_v46 = vsel %vm2037_vm1, %v3793_v41, %v3795_v16 }
 0x453   : > { %v3590_v54 = vpop.f32.mrf.mxu1  ;;  %v4236_v48 = vpop.f32.mrf.mxu0  ;;  %v3939_v34 = vadd.f32 %v3877_v46, %v8551_v53 }
 0x455   : > { %v3593_v26 = vpop.f32.mrf.mxu1  ;;  %v4239_v10 = vpop.f32.mrf.mxu0  ;;  %4618 = vmatmul.mubr.bf16.gmra.mxu1 %v6861_v1  ;;  %5284 = vmatmul.mubr.bf16.gmra.mxu0 %v6861_v1  ;;  %v6862_v1 = vld [vmem:[%s7058_s28 + $0x38] sm:$0xff]  }
 0x456   : > { %v9010_v42 = vadd.f32 %v4239_v10, %v3936_v28  ;;  %4627 = vmatprep.mubr.bf16.mxu1 %v9874_v35  ;;  %5293 = vmatprep.mubr.bf16.mxu0 %v9874_v35  ;;  %v3796_v32 = vrot.slane %v3593_v26, 2 }
 0x457   : > { %v3595_v55 = vpop.f32.mrf.mxu1  ;;  %v4241_v62 = vpop.f32.mrf.mxu0 }
 0x458   : > { %v9014_v2 = vadd.f32 %v4241_v62, %v3937_v61  ;;  %v3797_v19 = vrot.slane %v3595_v55, 2 }
 0x459   : > { %v3597_v41 = vpop.f32.mrf.mxu1  ;;  %v4243_v43 = vpop.f32.mrf.mxu0 }
 0x45a   : > { %v3798_v53 = vrot.slane %v3597_v41, 2  ;;  %v9016_v16 = vadd.f32 %v4243_v43, %v3938_v21 }
 0x45b   : > { %v3599_v27 = vpop.f32.mrf.mxu1  ;;  %v4245_v4 = vpop.f32.mrf.mxu0 }
 0x45c   : > { %v3799_v28 = vrot.slane %v3599_v27, 2  ;;  %v9018_v46 = vadd.f32 %v4245_v4, %v3939_v34  ;;  %v3874_v54 = vsel %vm2037_vm1, %v3796_v32, %v3798_v53 }
 0x45d   : > { %v3603_v48 = vpop.f32.mrf.mxu1  ;;  %v4249_v10 = vpop.f32.mrf.mxu0  ;;  %4628 = vmatmul.mubr.bf16.gmra.mxu1 %v6862_v1  ;;  %5294 = vmatmul.mubr.bf16.gmra.mxu0 %v6862_v1  ;;  %v3940_v61 = vadd.f32 %v3874_v54, %v8575_v14 }
 0x45e   : > { %v3800_v26 = vrot.slane %v3603_v48, 2  ;;  %4635 = vmatprep.mubr.bf16.mxu1 %v9874_v35  ;;  %5301 = vmatprep.mubr.bf16.mxu0 %v9874_v35  ;;  %v3875_v21 = vsel %vm2037_vm1, %v3797_v19, %v3799_v28 }
 0x45f   : > { %v3605_v34 = vpop.f32.mrf.mxu1  ;;  %v4250_v55 = vpop.f32.mrf.mxu0  ;;  %v3941_v62 = vadd.f32 %v3875_v21, %v8581_v51 }
 0x460   : > { %v3801_v41 = vrot.slane %v3605_v34, 2  ;;  %v3872_v43 = vsel %vm2037_vm1, %v3798_v53, %v3800_v26  ;;  %v6863_v55 = vld [vmem:[%s7058_s28 + $0x40] sm:$0xff]  }
 0x461   : > { %v3607_v32 = vpop.f32.mrf.mxu1  ;;  %v4251_v27 = vpop.f32.mrf.mxu0  ;;  %v3942_v14 = vadd.f32 %v3872_v43, %v8585_v44 }
 0x462   : > { %v3873_v4 = vsel %vm2037_vm1, %v3799_v28, %v3801_v41 }
 0x463   : > { %v3608_v54 = vpop.f32.mrf.mxu1  ;;  %v4252_v48 = vpop.f32.mrf.mxu0  ;;  %v3943_v10 = vadd.f32 %v3873_v4, %v8589_v38 }
 0x465   : > { %v3611_v19 = vpop.f32.mrf.mxu1  ;;  %v4255_v1 = vpop.f32.mrf.mxu0  ;;  %4636 = vmatmul.mubr.bf16.gmra.mxu1 %v6863_v55  ;;  %5302 = vmatmul.mubr.bf16.gmra.mxu0 %v6863_v55  ;;  %v6864_v55 = vld [vmem:[%s7058_s28 + $0x48] sm:$0xff]  }
 0x466   : > { %v9036_v51 = vadd.f32 %v4255_v1, %v3940_v61  ;;  %4645 = vmatprep.mubr.bf16.mxu1 %v9874_v35  ;;  %5311 = vmatprep.mubr.bf16.mxu0 %v9874_v35  ;;  %v3802_v34 = vrot.slane %v3611_v19, 2 }
 0x467   : > { %v3613_v53 = vpop.f32.mrf.mxu1  ;;  %v4257_v44 = vpop.f32.mrf.mxu0 }
 0x468   : > { %v9040_v26 = vadd.f32 %v4257_v44, %v3941_v62  ;;  %v3803_v27 = vrot.slane %v3613_v53, 2  ;;  %v9966_v44 = vld [vmem:[#allocation22_spill] sm:$0xff] }
 0x469   : > { %v3615_v28 = vpop.f32.mrf.mxu1  ;;  %v4259_v21 = vpop.f32.mrf.mxu0 }
 0x46a   : > { %9963 = vst [vmem:[#allocation17_spill] sm:$0xff] %v9040_v26  ;;  %v3804_v38 = vrot.slane %v3615_v28, 2  ;;  %v9042_v41 = vadd.f32 %v4259_v21, %v3942_v14 }
 0x46b   : > { %v3617_v43 = vpop.f32.mrf.mxu1  ;;  %v4261_v32 = vpop.f32.mrf.mxu0 }
 0x46c   : > { %9964 = vst [vmem:[#allocation18_spill] sm:$0xff] %v9042_v41  ;;  %v3805_v61 = vrot.slane %v3617_v43, 2  ;;  %v9044_v4 = vadd.f32 %v4261_v32, %v3943_v10  ;;  %v3870_v54 = vsel %vm2037_vm1, %v3802_v34, %v3804_v38 }
 0x46d   : > { %v3621_v48 = vpop.f32.mrf.mxu1  ;;  %v4265_v1 = vpop.f32.mrf.mxu0  ;;  %4646 = vmatmul.mubr.bf16.gmra.mxu1 %v6864_v55  ;;  %5312 = vmatmul.mubr.bf16.gmra.mxu0 %v6864_v55  ;;  %v3944_v62 = vadd.f32 %v3870_v54, %v8601_v57  ;;  %v9967_v57 = vld [vmem:[#allocation23_spill] sm:$0xff] }
 0x46e   : > { %9965 = vst [vmem:[#allocation19_spill] sm:$0xff] %v9044_v4  ;;  %v3806_v19 = vrot.slane %v3621_v48, 2  ;;  %4653 = vmatprep.mubr.bf16.mxu1 %v9874_v35  ;;  %5319 = vmatprep.mubr.bf16.mxu0 %v9874_v35  ;;  %v3871_v14 = vsel %vm2037_vm1, %v3803_v27, %v3805_v61  ;;  %v9968_v4 = vld [vmem:[#allocation24_spill] sm:$0xff] }
 0x46f   : > { %v3623_v10 = vpop.f32.mrf.mxu1  ;;  %v4266_v53 = vpop.f32.mrf.mxu0  ;;  %v3945_v28 = vadd.f32 %v3871_v14, %v9966_v44 }
 0x470   : > { %v3807_v21 = vrot.slane %v3623_v10, 2  ;;  %v3868_v34 = vsel %vm2037_vm1, %v3804_v38, %v3806_v19  ;;  %v6865_v53 = vld [vmem:[%s7058_s28 + $0x50] sm:$0xff]  }
 0x471   : > { %v3625_v43 = vpop.f32.mrf.mxu1  ;;  %v4267_v32 = vpop.f32.mrf.mxu0  ;;  %v3946_v54 = vadd.f32 %v3868_v34, %v9967_v57 }
 0x472   : > { %v3869_v48 = vsel %vm2037_vm1, %v3805_v61, %v3807_v21 }
 0x473   : > { %v3626_v1 = vpop.f32.mrf.mxu1  ;;  %v4268_v55 = vpop.f32.mrf.mxu0  ;;  %v3947_v41 = vadd.f32 %v3869_v48, %v9968_v4 }
 0x475   : > { %v3629_v27 = vpop.f32.mrf.mxu1  ;;  %v4271_v26 = vpop.f32.mrf.mxu0  ;;  %4654 = vmatmul.mubr.bf16.gmra.mxu1 %v6865_v53  ;;  %5320 = vmatmul.mubr.bf16.gmra.mxu0 %v6865_v53  ;;  %v6866_v53 = vld [vmem:[%s7058_s28 + $0x58] sm:$0xff]  }
 0x476   : > { %v9062_v14 = vadd.f32 %v4271_v26, %v3944_v62  ;;  %4663 = vmatprep.mubr.bf16.mxu1 %v9874_v35  ;;  %5329 = vmatprep.mubr.bf16.mxu0 %v9874_v35  ;;  %v3808_v21 = vrot.slane %v3629_v27, 2 }
 0x477   : > { %v3631_v38 = vpop.f32.mrf.mxu1  ;;  %v4273_v19 = vpop.f32.mrf.mxu0 }
 0x478   : > { %9969 = vst [vmem:[#allocation20_spill] sm:$0xff] %v9062_v14  ;;  %v9066_v10 = vadd.f32 %v4273_v19, %v3945_v28  ;;  %v3809_v57 = vrot.slane %v3631_v38, 2  ;;  %v9973_v28 = vld [vmem:[#allocation25_spill] sm:$0xff] }
 0x479   : > { %v3633_v61 = vpop.f32.mrf.mxu1  ;;  %v4275_v44 = vpop.f32.mrf.mxu0 }
 0x47a   : > { %9970 = vst [vmem:[#allocation21_spill] sm:$0xff] %v9066_v10  ;;  %v3810_v4 = vrot.slane %v3633_v61, 2  ;;  %v9068_v34 = vadd.f32 %v4275_v44, %v3946_v54  ;;  %v9974_v61 = vld [vmem:[#allocation26_spill] sm:$0xff] }
 0x47b   : > { %v3635_v43 = vpop.f32.mrf.mxu1  ;;  %v4277_v32 = vpop.f32.mrf.mxu0 }
 0x47c   : > { %9971 = vst [vmem:[#allocation22_spill] sm:$0xff] %v9068_v34  ;;  %v3811_v26 = vrot.slane %v3635_v43, 2  ;;  %v9070_v62 = vadd.f32 %v4277_v32, %v3947_v41  ;;  %v3866_v48 = vsel %vm2037_vm1, %v3808_v21, %v3810_v4  ;;  %v9976_v34 = vld [vmem:[#allocation28_spill] sm:$0xff] }
 0x47d   : > { %v3639_v1 = vpop.f32.mrf.mxu1  ;;  %v4281_v55 = vpop.f32.mrf.mxu0  ;;  %4664 = vmatmul.mubr.bf16.gmra.mxu1 %v6866_v53  ;;  %5330 = vmatmul.mubr.bf16.gmra.mxu0 %v6866_v53  ;;  %v3948_v19 = vadd.f32 %v3866_v48, %v9973_v28  ;;  %v9975_v48 = vld [vmem:[#allocation27_spill] sm:$0xff] }
 0x47e   : > { %9972 = vst [vmem:[#allocation23_spill] sm:$0xff] %v9070_v62  ;;  %v3812_v27 = vrot.slane %v3639_v1, 2  ;;  %4671 = vmatprep.mubr.bf16.mxu1 %v9874_v35  ;;  %5337 = vmatprep.mubr.bf16.mxu0 %v9874_v35  ;;  %v3867_v41 = vsel %vm2037_vm1, %v3809_v57, %v3811_v26 }
 0x47f   : > { %v3641_v54 = vpop.f32.mrf.mxu1  ;;  %v4282_v38 = vpop.f32.mrf.mxu0  ;;  %v3949_v44 = vadd.f32 %v3867_v41, %v9974_v61 }
 0x480   : > { %v3813_v21 = vrot.slane %v3641_v54, 2  ;;  %v3864_v43 = vsel %vm2037_vm1, %v3810_v4, %v3812_v27  ;;  %v6867_v38 = vld [vmem:[%s7058_s28 + $0x60] sm:$0xff]  }
 0x481   : > { %v3643_v32 = vpop.f32.mrf.mxu1  ;;  %v4283_v55 = vpop.f32.mrf.mxu0  ;;  %v3950_v1 = vadd.f32 %v3864_v43, %v9975_v48 }
 0x482   : > { %v3865_v53 = vsel %vm2037_vm1, %v3811_v26, %v3813_v21 }
 0x483   : > { %v3644_v28 = vpop.f32.mrf.mxu1  ;;  %v4284_v62 = vpop.f32.mrf.mxu0  ;;  %v3951_v10 = vadd.f32 %v3865_v53, %v9976_v34 }
 0x485   : > { %v3647_v57 = vpop.f32.mrf.mxu1  ;;  %v4287_v14 = vpop.f32.mrf.mxu0  ;;  %4672 = vmatmul.mubr.bf16.gmra.mxu1 %v6867_v38  ;;  %5338 = vmatmul.mubr.bf16.gmra.mxu0 %v6867_v38  ;;  %v6868_v38 = vld [vmem:[%s7058_s28 + $0x68] sm:$0xff]  }
 0x486   : > { %v9088_v41 = vadd.f32 %v4287_v14, %v3948_v19  ;;  %4681 = vmatprep.mubr.bf16.mxu1 %v9874_v35  ;;  %5347 = vmatprep.mubr.bf16.mxu0 %v9874_v35  ;;  %v3814_v61 = vrot.slane %v3647_v57, 2 }
 0x487   : > { %v3649_v4 = vpop.f32.mrf.mxu1  ;;  %v4289_v27 = vpop.f32.mrf.mxu0 }
 0x488   : > { %9977 = vst [vmem:[#allocation24_spill] sm:$0xff] %v9088_v41  ;;  %v9092_v54 = vadd.f32 %v4289_v27, %v3949_v44  ;;  %v3815_v55 = vrot.slane %v3649_v4, 2  ;;  %v9981_v44 = vld [vmem:[#allocation5_spill] sm:$0xff] }
 0x489   : > { %v3651_v26 = vpop.f32.mrf.mxu1  ;;  %v4291_v62 = vpop.f32.mrf.mxu0 }
 0x48a   : > { %9978 = vst [vmem:[#allocation25_spill] sm:$0xff] %v9092_v54  ;;  %v3816_v34 = vrot.slane %v3651_v26, 2  ;;  %v9094_v21 = vadd.f32 %v4291_v62, %v3950_v1  ;;  %v9982_v26 = vld [vmem:[#allocation6_spill] sm:$0xff] }
 0x48b   : > { %v3653_v43 = vpop.f32.mrf.mxu1  ;;  %v4293_v32 = vpop.f32.mrf.mxu0 }
 0x48c   : > { %9979 = vst [vmem:[#allocation26_spill] sm:$0xff] %v9094_v21  ;;  %v3817_v14 = vrot.slane %v3653_v43, 2  ;;  %v9096_v19 = vadd.f32 %v4293_v32, %v3951_v10  ;;  %v3862_v48 = vsel %vm2037_vm1, %v3814_v61, %v3816_v34  ;;  %v9984_v21 = vld [vmem:[#allocation29_spill] sm:$0xff] }
 0x48d   : > { %v3657_v53 = vpop.f32.mrf.mxu1  ;;  %v4297_v28 = vpop.f32.mrf.mxu0  ;;  %4682 = vmatmul.mubr.bf16.gmra.mxu1 %v6868_v38  ;;  %5348 = vmatmul.mubr.bf16.gmra.mxu0 %v6868_v38  ;;  %v3952_v27 = vadd.f32 %v3862_v48, %v9981_v44  ;;  %v9983_v48 = vld [vmem:[#allocation7_spill] sm:$0xff] }
 0x48e   : > { %9980 = vst [vmem:[#allocation27_spill] sm:$0xff] %v9096_v19  ;;  %v3818_v57 = vrot.slane %v3657_v53, 2  ;;  %4689 = vmatprep.mubr.bf16.mxu1 %v9874_v35  ;;  %5355 = vmatprep.mubr.bf16.mxu0 %v9874_v35  ;;  %v3863_v10 = vsel %vm2037_vm1, %v3815_v55, %v3817_v14 }
 0x48f   : > { %v3659_v1 = vpop.f32.mrf.mxu1  ;;  %v4298_v4 = vpop.f32.mrf.mxu0  ;;  %v3953_v62 = vadd.f32 %v3863_v10, %v9982_v26 }
 0x490   : > { %v3819_v61 = vrot.slane %v3659_v1, 2  ;;  %v3860_v43 = vsel %vm2037_vm1, %v3816_v34, %v3818_v57  ;;  %v6869_v4 = vld [vmem:[%s7058_s28 + $0x70] sm:$0xff]  }
 0x491   : > { %v3661_v32 = vpop.f32.mrf.mxu1  ;;  %v4299_v28 = vpop.f32.mrf.mxu0  ;;  %v3954_v53 = vadd.f32 %v3860_v43, %v9983_v48 }
 0x492   : > { %v3861_v38 = vsel %vm2037_vm1, %v3817_v14, %v3819_v61 }
 0x493   : > { %v3662_v44 = vpop.f32.mrf.mxu1  ;;  %v4300_v19 = vpop.f32.mrf.mxu0  ;;  %v3955_v54 = vadd.f32 %v3861_v38, %v9984_v21 }
 0x495   : > { %v3665_v55 = vpop.f32.mrf.mxu1  ;;  %v4303_v41 = vpop.f32.mrf.mxu0  ;;  %4690 = vmatmul.mubr.bf16.gmra.mxu1 %v6869_v4  ;;  %5356 = vmatmul.mubr.bf16.gmra.mxu0 %v6869_v4  ;;  %v6870_v4 = vld [vmem:[%s7058_s28 + $0x78] sm:$0xff]  }
 0x496   : > { %v9114_v10 = vadd.f32 %v4303_v41, %v3952_v27  ;;  %4699 = vmatprep.mubr.bf16.mxu1 %v9874_v35  ;;  %5365 = vmatprep.mubr.bf16.mxu0 %v9874_v35  ;;  %v3820_v26 = vrot.slane %v3665_v55, 2 }
 0x497   : > { %v3667_v34 = vpop.f32.mrf.mxu1  ;;  %v4305_v57 = vpop.f32.mrf.mxu0 }
 0x498   : > { %9985 = vst [vmem:[#allocation28_spill] sm:$0xff] %v9114_v10  ;;  %v9118_v1 = vadd.f32 %v4305_v57, %v3953_v62  ;;  %v3821_v28 = vrot.slane %v3667_v34, 2  ;;  %v9989_v62 = vld [vmem:[#allocation8_spill] sm:$0xff] }
 0x499   : > { %v3669_v14 = vpop.f32.mrf.mxu1  ;;  %v4307_v19 = vpop.f32.mrf.mxu0 }
 0x49a   : > { %9986 = vst [vmem:[#allocation5_spill] sm:$0xff] %v9118_v1  ;;  %v3822_v21 = vrot.slane %v3669_v14, 2  ;;  %v9120_v61 = vadd.f32 %v4307_v19, %v3954_v53  ;;  %v9990_v14 = vld [vmem:[#allocation9_spill] sm:$0xff] }
 0x49b   : > { %v3671_v43 = vpop.f32.mrf.mxu1  ;;  %v4309_v32 = vpop.f32.mrf.mxu0 }
 0x49c   : > { %9987 = vst [vmem:[#allocation6_spill] sm:$0xff] %v9120_v61  ;;  %v3823_v41 = vrot.slane %v3671_v43, 2  ;;  %v9122_v27 = vadd.f32 %v4309_v32, %v3955_v54  ;;  %v3858_v48 = vsel %vm2037_vm1, %v3820_v26, %v3822_v21  ;;  %v9992_v61 = vld [vmem:[#allocation11_spill] sm:$0xff] }
 0x49d   : > { %v3675_v38 = vpop.f32.mrf.mxu1  ;;  %v4313_v44 = vpop.f32.mrf.mxu0  ;;  %4700 = vmatmul.mubr.bf16.gmra.mxu1 %v6870_v4  ;;  %5366 = vmatmul.mubr.bf16.gmra.mxu0 %v6870_v4  ;;  %v3956_v57 = vadd.f32 %v3858_v48, %v9989_v62  ;;  %v9991_v48 = vld [vmem:[#allocation10_spill] sm:$0xff] }
 0x49e   : > { %9988 = vst [vmem:[#allocation7_spill] sm:$0xff] %v9122_v27  ;;  %v3824_v55 = vrot.slane %v3675_v38, 2  ;;  %4707 = vmatprep.mubr.bf16.mxu1 %v9874_v35  ;;  %5373 = vmatprep.mubr.bf16.mxu0 %v9874_v35  ;;  %v3859_v54 = vsel %vm2037_vm1, %v3821_v28, %v3823_v41 }
 0x49f   : > { %v3677_v53 = vpop.f32.mrf.mxu1  ;;  %v4314_v34 = vpop.f32.mrf.mxu0  ;;  %v3957_v19 = vadd.f32 %v3859_v54, %v9990_v14 }
 0x4a0   : > { %v3825_v26 = vrot.slane %v3677_v53, 2  ;;  %v3856_v43 = vsel %vm2037_vm1, %v3822_v21, %v3824_v55  ;;  %v6871_v34 = vld [vmem:[%s7058_s28 + $0x80] sm:$0xff]  }
 0x4a1   : > { %v3679_v32 = vpop.f32.mrf.mxu1  ;;  %v4315_v44 = vpop.f32.mrf.mxu0  ;;  %v3958_v38 = vadd.f32 %v3856_v43, %v9991_v48 }
 0x4a2   : > { %v3857_v4 = vsel %vm2037_vm1, %v3823_v41, %v3825_v26 }
 0x4a3   : > { %v3680_v62 = vpop.f32.mrf.mxu1  ;;  %v4316_v27 = vpop.f32.mrf.mxu0  ;;  %v3959_v1 = vadd.f32 %v3857_v4, %v9992_v61 }
 0x4a5   : > { %v3683_v28 = vpop.f32.mrf.mxu1  ;;  %v4319_v10 = vpop.f32.mrf.mxu0  ;;  %4708 = vmatmul.mubr.bf16.gmra.mxu1 %v6871_v34  ;;  %5374 = vmatmul.mubr.bf16.gmra.mxu0 %v6871_v34  ;;  %v6872_v34 = vld [vmem:[%s7058_s28 + $0x88] sm:$0xff]  }
 0x4a6   : > { %v9140_v54 = vadd.f32 %v4319_v10, %v3956_v57  ;;  %4717 = vmatprep.mubr.bf16.mxu1 %v9874_v35  ;;  %5383 = vmatprep.mubr.bf16.mxu0 %v9874_v35  ;;  %v3826_v14 = vrot.slane %v3683_v28, 2 }
 0x4a7   : > { %v3685_v21 = vpop.f32.mrf.mxu1  ;;  %v4321_v55 = vpop.f32.mrf.mxu0 }
 0x4a8   : > { %v9144_v53 = vadd.f32 %v4321_v55, %v3957_v19  ;;  %v3827_v44 = vrot.slane %v3685_v21, 2 }
 0x4a9   : > { %v3687_v41 = vpop.f32.mrf.mxu1  ;;  %v4323_v27 = vpop.f32.mrf.mxu0 }
 0x4aa   : > { %v3828_v61 = vrot.slane %v3687_v41, 2  ;;  %v9146_v26 = vadd.f32 %v4323_v27, %v3958_v38 }
 0x4ab   : > { %v3689_v43 = vpop.f32.mrf.mxu1  ;;  %v4325_v32 = vpop.f32.mrf.mxu0 }
 0x4ac   : > { %9993 = vst [vmem:[#allocation29_spill] sm:$0xff] %v9146_v26  ;;  %v3829_v10 = vrot.slane %v3689_v43, 2  ;;  %v9148_v57 = vadd.f32 %v4325_v32, %v3959_v1  ;;  %v3854_v48 = vsel %vm2037_vm1, %v3826_v14, %v3828_v61 }
 0x4ad   : > { %v3693_v4 = vpop.f32.mrf.mxu1  ;;  %v4329_v62 = vpop.f32.mrf.mxu0  ;;  %4718 = vmatmul.mubr.bf16.gmra.mxu1 %v6872_v34  ;;  %5384 = vmatmul.mubr.bf16.gmra.mxu0 %v6872_v34  ;;  %v3960_v19 = vadd.f32 %v3854_v48, %v8729_v8  ;;  %v9995_v8 = vld [vmem:[#allocation12_spill] sm:$0xff]  ;;  %v9996_v34 = vld [vmem:[#allocation13_spill] sm:$0xff] }
 0x4ae   : > { %9994 = vst [vmem:[#allocation8_spill] sm:$0xff] %v9148_v57  ;;  %v3830_v28 = vrot.slane %v3693_v4, 2  ;;  %4725 = vmatprep.mubr.bf16.mxu1 %v9874_v35  ;;  %5391 = vmatprep.mubr.bf16.mxu0 %v9874_v35  ;;  %v3855_v1 = vsel %vm2037_vm1, %v3827_v44, %v3829_v10 }
 0x4af   : > { %v3695_v38 = vpop.f32.mrf.mxu1  ;;  %v4330_v21 = vpop.f32.mrf.mxu0  ;;  %v3961_v55 = vadd.f32 %v3855_v1, %v8735_v50 }
 0x4b0   : > { %v3831_v41 = vrot.slane %v3695_v38, 2  ;;  %v3852_v27 = vsel %vm2037_vm1, %v3828_v61, %v3830_v28  ;;  %v6873_v21 = vld [vmem:[%s7058_s28 + $0x90] sm:$0xff]  }
 0x4b1   : > { %v3697_v14 = vpop.f32.mrf.mxu1  ;;  %v4331_v43 = vpop.f32.mrf.mxu0  ;;  %v3962_v32 = vadd.f32 %v3852_v27, %v9995_v8 }
 0x4b2   : > { %v3853_v48 = vsel %vm2037_vm1, %v3829_v10, %v3831_v41 }
 0x4b3   : > { %v3698_v4 = vpop.f32.mrf.mxu1  ;;  %v4332_v62 = vpop.f32.mrf.mxu0  ;;  %v3963_v57 = vadd.f32 %v3853_v48, %v9996_v34 }
 0x4b5   : > { %v3701_v44 = vpop.f32.mrf.mxu1  ;;  %v4335_v26 = vpop.f32.mrf.mxu0  ;;  %4726 = vmatmul.mubr.bf16.gmra.mxu1 %v6873_v21  ;;  %5392 = vmatmul.mubr.bf16.gmra.mxu0 %v6873_v21  ;;  %v6874_v21 = vld [vmem:[%s7058_s28 + $0x98] sm:$0xff]  }
 0x4b6   : > { %v9166_v50 = vadd.f32 %v4335_v26, %v3960_v19  ;;  %4735 = vmatprep.mubr.bf16.mxu1 %v9874_v35  ;;  %5401 = vmatprep.mubr.bf16.mxu0 %v9874_v35  ;;  %v3832_v41 = vrot.slane %v3701_v44, 2 }
 0x4b7   : > { %v3703_v61 = vpop.f32.mrf.mxu1  ;;  %v4337_v28 = vpop.f32.mrf.mxu0 }
 0x4b8   : > { %v9170_v1 = vadd.f32 %v4337_v28, %v3961_v55  ;;  %v3833_v48 = vrot.slane %v3703_v61, 2 }
 0x4b9   : > { %v3705_v10 = vpop.f32.mrf.mxu1  ;;  %v4339_v38 = vpop.f32.mrf.mxu0 }
 0x4ba   : > { %v3834_v27 = vrot.slane %v3705_v10, 2  ;;  %v9172_v14 = vadd.f32 %v4339_v38, %v3962_v32 }
 0x4bb   : > { %v3707_v43 = vpop.f32.mrf.mxu1  ;;  %v4341_v8 = vpop.f32.mrf.mxu0 }
 0x4bc   : > { %v3835_v26 = vrot.slane %v3707_v43, 2  ;;  %v9174_v19 = vadd.f32 %v4341_v8, %v3963_v57  ;;  %v3850_v4 = vsel %vm2037_vm1, %v3832_v41, %v3834_v27 }
 0x4bd   : > { %v3711_v62 = vpop.f32.mrf.mxu1  ;;  %v4345_v34 = vpop.f32.mrf.mxu0  ;;  %4736 = vmatmul.mubr.bf16.gmra.mxu1 %v6874_v21  ;;  %5402 = vmatmul.mubr.bf16.gmra.mxu0 %v6874_v21  ;;  %v3964_v55 = vadd.f32 %v3850_v4, %v8755_v23 }
 0x4be   : > { %9997 = vst [vmem:[#allocation9_spill] sm:$0xff] %v9174_v19  ;;  %v3836_v44 = vrot.slane %v3711_v62, 2  ;;  %4743 = vmatprep.mubr.bf16.mxu1 %v9874_v35  ;;  %5409 = vmatprep.mubr.bf16.mxu0 %v9874_v35  ;;  %v3851_v57 = vsel %vm2037_vm1, %v3833_v48, %v3835_v26  ;;  %v9998_v34 = vld [vmem:[#allocation14_spill] sm:$0xff] }
 0x4bf   : > { %v3713_v32 = vpop.f32.mrf.mxu1  ;;  %v4346_v61 = vpop.f32.mrf.mxu0  ;;  %v3965_v28 = vadd.f32 %v3851_v57, %v8761_v58 }
 0x4c0   : > { %v3837_v10 = vrot.slane %v3713_v32, 2  ;;  %v3848_v38 = vsel %vm2037_vm1, %v3834_v27, %v3836_v44  ;;  %v6875_v61 = vld [vmem:[%s7058_s28 + $0xa0] sm:$0xff]  }
 0x4c1   : > { %v3715_v41 = vpop.f32.mrf.mxu1  ;;  %v4347_v43 = vpop.f32.mrf.mxu0  ;;  %v3966_v23 = vadd.f32 %v3848_v38, %v8765_v36 }
 0x4c2   : > { %v3849_v8 = vsel %vm2037_vm1, %v3835_v26, %v3837_v10 }
 0x4c3   : > { %v3716_v4 = vpop.f32.mrf.mxu1  ;;  %v4348_v62 = vpop.f32.mrf.mxu0  ;;  %v3967_v21 = vadd.f32 %v3849_v8, %v9998_v34 }
 0x4c5   : > { %v3719_v48 = vpop.f32.mrf.mxu1  ;;  %v4351_v19 = vpop.f32.mrf.mxu0  ;;  %4744 = vmatmul.mubr.bf16.gmra.mxu1 %v6875_v61  ;;  %5410 = vmatmul.mubr.bf16.gmra.mxu0 %v6875_v61  ;;  %v6876_v61 = vld [vmem:[%s7058_s28 + $0xa8] sm:$0xff]  }
 0x4c6   : > { %v9192_v58 = vadd.f32 %v4351_v19, %v3964_v55  ;;  %4753 = vmatprep.mubr.bf16.mxu1 %v9874_v35  ;;  %5419 = vmatprep.mubr.bf16.mxu0 %v9874_v35  ;;  %v3838_v32 = vrot.slane %v3719_v48, 2 }
 0x4c7   : > { %v3721_v27 = vpop.f32.mrf.mxu1  ;;  %v4353_v36 = vpop.f32.mrf.mxu0 }
 0x4c8   : > { %v9196_v44 = vadd.f32 %v4353_v36, %v3965_v28  ;;  %v3839_v8 = vrot.slane %v3721_v27, 2 }
 0x4c9   : > { %v3723_v26 = vpop.f32.mrf.mxu1  ;;  %v4355_v57 = vpop.f32.mrf.mxu0 }
 0x4ca   : > { %v3840_v10 = vrot.slane %v3723_v26, 2  ;;  %v9198_v38 = vadd.f32 %v4355_v57, %v3966_v23 }
 0x4cb   : > { %v3725_v41 = vpop.f32.mrf.mxu1  ;;  %v4357_v43 = vpop.f32.mrf.mxu0 }
 0x4cc   : > { %9999 = vst [vmem:[#allocation10_spill] sm:$0xff] %v9198_v38  ;;  %v3841_v19 = vrot.slane %v3725_v41, 2  ;;  %v9200_v55 = vadd.f32 %v4357_v43, %v3967_v21  ;;  %v3846_v4 = vsel %vm2037_vm1, %v3838_v32, %v3840_v10 }
 0x4cd   : > { %v3729_v62 = vpop.f32.mrf.mxu1  ;;  %v4361_v34 = vpop.f32.mrf.mxu0  ;;  %4754 = vmatmul.mubr.bf16.gmra.mxu1 %v6876_v61  ;;  %5420 = vmatmul.mubr.bf16.gmra.mxu0 %v6876_v61  ;;  %v3968_v28 = vadd.f32 %v3846_v4, %v8781_v15 }
 0x4ce   : > { %10000 = vst [vmem:[#allocation11_spill] sm:$0xff] %v9200_v55  ;;  %v3842_v48 = vrot.slane %v3729_v62, 2  ;;  %4761 = vmatprep.mubr.bf16.mxu1 %v9874_v35  ;;  %5427 = vmatprep.mubr.bf16.mxu0 %v9874_v35  ;;  %v3847_v23 = vsel %vm2037_vm1, %v3839_v8, %v3841_v19 }
 0x4cf   : > { %v3731_v21 = vpop.f32.mrf.mxu1  ;;  %v4362_v27 = vpop.f32.mrf.mxu0  ;;  %v3969_v36 = vadd.f32 %v3847_v23, %v8787_v39 }
 0x4d0   : > { %v3843_v26 = vrot.slane %v3731_v21, 2  ;;  %v3844_v57 = vsel %vm2037_vm1, %v3840_v10, %v3842_v48  ;;  %v6877_v27 = vld [vmem:[%s7058_s28 + $0xb0] sm:$0xff]  }
 0x4d1   : > { %v3733_v32 = vpop.f32.mrf.mxu1  ;;  %v4363_v41 = vpop.f32.mrf.mxu0  ;;  %v3970_v15 = vadd.f32 %v3844_v57, %v8791_v9 }
 0x4d2   : > { %v3845_v43 = vsel %vm2037_vm1, %v3841_v19, %v3843_v26  ;;  %v6878_v41 = vld [vmem:[%s7058_s28 + $0xb8] sm:$0xff]  }
 0x4d3   : > { %v3734_v4 = vpop.f32.mrf.mxu1  ;;  %v4364_v62 = vpop.f32.mrf.mxu0  ;;  %v3971_v34 = vadd.f32 %v3845_v43, %v8795_v5 }
 0x4d5   : > { %v3737_v8 = vpop.f32.mrf.mxu1  ;;  %v4367_v61 = vpop.f32.mrf.mxu0  ;;  %4762 = vmatmul.mubr.bf16.gmra.mxu1 %v6877_v27  ;;  %5428 = vmatmul.mubr.bf16.gmra.mxu0 %v6877_v27  ;;  %v6879_v27 = vld [vmem:[%s7058_s28 + $0xc0] sm:$0xff]  }
 0x4d6   : > { %v9218_v39 = vadd.f32 %v4367_v61, %v3968_v28  ;;  %4771 = vmatprep.mubr.bf16.mxu1 %v9874_v35  ;;  %5437 = vmatprep.mubr.bf16.mxu0 %v9874_v35 }
 0x4d7   : > { %v3738_v9 = vpop.f32.mrf.mxu1  ;;  %v4369_v10 = vpop.f32.mrf.mxu0 }
 0x4d8   : > { %10001 = vst [vmem:[#allocation12_spill] sm:$0xff] %v9218_v39  ;;  %v9222_v48 = vadd.f32 %v4369_v10, %v3969_v36 }
 0x4d9   : > { %v3739_v19 = vpop.f32.mrf.mxu1  ;;  %v4371_v23 = vpop.f32.mrf.mxu0 }
 0x4da   : > { %10002 = vst [vmem:[#allocation13_spill] sm:$0xff] %v9222_v48  ;;  %v9224_v21 = vadd.f32 %v4371_v23, %v3970_v15  ;;  %v6884_v48 = vld [vmem:[%s7058_s28 + $0xe8] sm:$0xff]  }
 0x4db   : > { %v3740_v5 = vpop.f32.mrf.mxu1  ;;  %v4373_v26 = vpop.f32.mrf.mxu0 }
 0x4dc   : > { %10003 = vst [vmem:[#allocation14_spill] sm:$0xff] %v9224_v21  ;;  %v9226_v57 = vadd.f32 %v4373_v26, %v3971_v34 }
 0x4dd   : > { %v3743_v32 = vpop.f32.mrf.mxu1  ;;  %v4377_v28 = vpop.f32.mrf.mxu0  ;;  %4772 = vmatmul.mubr.bf16.gmra.mxu1 %v6878_v41  ;;  %5438 = vmatmul.mubr.bf16.gmra.mxu0 %v6878_v41 }
 0x4de   : > { %10004 = vst [vmem:[#allocation30_spill] sm:$0xff] %v9226_v57  ;;  %4779 = vmatprep.mubr.bf16.mxu1 %v9874_v35  ;;  %5445 = vmatprep.mubr.bf16.mxu0 %v9874_v35  ;;  %v6880_v28 = vld [vmem:[%s7058_s28 + $0xc8] sm:$0xff]  }
 0x4df   : > { %v3744_v36 = vpop.f32.mrf.mxu1  ;;  %v4378_v43 = vpop.f32.mrf.mxu0 }
 0x4e1   : > { %v3745_v4 = vpop.f32.mrf.mxu1  ;;  %v4379_v62 = vpop.f32.mrf.mxu0 }
 0x4e3   : > { %v3746_v15 = vpop.f32.mrf.mxu1  ;;  %v4380_v8 = vpop.f32.mrf.mxu0 }
 0x4e5   : > { %v4577_v61 = vpop.f32.mrf.mxu1  ;;  %4780 = vmatmul.mubr.bf16.gmra.mxu1 %v6879_v27  ;;  %v5243_v34 = vpop.f32.mrf.mxu0  ;;  %5446 = vmatmul.mubr.bf16.gmra.mxu0 %v6879_v27  ;;  %v6881_v27 = vld [vmem:[%s7058_s28 + $0xd0] sm:$0xff]  }
 0x4e6   : > { %4789 = vmatprep.mubr.bf16.mxu1 %v9874_v35  ;;  %5455 = vmatprep.mubr.bf16.mxu0 %v9874_v35 }
 0x4e7   : > { %v4578_v9 = vpop.f32.mrf.mxu1  ;;  %v5244_v10 = vpop.f32.mrf.mxu0 }
 0x4e9   : > { %v4579_v19 = vpop.f32.mrf.mxu1  ;;  %v5245_v23 = vpop.f32.mrf.mxu0 }
 0x4eb   : > { %v4580_v5 = vpop.f32.mrf.mxu1  ;;  %v5246_v26 = vpop.f32.mrf.mxu0 }
 0x4ed   : > { %v4583_v32 = vpop.f32.mrf.mxu1  ;;  %4790 = vmatmul.mubr.bf16.gmra.mxu1 %v6880_v28  ;;  %v5249_v41 = vpop.f32.mrf.mxu0  ;;  %5456 = vmatmul.mubr.bf16.gmra.mxu0 %v6880_v28  ;;  %v6882_v28 = vld [vmem:[%s7058_s28 + $0xd8] sm:$0xff]  }
 0x4ee   : > { %4797 = vmatprep.mubr.bf16.mxu1 %v9874_v35  ;;  %5463 = vmatprep.mubr.bf16.mxu0 %v9874_v35 }
 0x4ef   : > { %v4584_v36 = vpop.f32.mrf.mxu1  ;;  %v5250_v43 = vpop.f32.mrf.mxu0 }
 0x4f1   : > { %v4585_v4 = vpop.f32.mrf.mxu1  ;;  %v5251_v62 = vpop.f32.mrf.mxu0 }
 0x4f3   : > { %v4586_v15 = vpop.f32.mrf.mxu1  ;;  %v5252_v8 = vpop.f32.mrf.mxu0 }
 0x4f5   : > { %v4589_v61 = vpop.f32.mrf.mxu1  ;;  %4798 = vmatmul.mubr.bf16.gmra.mxu1 %v6881_v27  ;;  %v5255_v34 = vpop.f32.mrf.mxu0  ;;  %5464 = vmatmul.mubr.bf16.gmra.mxu0 %v6881_v27  ;;  %v6883_v27 = vld [vmem:[%s7058_s28 + $0xe0] sm:$0xff]  }
 0x4f6   : > { %4807 = vmatprep.mubr.bf16.mxu1 %v9874_v35  ;;  %5473 = vmatprep.mubr.bf16.mxu0 %v9874_v35 }
 0x4f7   : > { %v4590_v9 = vpop.f32.mrf.mxu1  ;;  %v5256_v10 = vpop.f32.mrf.mxu0 }
 0x4f9   : > { %v4591_v19 = vpop.f32.mrf.mxu1  ;;  %v5257_v23 = vpop.f32.mrf.mxu0 }
 0x4fb   : > { %v4592_v5 = vpop.f32.mrf.mxu1  ;;  %v5258_v26 = vpop.f32.mrf.mxu0 }
 0x4fc   : > { %v5783_v5 = vsub.s32 0, %v7395_v45 }
 0x4fd   : > { %v4595_v32 = vpop.f32.mrf.mxu1  ;;  %4808 = vmatmul.mubr.bf16.gmra.mxu1 %v6882_v28  ;;  %v5261_v41 = vpop.f32.mrf.mxu0  ;;  %5474 = vmatmul.mubr.bf16.gmra.mxu0 %v6882_v28 }
 0x4fe   : > { %4815 = vmatprep.mubr.bf16.mxu1 %v9874_v35  ;;  %5481 = vmatprep.mubr.bf16.mxu0 %v9874_v35  ;;  %v5778_v41 = vld [vmem:[%s9851_s2] sm:$0x3] }
 0x4ff   : > { %v4596_v36 = vpop.f32.mrf.mxu1  ;;  %v5262_v43 = vpop.f32.mrf.mxu0  ;;  %v9257_v21 = vrot.slane %v5778_v41, %v5783_v5 }
 0x501   : > { %v4597_v4 = vpop.f32.mrf.mxu1  ;;  %v5263_v62 = vpop.f32.mrf.mxu0 }
 0x502   : > { %v5787_v62 = vsub.s32 1, %v7395_v45 }
 0x503   : > { %v4598_v15 = vpop.f32.mrf.mxu1  ;;  %v5264_v8 = vpop.f32.mrf.mxu0 }
 0x505   : > { %v4601_v61 = vpop.f32.mrf.mxu1  ;;  %4816 = vmatmul.mubr.bf16.gmra.mxu1 %v6883_v27  ;;  %v5267_v34 = vpop.f32.mrf.mxu0  ;;  %5482 = vmatmul.mubr.bf16.gmra.mxu0 %v6883_v27 }
 0x506   : > { %4825 = vmatprep.mubr.bf16.mxu1 %v9874_v35  ;;  %5491 = vmatprep.mubr.bf16.mxu0 %v9874_v35  ;;  %v4888_v26 = vrot.slane %v4601_v61, 1  ;;  %v5554_v36 = vrot.slane %v5267_v34, 2  ;;  %v5779_v61 = vld [vmem:[%s9852_s3] sm:$0x3] }
 0x507   : > { %v4603_v9 = vpop.f32.mrf.mxu1  ;;  %v5269_v10 = vpop.f32.mrf.mxu0 }
 0x508   : > { %v4889_v15 = vrot.slane %v4603_v9, 1 }
 0x509   : > { %v4605_v19 = vpop.f32.mrf.mxu1  ;;  %v5271_v23 = vpop.f32.mrf.mxu0 }
 0x50a   : > { %v4890_v32 = vrot.slane %v4605_v19, 1  ;;  %v5556_v28 = vrot.slane %v5271_v23, 2  ;;  %v5555_v23 = vrot.slane %v5269_v10, 2  ;;  %v9267_v10 = vrot.slane %v5779_v61, %v5783_v5 }
 0x50b   : > { %v4607_v43 = vpop.f32.mrf.mxu1  ;;  %v5273_v4 = vpop.f32.mrf.mxu0 }
 0x50c   : > { %v5046_v8 = vsel %vm1041_vm0, %v4888_v26, %v4890_v32  ;;  %v4891_v27 = vrot.slane %v4607_v43, 1  ;;  %v5557_v19 = vrot.slane %v5273_v4, 2  ;;  %v5712_v9 = vsel %vm2037_vm1, %v5554_v36, %v5556_v28 }
 0x50d   : > { %v5048_v57 = vadd.f32 %v5046_v8, %v8828_v31  ;;  %v4611_v34 = vpop.f32.mrf.mxu1  ;;  %4826 = vmatmul.mubr.bf16.gmra.mxu1 %v6884_v48  ;;  %v5277_v39 = vpop.f32.mrf.mxu0  ;;  %5492 = vmatmul.mubr.bf16.gmra.mxu0 %v6884_v48  ;;  %v9270_v48 = vrot.slane %v5778_v41, %v5787_v62 }
 0x50e   : > { %v5047_v26 = vsel %vm1041_vm0, %v4889_v15, %v4891_v27  ;;  %v4892_v43 = vrot.slane %v4611_v34, 1  ;;  %v5558_v4 = vrot.slane %v5277_v39, 2  ;;  %4833 = vmatprep.mubr.bf16.mxu1 %v9874_v35  ;;  %5499 = vmatprep.mubr.bf16.mxu0 %v9874_v35  ;;  %v5713_v36 = vsel %vm2037_vm1, %v5555_v23, %v5557_v19 }
 0x50f   : > { %v5714_v31 = vadd.f32 %v5712_v9, %v5048_v57  ;;  %v5049_v8 = vadd.f32 %v5047_v26, %v8832_v13  ;;  %v4613_v55 = vpop.f32.mrf.mxu1  ;;  %v5279_v38 = vpop.f32.mrf.mxu0  ;;  %v9279_v9 = vrot.slane %v5779_v61, %v5787_v62 }
 0x510   : > { %v5044_v15 = vsel %vm1041_vm0, %v4890_v32, %v4892_v43  ;;  %v4893_v39 = vrot.slane %v4613_v55, 1  ;;  %v5559_v34 = vrot.slane %v5279_v38, 2  ;;  %v5710_v23 = vsel %vm2037_vm1, %v5556_v28, %v5558_v4 }
 0x511   : > { %v5791_v57 = vmul.f32 %v9257_v21, %v5714_v31  ;;  %v5715_v5 = vadd.f32 %v5713_v36, %v5049_v8  ;;  %v5050_v13 = vadd.f32 %v5044_v15, %v8834_v22  ;;  %v4615_v41 = vpop.f32.mrf.mxu1  ;;  %v5281_v26 = vpop.f32.mrf.mxu0 }
 0x512   : > { %v5045_v32 = vsel %vm1041_vm0, %v4891_v27, %v4893_v39  ;;  %v5711_v22 = vsel %vm2037_vm1, %v5557_v19, %v5559_v34  ;;  %v6885_v27 = vld [vmem:[%s7058_s28 + $0xf0] sm:$0xff]  }
 0x513   : > { %v5866_v38 = vadd.f32 %v9267_v10, %v5791_v57  ;;  %v5792_v55 = vmul.f32 %v9270_v48, %v5715_v5  ;;  %v5716_v43 = vadd.f32 %v5710_v23, %v5050_v13  ;;  %v5051_v31 = vadd.f32 %v5045_v32, %v8836_v47  ;;  %v4616_v62 = vpop.f32.mrf.mxu1  ;;  %v5282_v61 = vpop.f32.mrf.mxu0 }
 0x515   : > { %v5930_v8 = vmax.f32 %v5866_v38, 0.0  ;;  %v5867_v36 = vadd.f32 %v9279_v9, %v5792_v55  ;;  %v5793_v28 = vmul.f32 %v9257_v21, %v5716_v43  ;;  %v5717_v4 = vadd.f32 %v5711_v22, %v5051_v31  ;;  %v4619_v15 = vpop.f32.mrf.mxu1  ;;  %4834 = vmatmul.mubr.bf16.gmra.mxu1 %v6885_v27  ;;  %v5285_v39 = vpop.f32.mrf.mxu0  ;;  %5500 = vmatmul.mubr.bf16.gmra.mxu0 %v6885_v27 }
 0x516   : > { %4843 = vmatprep.mubr.bf16.mxu1 %v9874_v35  ;;  %5509 = vmatprep.mubr.bf16.mxu0 %v9874_v35  ;;  %v4894_v32 = vrot.slane %v4619_v15, 1  ;;  %v5560_v31 = vrot.slane %v5285_v39, 2  ;;  %v6886_v15 = vld [vmem:[%s7058_s28 + $0xf8] sm:$0xff]  }
 0x517   : > { %5994 = vst [vmem:[%s9296_s11] sm:$0xff] %v5930_v8  ;;  %v5931_v47 = vmax.f32 %v5867_v36, 0.0  ;;  %v5868_v19 = vadd.f32 %v9267_v10, %v5793_v28  ;;  %v5794_v34 = vmul.f32 %v9270_v48, %v5717_v4  ;;  %v4621_v57 = vpop.f32.mrf.mxu1  ;;  %v5287_v5 = vpop.f32.mrf.mxu0 }
 0x518   : > { %v4895_v22 = vrot.slane %v4621_v57, 1  ;;  %v5561_v4 = vrot.slane %v5287_v5, 2 }
 0x519   : > { %5995 = vst [vmem:[%s9296_s11 + $0x8] sm:$0xff] %v5931_v47  ;;  %v5932_v13 = vmax.f32 %v5868_v19, 0.0  ;;  %v5869_v41 = vadd.f32 %v9279_v9, %v5794_v34  ;;  %v4623_v26 = vpop.f32.mrf.mxu1  ;;  %v5289_v23 = vpop.f32.mrf.mxu0 }
 0x51a   : > { %v4896_v38 = vrot.slane %v4623_v26, 1  ;;  %v5562_v55 = vrot.slane %v5289_v23, 2 }
 0x51b   : > { %5996 = vst [vmem:[%s9296_s11 + $0x10] sm:$0xff] %v5932_v13  ;;  %v5933_v43 = vmax.f32 %v5869_v41, 0.0  ;;  %v4625_v62 = vpop.f32.mrf.mxu1  ;;  %v5291_v61 = vpop.f32.mrf.mxu0 }
 0x51c   : > { %v5042_v8 = vsel %vm1041_vm0, %v4894_v32, %v4896_v38  ;;  %v4897_v36 = vrot.slane %v4625_v62, 1  ;;  %v5563_v28 = vrot.slane %v5291_v61, 2  ;;  %v5708_v39 = vsel %vm2037_vm1, %v5560_v31, %v5562_v55 }
 0x51d   : > { %5997 = vst [vmem:[%s9296_s11 + $0x18] sm:$0xff] %v5933_v43  ;;  %v5052_v27 = vadd.f32 %v5042_v8, %v8854_v0  ;;  %v4629_v47 = vpop.f32.mrf.mxu1  ;;  %4844 = vmatmul.mubr.bf16.gmra.mxu1 %v6886_v15  ;;  %v5295_v19 = vpop.f32.mrf.mxu0  ;;  %5510 = vmatmul.mubr.bf16.gmra.mxu0 %v6886_v15 }
 0x51e   : > { %v5043_v34 = vsel %vm1041_vm0, %v4895_v22, %v4897_v36  ;;  %v4898_v57 = vrot.slane %v4629_v47, 1  ;;  %v5564_v13 = vrot.slane %v5295_v19, 2  ;;  %4851 = vmatprep.mubr.bf16.mxu1 %v9874_v35  ;;  %5517 = vmatprep.mubr.bf16.mxu0 %v9874_v35  ;;  %v5709_v23 = vsel %vm2037_vm1, %v5561_v4, %v5563_v28 }
 0x51f   : > { %v5718_v5 = vadd.f32 %v5708_v39, %v5052_v27  ;;  %v5053_v0 = vadd.f32 %v5043_v34, %v8858_v49  ;;  %v4631_v41 = vpop.f32.mrf.mxu1  ;;  %v5297_v26 = vpop.f32.mrf.mxu0 }
 0x520   : > { %v5040_v32 = vsel %vm1041_vm0, %v4896_v38, %v4898_v57  ;;  %v4899_v43 = vrot.slane %v4631_v41, 1  ;;  %v5565_v31 = vrot.slane %v5297_v26, 2  ;;  %v5706_v49 = vsel %vm2037_vm1, %v5562_v55, %v5564_v13 }
 0x521   : > { %v5795_v62 = vmul.f32 %v9257_v21, %v5718_v5  ;;  %v5719_v61 = vadd.f32 %v5709_v23, %v5053_v0  ;;  %v5054_v22 = vadd.f32 %v5040_v32, %v8860_v29  ;;  %v4633_v8 = vpop.f32.mrf.mxu1  ;;  %v5299_v27 = vpop.f32.mrf.mxu0  ;;  %v6887_v0 = vld [vmem:[%s7058_s28 + $0x100] sm:$0xff]  }
 0x522   : > { %v5041_v47 = vsel %vm1041_vm0, %v4897_v36, %v4899_v43  ;;  %v5707_v29 = vsel %vm2037_vm1, %v5563_v28, %v5565_v31 }
 0x523   : > { %v5870_v4 = vadd.f32 %v9267_v10, %v5795_v62  ;;  %v5796_v38 = vmul.f32 %v9270_v48, %v5719_v61  ;;  %v5720_v15 = vadd.f32 %v5706_v49, %v5054_v22  ;;  %v5055_v19 = vadd.f32 %v5041_v47, %v8862_v12  ;;  %v4634_v39 = vpop.f32.mrf.mxu1  ;;  %v5300_v34 = vpop.f32.mrf.mxu0 }
 0x525   : > { %v5934_v57 = vmax.f32 %v5870_v4, 0.0  ;;  %v5871_v5 = vadd.f32 %v9279_v9, %v5796_v38  ;;  %v5797_v55 = vmul.f32 %v9257_v21, %v5720_v15  ;;  %v5721_v36 = vadd.f32 %v5707_v29, %v5055_v19  ;;  %v4637_v13 = vpop.f32.mrf.mxu1  ;;  %4852 = vmatmul.mubr.bf16.gmra.mxu1 %v6887_v0  ;;  %v5303_v41 = vpop.f32.mrf.mxu0  ;;  %5518 = vmatmul.mubr.bf16.gmra.mxu0 %v6887_v0 }
 0x526   : > { %4861 = vmatprep.mubr.bf16.mxu1 %v9874_v35  ;;  %5527 = vmatprep.mubr.bf16.mxu0 %v9874_v35  ;;  %v4900_v22 = vrot.slane %v4637_v13, 1  ;;  %v5566_v47 = vrot.slane %v5303_v41, 2 }
 0x527   : > { %5998 = vst [vmem:[%s9296_s11 + $0x20] sm:$0xff] %v5934_v57  ;;  %v5935_v12 = vmax.f32 %v5871_v5, 0.0  ;;  %v5872_v28 = vadd.f32 %v9267_v10, %v5797_v55  ;;  %v5798_v26 = vmul.f32 %v9270_v48, %v5721_v36  ;;  %v4639_v23 = vpop.f32.mrf.mxu1  ;;  %v5305_v32 = vpop.f32.mrf.mxu0  ;;  %v6888_v55 = vld [vmem:[%s7058_s28 + $0x108] sm:$0xff]  }
 0x528   : > { %v4901_v15 = vrot.slane %v4639_v23, 1  ;;  %v5567_v29 = vrot.slane %v5305_v32, 2 }
 0x529   : > { %5999 = vst [vmem:[%s9296_s11 + $0x28] sm:$0xff] %v5935_v12  ;;  %v5936_v43 = vmax.f32 %v5872_v28, 0.0  ;;  %v5873_v31 = vadd.f32 %v9279_v9, %v5798_v26  ;;  %v4641_v62 = vpop.f32.mrf.mxu1  ;;  %v5307_v61 = vpop.f32.mrf.mxu0 }
 0x52a   : > { %v4902_v8 = vrot.slane %v4641_v62, 1  ;;  %v5568_v27 = vrot.slane %v5307_v61, 2 }
 0x52b   : > { %6000 = vst [vmem:[%s9296_s11 + $0x30] sm:$0xff] %v5936_v43  ;;  %v5937_v49 = vmax.f32 %v5873_v31, 0.0  ;;  %v4643_v4 = vpop.f32.mrf.mxu1  ;;  %v5309_v38 = vpop.f32.mrf.mxu0 }
 0x52c   : > { %v5038_v19 = vsel %vm1041_vm0, %v4900_v22, %v4902_v8  ;;  %v4903_v39 = vrot.slane %v4643_v4, 1  ;;  %v5569_v34 = vrot.slane %v5309_v38, 2  ;;  %v5704_v13 = vsel %vm2037_vm1, %v5566_v47, %v5568_v27 }
 0x52d   : > { %6001 = vst [vmem:[%s9296_s11 + $0x38] sm:$0xff] %v5937_v49  ;;  %v5056_v57 = vadd.f32 %v5038_v19, %v8880_v40  ;;  %v4647_v5 = vpop.f32.mrf.mxu1  ;;  %4862 = vmatmul.mubr.bf16.gmra.mxu1 %v6888_v55  ;;  %v5313_v36 = vpop.f32.mrf.mxu0  ;;  %5528 = vmatmul.mubr.bf16.gmra.mxu0 %v6888_v55 }
 0x52e   : > { %v5039_v0 = vsel %vm1041_vm0, %v4901_v15, %v4903_v39  ;;  %v4904_v41 = vrot.slane %v4647_v5, 1  ;;  %v5570_v12 = vrot.slane %v5313_v36, 2  ;;  %4869 = vmatprep.mubr.bf16.mxu1 %v9874_v35  ;;  %5535 = vmatprep.mubr.bf16.mxu0 %v9874_v35  ;;  %v5705_v32 = vsel %vm2037_vm1, %v5567_v29, %v5569_v34 }
 0x52f   : > { %v5722_v28 = vadd.f32 %v5704_v13, %v5056_v57  ;;  %v5057_v40 = vadd.f32 %v5039_v0, %v8884_v3  ;;  %v4649_v26 = vpop.f32.mrf.mxu1  ;;  %v5315_v23 = vpop.f32.mrf.mxu0  ;;  %v6889_v0 = vld [vmem:[%s7058_s28 + $0x110] sm:$0xff]  }
 0x530   : > { %v5036_v43 = vsel %vm1041_vm0, %v4902_v8, %v4904_v41  ;;  %v4905_v31 = vrot.slane %v4649_v26, 1  ;;  %v5571_v62 = vrot.slane %v5315_v23, 2  ;;  %v5702_v3 = vsel %vm2037_vm1, %v5568_v27, %v5570_v12 }
 0x531   : > { %v5799_v61 = vmul.f32 %v9257_v21, %v5722_v28  ;;  %v5723_v22 = vadd.f32 %v5705_v32, %v5057_v40  ;;  %v5058_v49 = vadd.f32 %v5036_v43, %v8886_v63  ;;  %v4651_v47 = vpop.f32.mrf.mxu1  ;;  %v5317_v4 = vpop.f32.mrf.mxu0 }
 0x532   : > { %v5037_v38 = vsel %vm1041_vm0, %v4903_v39, %v4905_v31  ;;  %v5703_v63 = vsel %vm2037_vm1, %v5569_v34, %v5571_v62 }
 0x533   : > { %v5874_v15 = vadd.f32 %v9267_v10, %v5799_v61  ;;  %v5800_v8 = vmul.f32 %v9270_v48, %v5723_v22  ;;  %v5724_v19 = vadd.f32 %v5702_v3, %v5058_v49  ;;  %v5059_v29 = vadd.f32 %v5037_v38, %v8888_v33  ;;  %v4652_v57 = vpop.f32.mrf.mxu1  ;;  %v5318_v5 = vpop.f32.mrf.mxu0 }
 0x534   : > { %v6890_v57 = vld [vmem:[%s7058_s28 + $0x118] sm:$0xff]   ;;  %s6453_s28 = sshll.u32 %s7003_s19, 13  ;;  %s9809_s19 = scalar_lea.sflag [#allocation3], %s188_s9 }
 0x535   : > { %v5938_v55 = vmax.f32 %v5874_v15, 0.0  ;;  %v5875_v36 = vadd.f32 %v9279_v9, %v5800_v8  ;;  %v5801_v27 = vmul.f32 %v9257_v21, %v5724_v19  ;;  %v5725_v39 = vadd.f32 %v5703_v63, %v5059_v29  ;;  %v4655_v13 = vpop.f32.mrf.mxu1  ;;  %4870 = vmatmul.mubr.bf16.gmra.mxu1 %v6889_v0  ;;  %v5321_v41 = vpop.f32.mrf.mxu0  ;;  %5536 = vmatmul.mubr.bf16.gmra.mxu0 %v6889_v0  ;;  %s9801_s20 = scalar_lea.hbm %s9853_s4, %s6453_s28 }
 0x536   : > { %4879 = vmatprep.mubr.bf16.mxu1 %v9874_v35  ;;  %5545 = vmatprep.mubr.bf16.mxu0 %v9874_v35  ;;  %v4906_v31 = vrot.slane %v4655_v13, 1  ;;  %v5572_v22 = vrot.slane %v5321_v41, 2 }
 0x537   : > { %6002 = vst [vmem:[%s9296_s11 + $0x40] sm:$0xff] %v5938_v55  ;;  %v5939_v33 = vmax.f32 %v5875_v36, 0.0  ;;  %v5876_v34 = vadd.f32 %v9267_v10, %v5801_v27  ;;  %v5802_v12 = vmul.f32 %v9270_v48, %v5725_v39  ;;  %v4657_v28 = vpop.f32.mrf.mxu1  ;;  %v5323_v40 = vpop.f32.mrf.mxu0 }
 0x538   : > { %v4907_v4 = vrot.slane %v4657_v28, 1  ;;  %v5573_v8 = vrot.slane %v5323_v40, 2 }
 0x539   : > { %6003 = vst [vmem:[%s9296_s11 + $0x48] sm:$0xff] %v5939_v33  ;;  %v5940_v26 = vmax.f32 %v5876_v34, 0.0  ;;  %v5877_v23 = vadd.f32 %v9279_v9, %v5802_v12  ;;  %v4659_v32 = vpop.f32.mrf.mxu1  ;;  %v5325_v43 = vpop.f32.mrf.mxu0 }
 0x53a   : > { %v4908_v62 = vrot.slane %v4659_v32, 1  ;;  %v5574_v61 = vrot.slane %v5325_v43, 2 }
 0x53b   : > { %6004 = vst [vmem:[%s9296_s11 + $0x50] sm:$0xff] %v5940_v26  ;;  %v5941_v35 = vmax.f32 %v5877_v23, 0.0  ;;  %v4661_v49 = vpop.f32.mrf.mxu1  ;;  %v5327_v47 = vpop.f32.mrf.mxu0 }
 0x53c   : > { %v5034_v3 = vsel %vm1041_vm0, %v4906_v31, %v4908_v62  ;;  %v4909_v38 = vrot.slane %v4661_v49, 1  ;;  %v5575_v15 = vrot.slane %v5327_v47, 2  ;;  %v5700_v63 = vsel %vm2037_vm1, %v5572_v22, %v5574_v61 }
 0x53d   : > { %6005 = vst [vmem:[%s9296_s11 + $0x58] sm:$0xff] %v5941_v35  ;;  %v5060_v19 = vadd.f32 %v5034_v3, %v8906_v24  ;;  %v4665_v29 = vpop.f32.mrf.mxu1  ;;  %4880 = vmatmul.mubr.bf16.gmra.mxu1 %v6890_v57  ;;  %v5331_v5 = vpop.f32.mrf.mxu0  ;;  %5546 = vmatmul.mubr.bf16.gmra.mxu0 %v6890_v57 }
 0x53e   : > { %v5035_v55 = vsel %vm1041_vm0, %v4907_v4, %v4909_v38  ;;  %v4910_v36 = vrot.slane %v4665_v29, 1  ;;  %v5576_v27 = vrot.slane %v5331_v5, 2  ;;  %v5701_v24 = vsel %vm2037_vm1, %v5573_v8, %v5575_v15 }
 0x53f   : > { %v5726_v39 = vadd.f32 %v5700_v63, %v5060_v19  ;;  %v5061_v13 = vadd.f32 %v5035_v55, %v8910_v25  ;;  %v4667_v0 = vpop.f32.mrf.mxu1  ;;  %v5333_v41 = vpop.f32.mrf.mxu0 }
 0x540   : > { %v5032_v33 = vsel %vm1041_vm0, %v4908_v62, %v4910_v36  ;;  %v4911_v34 = vrot.slane %v4667_v0, 1  ;;  %v5577_v12 = vrot.slane %v5333_v41, 2  ;;  %v5698_v25 = vsel %vm2037_vm1, %v5574_v61, %v5576_v27 }
 0x541   : > { %v5803_v28 = vmul.f32 %v9257_v21, %v5726_v39  ;;  %v5727_v40 = vadd.f32 %v5701_v24, %v5061_v13  ;;  %v5062_v26 = vadd.f32 %v5032_v33, %v8912_v37  ;;  %v4669_v23 = vpop.f32.mrf.mxu1  ;;  %v5335_v32 = vpop.f32.mrf.mxu0 }
 0x542   : > { %v5033_v43 = vsel %vm1041_vm0, %v4909_v38, %v4911_v34  ;;  %v5699_v37 = vsel %vm2037_vm1, %v5575_v15, %v5577_v12 }
 0x543   : > { %v5878_v31 = vadd.f32 %v9267_v10, %v5803_v28  ;;  %v5804_v62 = vmul.f32 %v9270_v48, %v5727_v40  ;;  %v5728_v35 = vadd.f32 %v5698_v25, %v5062_v26  ;;  %v5063_v22 = vadd.f32 %v5033_v43, %v8914_v60  ;;  %v4670_v49 = vpop.f32.mrf.mxu1  ;;  %v5336_v47 = vpop.f32.mrf.mxu0 }
 0x545   : > { %v5942_v4 = vmax.f32 %v5878_v31, 0.0  ;;  %v5879_v3 = vadd.f32 %v9279_v9, %v5804_v62  ;;  %v5805_v61 = vmul.f32 %v9257_v21, %v5728_v35  ;;  %v5729_v8 = vadd.f32 %v5699_v37, %v5063_v22  ;;  %v4673_v38 = vpop.f32.mrf.mxu1  ;;  %v5339_v19 = vpop.f32.mrf.mxu0 }
 0x546   : > { %v4912_v39 = vrot.slane %v4673_v38, 1  ;;  %v5578_v24 = vrot.slane %v5339_v19, 2 }
 0x547   : > { %6006 = vst [vmem:[%s9296_s11 + $0x60] sm:$0xff] %v5942_v4  ;;  %v5943_v29 = vmax.f32 %v5879_v3, 0.0  ;;  %v5880_v57 = vadd.f32 %v9267_v10, %v5805_v61  ;;  %v5806_v60 = vmul.f32 %v9270_v48, %v5729_v8  ;;  %v4675_v5 = vpop.f32.mrf.mxu1  ;;  %v5341_v63 = vpop.f32.mrf.mxu0 }
 0x548   : > { %v4913_v12 = vrot.slane %v4675_v5, 1  ;;  %v5579_v23 = vrot.slane %v5341_v63, 2 }
 0x549   : > { %6007 = vst [vmem:[%s9296_s11 + $0x68] sm:$0xff] %v5943_v29  ;;  %v5944_v55 = vmax.f32 %v5880_v57, 0.0  ;;  %v5881_v15 = vadd.f32 %v9279_v9, %v5806_v60  ;;  %v4677_v36 = vpop.f32.mrf.mxu1  ;;  %v5343_v27 = vpop.f32.mrf.mxu0  ;;  %v10005_v29 = vld [vmem:[#allocation15_spill] sm:$0xff] }
 0x54a   : > { %v4914_v13 = vrot.slane %v4677_v36, 1  ;;  %v5580_v0 = vrot.slane %v5343_v27, 2  ;;  %v10006_v27 = vld [vmem:[#allocation16_spill] sm:$0xff] }
 0x54b   : > { %6008 = vst [vmem:[%s9296_s11 + $0x70] sm:$0xff] %v5944_v55  ;;  %v5945_v41 = vmax.f32 %v5881_v15, 0.0  ;;  %v4679_v33 = vpop.f32.mrf.mxu1  ;;  %v5345_v34 = vpop.f32.mrf.mxu0 }
 0x54c   : > { %v5030_v28 = vsel %vm1041_vm0, %v4912_v39, %v4914_v13  ;;  %v4915_v40 = vrot.slane %v4679_v33, 1  ;;  %v5581_v26 = vrot.slane %v5345_v34, 2  ;;  %v5696_v31 = vsel %vm2037_vm1, %v5578_v24, %v5580_v0 }
 0x54d   : > { %6009 = vst [vmem:[%s9296_s11 + $0x78] sm:$0xff] %v5945_v41  ;;  %v5064_v32 = vadd.f32 %v5030_v28, %v8932_v52  ;;  %v4683_v25 = vpop.f32.mrf.mxu1  ;;  %v5349_v43 = vpop.f32.mrf.mxu0 }
 0x54e   : > { %v5031_v62 = vsel %vm1041_vm0, %v4913_v12, %v4915_v40  ;;  %v4916_v35 = vrot.slane %v4683_v25, 1  ;;  %v5582_v22 = vrot.slane %v5349_v43, 2  ;;  %v5697_v3 = vsel %vm2037_vm1, %v5579_v23, %v5581_v26 }
 0x54f   : > { %v5730_v49 = vadd.f32 %v5696_v31, %v5064_v32  ;;  %v5065_v47 = vadd.f32 %v5031_v62, %v8936_v59  ;;  %v4685_v37 = vpop.f32.mrf.mxu1  ;;  %v5351_v4 = vpop.f32.mrf.mxu0 }
 0x550   : > { %v5028_v52 = vsel %vm1041_vm0, %v4914_v13, %v4916_v35  ;;  %v4917_v61 = vrot.slane %v4685_v37, 1  ;;  %v5583_v8 = vrot.slane %v5351_v4, 2  ;;  %v5694_v59 = vsel %vm2037_vm1, %v5580_v0, %v5582_v22 }
 0x551   : > { %v5807_v38 = vmul.f32 %v9257_v21, %v5730_v49  ;;  %v5731_v19 = vadd.f32 %v5697_v3, %v5065_v47  ;;  %v5066_v57 = vadd.f32 %v5028_v52, %v10005_v29  ;;  %v4687_v60 = vpop.f32.mrf.mxu1  ;;  %v5353_v5 = vpop.f32.mrf.mxu0 }
 0x552   : > { %v5029_v63 = vsel %vm1041_vm0, %v4915_v40, %v4917_v61  ;;  %v5695_v24 = vsel %vm2037_vm1, %v5581_v26, %v5583_v8 }
 0x553   : > { %v5882_v55 = vadd.f32 %v9267_v10, %v5807_v38  ;;  %v5808_v15 = vmul.f32 %v9270_v48, %v5731_v19  ;;  %v5732_v36 = vadd.f32 %v5694_v59, %v5066_v57  ;;  %v5067_v39 = vadd.f32 %v5029_v63, %v10006_v27  ;;  %v4688_v13 = vpop.f32.mrf.mxu1  ;;  %v5354_v41 = vpop.f32.mrf.mxu0 }
 0x555   : > { %v5946_v33 = vmax.f32 %v5882_v55, 0.0  ;;  %v5883_v34 = vadd.f32 %v9279_v9, %v5808_v15  ;;  %v5809_v0 = vmul.f32 %v9257_v21, %v5732_v36  ;;  %v5733_v12 = vadd.f32 %v5695_v24, %v5067_v39  ;;  %v4691_v28 = vpop.f32.mrf.mxu1  ;;  %v5357_v40 = vpop.f32.mrf.mxu0 }
 0x556   : > { %v4918_v49 = vrot.slane %v4691_v28, 1  ;;  %v5584_v3 = vrot.slane %v5357_v40, 2 }
 0x557   : > { %6010 = vst [vmem:[%s9296_s11 + $0x80] sm:$0xff] %v5946_v33  ;;  %v5947_v23 = vmax.f32 %v5883_v34, 0.0  ;;  %v5884_v32 = vadd.f32 %v9267_v10, %v5809_v0  ;;  %v5810_v25 = vmul.f32 %v9270_v48, %v5733_v12  ;;  %v4693_v43 = vpop.f32.mrf.mxu1  ;;  %v5359_v31 = vpop.f32.mrf.mxu0 }
 0x558   : > { %v4919_v8 = vrot.slane %v4693_v43, 1  ;;  %v5585_v57 = vrot.slane %v5359_v31, 2 }
 0x559   : > { %6011 = vst [vmem:[%s9296_s11 + $0x88] sm:$0xff] %v5947_v23  ;;  %v5948_v62 = vmax.f32 %v5884_v32, 0.0  ;;  %v5885_v26 = vadd.f32 %v9279_v9, %v5810_v25  ;;  %v4695_v35 = vpop.f32.mrf.mxu1  ;;  %v5361_v22 = vpop.f32.mrf.mxu0 }
 0x55a   : > { %v4920_v47 = vrot.slane %v4695_v35, 1  ;;  %v5586_v37 = vrot.slane %v5361_v22, 2 }
 0x55b   : > { %6012 = vst [vmem:[%s9296_s11 + $0x90] sm:$0xff] %v5948_v62  ;;  %v5949_v4 = vmax.f32 %v5885_v26, 0.0  ;;  %v4697_v52 = vpop.f32.mrf.mxu1  ;;  %v5363_v61 = vpop.f32.mrf.mxu0 }
 0x55c   : > { %v5026_v38 = vsel %vm1041_vm0, %v4918_v49, %v4920_v47  ;;  %v4921_v19 = vrot.slane %v4697_v52, 1  ;;  %v5587_v29 = vrot.slane %v5363_v61, 2  ;;  %v5692_v63 = vsel %vm2037_vm1, %v5584_v3, %v5586_v37 }
 0x55d   : > { %6013 = vst [vmem:[%s9296_s11 + $0x98] sm:$0xff] %v5949_v4  ;;  %v5068_v60 = vadd.f32 %v5026_v38, %v8958_v17  ;;  %v4701_v5 = vpop.f32.mrf.mxu1  ;;  %v5367_v59 = vpop.f32.mrf.mxu0 }
 0x55e   : > { %v5027_v55 = vsel %vm1041_vm0, %v4919_v8, %v4921_v19  ;;  %v4922_v15 = vrot.slane %v4701_v5, 1  ;;  %v5588_v36 = vrot.slane %v5367_v59, 2  ;;  %v5693_v24 = vsel %vm2037_vm1, %v5585_v57, %v5587_v29 }
 0x55f   : > { %v5734_v27 = vadd.f32 %v5692_v63, %v5068_v60  ;;  %v5069_v39 = vadd.f32 %v5027_v55, %v8962_v11  ;;  %v4703_v13 = vpop.f32.mrf.mxu1  ;;  %v5369_v41 = vpop.f32.mrf.mxu0 }
 0x560   : > { %v5024_v17 = vsel %vm1041_vm0, %v4920_v47, %v4922_v15  ;;  %v4923_v33 = vrot.slane %v4703_v13, 1  ;;  %v5589_v34 = vrot.slane %v5369_v41, 2  ;;  %v5690_v11 = vsel %vm2037_vm1, %v5586_v37, %v5588_v36 }
 0x561   : > { %v5811_v0 = vmul.f32 %v9257_v21, %v5734_v27  ;;  %v5735_v12 = vadd.f32 %v5693_v24, %v5069_v39  ;;  %v5070_v28 = vadd.f32 %v5024_v17, %v8964_v30  ;;  %v4705_v40 = vpop.f32.mrf.mxu1  ;;  %v5371_v23 = vpop.f32.mrf.mxu0 }
 0x562   : > { %v5025_v32 = vsel %vm1041_vm0, %v4921_v19, %v4923_v33  ;;  %v5691_v30 = vsel %vm2037_vm1, %v5587_v29, %v5589_v34 }
 0x563   : > { %v5886_v25 = vadd.f32 %v9267_v10, %v5811_v0  ;;  %v5812_v43 = vmul.f32 %v9270_v48, %v5735_v12  ;;  %v5736_v31 = vadd.f32 %v5690_v11, %v5070_v28  ;;  %v5071_v62 = vadd.f32 %v5025_v32, %v8966_v56  ;;  %v4706_v26 = vpop.f32.mrf.mxu1  ;;  %v5372_v35 = vpop.f32.mrf.mxu0 }
 0x565   : > { %v5950_v22 = vmax.f32 %v5886_v25, 0.0  ;;  %v5887_v49 = vadd.f32 %v9279_v9, %v5812_v43  ;;  %v5813_v47 = vmul.f32 %v9257_v21, %v5736_v31  ;;  %v5737_v37 = vadd.f32 %v5691_v30, %v5071_v62  ;;  %v4709_v4 = vpop.f32.mrf.mxu1  ;;  %v5375_v3 = vpop.f32.mrf.mxu0 }
 0x566   : > { %v4924_v5 = vrot.slane %v4709_v4, 1  ;;  %v5590_v15 = vrot.slane %v5375_v3, 2 }
 0x567   : > { %6014 = vst [vmem:[%s9296_s11 + $0xa0] sm:$0xff] %v5950_v22  ;;  %v5951_v52 = vmax.f32 %v5887_v49, 0.0  ;;  %v5888_v61 = vadd.f32 %v9267_v10, %v5813_v47  ;;  %v5814_v56 = vmul.f32 %v9270_v48, %v5737_v37  ;;  %v4711_v8 = vpop.f32.mrf.mxu1  ;;  %v5377_v38 = vpop.f32.mrf.mxu0 }
 0x568   : > { %v4925_v39 = vrot.slane %v4711_v8, 1  ;;  %v5591_v17 = vrot.slane %v5377_v38, 2 }
 0x569   : > { %6015 = vst [vmem:[%s9296_s11 + $0xa8] sm:$0xff] %v5951_v52  ;;  %v5952_v19 = vmax.f32 %v5888_v61, 0.0  ;;  %v5889_v29 = vadd.f32 %v9279_v9, %v5814_v56  ;;  %v4713_v57 = vpop.f32.mrf.mxu1  ;;  %v5379_v60 = vpop.f32.mrf.mxu0 }
 0x56a   : > { %v4926_v59 = vrot.slane %v4713_v57, 1  ;;  %v5592_v63 = vrot.slane %v5379_v60, 2 }
 0x56b   : > { %6016 = vst [vmem:[%s9296_s11 + $0xb0] sm:$0xff] %v5952_v19  ;;  %v5953_v55 = vmax.f32 %v5889_v29, 0.0  ;;  %v4715_v36 = vpop.f32.mrf.mxu1  ;;  %v5381_v27 = vpop.f32.mrf.mxu0 }
 0x56c   : > { %v5022_v13 = vsel %vm1041_vm0, %v4924_v5, %v4926_v59  ;;  %v4927_v41 = vrot.slane %v4715_v36, 1  ;;  %v5593_v24 = vrot.slane %v5381_v27, 2  ;;  %v5688_v12 = vsel %vm2037_vm1, %v5590_v15, %v5592_v63 }
 0x56d   : > { %6017 = vst [vmem:[%s9296_s11 + $0xb8] sm:$0xff] %v5953_v55  ;;  %v5072_v33 = vadd.f32 %v5022_v13, %v8984_v6  ;;  %v4719_v34 = vpop.f32.mrf.mxu1  ;;  %v5385_v0 = vpop.f32.mrf.mxu0 }
 0x56e   : > { %v5023_v28 = vsel %vm1041_vm0, %v4925_v39, %v4927_v41  ;;  %v4928_v40 = vrot.slane %v4719_v34, 1  ;;  %v5594_v23 = vrot.slane %v5385_v0, 2  ;;  %v5689_v31 = vsel %vm2037_vm1, %v5591_v17, %v5593_v24 }
 0x56f   : > { %v5738_v11 = vadd.f32 %v5688_v12, %v5072_v33  ;;  %v5073_v32 = vadd.f32 %v5023_v28, %v8988_v20  ;;  %v4721_v25 = vpop.f32.mrf.mxu1  ;;  %v5387_v43 = vpop.f32.mrf.mxu0 }
 0x570   : > { %v5020_v6 = vsel %vm1041_vm0, %v4926_v59, %v4928_v40  ;;  %v4929_v62 = vrot.slane %v4721_v25, 1  ;;  %v5595_v26 = vrot.slane %v5387_v43, 2  ;;  %v5686_v20 = vsel %vm2037_vm1, %v5592_v63, %v5594_v23 }
 0x571   : > { %v5815_v35 = vmul.f32 %v9257_v21, %v5738_v11  ;;  %v5739_v30 = vadd.f32 %v5689_v31, %v5073_v32  ;;  %v5074_v22 = vadd.f32 %v5020_v6, %v8990_v7  ;;  %v4723_v49 = vpop.f32.mrf.mxu1  ;;  %v5389_v47 = vpop.f32.mrf.mxu0 }
 0x572   : > { %v5021_v37 = vsel %vm1041_vm0, %v4927_v41, %v4929_v62  ;;  %v5687_v7 = vsel %vm2037_vm1, %v5593_v24, %v5595_v26 }
 0x573   : > { %v5890_v4 = vadd.f32 %v9267_v10, %v5815_v35  ;;  %v5816_v3 = vmul.f32 %v9270_v48, %v5739_v30  ;;  %v5740_v52 = vadd.f32 %v5686_v20, %v5074_v22  ;;  %v5075_v61 = vadd.f32 %v5021_v37, %v8992_v18  ;;  %v4724_v56 = vpop.f32.mrf.mxu1  ;;  %v5390_v8 = vpop.f32.mrf.mxu0 }
 0x575   : > { %v5954_v38 = vmax.f32 %v5890_v4, 0.0  ;;  %v5891_v19 = vadd.f32 %v9279_v9, %v5816_v3  ;;  %v5817_v29 = vmul.f32 %v9257_v21, %v5740_v52  ;;  %v5741_v57 = vadd.f32 %v5687_v7, %v5075_v61  ;;  %v4727_v60 = vpop.f32.mrf.mxu1  ;;  %v5393_v5 = vpop.f32.mrf.mxu0 }
 0x576   : > { %v4930_v41 = vrot.slane %v4727_v60, 1  ;;  %v5596_v34 = vrot.slane %v5393_v5, 2 }
 0x577   : > { %6018 = vst [vmem:[%s9296_s11 + $0xc0] sm:$0xff] %v5954_v38  ;;  %v5955_v59 = vmax.f32 %v5891_v19, 0.0  ;;  %v5892_v63 = vadd.f32 %v9267_v10, %v5817_v29  ;;  %v5818_v18 = vmul.f32 %v9270_v48, %v5741_v57  ;;  %v4729_v55 = vpop.f32.mrf.mxu1  ;;  %v5395_v15 = vpop.f32.mrf.mxu0 }
 0x578   : > { %v4931_v28 = vrot.slane %v4729_v55, 1  ;;  %v5597_v32 = vrot.slane %v5395_v15, 2 }
 0x579   : > { %6019 = vst [vmem:[%s9296_s11 + $0xc8] sm:$0xff] %v5955_v59  ;;  %v5956_v36 = vmax.f32 %v5892_v63, 0.0  ;;  %v5893_v27 = vadd.f32 %v9279_v9, %v5818_v18  ;;  %v4731_v39 = vpop.f32.mrf.mxu1  ;;  %v5397_v13 = vpop.f32.mrf.mxu0 }
 0x57a   : > { %v4932_v24 = vrot.slane %v4731_v39, 1  ;;  %v5598_v17 = vrot.slane %v5397_v13, 2 }
 0x57b   : > { %6020 = vst [vmem:[%s9296_s11 + $0xd0] sm:$0xff] %v5956_v36  ;;  %v5957_v33 = vmax.f32 %v5893_v27, 0.0  ;;  %v4733_v0 = vpop.f32.mrf.mxu1  ;;  %v5399_v12 = vpop.f32.mrf.mxu0 }
 0x57c   : > { %v5018_v40 = vsel %vm1041_vm0, %v4930_v41, %v4932_v24  ;;  %v4933_v23 = vrot.slane %v4733_v0, 1  ;;  %v5599_v11 = vrot.slane %v5399_v12, 2  ;;  %v5684_v6 = vsel %vm2037_vm1, %v5596_v34, %v5598_v17 }
 0x57d   : > { %6021 = vst [vmem:[%s9296_s11 + $0xd8] sm:$0xff] %v5957_v33  ;;  %v5076_v25 = vadd.f32 %v5018_v40, %v9010_v42  ;;  %v4737_v43 = vpop.f32.mrf.mxu1  ;;  %v5403_v31 = vpop.f32.mrf.mxu0 }
 0x57e   : > { %v5019_v62 = vsel %vm1041_vm0, %v4931_v28, %v4933_v23  ;;  %v4934_v26 = vrot.slane %v4737_v43, 1  ;;  %v5600_v35 = vrot.slane %v5403_v31, 2  ;;  %v5685_v20 = vsel %vm2037_vm1, %v5597_v32, %v5599_v11 }
 0x57f   : > { %v5742_v30 = vadd.f32 %v5684_v6, %v5076_v25  ;;  %v5077_v22 = vadd.f32 %v5019_v62, %v9014_v2  ;;  %v4739_v49 = vpop.f32.mrf.mxu1  ;;  %v5405_v47 = vpop.f32.mrf.mxu0 }
 0x580   : > { %v5016_v42 = vsel %vm1041_vm0, %v4932_v24, %v4934_v26  ;;  %v4935_v37 = vrot.slane %v4739_v49, 1  ;;  %v5601_v4 = vrot.slane %v5405_v47, 2  ;;  %v5682_v2 = vsel %vm2037_vm1, %v5598_v17, %v5600_v35 }
 0x581   : > { %v5819_v3 = vmul.f32 %v9257_v21, %v5742_v30  ;;  %v5743_v52 = vadd.f32 %v5685_v20, %v5077_v22  ;;  %v5078_v61 = vadd.f32 %v5016_v42, %v9016_v16  ;;  %v4741_v56 = vpop.f32.mrf.mxu1  ;;  %v5407_v8 = vpop.f32.mrf.mxu0 }
 0x582   : > { %v5017_v7 = vsel %vm1041_vm0, %v4933_v23, %v4935_v37  ;;  %v5683_v16 = vsel %vm2037_vm1, %v5599_v11, %v5601_v4  ;;  %v10007_v37 = vld [vmem:[#allocation17_spill] sm:$0xff] }
 0x583   : > { %v5894_v38 = vadd.f32 %v9267_v10, %v5819_v3  ;;  %v5820_v19 = vmul.f32 %v9270_v48, %v5743_v52  ;;  %v5744_v29 = vadd.f32 %v5682_v2, %v5078_v61  ;;  %v5079_v57 = vadd.f32 %v5017_v7, %v9018_v46  ;;  %v4742_v60 = vpop.f32.mrf.mxu1  ;;  %v5408_v5 = vpop.f32.mrf.mxu0 }
 0x585   : > { %v5958_v59 = vmax.f32 %v5894_v38, 0.0  ;;  %v5895_v63 = vadd.f32 %v9279_v9, %v5820_v19  ;;  %v5821_v18 = vmul.f32 %v9257_v21, %v5744_v29  ;;  %v5745_v55 = vadd.f32 %v5683_v16, %v5079_v57  ;;  %v4745_v15 = vpop.f32.mrf.mxu1  ;;  %v5411_v36 = vpop.f32.mrf.mxu0  ;;  %v10008_v38 = vld [vmem:[#allocation18_spill] sm:$0xff] }
 0x586   : > { %v4936_v0 = vrot.slane %v4745_v15, 1  ;;  %v5602_v23 = vrot.slane %v5411_v36, 2 }
 0x587   : > { %6022 = vst [vmem:[%s9296_s11 + $0xe0] sm:$0xff] %v5958_v59  ;;  %v5959_v27 = vmax.f32 %v5895_v63, 0.0  ;;  %v5896_v39 = vadd.f32 %v9267_v10, %v5821_v18  ;;  %v5822_v46 = vmul.f32 %v9270_v48, %v5745_v55  ;;  %v4747_v13 = vpop.f32.mrf.mxu1  ;;  %v5413_v41 = vpop.f32.mrf.mxu0  ;;  %v10009_v18 = vld [vmem:[#allocation19_spill] sm:$0xff] }
 0x588   : > { %v4937_v25 = vrot.slane %v4747_v13, 1  ;;  %v5603_v62 = vrot.slane %v5413_v41, 2 }
 0x589   : > { %6023 = vst [vmem:[%s9296_s11 + $0xe8] sm:$0xff] %v5959_v27  ;;  %v5960_v24 = vmax.f32 %v5896_v39, 0.0  ;;  %v5897_v17 = vadd.f32 %v9279_v9, %v5822_v46  ;;  %v4749_v33 = vpop.f32.mrf.mxu1  ;;  %v5415_v34 = vpop.f32.mrf.mxu0 }
 0x58a   : > { %v4938_v12 = vrot.slane %v4749_v33, 1  ;;  %v5604_v28 = vrot.slane %v5415_v34, 2 }
 0x58b   : > { %6024 = vst [vmem:[%s9296_s11 + $0xf0] sm:$0xff] %v5960_v24  ;;  %v5961_v40 = vmax.f32 %v5897_v17, 0.0  ;;  %v4751_v11 = vpop.f32.mrf.mxu1  ;;  %v5417_v32 = vpop.f32.mrf.mxu0 }
 0x58c   : > { %v5014_v43 = vsel %vm1041_vm0, %v4936_v0, %v4938_v12  ;;  %v4939_v31 = vrot.slane %v4751_v11, 1  ;;  %v5605_v6 = vrot.slane %v5417_v32, 2  ;;  %v5680_v22 = vsel %vm2037_vm1, %v5602_v23, %v5604_v28 }
 0x58d   : > { %6025 = vst [vmem:[%s9296_s11 + $0xf8] sm:$0xff] %v5961_v40  ;;  %v5080_v26 = vadd.f32 %v5014_v43, %v9036_v51  ;;  %v4755_v35 = vpop.f32.mrf.mxu1  ;;  %v5421_v30 = vpop.f32.mrf.mxu0 }
 0x58e   : > { %v5015_v49 = vsel %vm1041_vm0, %v4937_v25, %v4939_v31  ;;  %v4940_v47 = vrot.slane %v4755_v35, 1  ;;  %v5606_v20 = vrot.slane %v5421_v30, 2  ;;  %v5681_v61 = vsel %vm2037_vm1, %v5603_v62, %v5605_v6 }
 0x58f   : > { %v5746_v42 = vadd.f32 %v5680_v22, %v5080_v26  ;;  %v5081_v4 = vadd.f32 %v5015_v49, %v10007_v37  ;;  %v4757_v3 = vpop.f32.mrf.mxu1  ;;  %v5423_v52 = vpop.f32.mrf.mxu0 }
 0x590   : > { %v5012_v51 = vsel %vm1041_vm0, %v4938_v12, %v4940_v47  ;;  %v4941_v56 = vrot.slane %v4757_v3, 1  ;;  %v5607_v8 = vrot.slane %v5423_v52, 2  ;;  %v5678_v60 = vsel %vm2037_vm1, %v5604_v28, %v5606_v20 }
 0x591   : > { %v5823_v2 = vmul.f32 %v9257_v21, %v5746_v42  ;;  %v5747_v7 = vadd.f32 %v5681_v61, %v5081_v4  ;;  %v5082_v19 = vadd.f32 %v5012_v51, %v10008_v38  ;;  %v4759_v29 = vpop.f32.mrf.mxu1  ;;  %v5425_v57 = vpop.f32.mrf.mxu0  ;;  %v10010_v42 = vld [vmem:[#allocation20_spill] sm:$0xff] }
 0x592   : > { %v5013_v5 = vsel %vm1041_vm0, %v4939_v31, %v4941_v56  ;;  %v5679_v27 = vsel %vm2037_vm1, %v5605_v6, %v5607_v8 }
 0x593   : > { %v5898_v16 = vadd.f32 %v9267_v10, %v5823_v2  ;;  %v5824_v59 = vmul.f32 %v9270_v48, %v5747_v7  ;;  %v5748_v63 = vadd.f32 %v5678_v60, %v5082_v19  ;;  %v5083_v55 = vadd.f32 %v5013_v5, %v10009_v18  ;;  %v4760_v15 = vpop.f32.mrf.mxu1  ;;  %v5426_v36 = vpop.f32.mrf.mxu0  ;;  %v10011_v2 = vld [vmem:[#allocation21_spill] sm:$0xff] }
 0x595   : > { %v5962_v39 = vmax.f32 %v5898_v16, 0.0  ;;  %v5899_v46 = vadd.f32 %v9279_v9, %v5824_v59  ;;  %v5825_v13 = vmul.f32 %v9257_v21, %v5748_v63  ;;  %v5749_v41 = vadd.f32 %v5679_v27, %v5083_v55  ;;  %v4763_v24 = vpop.f32.mrf.mxu1  ;;  %v5429_v17 = vpop.f32.mrf.mxu0  ;;  %v10012_v63 = vld [vmem:[#allocation22_spill] sm:$0xff] }
 0x596   : > { %v4942_v25 = vrot.slane %v4763_v24, 1  ;;  %v5608_v62 = vrot.slane %v5429_v17, 2 }
 0x597   : > { %6026 = vst [vmem:[%s9296_s11 + $0x100] sm:$0xff] %v5962_v39  ;;  %v5963_v33 = vmax.f32 %v5899_v46, 0.0  ;;  %v5900_v34 = vadd.f32 %v9267_v10, %v5825_v13  ;;  %v5826_v0 = vmul.f32 %v9270_v48, %v5749_v41  ;;  %v4765_v12 = vpop.f32.mrf.mxu1  ;;  %v5431_v28 = vpop.f32.mrf.mxu0  ;;  %v10013_v41 = vld [vmem:[#allocation23_spill] sm:$0xff] }
 0x598   : > { %v4943_v30 = vrot.slane %v4765_v12, 1  ;;  %v5609_v20 = vrot.slane %v5431_v28, 2 }
 0x599   : > { %6027 = vst [vmem:[%s9296_s11 + $0x108] sm:$0xff] %v5963_v33  ;;  %v5964_v40 = vmax.f32 %v5900_v34, 0.0  ;;  %v5901_v23 = vadd.f32 %v9279_v9, %v5826_v0  ;;  %v4767_v11 = vpop.f32.mrf.mxu1  ;;  %v5433_v32 = vpop.f32.mrf.mxu0 }
 0x59a   : > { %v4944_v43 = vrot.slane %v4767_v11, 1  ;;  %v5610_v31 = vrot.slane %v5433_v32, 2 }
 0x59b   : > { %6028 = vst [vmem:[%s9296_s11 + $0x110] sm:$0xff] %v5964_v40  ;;  %v5965_v6 = vmax.f32 %v5901_v23, 0.0  ;;  %v4769_v26 = vpop.f32.mrf.mxu1  ;;  %v5435_v35 = vpop.f32.mrf.mxu0 }
 0x59c   : > { %v5010_v22 = vsel %vm1041_vm0, %v4942_v25, %v4944_v43  ;;  %v4945_v49 = vrot.slane %v4769_v26, 1  ;;  %v5611_v47 = vrot.slane %v5435_v35, 2  ;;  %v5676_v52 = vsel %vm2037_vm1, %v5608_v62, %v5610_v31 }
 0x59d   : > { %6029 = vst [vmem:[%s9296_s11 + $0x118] sm:$0xff] %v5965_v6  ;;  %v5084_v37 = vadd.f32 %v5010_v22, %v10010_v42  ;;  %v4773_v4 = vpop.f32.mrf.mxu1  ;;  %v5439_v3 = vpop.f32.mrf.mxu0 }
 0x59e   : > { %v5011_v61 = vsel %vm1041_vm0, %v4943_v30, %v4945_v49  ;;  %v4946_v51 = vrot.slane %v4773_v4, 1  ;;  %v5612_v56 = vrot.slane %v5439_v3, 2  ;;  %v5677_v29 = vsel %vm2037_vm1, %v5609_v20, %v5611_v47 }
 0x59f   : > { %v5750_v8 = vadd.f32 %v5676_v52, %v5084_v37  ;;  %v5085_v7 = vadd.f32 %v5011_v61, %v10011_v2  ;;  %v4775_v38 = vpop.f32.mrf.mxu1  ;;  %v5441_v19 = vpop.f32.mrf.mxu0 }
 0x5a0   : > { %v5008_v57 = vsel %vm1041_vm0, %v4944_v43, %v4946_v51  ;;  %v4947_v60 = vrot.slane %v4775_v38, 1  ;;  %v5613_v5 = vrot.slane %v5441_v19, 2  ;;  %v5674_v36 = vsel %vm2037_vm1, %v5610_v31, %v5612_v56 }
 0x5a1   : > { %v5827_v16 = vmul.f32 %v9257_v21, %v5750_v8  ;;  %v5751_v59 = vadd.f32 %v5677_v29, %v5085_v7  ;;  %v5086_v18 = vadd.f32 %v5008_v57, %v10012_v63  ;;  %v4777_v55 = vpop.f32.mrf.mxu1  ;;  %v5443_v15 = vpop.f32.mrf.mxu0  ;;  %v10014_v8 = vld [vmem:[#allocation24_spill] sm:$0xff] }
 0x5a2   : > { %v5009_v27 = vsel %vm1041_vm0, %v4945_v49, %v4947_v60  ;;  %v5675_v34 = vsel %vm2037_vm1, %v5611_v47, %v5613_v5 }
 0x5a3   : > { %v5902_v39 = vadd.f32 %v9267_v10, %v5827_v16  ;;  %v5828_v46 = vmul.f32 %v9270_v48, %v5751_v59  ;;  %v5752_v13 = vadd.f32 %v5674_v36, %v5086_v18  ;;  %v5087_v24 = vadd.f32 %v5009_v27, %v10013_v41  ;;  %v4778_v17 = vpop.f32.mrf.mxu1  ;;  %v5444_v33 = vpop.f32.mrf.mxu0  ;;  %v10015_v16 = vld [vmem:[#allocation25_spill] sm:$0xff] }
 0x5a5   : > { %v5966_v0 = vmax.f32 %v5902_v39, 0.0  ;;  %v5903_v12 = vadd.f32 %v9279_v9, %v5828_v46  ;;  %v5829_v28 = vmul.f32 %v9257_v21, %v5752_v13  ;;  %v5753_v40 = vadd.f32 %v5675_v34, %v5087_v24  ;;  %v4781_v23 = vpop.f32.mrf.mxu1  ;;  %v5447_v11 = vpop.f32.mrf.mxu0  ;;  %v10016_v13 = vld [vmem:[#allocation26_spill] sm:$0xff] }
 0x5a6   : > { %v4948_v22 = vrot.slane %v4781_v23, 1  ;;  %v5614_v42 = vrot.slane %v5447_v11, 2 }
 0x5a7   : > { %6030 = vst [vmem:[%s9296_s11 + $0x120] sm:$0xff] %v5966_v0  ;;  %v5967_v32 = vmax.f32 %v5903_v12, 0.0  ;;  %v5904_v25 = vadd.f32 %v9267_v10, %v5829_v28  ;;  %v5830_v43 = vmul.f32 %v9270_v48, %v5753_v40  ;;  %v4783_v31 = vpop.f32.mrf.mxu1  ;;  %v5449_v6 = vpop.f32.mrf.mxu0  ;;  %v10017_v40 = vld [vmem:[#allocation27_spill] sm:$0xff] }
 0x5a8   : > { %v4949_v3 = vrot.slane %v4783_v31, 1  ;;  %v5615_v56 = vrot.slane %v5449_v6, 2 }
 0x5a9   : > { %6031 = vst [vmem:[%s9296_s11 + $0x128] sm:$0xff] %v5967_v32  ;;  %v5968_v62 = vmax.f32 %v5904_v25, 0.0  ;;  %v5905_v26 = vadd.f32 %v9279_v9, %v5830_v43  ;;  %v4785_v35 = vpop.f32.mrf.mxu1  ;;  %v5451_v30 = vpop.f32.mrf.mxu0 }
 0x5aa   : > { %v4950_v49 = vrot.slane %v4785_v35, 1  ;;  %v5616_v47 = vrot.slane %v5451_v30, 2 }
 0x5ab   : > { %6032 = vst [vmem:[%s9296_s11 + $0x130] sm:$0xff] %v5968_v62  ;;  %v5969_v20 = vmax.f32 %v5905_v26, 0.0  ;;  %v4787_v37 = vpop.f32.mrf.mxu1  ;;  %v5453_v4 = vpop.f32.mrf.mxu0 }
 0x5ac   : > { %v5006_v52 = vsel %vm1041_vm0, %v4948_v22, %v4950_v49  ;;  %v4951_v61 = vrot.slane %v4787_v37, 1  ;;  %v5617_v51 = vrot.slane %v5453_v4, 2  ;;  %v5672_v19 = vsel %vm2037_vm1, %v5614_v42, %v5616_v47 }
 0x5ad   : > { %6033 = vst [vmem:[%s9296_s11 + $0x138] sm:$0xff] %v5969_v20  ;;  %v5088_v2 = vadd.f32 %v5006_v52, %v10014_v8  ;;  %v4791_v7 = vpop.f32.mrf.mxu1  ;;  %v5457_v38 = vpop.f32.mrf.mxu0 }
 0x5ae   : > { %v5007_v29 = vsel %vm1041_vm0, %v4949_v3, %v4951_v61  ;;  %v4952_v57 = vrot.slane %v4791_v7, 1  ;;  %v5618_v60 = vrot.slane %v5457_v38, 2  ;;  %v5673_v55 = vsel %vm2037_vm1, %v5615_v56, %v5617_v51 }
 0x5af   : > { %v5754_v5 = vadd.f32 %v5672_v19, %v5088_v2  ;;  %v5089_v59 = vadd.f32 %v5007_v29, %v10015_v16  ;;  %v4793_v63 = vpop.f32.mrf.mxu1  ;;  %v5459_v18 = vpop.f32.mrf.mxu0 }
 0x5b0   : > { %v5004_v15 = vsel %vm1041_vm0, %v4950_v49, %v4952_v57  ;;  %v4953_v36 = vrot.slane %v4793_v63, 1  ;;  %v5619_v27 = vrot.slane %v5459_v18, 2  ;;  %v5670_v33 = vsel %vm2037_vm1, %v5616_v47, %v5618_v60 }
 0x5b1   : > { %v5831_v39 = vmul.f32 %v9257_v21, %v5754_v5  ;;  %v5755_v46 = vadd.f32 %v5673_v55, %v5089_v59  ;;  %v5090_v41 = vadd.f32 %v5004_v15, %v10016_v13  ;;  %v4795_v24 = vpop.f32.mrf.mxu1  ;;  %v5461_v17 = vpop.f32.mrf.mxu0  ;;  %v10018_v5 = vld [vmem:[#allocation28_spill] sm:$0xff] }
 0x5b2   : > { %v5005_v34 = vsel %vm1041_vm0, %v4951_v61, %v4953_v36  ;;  %v5671_v25 = vsel %vm2037_vm1, %v5617_v51, %v5619_v27 }
 0x5b3   : > { %v5906_v0 = vadd.f32 %v9267_v10, %v5831_v39  ;;  %v5832_v12 = vmul.f32 %v9270_v48, %v5755_v46  ;;  %v5756_v28 = vadd.f32 %v5670_v33, %v5090_v41  ;;  %v5091_v23 = vadd.f32 %v5005_v34, %v10017_v40  ;;  %v4796_v11 = vpop.f32.mrf.mxu1  ;;  %v5462_v32 = vpop.f32.mrf.mxu0  ;;  %v10019_v39 = vld [vmem:[#allocation5_spill] sm:$0xff] }
 0x5b5   : > { %v5970_v43 = vmax.f32 %v5906_v0, 0.0  ;;  %v5907_v31 = vadd.f32 %v9279_v9, %v5832_v12  ;;  %v5833_v6 = vmul.f32 %v9257_v21, %v5756_v28  ;;  %v5757_v62 = vadd.f32 %v5671_v25, %v5091_v23  ;;  %v4799_v26 = vpop.f32.mrf.mxu1  ;;  %v5465_v35 = vpop.f32.mrf.mxu0  ;;  %v10020_v28 = vld [vmem:[#allocation6_spill] sm:$0xff] }
 0x5b6   : > { %v4954_v52 = vrot.slane %v4799_v26, 1  ;;  %v5620_v8 = vrot.slane %v5465_v35, 2 }
 0x5b7   : > { %6034 = vst [vmem:[%s9296_s11 + $0x140] sm:$0xff] %v5970_v43  ;;  %v5971_v30 = vmax.f32 %v5907_v31, 0.0  ;;  %v5908_v22 = vadd.f32 %v9267_v10, %v5833_v6  ;;  %v5834_v49 = vmul.f32 %v9270_v48, %v5757_v62  ;;  %v4801_v47 = vpop.f32.mrf.mxu1  ;;  %v5467_v20 = vpop.f32.mrf.mxu0  ;;  %v10021_v62 = vld [vmem:[#allocation7_spill] sm:$0xff] }
 0x5b8   : > { %v4955_v38 = vrot.slane %v4801_v47, 1  ;;  %v5621_v60 = vrot.slane %v5467_v20, 2 }
 0x5b9   : > { %6035 = vst [vmem:[%s9296_s11 + $0x148] sm:$0xff] %v5971_v30  ;;  %v5972_v42 = vmax.f32 %v5908_v22, 0.0  ;;  %v5909_v37 = vadd.f32 %v9279_v9, %v5834_v49  ;;  %v4803_v4 = vpop.f32.mrf.mxu1  ;;  %v5469_v3 = vpop.f32.mrf.mxu0 }
 0x5ba   : > { %v4956_v61 = vrot.slane %v4803_v4, 1  ;;  %v5622_v51 = vrot.slane %v5469_v3, 2 }
 0x5bb   : > { %6036 = vst [vmem:[%s9296_s11 + $0x150] sm:$0xff] %v5972_v42  ;;  %v5973_v56 = vmax.f32 %v5909_v37, 0.0  ;;  %v4805_v2 = vpop.f32.mrf.mxu1  ;;  %v5471_v7 = vpop.f32.mrf.mxu0 }
 0x5bc   : > { %v5002_v19 = vsel %vm1041_vm0, %v4954_v52, %v4956_v61  ;;  %v4957_v29 = vrot.slane %v4805_v2, 1  ;;  %v5623_v57 = vrot.slane %v5471_v7, 2  ;;  %v5668_v18 = vsel %vm2037_vm1, %v5620_v8, %v5622_v51 }
 0x5bd   : > { %6037 = vst [vmem:[%s9296_s11 + $0x158] sm:$0xff] %v5973_v56  ;;  %v5092_v16 = vadd.f32 %v5002_v19, %v10018_v5  ;;  %v4809_v59 = vpop.f32.mrf.mxu1  ;;  %v5475_v63 = vpop.f32.mrf.mxu0 }
 0x5be   : > { %v5003_v55 = vsel %vm1041_vm0, %v4955_v38, %v4957_v29  ;;  %v4958_v15 = vrot.slane %v4809_v59, 1  ;;  %v5624_v36 = vrot.slane %v5475_v63, 2  ;;  %v5669_v24 = vsel %vm2037_vm1, %v5621_v60, %v5623_v57 }
 0x5bf   : > { %v5758_v27 = vadd.f32 %v5668_v18, %v5092_v16  ;;  %v5093_v46 = vadd.f32 %v5003_v55, %v10019_v39  ;;  %v4811_v13 = vpop.f32.mrf.mxu1  ;;  %v5477_v41 = vpop.f32.mrf.mxu0 }
 0x5c0   : > { %v5000_v17 = vsel %vm1041_vm0, %v4956_v61, %v4958_v15  ;;  %v4959_v33 = vrot.slane %v4811_v13, 1  ;;  %v5625_v34 = vrot.slane %v5477_v41, 2  ;;  %v5666_v32 = vsel %vm2037_vm1, %v5622_v51, %v5624_v36 }
 0x5c1   : > { %v5835_v0 = vmul.f32 %v9257_v21, %v5758_v27  ;;  %v5759_v12 = vadd.f32 %v5669_v24, %v5093_v46  ;;  %v5094_v40 = vadd.f32 %v5000_v17, %v10020_v28  ;;  %v4813_v23 = vpop.f32.mrf.mxu1  ;;  %v5479_v11 = vpop.f32.mrf.mxu0 }
 0x5c2   : > { %v5001_v25 = vsel %vm1041_vm0, %v4957_v29, %v4959_v33  ;;  %v5667_v22 = vsel %vm2037_vm1, %v5623_v57, %v5625_v34 }
 0x5c3   : > { %v5910_v43 = vadd.f32 %v9267_v10, %v5835_v0  ;;  %v5836_v31 = vmul.f32 %v9270_v48, %v5759_v12  ;;  %v5760_v6 = vadd.f32 %v5666_v32, %v5094_v40  ;;  %v5095_v26 = vadd.f32 %v5001_v25, %v10021_v62  ;;  %v4814_v35 = vpop.f32.mrf.mxu1  ;;  %v5480_v30 = vpop.f32.mrf.mxu0  ;;  %v10022_v25 = vld [vmem:[#allocation29_spill] sm:$0xff] }
 0x5c5   : > { %v5974_v49 = vmax.f32 %v5910_v43, 0.0  ;;  %v5911_v47 = vadd.f32 %v9279_v9, %v5836_v31  ;;  %v5837_v20 = vmul.f32 %v9257_v21, %v5760_v6  ;;  %v5761_v42 = vadd.f32 %v5667_v22, %v5095_v26  ;;  %v4817_v37 = vpop.f32.mrf.mxu1  ;;  %v5483_v4 = vpop.f32.mrf.mxu0  ;;  %v10023_v22 = vld [vmem:[#allocation8_spill] sm:$0xff] }
 0x5c6   : > { %v4960_v19 = vrot.slane %v4817_v37, 1  ;;  %v5626_v5 = vrot.slane %v5483_v4, 2 }
 0x5c7   : > { %6038 = vst [vmem:[%s9296_s11 + $0x160] sm:$0xff] %v5974_v49  ;;  %v5975_v3 = vmax.f32 %v5911_v47, 0.0  ;;  %v5912_v52 = vadd.f32 %v9267_v10, %v5837_v20  ;;  %v5838_v61 = vmul.f32 %v9270_v48, %v5761_v42  ;;  %v4819_v51 = vpop.f32.mrf.mxu1  ;;  %v5485_v56 = vpop.f32.mrf.mxu0 }
 0x5c8   : > { %v4961_v63 = vrot.slane %v4819_v51, 1  ;;  %v5627_v36 = vrot.slane %v5485_v56, 2 }
 0x5c9   : > { %6039 = vst [vmem:[%s9296_s11 + $0x168] sm:$0xff] %v5975_v3  ;;  %v5976_v8 = vmax.f32 %v5912_v52, 0.0  ;;  %v5913_v2 = vadd.f32 %v9279_v9, %v5838_v61  ;;  %v4821_v7 = vpop.f32.mrf.mxu1  ;;  %v5487_v38 = vpop.f32.mrf.mxu0 }
 0x5ca   : > { %v4962_v29 = vrot.slane %v4821_v7, 1  ;;  %v5628_v57 = vrot.slane %v5487_v38, 2 }
 0x5cb   : > { %6040 = vst [vmem:[%s9296_s11 + $0x170] sm:$0xff] %v5976_v8  ;;  %v5977_v60 = vmax.f32 %v5913_v2, 0.0  ;;  %v4823_v16 = vpop.f32.mrf.mxu1  ;;  %v5489_v59 = vpop.f32.mrf.mxu0 }
 0x5cc   : > { %v4998_v18 = vsel %vm1041_vm0, %v4960_v19, %v4962_v29  ;;  %v4963_v55 = vrot.slane %v4823_v16, 1  ;;  %v5629_v15 = vrot.slane %v5489_v59, 2  ;;  %v5664_v13 = vsel %vm2037_vm1, %v5626_v5, %v5628_v57 }
 0x5cd   : > { %6041 = vst [vmem:[%s9296_s11 + $0x178] sm:$0xff] %v5977_v60  ;;  %v5096_v27 = vadd.f32 %v4998_v18, %v9140_v54  ;;  %v4827_v39 = vpop.f32.mrf.mxu1  ;;  %v5493_v46 = vpop.f32.mrf.mxu0 }
 0x5ce   : > { %v4999_v41 = vsel %vm1041_vm0, %v4961_v63, %v4963_v55  ;;  %v4964_v24 = vrot.slane %v4827_v39, 1  ;;  %v5630_v17 = vrot.slane %v5493_v46, 2  ;;  %v5665_v28 = vsel %vm2037_vm1, %v5627_v36, %v5629_v15 }
 0x5cf   : > { %v5762_v33 = vadd.f32 %v5664_v13, %v5096_v27  ;;  %v5097_v34 = vadd.f32 %v4999_v41, %v9144_v53  ;;  %v4829_v0 = vpop.f32.mrf.mxu1  ;;  %v5495_v12 = vpop.f32.mrf.mxu0 }
 0x5d0   : > { %v4996_v54 = vsel %vm1041_vm0, %v4962_v29, %v4964_v24  ;;  %v4965_v40 = vrot.slane %v4829_v0, 1  ;;  %v5631_v23 = vrot.slane %v5495_v12, 2  ;;  %v5662_v53 = vsel %vm2037_vm1, %v5628_v57, %v5630_v17 }
 0x5d1   : > { %v5839_v11 = vmul.f32 %v9257_v21, %v5762_v33  ;;  %v5763_v32 = vadd.f32 %v5665_v28, %v5097_v34  ;;  %v5098_v43 = vadd.f32 %v4996_v54, %v10022_v25  ;;  %v4831_v31 = vpop.f32.mrf.mxu1  ;;  %v5497_v6 = vpop.f32.mrf.mxu0 }
 0x5d2   : > { %v4997_v62 = vsel %vm1041_vm0, %v4963_v55, %v4965_v40  ;;  %v5663_v42 = vsel %vm2037_vm1, %v5629_v15, %v5631_v23 }
 0x5d3   : > { %v5914_v26 = vadd.f32 %v9267_v10, %v5839_v11  ;;  %v5840_v35 = vmul.f32 %v9270_v48, %v5763_v32  ;;  %v5764_v30 = vadd.f32 %v5662_v53, %v5098_v43  ;;  %v5099_v49 = vadd.f32 %v4997_v62, %v10023_v22  ;;  %v4832_v47 = vpop.f32.mrf.mxu1  ;;  %v5498_v20 = vpop.f32.mrf.mxu0 }
 0x5d5   : > { %v5978_v37 = vmax.f32 %v5914_v26, 0.0  ;;  %v5915_v4 = vadd.f32 %v9279_v9, %v5840_v35  ;;  %v5841_v3 = vmul.f32 %v9257_v21, %v5764_v30  ;;  %v5765_v52 = vadd.f32 %v5663_v42, %v5099_v49  ;;  %v4835_v61 = vpop.f32.mrf.mxu1  ;;  %v5501_v51 = vpop.f32.mrf.mxu0  ;;  %v10024_v49 = vld [vmem:[#allocation9_spill] sm:$0xff] }
 0x5d6   : > { %v4966_v5 = vrot.slane %v4835_v61, 1  ;;  %v5632_v18 = vrot.slane %v5501_v51, 2 }
 0x5d7   : > { %6042 = vst [vmem:[%s9296_s11 + $0x180] sm:$0xff] %v5978_v37  ;;  %v5979_v56 = vmax.f32 %v5915_v4, 0.0  ;;  %v5916_v8 = vadd.f32 %v9267_v10, %v5841_v3  ;;  %v5842_v2 = vmul.f32 %v9270_v48, %v5765_v52  ;;  %v4837_v7 = vpop.f32.mrf.mxu1  ;;  %v5503_v38 = vpop.f32.mrf.mxu0 }
 0x5d8   : > { %v4967_v36 = vrot.slane %v4837_v7, 1  ;;  %v5633_v13 = vrot.slane %v5503_v38, 2 }
 0x5d9   : > { %6043 = vst [vmem:[%s9296_s11 + $0x188] sm:$0xff] %v5979_v56  ;;  %v5980_v19 = vmax.f32 %v5916_v8, 0.0  ;;  %v5917_v29 = vadd.f32 %v9279_v9, %v5842_v2  ;;  %v4839_v57 = vpop.f32.mrf.mxu1  ;;  %v5505_v60 = vpop.f32.mrf.mxu0 }
 0x5da   : > { %v4968_v16 = vrot.slane %v4839_v57, 1  ;;  %v5634_v59 = vrot.slane %v5505_v60, 2 }
 0x5db   : > { %6044 = vst [vmem:[%s9296_s11 + $0x190] sm:$0xff] %v5980_v19  ;;  %v5981_v63 = vmax.f32 %v5917_v29, 0.0  ;;  %v4841_v55 = vpop.f32.mrf.mxu1  ;;  %v5507_v15 = vpop.f32.mrf.mxu0 }
 0x5dc   : > { %v4994_v27 = vsel %vm1041_vm0, %v4966_v5, %v4968_v16  ;;  %v4969_v39 = vrot.slane %v4841_v55, 1  ;;  %v5635_v46 = vrot.slane %v5507_v15, 2  ;;  %v5660_v33 = vsel %vm2037_vm1, %v5632_v18, %v5634_v59 }
 0x5dd   : > { %6045 = vst [vmem:[%s9296_s11 + $0x198] sm:$0xff] %v5981_v63  ;;  %v5100_v41 = vadd.f32 %v4994_v27, %v9166_v50  ;;  %v4845_v24 = vpop.f32.mrf.mxu1  ;;  %v5511_v17 = vpop.f32.mrf.mxu0 }
 0x5de   : > { %v4995_v34 = vsel %vm1041_vm0, %v4967_v36, %v4969_v39  ;;  %v4970_v0 = vrot.slane %v4845_v24, 1  ;;  %v5636_v12 = vrot.slane %v5511_v17, 2  ;;  %v5661_v11 = vsel %vm2037_vm1, %v5633_v13, %v5635_v46 }
 0x5df   : > { %v5766_v28 = vadd.f32 %v5660_v33, %v5100_v41  ;;  %v5101_v54 = vadd.f32 %v4995_v34, %v9170_v1  ;;  %v4847_v40 = vpop.f32.mrf.mxu1  ;;  %v5513_v23 = vpop.f32.mrf.mxu0 }
 0x5e0   : > { %v4992_v50 = vsel %vm1041_vm0, %v4968_v16, %v4970_v0  ;;  %v4971_v32 = vrot.slane %v4847_v40, 1  ;;  %v5637_v25 = vrot.slane %v5513_v23, 2  ;;  %v5658_v1 = vsel %vm2037_vm1, %v5634_v59, %v5636_v12 }
 0x5e1   : > { %v5843_v43 = vmul.f32 %v9257_v21, %v5766_v28  ;;  %v5767_v31 = vadd.f32 %v5661_v11, %v5101_v54  ;;  %v5102_v6 = vadd.f32 %v4992_v50, %v9172_v14  ;;  %v4849_v53 = vpop.f32.mrf.mxu1  ;;  %v5515_v62 = vpop.f32.mrf.mxu0 }
 0x5e2   : > { %v4993_v26 = vsel %vm1041_vm0, %v4969_v39, %v4971_v32  ;;  %v5659_v14 = vsel %vm2037_vm1, %v5635_v46, %v5637_v25 }
 0x5e3   : > { %v5918_v35 = vadd.f32 %v9267_v10, %v5843_v43  ;;  %v5844_v30 = vmul.f32 %v9270_v48, %v5767_v31  ;;  %v5768_v22 = vadd.f32 %v5658_v1, %v5102_v6  ;;  %v5103_v47 = vadd.f32 %v4993_v26, %v10024_v49  ;;  %v4850_v20 = vpop.f32.mrf.mxu1  ;;  %v5516_v42 = vpop.f32.mrf.mxu0  ;;  %v10025_v31 = vld [vmem:[#allocation10_spill] sm:$0xff] }
 0x5e5   : > { %v5982_v37 = vmax.f32 %v5918_v35, 0.0  ;;  %v5919_v4 = vadd.f32 %v9279_v9, %v5844_v30  ;;  %v5845_v3 = vmul.f32 %v9257_v21, %v5768_v22  ;;  %v5769_v52 = vadd.f32 %v5659_v14, %v5103_v47  ;;  %v4853_v61 = vpop.f32.mrf.mxu1  ;;  %v5519_v51 = vpop.f32.mrf.mxu0  ;;  %v10026_v22 = vld [vmem:[#allocation11_spill] sm:$0xff] }
 0x5e6   : > { %v4972_v5 = vrot.slane %v4853_v61, 1  ;;  %v5638_v18 = vrot.slane %v5519_v51, 2 }
 0x5e7   : > { %6046 = vst [vmem:[%s9296_s11 + $0x1a0] sm:$0xff] %v5982_v37  ;;  %v5983_v56 = vmax.f32 %v5919_v4, 0.0  ;;  %v5920_v8 = vadd.f32 %v9267_v10, %v5845_v3  ;;  %v5846_v2 = vmul.f32 %v9270_v48, %v5769_v52  ;;  %v4855_v7 = vpop.f32.mrf.mxu1  ;;  %v5521_v38 = vpop.f32.mrf.mxu0 }
 0x5e8   : > { %v4973_v36 = vrot.slane %v4855_v7, 1  ;;  %v5639_v13 = vrot.slane %v5521_v38, 2 }
 0x5e9   : > { %6047 = vst [vmem:[%s9296_s11 + $0x1a8] sm:$0xff] %v5983_v56  ;;  %v5984_v19 = vmax.f32 %v5920_v8, 0.0  ;;  %v5921_v29 = vadd.f32 %v9279_v9, %v5846_v2  ;;  %v4857_v57 = vpop.f32.mrf.mxu1  ;;  %v5523_v60 = vpop.f32.mrf.mxu0 }
 0x5ea   : > { %v4974_v16 = vrot.slane %v4857_v57, 1  ;;  %v5640_v59 = vrot.slane %v5523_v60, 2 }
 0x5eb   : > { %6048 = vst [vmem:[%s9296_s11 + $0x1b0] sm:$0xff] %v5984_v19  ;;  %v5985_v63 = vmax.f32 %v5921_v29, 0.0  ;;  %v4859_v55 = vpop.f32.mrf.mxu1  ;;  %v5525_v15 = vpop.f32.mrf.mxu0 }
 0x5ec   : > { %v4990_v27 = vsel %vm1041_vm0, %v4972_v5, %v4974_v16  ;;  %v4975_v39 = vrot.slane %v4859_v55, 1  ;;  %v5641_v46 = vrot.slane %v5525_v15, 2  ;;  %v5656_v33 = vsel %vm2037_vm1, %v5638_v18, %v5640_v59 }
 0x5ed   : > { %6049 = vst [vmem:[%s9296_s11 + $0x1b8] sm:$0xff] %v5985_v63  ;;  %v5104_v41 = vadd.f32 %v4990_v27, %v9192_v58  ;;  %v4863_v24 = vpop.f32.mrf.mxu1  ;;  %v5529_v17 = vpop.f32.mrf.mxu0 }
 0x5ee   : > { %v4991_v34 = vsel %vm1041_vm0, %v4973_v36, %v4975_v39  ;;  %v4976_v0 = vrot.slane %v4863_v24, 1  ;;  %v5642_v12 = vrot.slane %v5529_v17, 2  ;;  %v5657_v11 = vsel %vm2037_vm1, %v5639_v13, %v5641_v46  ;;  %v10027_v13 = vld [vmem:[#allocation12_spill] sm:$0xff] }
 0x5ef   : > { %v5770_v28 = vadd.f32 %v5656_v33, %v5104_v41  ;;  %v5105_v54 = vadd.f32 %v4991_v34, %v9196_v44  ;;  %v4865_v40 = vpop.f32.mrf.mxu1  ;;  %v5531_v23 = vpop.f32.mrf.mxu0 }
 0x5f0   : > { %v4988_v58 = vsel %vm1041_vm0, %v4974_v16, %v4976_v0  ;;  %v4977_v50 = vrot.slane %v4865_v40, 1  ;;  %v5643_v32 = vrot.slane %v5531_v23, 2  ;;  %v5654_v44 = vsel %vm2037_vm1, %v5640_v59, %v5642_v12 }
 0x5f1   : > { %v5847_v25 = vmul.f32 %v9257_v21, %v5770_v28  ;;  %v5771_v43 = vadd.f32 %v5657_v11, %v5105_v54  ;;  %v5106_v6 = vadd.f32 %v4988_v58, %v10025_v31  ;;  %v4867_v53 = vpop.f32.mrf.mxu1  ;;  %v5533_v62 = vpop.f32.mrf.mxu0  ;;  %v10028_v54 = vld [vmem:[#allocation13_spill] sm:$0xff] }
 0x5f2   : > { %v4989_v1 = vsel %vm1041_vm0, %v4975_v39, %v4977_v50  ;;  %v5655_v42 = vsel %vm2037_vm1, %v5641_v46, %v5643_v32 }
 0x5f3   : > { %v5922_v26 = vadd.f32 %v9267_v10, %v5847_v25  ;;  %v5848_v35 = vmul.f32 %v9270_v48, %v5771_v43  ;;  %v5772_v30 = vadd.f32 %v5654_v44, %v5106_v6  ;;  %v5107_v49 = vadd.f32 %v4989_v1, %v10026_v22  ;;  %v4868_v47 = vpop.f32.mrf.mxu1  ;;  %v5534_v20 = vpop.f32.mrf.mxu0  ;;  %v10029_v6 = vld [vmem:[#allocation14_spill] sm:$0xff] }
 0x5f5   : > { %v5986_v14 = vmax.f32 %v5922_v26, 0.0  ;;  %v5923_v37 = vadd.f32 %v9279_v9, %v5848_v35  ;;  %v5849_v4 = vmul.f32 %v9257_v21, %v5772_v30  ;;  %v5773_v3 = vadd.f32 %v5655_v42, %v5107_v49  ;;  %v4871_v52 = vpop.f32.mrf.mxu1  ;;  %v5537_v61 = vpop.f32.mrf.mxu0  ;;  %v10030_v49 = vld [vmem:[#allocation30_spill] sm:$0xff] }
 0x5f6   : > { %v4978_v60 = vrot.slane %v4871_v52, 1  ;;  %v5644_v63 = vrot.slane %v5537_v61, 2 }
 0x5f7   : > { %6050 = vst [vmem:[%s9296_s11 + $0x1c0] sm:$0xff] %v5986_v14  ;;  %v5987_v51 = vmax.f32 %v5923_v37, 0.0  ;;  %v5924_v56 = vadd.f32 %v9267_v10, %v5849_v4  ;;  %v5850_v8 = vmul.f32 %v9270_v48, %v5773_v3  ;;  %v4873_v2 = vpop.f32.mrf.mxu1  ;;  %v5539_v7 = vpop.f32.mrf.mxu0 }
 0x5f8   : > { %v4979_v15 = vrot.slane %v4873_v2, 1  ;;  %v5645_v46 = vrot.slane %v5539_v7, 2 }
 0x5f9   : > { %6051 = vst [vmem:[%s9296_s11 + $0x1c8] sm:$0xff] %v5987_v51  ;;  %v5988_v38 = vmax.f32 %v5924_v56, 0.0  ;;  %v5925_v19 = vadd.f32 %v9279_v9, %v5850_v8  ;;  %v4875_v29 = vpop.f32.mrf.mxu1  ;;  %v5541_v57 = vpop.f32.mrf.mxu0 }
 0x5fa   : > { %v4980_v5 = vrot.slane %v4875_v29, 1  ;;  %v5646_v16 = vrot.slane %v5541_v57, 2 }
 0x5fb   : > { %6052 = vst [vmem:[%s9296_s11 + $0x1d0] sm:$0xff] %v5988_v38  ;;  %v5989_v59 = vmax.f32 %v5925_v19, 0.0  ;;  %v4877_v18 = vpop.f32.mrf.mxu1  ;;  %v5543_v55 = vpop.f32.mrf.mxu0 }
 0x5fc   : > { %v4986_v36 = vsel %vm1041_vm0, %v4978_v60, %v4980_v5  ;;  %v4981_v27 = vrot.slane %v4877_v18, 1  ;;  %v5647_v39 = vrot.slane %v5543_v55, 2  ;;  %v5652_v33 = vsel %vm2037_vm1, %v5644_v63, %v5646_v16 }
 0x5fd   : > { %6053 = vst [vmem:[%s9296_s11 + $0x1d8] sm:$0xff] %v5989_v59  ;;  %v5108_v41 = vadd.f32 %v4986_v36, %v10027_v13  ;;  %v4881_v24 = vpop.f32.mrf.mxu1  ;;  %v5547_v17 = vpop.f32.mrf.mxu0 }
 0x5fe   : > { %v4987_v34 = vsel %vm1041_vm0, %v4979_v15, %v4981_v27  ;;  %v4982_v0 = vrot.slane %v4881_v24, 1  ;;  %v5648_v12 = vrot.slane %v5547_v17, 2  ;;  %v5653_v58 = vsel %vm2037_vm1, %v5645_v46, %v5647_v39 }
 0x5ff   : > { %v5774_v28 = vadd.f32 %v5652_v33, %v5108_v41  ;;  %v5109_v40 = vadd.f32 %v4987_v34, %v10028_v54  ;;  %v4883_v23 = vpop.f32.mrf.mxu1  ;;  %v5549_v11 = vpop.f32.mrf.mxu0 }
 0x600   : > { %v4984_v50 = vsel %vm1041_vm0, %v4980_v5, %v4982_v0  ;;  %v4983_v32 = vrot.slane %v4883_v23, 1  ;;  %v5649_v25 = vrot.slane %v5549_v11, 2  ;;  %v5650_v1 = vsel %vm2037_vm1, %v5646_v16, %v5648_v12 }
 0x601   : > { %v5851_v43 = vmul.f32 %v9257_v21, %v5774_v28  ;;  %v5775_v31 = vadd.f32 %v5653_v58, %v5109_v40  ;;  %v5110_v53 = vadd.f32 %v4984_v50, %v10029_v6  ;;  %v4885_v62 = vpop.f32.mrf.mxu1  ;;  %v5551_v44 = vpop.f32.mrf.mxu0 }
 0x602   : > { %v4985_v26 = vsel %vm1041_vm0, %v4981_v27, %v4983_v32  ;;  %v5651_v14 = vsel %vm2037_vm1, %v5647_v39, %v5649_v25 }
 0x603   : > { %v5926_v35 = vadd.f32 %v9267_v10, %v5851_v43  ;;  %v5852_v30 = vmul.f32 %v9270_v48, %v5775_v31  ;;  %v5776_v22 = vadd.f32 %v5650_v1, %v5110_v53  ;;  %v5111_v47 = vadd.f32 %v4985_v26, %v10030_v49  ;;  %v4886_v20 = vpop.f32.mrf.mxu1  ;;  %v5552_v42 = vpop.f32.mrf.mxu0 }
 0x605   : > { %v5990_v37 = vmax.f32 %v5926_v35, 0.0  ;;  %v5927_v4 = vadd.f32 %v9279_v9, %v5852_v30  ;;  %v5853_v3 = vmul.f32 %v9257_v21, %v5776_v22  ;;  %v5777_v52 = vadd.f32 %v5651_v14, %v5111_v47 }
 0x607   : > { %6054 = vst [vmem:[%s9296_s11 + $0x1e0] sm:$0xff] %v5990_v37  ;;  %v5991_v61 = vmax.f32 %v5927_v4, 0.0  ;;  %v5928_v51 = vadd.f32 %v9267_v10, %v5853_v3  ;;  %v5854_v56 = vmul.f32 %v9270_v48, %v5777_v52 }
 0x609   : > { %6055 = vst [vmem:[%s9296_s11 + $0x1e8] sm:$0xff] %v5991_v61  ;;  %v5992_v45 = vmax.f32 %v5928_v51, 0.0  ;;  %v5929_v8 = vadd.f32 %v9279_v9, %v5854_v56 }
 0x60b   : > { %6056 = vst [vmem:[%s9296_s11 + $0x1f0] sm:$0xff] %v5992_v45  ;;  %v5993_v21 = vmax.f32 %v5929_v8, 0.0 }
 0x60d   : > { %6057 = vst [vmem:[%s9296_s11 + $0x1f8] sm:$0xff] %v5993_v21 }
 0x60e   : > { %6904 = shalt.err (!%p6901_p3)
}
 0x60f   : > { %s6905_s30 = scalar_lea.hbm %s9801_s20, 8192  ;;  %s6909_s7 = scalar_lea.hbm %s9853_s4, 16384 }
 0x610   : > { %p6906_p4 = scmp.ne.s32.totalorder %s9801_s20, %s6905_s30  ;;  %p6910_p9 = scmp.lt.s32.totalorder %s9801_s20, %s9853_s4 }
 0x611   : > { %p6911_p10 = scmp.lt.s32.totalorder %s6909_s7, %s6905_s30 }
 0x612   : > { %p6907_p7 = pnand %p6906_p4, %p7020_p5 }
 0x613   : > { %p6912_p11 = por %p6911_p10, %p6910_p9 }
 0x614   : > { %p6908_p8 = pneg %p6907_p7 }
 0x616   : > { %p6913_p12 = pnand %p6912_p11, %p6908_p8 }
 0x618   : > { %6916 = shalt.err (!%p6913_p12)
}
 0x619   : > { %s6955_s10 = smov 256   ;;  %s6956_s11 = smov 16  }
 0x61a   : > { %6471 = dma.vmem_to_hbm [thread:$0]  (%p7020_p5), %s9803_s12, 8192, %s9801_s20, %s9809_s19, %s6955_s10, %s6955_s10, %s6956_s11  }
 0x61b PF: > { %p6477_p13 = scmp.ge.s32.totalorder %s6951_s18, 2  ;;  %s6087_s28 = sand.u32 1, %s6939_s15  }
 0x61c   : > { %s6088_s13 = scalar_lea.sflag [#allocation3], %s6087_s28 }
 0x61d   : > { %p6474_p0 = pnand %p6477_p13, %p7024_p6 }
 0x61f   : > { %p6475_p1 = pneg %p6474_p0 }
 0x621   : > { %6934 = dma.done.wait (%p6475_p1), %s6088_s13, 8192  }
 0x622   : > { %6936 = vsyncadd (%p6475_p1), %s6088_s13, 4294959104  ;;  %p14_p2 = scmp.ge.s32.totalorder %s7007_s21, 4   ;;  %s10031_s15 = smov %s6943_s16 }
 0x623   : > { %s10032_s16 = smov %s6947_s17  ;;  %s10033_s17 = smov %s7018_s24 }
 0x624   : > { %s10034_s18 = smov %s7007_s21  ;;  %16 = sbr.rel (!%p14_p2) target bundleno = 3 (0x3), region = 79 }
 0x629   :  { %6093 = vsyncpa [#allocation3], 1 }
 0x62a   :  { %6095 = vsyncpa [#allocation3 + $0x1], 1 }

</bundles_post_ra>
